<compile_context>
chip_gen: v7x
topology: tpu7x:2x2x1
jax: 0.10.0
libtpu: 0.0.40
codegen_flags: <defaults>
</compile_context>

<pallas_src>
import math
import functools

import jax
import jax.numpy as jnp
from jax import lax
from jax.experimental import pallas as pl
from jax.experimental.pallas import tpu as pltpu

F_REAL = 96     # true feature width from the PyTorch module (Linear(96,96), GRU(96,96))
FP = 128        # lane-padded feature width
EDGE_IN = 2     # raw edge-feature width (embedding_e = nn.Linear(2, 96))


# ---------------------------------------------------------------------------
# Fused kernel: emb_e Linear -> 3x NodeUpdateNetwork -> MLPReadout
# ---------------------------------------------------------------------------
def _graph_net_kernel(
    h0_ref, ef_ref, S_ref, Dt_ref, SD_ref,
    embW_ref, embB_ref,
    ABw_ref, ABb_ref, Cw_ref, Cb_ref,
    Wg_ref, Gb_ref,
    bnhg_ref, bnhb_ref, bneg_ref, bneb_ref,
    r1w_ref, r1b_ref, r2w_ref, r2b_ref, r3w_ref, r3b_ref,
    e0_ref, e1_ref, e2_ref,
):
    f32 = jnp.float32
    bf16 = jnp.bfloat16

    S = S_ref[...]     # (E, N) bf16 one-hot            edge -> src node (gather)
    Dt = Dt_ref[...]   # (N, E) bf16 one-hot transpose  dst scatter-sum
    SD = SD_ref[...]   # (E, N) bf16 {-1,0,+1}          src-minus-dst gather

    def bn_relu(x, gamma, beta):
        # BatchNorm1d (training-mode batch statistics, eps=1e-5) + ReLU
        mean = jnp.mean(x, axis=0, keepdims=True)
        var = jnp.mean((x - mean) ** 2, axis=0, keepdims=True)
        y = (x - mean) * lax.rsqrt(var + 1e-5) * gamma + beta
        return jnp.maximum(y, 0.0)

    # L == 0 edge embedding: Linear(2, 96) as two broadcast-FMAs on the VPU
    # (only 2 of 128 contraction rows would be nonzero in an MXU pass).
    ef = ef_ref[...]                      # (E, 2) f32
    embW = embW_ref[...]                  # (2, FP) f32
    e = ef[:, 0:1] * embW[0:1, :] + ef[:, 1:2] * embW[1:2, :] + embB_ref[...]
    h = h0_ref[...]

    for l in range(3):   # three stacked NodeUpdateNetwork layers (statically unrolled)
        hb = h.astype(bf16)
        eb = e.astype(bf16)

        # Fused A/B projection: [Ah | Bh] = h @ [Aw | Bw] + [Ab | Bb]
        AB = jnp.dot(hb, ABw_ref[l], preferred_element_type=f32) + ABb_ref[l]
        Ah, Bh = AB[:, :FP], AB[:, FP:]
        Ce = jnp.dot(eb, Cw_ref[l], preferred_element_type=f32) + Cb_ref[l]

        # update_all: gather Bh at edge sources, gate with sigmoid(Ce),
        # scatter-(normalized)sum per destination node. num and den are fused
        # into one bf16 K=E matmul against the transposed incidence Dt.
        Bh_j = jnp.dot(S, Bh.astype(bf16), preferred_element_type=f32)   # (E, FP)
        sig = jax.nn.sigmoid(Ce)                                         # (E, FP)
        nd = jnp.dot(Dt,
                     jnp.concatenate([sig * Bh_j, sig], axis=-1).astype(bf16),
                     preferred_element_type=f32)                         # (N, 2*FP)
        num, den = nd[:, :FP], nd[:, FP:]
        h_new = Ah + num * pl.reciprocal(den + 1e-6, approx=True)

        # apply_edges + GRU_minimal(input=|h_src - h_dst|, state=Ce).
        # gin via one (S - D) matmul; the two GRU gate matmuls are fused into a
        # single K=256, N=256 MXU pass: gates = [Ce | gin] @ [[Ws],[Wi]] + b.
        gin = jnp.abs(jnp.dot(SD, h_new.astype(bf16), preferred_element_type=f32))
        X = jnp.concatenate([Ce, gin], axis=-1).astype(bf16)             # (E, 2*FP)
        gates = jnp.dot(X, Wg_ref[l], preferred_element_type=f32) + Gb_ref[l]
        z = jax.nn.sigmoid(gates[:, :FP])
        cand = jnp.tanh(gates[:, FP:])
        e_gru = Ce * z + cand * (1.0 - z)        # new_h = old_h*z + cand*(1-z)

        # BatchNorm + ReLU + residual.
        h = h + bn_relu(h_new, bnhg_ref[l], bnhb_ref[l])
        e = e + bn_relu(e_gru, bneg_ref[l], bneb_ref[l])

        if l == 0:
            e0_ref[...] = e
        elif l == 1:
            e1_ref[...] = e

    # L == 2: MLPReadout(96, 2): 96 -> 48 -> relu -> 24 -> relu -> 2 (lane-padded).
    y = jnp.maximum(
        jnp.dot(e.astype(bf16), r1w_ref[...], preferred_element_type=jnp.float32)
        + r1b_ref[...], 0.0)
    y = jnp.maximum(
        jnp.dot(y.astype(bf16), r2w_ref[...], preferred_element_type=jnp.float32)
        + r2b_ref[...], 0.0)
    e2_ref[...] = (jnp.dot(y.astype(bf16), r3w_ref[...],
                           preferred_element_type=jnp.float32) + r3b_ref[...])


# ---------------------------------------------------------------------------
# Wrapper
# ---------------------------------------------------------------------------
def _vmem_limit_bytes():
    # Generation-aware VMEM budget: <= physical - 8 MiB headroom, capped at
    # 100 MiB (v5e/v6e have 128 MiB, v7x has 64 MiB per TensorCore).
    try:
        cap = int(pltpu.get_tpu_info().vmem_capacity_bytes)
    except Exception:
        cap = 64 * 1024 * 1024
    return int(min(cap - 8 * 1024 * 1024, 100 * 1024 * 1024))


def graph_network_forward(params, S, Dt, SD, node_feat_p, edge_feat):
    E = edge_feat.shape[0]
    inputs = (
        node_feat_p, edge_feat, S, Dt, SD,
        params["embW"], params["embB"],
        params["ABw"], params["ABb"], params["Cw"], params["Cb"],
        params["Wg"], params["Gb"],
        params["bnhg"], params["bnhb"], params["bneg"], params["bneb"],
        params["r1w"], params["r1b"], params["r2w"], params["r2b"],
        params["r3w"], params["r3b"],
    )
    out_shapes = (
        jax.ShapeDtypeStruct((E, FP), jnp.float32),
        jax.ShapeDtypeStruct((E, FP), jnp.float32),
        jax.ShapeDtypeStruct((E, FP), jnp.float32),
    )
    vmem_spec = pl.BlockSpec(memory_space=pltpu.MemorySpace.VMEM)
    e0p, e1p, e2p = pl.pallas_call(
        _graph_net_kernel,
        out_shape=out_shapes,
        in_specs=[vmem_spec for _ in inputs],          # whole arrays, no double-buffer
        out_specs=[vmem_spec for _ in out_shapes],
        compiler_params=pltpu.CompilerParams(
            vmem_limit_bytes=_vmem_limit_bytes(),
        ),
    )(*inputs)
    # Slice the lane padding back off (96 real features; readout has 2).
    return [e0p[:, :F_REAL], e1p[:, :F_REAL], e2p[:, :2]]


# ---------------------------------------------------------------------------
# Parameter init (PyTorch-default-style uniform bounds) + lane padding to 128
# ---------------------------------------------------------------------------
def init_linear(key, fan_in, fan_out):
    kw, kb = jax.random.split(key)
    bound = 1.0 / math.sqrt(fan_in)
    w_t = jax.random.uniform(kw, (fan_in, fan_out), jnp.float32, -bound, bound)
    b = jax.random.uniform(kb, (1, fan_out), jnp.float32, -bound, bound)
    return w_t, b


def _pad_w(w, rows=FP, cols=FP):
    return jnp.zeros((rows, cols), jnp.float32).at[: w.shape[0], : w.shape[1]].set(w)


def _pad_b(b, cols=FP):
    return jnp.zeros((1, cols), jnp.float32).at[:, : b.shape[1]].set(b)


def init_params(key):
    keys = iter(jax.random.split(key, 16))
    p = {}
    # embedding_e = nn.Linear(2, 96): kept f32 at (2, 128) for the VPU FMA path.
    ew, eb = init_linear(next(keys), EDGE_IN, F_REAL)
    p["embW"] = jnp.zeros((EDGE_IN, FP), jnp.float32).at[:, :F_REAL].set(ew)
    p["embB"] = _pad_b(eb)

    ABw, ABb, Cw, Cb, Wg, Gb = [], [], [], [], [], []
    bnhg, bnhb, bneg, bneb = [], [], [], []
    for _l in range(3):
        Aw, Ab = init_linear(next(keys), F_REAL, F_REAL)
        Bw, Bb = init_linear(next(keys), F_REAL, F_REAL)
        Cw_l, Cb_l = init_linear(next(keys), F_REAL, F_REAL)
        ABw.append(jnp.concatenate([_pad_w(Aw), _pad_w(Bw)], axis=1))      # (128, 256)
        ABb.append(jnp.concatenate([_pad_b(Ab), _pad_b(Bb)], axis=1))      # (1, 256)
        Cw.append(_pad_w(Cw_l))
        Cb.append(_pad_b(Cb_l))

        # GRU_minimal(96, 96): W (192,192), bias (192); X = [state | input],
        # gates = X @ W.T + b, chunk(2) along outputs -> [z | c].
        stdv = 1.0 / math.sqrt(F_REAL)
        kw, kb = jax.random.split(next(keys))
        W_t = jax.random.uniform(kw, (2 * F_REAL, 2 * F_REAL), jnp.float32, -stdv, stdv)
        gbias = jax.random.uniform(kb, (1, 2 * F_REAL), jnp.float32, -stdv, stdv)
        Wz_s, Wc_s = W_t[:F_REAL, :F_REAL], W_t[:F_REAL, F_REAL:]
        Wz_i, Wc_i = W_t[F_REAL:, :F_REAL], W_t[F_REAL:, F_REAL:]
        Ws_l = jnp.concatenate([_pad_w(Wz_s), _pad_w(Wc_s)], axis=1)       # (128, 256)
        Wi_l = jnp.concatenate([_pad_w(Wz_i), _pad_w(Wc_i)], axis=1)       # (128, 256)
        Wg.append(jnp.concatenate([Ws_l, Wi_l], axis=0))                   # (256, 256)
        Gb.append(jnp.concatenate([_pad_b(gbias[:, :F_REAL]),
                                   _pad_b(gbias[:, F_REAL:])], axis=1))    # (1, 256)

        # BatchNorm1d affine params (gamma=1, beta=0), lane-padded.
        bnhg.append(_pad_b(jnp.ones((1, F_REAL), jnp.float32)))
        bnhb.append(_pad_b(jnp.zeros((1, F_REAL), jnp.float32)))
        bneg.append(_pad_b(jnp.ones((1, F_REAL), jnp.float32)))
        bneb.append(_pad_b(jnp.zeros((1, F_REAL), jnp.float32)))

    # MXU weights pre-cast to bf16 (halves weight DMA/VMEM; MXU is bf16 anyway).
    p["ABw"] = jnp.stack(ABw).astype(jnp.bfloat16)
    p["Cw"] = jnp.stack(Cw).astype(jnp.bfloat16)
    p["Wg"] = jnp.stack(Wg).astype(jnp.bfloat16)
    p["ABb"] = jnp.stack(ABb)
    p["Cb"] = jnp.stack(Cb)
    p["Gb"] = jnp.stack(Gb)
    for name, lst in [("bnhg", bnhg), ("bnhb", bnhb), ("bneg", bneg), ("bneb", bneb)]:
        p[name] = jnp.stack(lst)   # leading layer axis of size 3

    # MLPReadout(96, 2): 96 -> 48 -> 24 -> 2, all lane-padded to 128.
    r1w, r1b = init_linear(next(keys), F_REAL, 48)
    r2w, r2b = init_linear(next(keys), 48, 24)
    r3w, r3b = init_linear(next(keys), 24, 2)
    p["r1w"], p["r1b"] = _pad_w(r1w).astype(jnp.bfloat16), _pad_b(r1b)
    p["r2w"], p["r2b"] = _pad_w(r2w).astype(jnp.bfloat16), _pad_b(r2b)
    p["r3w"], p["r3b"] = _pad_w(r3w).astype(jnp.bfloat16), _pad_b(r3b)
    return p


if __name__ == "__main__":
    key = jax.random.PRNGKey(0)
    k_node, k_edge, k_params = jax.random.split(key, 3)

    # Small graph: 64 nodes, bidirectional ring => 128 directed edges
    # (sublane-aligned; large enough that the MXU sees non-degenerate tiles).
    N, E = 64, 128
    src = jnp.array(list(range(N)) + [(i + 1) % N for i in range(N)], dtype=jnp.int32)
    dst = jnp.array([(i + 1) % N for i in range(N)] + list(range(N)), dtype=jnp.int32)

    node_feat = jax.random.normal(k_node, (N, F_REAL), jnp.float32)    # (64, 96)
    edge_feat = jax.random.normal(k_edge, (E, EDGE_IN), jnp.float32)   # (128, 2)
    params = init_params(k_params)

    # Static graph: incidence operators built ONCE, in bf16 (exact small ints).
    S_f = jax.nn.one_hot(src, N, dtype=jnp.float32)    # (E, N) edge -> src
    D_f = jax.nn.one_hot(dst, N, dtype=jnp.float32)    # (E, N) edge -> dst
    S = S_f.astype(jnp.bfloat16)                       # gather src
    Dt = D_f.T.astype(jnp.bfloat16)                    # (N, E) scatter to dst
    SD = (S_f - D_f).astype(jnp.bfloat16)              # (E, N) {-1,0,+1} src-dst

    # Lane-pad node features to 128 with zeros (padding stays exactly zero
    # through every layer; outputs are sliced back after the kernel).
    node_feat_p = jnp.zeros((N, FP), jnp.float32).at[:, :F_REAL].set(node_feat)

    fwd = jax.jit(functools.partial(graph_network_forward, params))
    e0, e1, e2 = jax.block_until_ready(fwd(S, Dt, SD, node_feat_p, edge_feat))

    assert e0.shape == (E, F_REAL) and e1.shape == (E, F_REAL) and e2.shape == (E, 2)
    assert bool(jnp.all(jnp.isfinite(e0)) & jnp.all(jnp.isfinite(e1)) & jnp.all(jnp.isfinite(e2)))
    print("KERNEL_OK")
</pallas_src>

<mosaic_0001>
module attributes {stable_mosaic.version = 11 : i64} {
  func.func @_graph_net_kernel(%arg0: memref<64x128xf32, #tpu.memory_space<vmem>>, %arg1: memref<128x2xf32, #tpu.memory_space<vmem>>, %arg2: memref<128x64xbf16, #tpu.memory_space<vmem>>, %arg3: memref<64x128xbf16, #tpu.memory_space<vmem>>, %arg4: memref<128x64xbf16, #tpu.memory_space<vmem>>, %arg5: memref<2x128xf32, #tpu.memory_space<vmem>>, %arg6: memref<1x128xf32, #tpu.memory_space<vmem>>, %arg7: memref<3x128x256xbf16, #tpu.memory_space<vmem>>, %arg8: memref<3x1x256xf32, #tpu.memory_space<vmem>>, %arg9: memref<3x128x128xbf16, #tpu.memory_space<vmem>>, %arg10: memref<3x1x128xf32, #tpu.memory_space<vmem>>, %arg11: memref<3x256x256xbf16, #tpu.memory_space<vmem>>, %arg12: memref<3x1x256xf32, #tpu.memory_space<vmem>>, %arg13: memref<3x1x128xf32, #tpu.memory_space<vmem>>, %arg14: memref<3x1x128xf32, #tpu.memory_space<vmem>>, %arg15: memref<3x1x128xf32, #tpu.memory_space<vmem>>, %arg16: memref<3x1x128xf32, #tpu.memory_space<vmem>>, %arg17: memref<128x128xbf16, #tpu.memory_space<vmem>>, %arg18: memref<1x128xf32, #tpu.memory_space<vmem>>, %arg19: memref<128x128xbf16, #tpu.memory_space<vmem>>, %arg20: memref<1x128xf32, #tpu.memory_space<vmem>>, %arg21: memref<128x128xbf16, #tpu.memory_space<vmem>>, %arg22: memref<1x128xf32, #tpu.memory_space<vmem>>, %arg23: memref<128x128xf32, #tpu.memory_space<vmem>>, %arg24: memref<128x128xf32, #tpu.memory_space<vmem>>, %arg25: memref<128x128xf32, #tpu.memory_space<vmem>>) attributes {dimension_semantics = [], scalar_prefetch = 0 : i64, scratch_operands = 0 : i64, tpu.core_type = #tpu.core_type<tc>} {
    %c0 = arith.constant 0 : index
    %c0_0 = arith.constant 0 : index
    %0 = vector.load %arg2[%c0, %c0_0] : memref<128x64xbf16, #tpu.memory_space<vmem>>, vector<128x64xbf16>
    %c0_1 = arith.constant 0 : index
    %c0_2 = arith.constant 0 : index
    %1 = vector.load %arg3[%c0_1, %c0_2] : memref<64x128xbf16, #tpu.memory_space<vmem>>, vector<64x128xbf16>
    %c0_3 = arith.constant 0 : index
    %c0_4 = arith.constant 0 : index
    %2 = vector.load %arg4[%c0_3, %c0_4] : memref<128x64xbf16, #tpu.memory_space<vmem>>, vector<128x64xbf16>
    %c0_5 = arith.constant 0 : index
    %c0_6 = arith.constant 0 : index
    %3 = vector.load %arg1[%c0_5, %c0_6] : memref<128x2xf32, #tpu.memory_space<vmem>>, vector<128x2xf32>
    %c0_7 = arith.constant 0 : index
    %c0_8 = arith.constant 0 : index
    %4 = vector.load %arg5[%c0_7, %c0_8] : memref<2x128xf32, #tpu.memory_space<vmem>>, vector<2x128xf32>
    %5 = vector.extract_strided_slice %3 {offsets = [0, 0], sizes = [128, 1], strides = [1, 1]} : vector<128x2xf32> to vector<128x1xf32>
    %6 = vector.extract_strided_slice %4 {offsets = [0, 0], sizes = [1, 128], strides = [1, 1]} : vector<2x128xf32> to vector<1x128xf32>
    %7 = vector.broadcast %5 : vector<128x1xf32> to vector<128x128xf32>
    %8 = vector.broadcast %6 : vector<1x128xf32> to vector<128x128xf32>
    %9 = arith.mulf %7, %8 : vector<128x128xf32>
    %10 = vector.extract_strided_slice %3 {offsets = [0, 1], sizes = [128, 1], strides = [1, 1]} : vector<128x2xf32> to vector<128x1xf32>
    %11 = vector.extract_strided_slice %4 {offsets = [1, 0], sizes = [1, 128], strides = [1, 1]} : vector<2x128xf32> to vector<1x128xf32>
    %12 = vector.broadcast %10 : vector<128x1xf32> to vector<128x128xf32>
    %13 = vector.broadcast %11 : vector<1x128xf32> to vector<128x128xf32>
    %14 = arith.mulf %12, %13 : vector<128x128xf32>
    %15 = arith.addf %9, %14 : vector<128x128xf32>
    %c0_9 = arith.constant 0 : index
    %c0_10 = arith.constant 0 : index
    %16 = vector.load %arg6[%c0_9, %c0_10] : memref<1x128xf32, #tpu.memory_space<vmem>>, vector<1x128xf32>
    %17 = vector.broadcast %16 : vector<1x128xf32> to vector<128x128xf32>
    %18 = arith.addf %15, %17 : vector<128x128xf32>
    %c0_11 = arith.constant 0 : index
    %c0_12 = arith.constant 0 : index
    %19 = vector.load %arg0[%c0_11, %c0_12] : memref<64x128xf32, #tpu.memory_space<vmem>>, vector<64x128xf32>
    %20 = arith.truncf %19 : vector<64x128xf32> to vector<64x128xbf16>
    %21 = arith.truncf %18 : vector<128x128xf32> to vector<128x128xbf16>
    %c0_13 = arith.constant 0 : index
    %c0_14 = arith.constant 0 : index
    %c0_15 = arith.constant 0 : index
    %22 = vector.load %arg7[%c0_13, %c0_14, %c0_15] : memref<3x128x256xbf16, #tpu.memory_space<vmem>>, vector<1x128x256xbf16>
    %23 = vector.shape_cast %22 : vector<1x128x256xbf16> to vector<128x256xbf16>
    %cst = arith.constant dense<0.000000e+00> : vector<64x256xf32>
    %24 = tpu.matmul %20, %23, %cst {dimension_numbers = #tpu.dot_dimension_numbers<[1], [0], [0], [1], [0, 0, 1, 1], [], []>} : vector<64x128xbf16>, vector<128x256xbf16>, vector<64x256xf32> -> vector<64x256xf32>
    %c0_16 = arith.constant 0 : index
    %c0_17 = arith.constant 0 : index
    %c0_18 = arith.constant 0 : index
    %25 = vector.load %arg8[%c0_16, %c0_17, %c0_18] : memref<3x1x256xf32, #tpu.memory_space<vmem>>, vector<1x1x256xf32>
    %26 = vector.shape_cast %25 : vector<1x1x256xf32> to vector<1x256xf32>
    %27 = vector.broadcast %26 : vector<1x256xf32> to vector<64x256xf32>
    %28 = arith.addf %24, %27 : vector<64x256xf32>
    %29 = vector.extract_strided_slice %28 {offsets = [0, 0], sizes = [64, 128], strides = [1, 1]} : vector<64x256xf32> to vector<64x128xf32>
    %30 = vector.extract_strided_slice %28 {offsets = [0, 128], sizes = [64, 128], strides = [1, 1]} : vector<64x256xf32> to vector<64x128xf32>
    %c0_19 = arith.constant 0 : index
    %c0_20 = arith.constant 0 : index
    %c0_21 = arith.constant 0 : index
    %31 = vector.load %arg9[%c0_19, %c0_20, %c0_21] : memref<3x128x128xbf16, #tpu.memory_space<vmem>>, vector<1x128x128xbf16>
    %32 = vector.shape_cast %31 : vector<1x128x128xbf16> to vector<128x128xbf16>
    %cst_22 = arith.constant dense<0.000000e+00> : vector<128x128xf32>
    %33 = tpu.matmul %21, %32, %cst_22 {dimension_numbers = #tpu.dot_dimension_numbers<[1], [0], [0], [1], [0, 0, 1, 1], [], []>} : vector<128x128xbf16>, vector<128x128xbf16>, vector<128x128xf32> -> vector<128x128xf32>
    %c0_23 = arith.constant 0 : index
    %c0_24 = arith.constant 0 : index
    %c0_25 = arith.constant 0 : index
    %34 = vector.load %arg10[%c0_23, %c0_24, %c0_25] : memref<3x1x128xf32, #tpu.memory_space<vmem>>, vector<1x1x128xf32>
    %35 = vector.shape_cast %34 : vector<1x1x128xf32> to vector<1x128xf32>
    %36 = vector.broadcast %35 : vector<1x128xf32> to vector<128x128xf32>
    %37 = arith.addf %33, %36 : vector<128x128xf32>
    %38 = arith.truncf %30 : vector<64x128xf32> to vector<64x128xbf16>
    %cst_26 = arith.constant dense<0.000000e+00> : vector<128x128xf32>
    %39 = tpu.matmul %0, %38, %cst_26 {dimension_numbers = #tpu.dot_dimension_numbers<[1], [0], [0], [1], [0, 0, 1, 1], [], []>} : vector<128x64xbf16>, vector<64x128xbf16>, vector<128x128xf32> -> vector<128x128xf32>
    %40 = arith.negf %37 : vector<128x128xf32>
    %41 = math.exp %40 : vector<128x128xf32>
    %cst_27 = arith.constant 1.000000e+00 : f32
    %42 = vector.broadcast %cst_27 : f32 to vector<128x128xf32>
    %43 = arith.addf %42, %41 : vector<128x128xf32>
    %44 = arith.divf %42, %43 : vector<128x128xf32>
    %45 = arith.mulf %44, %39 : vector<128x128xf32>
    %46 = tpu.concatenate %45, %44 in 1 : vector<128x128xf32>, vector<128x128xf32> -> vector<128x256xf32>
    %47 = arith.truncf %46 : vector<128x256xf32> to vector<128x256xbf16>
    %cst_28 = arith.constant dense<0.000000e+00> : vector<64x256xf32>
    %48 = tpu.matmul %1, %47, %cst_28 {dimension_numbers = #tpu.dot_dimension_numbers<[1], [0], [0], [1], [0, 0, 1, 1], [], []>} : vector<64x128xbf16>, vector<128x256xbf16>, vector<64x256xf32> -> vector<64x256xf32>
    %49 = vector.extract_strided_slice %48 {offsets = [0, 0], sizes = [64, 128], strides = [1, 1]} : vector<64x256xf32> to vector<64x128xf32>
    %50 = vector.extract_strided_slice %48 {offsets = [0, 128], sizes = [64, 128], strides = [1, 1]} : vector<64x256xf32> to vector<64x128xf32>
    %cst_29 = arith.constant 9.99999997E-7 : f32
    %51 = vector.broadcast %cst_29 : f32 to vector<64x128xf32>
    %52 = arith.addf %50, %51 : vector<64x128xf32>
    %53 = tpu.reciprocal %52 {approx = true} : vector<64x128xf32> -> vector<64x128xf32>
    %54 = arith.mulf %49, %53 : vector<64x128xf32>
    %55 = arith.addf %29, %54 : vector<64x128xf32>
    %56 = arith.truncf %55 : vector<64x128xf32> to vector<64x128xbf16>
    %cst_30 = arith.constant dense<0.000000e+00> : vector<128x128xf32>
    %57 = tpu.matmul %2, %56, %cst_30 {dimension_numbers = #tpu.dot_dimension_numbers<[1], [0], [0], [1], [0, 0, 1, 1], [], []>} : vector<128x64xbf16>, vector<64x128xbf16>, vector<128x128xf32> -> vector<128x128xf32>
    %58 = math.absf %57 : vector<128x128xf32>
    %59 = tpu.concatenate %37, %58 in 1 : vector<128x128xf32>, vector<128x128xf32> -> vector<128x256xf32>
    %60 = arith.truncf %59 : vector<128x256xf32> to vector<128x256xbf16>
    %c0_31 = arith.constant 0 : index
    %c0_32 = arith.constant 0 : index
    %c0_33 = arith.constant 0 : index
    %61 = vector.load %arg11[%c0_31, %c0_32, %c0_33] : memref<3x256x256xbf16, #tpu.memory_space<vmem>>, vector<1x256x256xbf16>
    %62 = vector.shape_cast %61 : vector<1x256x256xbf16> to vector<256x256xbf16>
    %cst_34 = arith.constant dense<0.000000e+00> : vector<128x256xf32>
    %63 = tpu.matmul %60, %62, %cst_34 {dimension_numbers = #tpu.dot_dimension_numbers<[1], [0], [0], [1], [0, 0, 1, 1], [], []>} : vector<128x256xbf16>, vector<256x256xbf16>, vector<128x256xf32> -> vector<128x256xf32>
    %c0_35 = arith.constant 0 : index
    %c0_36 = arith.constant 0 : index
    %c0_37 = arith.constant 0 : index
    %64 = vector.load %arg12[%c0_35, %c0_36, %c0_37] : memref<3x1x256xf32, #tpu.memory_space<vmem>>, vector<1x1x256xf32>
    %65 = vector.shape_cast %64 : vector<1x1x256xf32> to vector<1x256xf32>
    %66 = vector.broadcast %65 : vector<1x256xf32> to vector<128x256xf32>
    %67 = arith.addf %63, %66 : vector<128x256xf32>
    %68 = vector.extract_strided_slice %67 {offsets = [0, 0], sizes = [128, 128], strides = [1, 1]} : vector<128x256xf32> to vector<128x128xf32>
    %69 = arith.negf %68 : vector<128x128xf32>
    %70 = math.exp %69 : vector<128x128xf32>
    %cst_38 = arith.constant 1.000000e+00 : f32
    %71 = vector.broadcast %cst_38 : f32 to vector<128x128xf32>
    %72 = arith.addf %71, %70 : vector<128x128xf32>
    %73 = arith.divf %71, %72 : vector<128x128xf32>
    %74 = vector.extract_strided_slice %67 {offsets = [0, 128], sizes = [128, 128], strides = [1, 1]} : vector<128x256xf32> to vector<128x128xf32>
    %75 = math.tanh %74 : vector<128x128xf32>
    %76 = arith.mulf %37, %73 : vector<128x128xf32>
    %cst_39 = arith.constant 1.000000e+00 : f32
    %77 = vector.broadcast %cst_39 : f32 to vector<128x128xf32>
    %78 = arith.subf %77, %73 : vector<128x128xf32>
    %79 = arith.mulf %75, %78 : vector<128x128xf32>
    %80 = arith.addf %76, %79 : vector<128x128xf32>
    %c0_40 = arith.constant 0 : index
    %c0_41 = arith.constant 0 : index
    %c0_42 = arith.constant 0 : index
    %81 = vector.load %arg13[%c0_40, %c0_41, %c0_42] : memref<3x1x128xf32, #tpu.memory_space<vmem>>, vector<1x1x128xf32>
    %82 = vector.shape_cast %81 : vector<1x1x128xf32> to vector<1x128xf32>
    %c0_43 = arith.constant 0 : index
    %c0_44 = arith.constant 0 : index
    %c0_45 = arith.constant 0 : index
    %83 = vector.load %arg14[%c0_43, %c0_44, %c0_45] : memref<3x1x128xf32, #tpu.memory_space<vmem>>, vector<1x1x128xf32>
    %84 = vector.shape_cast %83 : vector<1x1x128xf32> to vector<1x128xf32>
    %cst_46 = arith.constant dense<0.000000e+00> : vector<128xf32>
    %85 = vector.multi_reduction <add>, %55, %cst_46 [0] : vector<64x128xf32> to vector<128xf32>
    %86 = vector.shape_cast %85 : vector<128xf32> to vector<1x128xf32>
    %cst_47 = arith.constant 6.400000e+01 : f32
    %87 = vector.broadcast %cst_47 : f32 to vector<1x128xf32>
    %88 = arith.divf %86, %87 : vector<1x128xf32>
    %89 = vector.broadcast %88 : vector<1x128xf32> to vector<64x128xf32>
    %90 = arith.subf %55, %89 : vector<64x128xf32>
    %91 = arith.mulf %90, %90 : vector<64x128xf32>
    %cst_48 = arith.constant dense<0.000000e+00> : vector<128xf32>
    %92 = vector.multi_reduction <add>, %91, %cst_48 [0] : vector<64x128xf32> to vector<128xf32>
    %93 = vector.shape_cast %92 : vector<128xf32> to vector<1x128xf32>
    %cst_49 = arith.constant 6.400000e+01 : f32
    %94 = vector.broadcast %cst_49 : f32 to vector<1x128xf32>
    %95 = arith.divf %93, %94 : vector<1x128xf32>
    %96 = vector.broadcast %88 : vector<1x128xf32> to vector<64x128xf32>
    %97 = arith.subf %55, %96 : vector<64x128xf32>
    %cst_50 = arith.constant 9.99999974E-6 : f32
    %98 = vector.broadcast %cst_50 : f32 to vector<1x128xf32>
    %99 = arith.addf %95, %98 : vector<1x128xf32>
    %100 = math.rsqrt %99 : vector<1x128xf32>
    %101 = vector.broadcast %100 : vector<1x128xf32> to vector<64x128xf32>
    %102 = arith.mulf %97, %101 : vector<64x128xf32>
    %103 = vector.broadcast %82 : vector<1x128xf32> to vector<64x128xf32>
    %104 = arith.mulf %102, %103 : vector<64x128xf32>
    %105 = vector.broadcast %84 : vector<1x128xf32> to vector<64x128xf32>
    %106 = arith.addf %104, %105 : vector<64x128xf32>
    %cst_51 = arith.constant 0.000000e+00 : f32
    %107 = vector.broadcast %cst_51 : f32 to vector<64x128xf32>
    %108 = arith.maximumf %106, %107 : vector<64x128xf32>
    %109 = arith.addf %19, %108 : vector<64x128xf32>
    %c0_52 = arith.constant 0 : index
    %c0_53 = arith.constant 0 : index
    %c0_54 = arith.constant 0 : index
    %110 = vector.load %arg15[%c0_52, %c0_53, %c0_54] : memref<3x1x128xf32, #tpu.memory_space<vmem>>, vector<1x1x128xf32>
    %111 = vector.shape_cast %110 : vector<1x1x128xf32> to vector<1x128xf32>
    %c0_55 = arith.constant 0 : index
    %c0_56 = arith.constant 0 : index
    %c0_57 = arith.constant 0 : index
    %112 = vector.load %arg16[%c0_55, %c0_56, %c0_57] : memref<3x1x128xf32, #tpu.memory_space<vmem>>, vector<1x1x128xf32>
    %113 = vector.shape_cast %112 : vector<1x1x128xf32> to vector<1x128xf32>
    %cst_58 = arith.constant dense<0.000000e+00> : vector<128xf32>
    %114 = vector.multi_reduction <add>, %80, %cst_58 [0] : vector<128x128xf32> to vector<128xf32>
    %115 = vector.shape_cast %114 : vector<128xf32> to vector<1x128xf32>
    %cst_59 = arith.constant 1.280000e+02 : f32
    %116 = vector.broadcast %cst_59 : f32 to vector<1x128xf32>
    %117 = arith.divf %115, %116 : vector<1x128xf32>
    %118 = vector.broadcast %117 : vector<1x128xf32> to vector<128x128xf32>
    %119 = arith.subf %80, %118 : vector<128x128xf32>
    %120 = arith.mulf %119, %119 : vector<128x128xf32>
    %cst_60 = arith.constant dense<0.000000e+00> : vector<128xf32>
    %121 = vector.multi_reduction <add>, %120, %cst_60 [0] : vector<128x128xf32> to vector<128xf32>
    %122 = vector.shape_cast %121 : vector<128xf32> to vector<1x128xf32>
    %cst_61 = arith.constant 1.280000e+02 : f32
    %123 = vector.broadcast %cst_61 : f32 to vector<1x128xf32>
    %124 = arith.divf %122, %123 : vector<1x128xf32>
    %125 = vector.broadcast %117 : vector<1x128xf32> to vector<128x128xf32>
    %126 = arith.subf %80, %125 : vector<128x128xf32>
    %cst_62 = arith.constant 9.99999974E-6 : f32
    %127 = vector.broadcast %cst_62 : f32 to vector<1x128xf32>
    %128 = arith.addf %124, %127 : vector<1x128xf32>
    %129 = math.rsqrt %128 : vector<1x128xf32>
    %130 = vector.broadcast %129 : vector<1x128xf32> to vector<128x128xf32>
    %131 = arith.mulf %126, %130 : vector<128x128xf32>
    %132 = vector.broadcast %111 : vector<1x128xf32> to vector<128x128xf32>
    %133 = arith.mulf %131, %132 : vector<128x128xf32>
    %134 = vector.broadcast %113 : vector<1x128xf32> to vector<128x128xf32>
    %135 = arith.addf %133, %134 : vector<128x128xf32>
    %cst_63 = arith.constant 0.000000e+00 : f32
    %136 = vector.broadcast %cst_63 : f32 to vector<128x128xf32>
    %137 = arith.maximumf %135, %136 : vector<128x128xf32>
    %138 = arith.addf %18, %137 : vector<128x128xf32>
    %c0_64 = arith.constant 0 : index
    %c0_65 = arith.constant 0 : index
    %139 = vector.load %arg23[%c0_64, %c0_65] : memref<128x128xf32, #tpu.memory_space<vmem>>, vector<128x128xf32>
    tpu.vector_store %arg23[%c0_64, %c0_65], %138 {strides = array<i32>} : memref<128x128xf32, #tpu.memory_space<vmem>>, vector<128x128xf32>,
    %140 = arith.truncf %109 : vector<64x128xf32> to vector<64x128xbf16>
    %141 = arith.truncf %138 : vector<128x128xf32> to vector<128x128xbf16>
    %c1 = arith.constant 1 : index
    %c0_66 = arith.constant 0 : index
    %c0_67 = arith.constant 0 : index
    %142 = vector.load %arg7[%c1, %c0_66, %c0_67] : memref<3x128x256xbf16, #tpu.memory_space<vmem>>, vector<1x128x256xbf16>
    %143 = vector.shape_cast %142 : vector<1x128x256xbf16> to vector<128x256xbf16>
    %cst_68 = arith.constant dense<0.000000e+00> : vector<64x256xf32>
    %144 = tpu.matmul %140, %143, %cst_68 {dimension_numbers = #tpu.dot_dimension_numbers<[1], [0], [0], [1], [0, 0, 1, 1], [], []>} : vector<64x128xbf16>, vector<128x256xbf16>, vector<64x256xf32> -> vector<64x256xf32>
    %c1_69 = arith.constant 1 : index
    %c0_70 = arith.constant 0 : index
    %c0_71 = arith.constant 0 : index
    %145 = vector.load %arg8[%c1_69, %c0_70, %c0_71] : memref<3x1x256xf32, #tpu.memory_space<vmem>>, vector<1x1x256xf32>
    %146 = vector.shape_cast %145 : vector<1x1x256xf32> to vector<1x256xf32>
    %147 = vector.broadcast %146 : vector<1x256xf32> to vector<64x256xf32>
    %148 = arith.addf %144, %147 : vector<64x256xf32>
    %149 = vector.extract_strided_slice %148 {offsets = [0, 0], sizes = [64, 128], strides = [1, 1]} : vector<64x256xf32> to vector<64x128xf32>
    %150 = vector.extract_strided_slice %148 {offsets = [0, 128], sizes = [64, 128], strides = [1, 1]} : vector<64x256xf32> to vector<64x128xf32>
    %c1_72 = arith.constant 1 : index
    %c0_73 = arith.constant 0 : index
    %c0_74 = arith.constant 0 : index
    %151 = vector.load %arg9[%c1_72, %c0_73, %c0_74] : memref<3x128x128xbf16, #tpu.memory_space<vmem>>, vector<1x128x128xbf16>
    %152 = vector.shape_cast %151 : vector<1x128x128xbf16> to vector<128x128xbf16>
    %cst_75 = arith.constant dense<0.000000e+00> : vector<128x128xf32>
    %153 = tpu.matmul %141, %152, %cst_75 {dimension_numbers = #tpu.dot_dimension_numbers<[1], [0], [0], [1], [0, 0, 1, 1], [], []>} : vector<128x128xbf16>, vector<128x128xbf16>, vector<128x128xf32> -> vector<128x128xf32>
    %c1_76 = arith.constant 1 : index
    %c0_77 = arith.constant 0 : index
    %c0_78 = arith.constant 0 : index
    %154 = vector.load %arg10[%c1_76, %c0_77, %c0_78] : memref<3x1x128xf32, #tpu.memory_space<vmem>>, vector<1x1x128xf32>
    %155 = vector.shape_cast %154 : vector<1x1x128xf32> to vector<1x128xf32>
    %156 = vector.broadcast %155 : vector<1x128xf32> to vector<128x128xf32>
    %157 = arith.addf %153, %156 : vector<128x128xf32>
    %158 = arith.truncf %150 : vector<64x128xf32> to vector<64x128xbf16>
    %cst_79 = arith.constant dense<0.000000e+00> : vector<128x128xf32>
    %159 = tpu.matmul %0, %158, %cst_79 {dimension_numbers = #tpu.dot_dimension_numbers<[1], [0], [0], [1], [0, 0, 1, 1], [], []>} : vector<128x64xbf16>, vector<64x128xbf16>, vector<128x128xf32> -> vector<128x128xf32>
    %160 = arith.negf %157 : vector<128x128xf32>
    %161 = math.exp %160 : vector<128x128xf32>
    %cst_80 = arith.constant 1.000000e+00 : f32
    %162 = vector.broadcast %cst_80 : f32 to vector<128x128xf32>
    %163 = arith.addf %162, %161 : vector<128x128xf32>
    %164 = arith.divf %162, %163 : vector<128x128xf32>
    %165 = arith.mulf %164, %159 : vector<128x128xf32>
    %166 = tpu.concatenate %165, %164 in 1 : vector<128x128xf32>, vector<128x128xf32> -> vector<128x256xf32>
    %167 = arith.truncf %166 : vector<128x256xf32> to vector<128x256xbf16>
    %cst_81 = arith.constant dense<0.000000e+00> : vector<64x256xf32>
    %168 = tpu.matmul %1, %167, %cst_81 {dimension_numbers = #tpu.dot_dimension_numbers<[1], [0], [0], [1], [0, 0, 1, 1], [], []>} : vector<64x128xbf16>, vector<128x256xbf16>, vector<64x256xf32> -> vector<64x256xf32>
    %169 = vector.extract_strided_slice %168 {offsets = [0, 0], sizes = [64, 128], strides = [1, 1]} : vector<64x256xf32> to vector<64x128xf32>
    %170 = vector.extract_strided_slice %168 {offsets = [0, 128], sizes = [64, 128], strides = [1, 1]} : vector<64x256xf32> to vector<64x128xf32>
    %cst_82 = arith.constant 9.99999997E-7 : f32
    %171 = vector.broadcast %cst_82 : f32 to vector<64x128xf32>
    %172 = arith.addf %170, %171 : vector<64x128xf32>
    %173 = tpu.reciprocal %172 {approx = true} : vector<64x128xf32> -> vector<64x128xf32>
    %174 = arith.mulf %169, %173 : vector<64x128xf32>
    %175 = arith.addf %149, %174 : vector<64x128xf32>
    %176 = arith.truncf %175 : vector<64x128xf32> to vector<64x128xbf16>
    %cst_83 = arith.constant dense<0.000000e+00> : vector<128x128xf32>
    %177 = tpu.matmul %2, %176, %cst_83 {dimension_numbers = #tpu.dot_dimension_numbers<[1], [0], [0], [1], [0, 0, 1, 1], [], []>} : vector<128x64xbf16>, vector<64x128xbf16>, vector<128x128xf32> -> vector<128x128xf32>
    %178 = math.absf %177 : vector<128x128xf32>
    %179 = tpu.concatenate %157, %178 in 1 : vector<128x128xf32>, vector<128x128xf32> -> vector<128x256xf32>
    %180 = arith.truncf %179 : vector<128x256xf32> to vector<128x256xbf16>
    %c1_84 = arith.constant 1 : index
    %c0_85 = arith.constant 0 : index
    %c0_86 = arith.constant 0 : index
    %181 = vector.load %arg11[%c1_84, %c0_85, %c0_86] : memref<3x256x256xbf16, #tpu.memory_space<vmem>>, vector<1x256x256xbf16>
    %182 = vector.shape_cast %181 : vector<1x256x256xbf16> to vector<256x256xbf16>
    %cst_87 = arith.constant dense<0.000000e+00> : vector<128x256xf32>
    %183 = tpu.matmul %180, %182, %cst_87 {dimension_numbers = #tpu.dot_dimension_numbers<[1], [0], [0], [1], [0, 0, 1, 1], [], []>} : vector<128x256xbf16>, vector<256x256xbf16>, vector<128x256xf32> -> vector<128x256xf32>
    %c1_88 = arith.constant 1 : index
    %c0_89 = arith.constant 0 : index
    %c0_90 = arith.constant 0 : index
    %184 = vector.load %arg12[%c1_88, %c0_89, %c0_90] : memref<3x1x256xf32, #tpu.memory_space<vmem>>, vector<1x1x256xf32>
    %185 = vector.shape_cast %184 : vector<1x1x256xf32> to vector<1x256xf32>
    %186 = vector.broadcast %185 : vector<1x256xf32> to vector<128x256xf32>
    %187 = arith.addf %183, %186 : vector<128x256xf32>
    %188 = vector.extract_strided_slice %187 {offsets = [0, 0], sizes = [128, 128], strides = [1, 1]} : vector<128x256xf32> to vector<128x128xf32>
    %189 = arith.negf %188 : vector<128x128xf32>
    %190 = math.exp %189 : vector<128x128xf32>
    %cst_91 = arith.constant 1.000000e+00 : f32
    %191 = vector.broadcast %cst_91 : f32 to vector<128x128xf32>
    %192 = arith.addf %191, %190 : vector<128x128xf32>
    %193 = arith.divf %191, %192 : vector<128x128xf32>
    %194 = vector.extract_strided_slice %187 {offsets = [0, 128], sizes = [128, 128], strides = [1, 1]} : vector<128x256xf32> to vector<128x128xf32>
    %195 = math.tanh %194 : vector<128x128xf32>
    %196 = arith.mulf %157, %193 : vector<128x128xf32>
    %cst_92 = arith.constant 1.000000e+00 : f32
    %197 = vector.broadcast %cst_92 : f32 to vector<128x128xf32>
    %198 = arith.subf %197, %193 : vector<128x128xf32>
    %199 = arith.mulf %195, %198 : vector<128x128xf32>
    %200 = arith.addf %196, %199 : vector<128x128xf32>
    %c1_93 = arith.constant 1 : index
    %c0_94 = arith.constant 0 : index
    %c0_95 = arith.constant 0 : index
    %201 = vector.load %arg13[%c1_93, %c0_94, %c0_95] : memref<3x1x128xf32, #tpu.memory_space<vmem>>, vector<1x1x128xf32>
    %202 = vector.shape_cast %201 : vector<1x1x128xf32> to vector<1x128xf32>
    %c1_96 = arith.constant 1 : index
    %c0_97 = arith.constant 0 : index
    %c0_98 = arith.constant 0 : index
    %203 = vector.load %arg14[%c1_96, %c0_97, %c0_98] : memref<3x1x128xf32, #tpu.memory_space<vmem>>, vector<1x1x128xf32>
    %204 = vector.shape_cast %203 : vector<1x1x128xf32> to vector<1x128xf32>
    %cst_99 = arith.constant dense<0.000000e+00> : vector<128xf32>
    %205 = vector.multi_reduction <add>, %175, %cst_99 [0] : vector<64x128xf32> to vector<128xf32>
    %206 = vector.shape_cast %205 : vector<128xf32> to vector<1x128xf32>
    %cst_100 = arith.constant 6.400000e+01 : f32
    %207 = vector.broadcast %cst_100 : f32 to vector<1x128xf32>
    %208 = arith.divf %206, %207 : vector<1x128xf32>
    %209 = vector.broadcast %208 : vector<1x128xf32> to vector<64x128xf32>
    %210 = arith.subf %175, %209 : vector<64x128xf32>
    %211 = arith.mulf %210, %210 : vector<64x128xf32>
    %cst_101 = arith.constant dense<0.000000e+00> : vector<128xf32>
    %212 = vector.multi_reduction <add>, %211, %cst_101 [0] : vector<64x128xf32> to vector<128xf32>
    %213 = vector.shape_cast %212 : vector<128xf32> to vector<1x128xf32>
    %cst_102 = arith.constant 6.400000e+01 : f32
    %214 = vector.broadcast %cst_102 : f32 to vector<1x128xf32>
    %215 = arith.divf %213, %214 : vector<1x128xf32>
    %216 = vector.broadcast %208 : vector<1x128xf32> to vector<64x128xf32>
    %217 = arith.subf %175, %216 : vector<64x128xf32>
    %cst_103 = arith.constant 9.99999974E-6 : f32
    %218 = vector.broadcast %cst_103 : f32 to vector<1x128xf32>
    %219 = arith.addf %215, %218 : vector<1x128xf32>
    %220 = math.rsqrt %219 : vector<1x128xf32>
    %221 = vector.broadcast %220 : vector<1x128xf32> to vector<64x128xf32>
    %222 = arith.mulf %217, %221 : vector<64x128xf32>
    %223 = vector.broadcast %202 : vector<1x128xf32> to vector<64x128xf32>
    %224 = arith.mulf %222, %223 : vector<64x128xf32>
    %225 = vector.broadcast %204 : vector<1x128xf32> to vector<64x128xf32>
    %226 = arith.addf %224, %225 : vector<64x128xf32>
    %cst_104 = arith.constant 0.000000e+00 : f32
    %227 = vector.broadcast %cst_104 : f32 to vector<64x128xf32>
    %228 = arith.maximumf %226, %227 : vector<64x128xf32>
    %229 = arith.addf %109, %228 : vector<64x128xf32>
    %c1_105 = arith.constant 1 : index
    %c0_106 = arith.constant 0 : index
    %c0_107 = arith.constant 0 : index
    %230 = vector.load %arg15[%c1_105, %c0_106, %c0_107] : memref<3x1x128xf32, #tpu.memory_space<vmem>>, vector<1x1x128xf32>
    %231 = vector.shape_cast %230 : vector<1x1x128xf32> to vector<1x128xf32>
    %c1_108 = arith.constant 1 : index
    %c0_109 = arith.constant 0 : index
    %c0_110 = arith.constant 0 : index
    %232 = vector.load %arg16[%c1_108, %c0_109, %c0_110] : memref<3x1x128xf32, #tpu.memory_space<vmem>>, vector<1x1x128xf32>
    %233 = vector.shape_cast %232 : vector<1x1x128xf32> to vector<1x128xf32>
    %cst_111 = arith.constant dense<0.000000e+00> : vector<128xf32>
    %234 = vector.multi_reduction <add>, %200, %cst_111 [0] : vector<128x128xf32> to vector<128xf32>
    %235 = vector.shape_cast %234 : vector<128xf32> to vector<1x128xf32>
    %cst_112 = arith.constant 1.280000e+02 : f32
    %236 = vector.broadcast %cst_112 : f32 to vector<1x128xf32>
    %237 = arith.divf %235, %236 : vector<1x128xf32>
    %238 = vector.broadcast %237 : vector<1x128xf32> to vector<128x128xf32>
    %239 = arith.subf %200, %238 : vector<128x128xf32>
    %240 = arith.mulf %239, %239 : vector<128x128xf32>
    %cst_113 = arith.constant dense<0.000000e+00> : vector<128xf32>
    %241 = vector.multi_reduction <add>, %240, %cst_113 [0] : vector<128x128xf32> to vector<128xf32>
    %242 = vector.shape_cast %241 : vector<128xf32> to vector<1x128xf32>
    %cst_114 = arith.constant 1.280000e+02 : f32
    %243 = vector.broadcast %cst_114 : f32 to vector<1x128xf32>
    %244 = arith.divf %242, %243 : vector<1x128xf32>
    %245 = vector.broadcast %237 : vector<1x128xf32> to vector<128x128xf32>
    %246 = arith.subf %200, %245 : vector<128x128xf32>
    %cst_115 = arith.constant 9.99999974E-6 : f32
    %247 = vector.broadcast %cst_115 : f32 to vector<1x128xf32>
    %248 = arith.addf %244, %247 : vector<1x128xf32>
    %249 = math.rsqrt %248 : vector<1x128xf32>
    %250 = vector.broadcast %249 : vector<1x128xf32> to vector<128x128xf32>
    %251 = arith.mulf %246, %250 : vector<128x128xf32>
    %252 = vector.broadcast %231 : vector<1x128xf32> to vector<128x128xf32>
    %253 = arith.mulf %251, %252 : vector<128x128xf32>
    %254 = vector.broadcast %233 : vector<1x128xf32> to vector<128x128xf32>
    %255 = arith.addf %253, %254 : vector<128x128xf32>
    %cst_116 = arith.constant 0.000000e+00 : f32
    %256 = vector.broadcast %cst_116 : f32 to vector<128x128xf32>
    %257 = arith.maximumf %255, %256 : vector<128x128xf32>
    %258 = arith.addf %138, %257 : vector<128x128xf32>
    %c0_117 = arith.constant 0 : index
    %c0_118 = arith.constant 0 : index
    %259 = vector.load %arg24[%c0_117, %c0_118] : memref<128x128xf32, #tpu.memory_space<vmem>>, vector<128x128xf32>
    tpu.vector_store %arg24[%c0_117, %c0_118], %258 {strides = array<i32>} : memref<128x128xf32, #tpu.memory_space<vmem>>, vector<128x128xf32>,
    %260 = arith.truncf %229 : vector<64x128xf32> to vector<64x128xbf16>
    %261 = arith.truncf %258 : vector<128x128xf32> to vector<128x128xbf16>
    %c2 = arith.constant 2 : index
    %c0_119 = arith.constant 0 : index
    %c0_120 = arith.constant 0 : index
    %262 = vector.load %arg7[%c2, %c0_119, %c0_120] : memref<3x128x256xbf16, #tpu.memory_space<vmem>>, vector<1x128x256xbf16>
    %263 = vector.shape_cast %262 : vector<1x128x256xbf16> to vector<128x256xbf16>
    %cst_121 = arith.constant dense<0.000000e+00> : vector<64x256xf32>
    %264 = tpu.matmul %260, %263, %cst_121 {dimension_numbers = #tpu.dot_dimension_numbers<[1], [0], [0], [1], [0, 0, 1, 1], [], []>} : vector<64x128xbf16>, vector<128x256xbf16>, vector<64x256xf32> -> vector<64x256xf32>
    %c2_122 = arith.constant 2 : index
    %c0_123 = arith.constant 0 : index
    %c0_124 = arith.constant 0 : index
    %265 = vector.load %arg8[%c2_122, %c0_123, %c0_124] : memref<3x1x256xf32, #tpu.memory_space<vmem>>, vector<1x1x256xf32>
    %266 = vector.shape_cast %265 : vector<1x1x256xf32> to vector<1x256xf32>
    %267 = vector.broadcast %266 : vector<1x256xf32> to vector<64x256xf32>
    %268 = arith.addf %264, %267 : vector<64x256xf32>
    %269 = vector.extract_strided_slice %268 {offsets = [0, 0], sizes = [64, 128], strides = [1, 1]} : vector<64x256xf32> to vector<64x128xf32>
    %270 = vector.extract_strided_slice %268 {offsets = [0, 128], sizes = [64, 128], strides = [1, 1]} : vector<64x256xf32> to vector<64x128xf32>
    %c2_125 = arith.constant 2 : index
    %c0_126 = arith.constant 0 : index
    %c0_127 = arith.constant 0 : index
    %271 = vector.load %arg9[%c2_125, %c0_126, %c0_127] : memref<3x128x128xbf16, #tpu.memory_space<vmem>>, vector<1x128x128xbf16>
    %272 = vector.shape_cast %271 : vector<1x128x128xbf16> to vector<128x128xbf16>
    %cst_128 = arith.constant dense<0.000000e+00> : vector<128x128xf32>
    %273 = tpu.matmul %261, %272, %cst_128 {dimension_numbers = #tpu.dot_dimension_numbers<[1], [0], [0], [1], [0, 0, 1, 1], [], []>} : vector<128x128xbf16>, vector<128x128xbf16>, vector<128x128xf32> -> vector<128x128xf32>
    %c2_129 = arith.constant 2 : index
    %c0_130 = arith.constant 0 : index
    %c0_131 = arith.constant 0 : index
    %274 = vector.load %arg10[%c2_129, %c0_130, %c0_131] : memref<3x1x128xf32, #tpu.memory_space<vmem>>, vector<1x1x128xf32>
    %275 = vector.shape_cast %274 : vector<1x1x128xf32> to vector<1x128xf32>
    %276 = vector.broadcast %275 : vector<1x128xf32> to vector<128x128xf32>
    %277 = arith.addf %273, %276 : vector<128x128xf32>
    %278 = arith.truncf %270 : vector<64x128xf32> to vector<64x128xbf16>
    %cst_132 = arith.constant dense<0.000000e+00> : vector<128x128xf32>
    %279 = tpu.matmul %0, %278, %cst_132 {dimension_numbers = #tpu.dot_dimension_numbers<[1], [0], [0], [1], [0, 0, 1, 1], [], []>} : vector<128x64xbf16>, vector<64x128xbf16>, vector<128x128xf32> -> vector<128x128xf32>
    %280 = arith.negf %277 : vector<128x128xf32>
    %281 = math.exp %280 : vector<128x128xf32>
    %cst_133 = arith.constant 1.000000e+00 : f32
    %282 = vector.broadcast %cst_133 : f32 to vector<128x128xf32>
    %283 = arith.addf %282, %281 : vector<128x128xf32>
    %284 = arith.divf %282, %283 : vector<128x128xf32>
    %285 = arith.mulf %284, %279 : vector<128x128xf32>
    %286 = tpu.concatenate %285, %284 in 1 : vector<128x128xf32>, vector<128x128xf32> -> vector<128x256xf32>
    %287 = arith.truncf %286 : vector<128x256xf32> to vector<128x256xbf16>
    %cst_134 = arith.constant dense<0.000000e+00> : vector<64x256xf32>
    %288 = tpu.matmul %1, %287, %cst_134 {dimension_numbers = #tpu.dot_dimension_numbers<[1], [0], [0], [1], [0, 0, 1, 1], [], []>} : vector<64x128xbf16>, vector<128x256xbf16>, vector<64x256xf32> -> vector<64x256xf32>
    %289 = vector.extract_strided_slice %288 {offsets = [0, 0], sizes = [64, 128], strides = [1, 1]} : vector<64x256xf32> to vector<64x128xf32>
    %290 = vector.extract_strided_slice %288 {offsets = [0, 128], sizes = [64, 128], strides = [1, 1]} : vector<64x256xf32> to vector<64x128xf32>
    %cst_135 = arith.constant 9.99999997E-7 : f32
    %291 = vector.broadcast %cst_135 : f32 to vector<64x128xf32>
    %292 = arith.addf %290, %291 : vector<64x128xf32>
    %293 = tpu.reciprocal %292 {approx = true} : vector<64x128xf32> -> vector<64x128xf32>
    %294 = arith.mulf %289, %293 : vector<64x128xf32>
    %295 = arith.addf %269, %294 : vector<64x128xf32>
    %296 = arith.truncf %295 : vector<64x128xf32> to vector<64x128xbf16>
    %cst_136 = arith.constant dense<0.000000e+00> : vector<128x128xf32>
    %297 = tpu.matmul %2, %296, %cst_136 {dimension_numbers = #tpu.dot_dimension_numbers<[1], [0], [0], [1], [0, 0, 1, 1], [], []>} : vector<128x64xbf16>, vector<64x128xbf16>, vector<128x128xf32> -> vector<128x128xf32>
    %298 = math.absf %297 : vector<128x128xf32>
    %299 = tpu.concatenate %277, %298 in 1 : vector<128x128xf32>, vector<128x128xf32> -> vector<128x256xf32>
    %300 = arith.truncf %299 : vector<128x256xf32> to vector<128x256xbf16>
    %c2_137 = arith.constant 2 : index
    %c0_138 = arith.constant 0 : index
    %c0_139 = arith.constant 0 : index
    %301 = vector.load %arg11[%c2_137, %c0_138, %c0_139] : memref<3x256x256xbf16, #tpu.memory_space<vmem>>, vector<1x256x256xbf16>
    %302 = vector.shape_cast %301 : vector<1x256x256xbf16> to vector<256x256xbf16>
    %cst_140 = arith.constant dense<0.000000e+00> : vector<128x256xf32>
    %303 = tpu.matmul %300, %302, %cst_140 {dimension_numbers = #tpu.dot_dimension_numbers<[1], [0], [0], [1], [0, 0, 1, 1], [], []>} : vector<128x256xbf16>, vector<256x256xbf16>, vector<128x256xf32> -> vector<128x256xf32>
    %c2_141 = arith.constant 2 : index
    %c0_142 = arith.constant 0 : index
    %c0_143 = arith.constant 0 : index
    %304 = vector.load %arg12[%c2_141, %c0_142, %c0_143] : memref<3x1x256xf32, #tpu.memory_space<vmem>>, vector<1x1x256xf32>
    %305 = vector.shape_cast %304 : vector<1x1x256xf32> to vector<1x256xf32>
    %306 = vector.broadcast %305 : vector<1x256xf32> to vector<128x256xf32>
    %307 = arith.addf %303, %306 : vector<128x256xf32>
    %308 = vector.extract_strided_slice %307 {offsets = [0, 0], sizes = [128, 128], strides = [1, 1]} : vector<128x256xf32> to vector<128x128xf32>
    %309 = arith.negf %308 : vector<128x128xf32>
    %310 = math.exp %309 : vector<128x128xf32>
    %cst_144 = arith.constant 1.000000e+00 : f32
    %311 = vector.broadcast %cst_144 : f32 to vector<128x128xf32>
    %312 = arith.addf %311, %310 : vector<128x128xf32>
    %313 = arith.divf %311, %312 : vector<128x128xf32>
    %314 = vector.extract_strided_slice %307 {offsets = [0, 128], sizes = [128, 128], strides = [1, 1]} : vector<128x256xf32> to vector<128x128xf32>
    %315 = math.tanh %314 : vector<128x128xf32>
    %316 = arith.mulf %277, %313 : vector<128x128xf32>
    %cst_145 = arith.constant 1.000000e+00 : f32
    %317 = vector.broadcast %cst_145 : f32 to vector<128x128xf32>
    %318 = arith.subf %317, %313 : vector<128x128xf32>
    %319 = arith.mulf %315, %318 : vector<128x128xf32>
    %320 = arith.addf %316, %319 : vector<128x128xf32>
    %c2_146 = arith.constant 2 : index
    %c0_147 = arith.constant 0 : index
    %c0_148 = arith.constant 0 : index
    %321 = vector.load %arg15[%c2_146, %c0_147, %c0_148] : memref<3x1x128xf32, #tpu.memory_space<vmem>>, vector<1x1x128xf32>
    %322 = vector.shape_cast %321 : vector<1x1x128xf32> to vector<1x128xf32>
    %c2_149 = arith.constant 2 : index
    %c0_150 = arith.constant 0 : index
    %c0_151 = arith.constant 0 : index
    %323 = vector.load %arg16[%c2_149, %c0_150, %c0_151] : memref<3x1x128xf32, #tpu.memory_space<vmem>>, vector<1x1x128xf32>
    %324 = vector.shape_cast %323 : vector<1x1x128xf32> to vector<1x128xf32>
    %cst_152 = arith.constant dense<0.000000e+00> : vector<128xf32>
    %325 = vector.multi_reduction <add>, %320, %cst_152 [0] : vector<128x128xf32> to vector<128xf32>
    %326 = vector.shape_cast %325 : vector<128xf32> to vector<1x128xf32>
    %cst_153 = arith.constant 1.280000e+02 : f32
    %327 = vector.broadcast %cst_153 : f32 to vector<1x128xf32>
    %328 = arith.divf %326, %327 : vector<1x128xf32>
    %329 = vector.broadcast %328 : vector<1x128xf32> to vector<128x128xf32>
    %330 = arith.subf %320, %329 : vector<128x128xf32>
    %331 = arith.mulf %330, %330 : vector<128x128xf32>
    %cst_154 = arith.constant dense<0.000000e+00> : vector<128xf32>
    %332 = vector.multi_reduction <add>, %331, %cst_154 [0] : vector<128x128xf32> to vector<128xf32>
    %333 = vector.shape_cast %332 : vector<128xf32> to vector<1x128xf32>
    %cst_155 = arith.constant 1.280000e+02 : f32
    %334 = vector.broadcast %cst_155 : f32 to vector<1x128xf32>
    %335 = arith.divf %333, %334 : vector<1x128xf32>
    %336 = vector.broadcast %328 : vector<1x128xf32> to vector<128x128xf32>
    %337 = arith.subf %320, %336 : vector<128x128xf32>
    %cst_156 = arith.constant 9.99999974E-6 : f32
    %338 = vector.broadcast %cst_156 : f32 to vector<1x128xf32>
    %339 = arith.addf %335, %338 : vector<1x128xf32>
    %340 = math.rsqrt %339 : vector<1x128xf32>
    %341 = vector.broadcast %340 : vector<1x128xf32> to vector<128x128xf32>
    %342 = arith.mulf %337, %341 : vector<128x128xf32>
    %343 = vector.broadcast %322 : vector<1x128xf32> to vector<128x128xf32>
    %344 = arith.mulf %342, %343 : vector<128x128xf32>
    %345 = vector.broadcast %324 : vector<1x128xf32> to vector<128x128xf32>
    %346 = arith.addf %344, %345 : vector<128x128xf32>
    %cst_157 = arith.constant 0.000000e+00 : f32
    %347 = vector.broadcast %cst_157 : f32 to vector<128x128xf32>
    %348 = arith.maximumf %346, %347 : vector<128x128xf32>
    %349 = arith.addf %258, %348 : vector<128x128xf32>
    %350 = arith.truncf %349 : vector<128x128xf32> to vector<128x128xbf16>
    %c0_158 = arith.constant 0 : index
    %c0_159 = arith.constant 0 : index
    %351 = vector.load %arg17[%c0_158, %c0_159] : memref<128x128xbf16, #tpu.memory_space<vmem>>, vector<128x128xbf16>
    %cst_160 = arith.constant dense<0.000000e+00> : vector<128x128xf32>
    %352 = tpu.matmul %350, %351, %cst_160 {dimension_numbers = #tpu.dot_dimension_numbers<[1], [0], [0], [1], [0, 0, 1, 1], [], []>} : vector<128x128xbf16>, vector<128x128xbf16>, vector<128x128xf32> -> vector<128x128xf32>
    %c0_161 = arith.constant 0 : index
    %c0_162 = arith.constant 0 : index
    %353 = vector.load %arg18[%c0_161, %c0_162] : memref<1x128xf32, #tpu.memory_space<vmem>>, vector<1x128xf32>
    %354 = vector.broadcast %353 : vector<1x128xf32> to vector<128x128xf32>
    %355 = arith.addf %352, %354 : vector<128x128xf32>
    %cst_163 = arith.constant 0.000000e+00 : f32
    %356 = vector.broadcast %cst_163 : f32 to vector<128x128xf32>
    %357 = arith.maximumf %355, %356 : vector<128x128xf32>
    %358 = arith.truncf %357 : vector<128x128xf32> to vector<128x128xbf16>
    %c0_164 = arith.constant 0 : index
    %c0_165 = arith.constant 0 : index
    %359 = vector.load %arg19[%c0_164, %c0_165] : memref<128x128xbf16, #tpu.memory_space<vmem>>, vector<128x128xbf16>
    %cst_166 = arith.constant dense<0.000000e+00> : vector<128x128xf32>
    %360 = tpu.matmul %358, %359, %cst_166 {dimension_numbers = #tpu.dot_dimension_numbers<[1], [0], [0], [1], [0, 0, 1, 1], [], []>} : vector<128x128xbf16>, vector<128x128xbf16>, vector<128x128xf32> -> vector<128x128xf32>
    %c0_167 = arith.constant 0 : index
    %c0_168 = arith.constant 0 : index
    %361 = vector.load %arg20[%c0_167, %c0_168] : memref<1x128xf32, #tpu.memory_space<vmem>>, vector<1x128xf32>
    %362 = vector.broadcast %361 : vector<1x128xf32> to vector<128x128xf32>
    %363 = arith.addf %360, %362 : vector<128x128xf32>
    %cst_169 = arith.constant 0.000000e+00 : f32
    %364 = vector.broadcast %cst_169 : f32 to vector<128x128xf32>
    %365 = arith.maximumf %363, %364 : vector<128x128xf32>
    %366 = arith.truncf %365 : vector<128x128xf32> to vector<128x128xbf16>
    %c0_170 = arith.constant 0 : index
    %c0_171 = arith.constant 0 : index
    %367 = vector.load %arg21[%c0_170, %c0_171] : memref<128x128xbf16, #tpu.memory_space<vmem>>, vector<128x128xbf16>
    %cst_172 = arith.constant dense<0.000000e+00> : vector<128x128xf32>
    %368 = tpu.matmul %366, %367, %cst_172 {dimension_numbers = #tpu.dot_dimension_numbers<[1], [0], [0], [1], [0, 0, 1, 1], [], []>} : vector<128x128xbf16>, vector<128x128xbf16>, vector<128x128xf32> -> vector<128x128xf32>
    %c0_173 = arith.constant 0 : index
    %c0_174 = arith.constant 0 : index
    %369 = vector.load %arg22[%c0_173, %c0_174] : memref<1x128xf32, #tpu.memory_space<vmem>>, vector<1x128xf32>
    %370 = vector.broadcast %369 : vector<1x128xf32> to vector<128x128xf32>
    %371 = arith.addf %368, %370 : vector<128x128xf32>
    %c0_175 = arith.constant 0 : index
    %c0_176 = arith.constant 0 : index
    %372 = vector.load %arg25[%c0_175, %c0_176] : memref<128x128xf32, #tpu.memory_space<vmem>>, vector<128x128xf32>
    tpu.vector_store %arg25[%c0_175, %c0_176], %371 {strides = array<i32>} : memref<128x128xf32, #tpu.memory_space<vmem>>, vector<128x128xf32>,
    return
  }
}

</mosaic_0001>

<bundles_post_ra>
// kernel: graph_network_forward.1
= control target key start
LH: loop header
LB: loop body
LE: loop exit
PB: predicated region body
PF: predicated region fallthrough
CT: control target
= control target key end

     0   :  { %v7793_v1 = vmov 1   ;;  %v10492_v2 = vmov 0   ;;  %v215_v55 = vlaneseq  ;;  %vm771_vm0 = vcmask 523264   ;;  %s10458_s7 = inlined_call_operand.vmem [shape: bf16[3,128,256], index: 7, kind: input, shape index: {}]   ;;  %s10459_s1 = inlined_call_operand.vmem [shape: f32[128,2], index: 1, kind: input, shape index: {}]   ;;  %s10460_s9 = inlined_call_operand.vmem [shape: bf16[3,128,128], index: 9, kind: input, shape index: {}]   ;;  %s10461_s0 = inlined_call_operand.vmem [shape: f32[64,128], index: 0, kind: input, shape index: {}]   ;;  %s10462_s5 = inlined_call_operand.vmem [shape: f32[2,128], index: 5, kind: input, shape index: {}]   ;;  %s10463_s2 = inlined_call_operand.vmem [shape: bf16[128,64], index: 2, kind: input, shape index: {}]   ;;  %s10464_s6 = inlined_call_operand.vmem [shape: f32[1,128], index: 6, kind: input, shape index: {}]   ;;  %s10465_s8 = inlined_call_operand.vmem [shape: f32[3,1,256], index: 8, kind: input, shape index: {}]   ;;  %s10466_s10 = inlined_call_operand.vmem [shape: f32[3,1,128], index: 10, kind: input, shape index: {}]   ;;  %s10467_s3 = inlined_call_operand.vmem [shape: bf16[64,128], index: 3, kind: input, shape index: {}]   ;;  %s10468_s4 = inlined_call_operand.vmem [shape: bf16[128,64], index: 4, kind: input, shape index: {}]   ;;  %s10469_s11 = inlined_call_operand.vmem [shape: bf16[3,256,256], index: 11, kind: input, shape index: {}]   ;;  %s10470_s13 = inlined_call_operand.vmem [shape: f32[3,1,128], index: 13, kind: input, shape index: {}, may-alias: {13,15}]   ;;  %s10471_s14 = inlined_call_operand.vmem [shape: f32[3,1,128], index: 14, kind: input, shape index: {}, may-alias: {14,16}]   ;;  %s10472_s12 = inlined_call_operand.vmem [shape: f32[3,1,256], index: 12, kind: input, shape index: {}]   ;;  %s10473_s15 = inlined_call_operand.vmem [shape: f32[3,1,128], index: 15, kind: input, shape index: {}, may-alias: {13,15}]   ;;  %s10474_s16 = inlined_call_operand.vmem [shape: f32[3,1,128], index: 16, kind: input, shape index: {}, may-alias: {14,16}]   ;;  %s10475_s23 = inlined_call_operand.vmem [shape: f32[128,128], index: 23, kind: output, shape index: {0}]   ;;  %s10476_s24 = inlined_call_operand.vmem [shape: f32[128,128], index: 24, kind: output, shape index: {1}]   ;;  %s10477_s17 = inlined_call_operand.vmem [shape: bf16[128,128], index: 17, kind: input, shape index: {}]   ;;  %s10478_s19 = inlined_call_operand.vmem [shape: bf16[128,128], index: 19, kind: input, shape index: {}]   ;;  %s10479_s21 = inlined_call_operand.vmem [shape: bf16[128,128], index: 21, kind: input, shape index: {}]   ;;  %s10480_s18 = inlined_call_operand.vmem [shape: f32[1,128], index: 18, kind: input, shape index: {}]   ;;  %s10481_s20 = inlined_call_operand.vmem [shape: f32[1,128], index: 20, kind: input, shape index: {}]   ;;  %s10482_s22 = inlined_call_operand.vmem [shape: f32[1,128], index: 22, kind: input, shape index: {}]   ;;  %s10483_s25 = inlined_call_operand.vmem [shape: f32[128,128], index: 25, kind: output, shape index: {2}]  }
   0x1   :  { %10512 = sst [smem:[#allocation20_spill]] %s10458_s7  ;;  %6873 = vset.pattern.permute.xlu1 %v7793_v1  ;;  %518 = vmatprep.mubr.bf16.mxu0 %v10492_v2 }
   0x2   :  { %10513 = sst [smem:[#allocation21_spill]] %s10459_s1  ;;  %6875 = vset.pattern.permute.xlu0 %v7793_v1  ;;  %v216_v57 = vshrl.u32 %v215_v55, 7 }
   0x3   :  { %10514 = sst [smem:[#allocation22_spill]] %s10460_s9  ;;  %s10524_s9 = sld [smem:[#allocation20_spill]] }
   0x4   :  { %10515 = sst [smem:[#allocation23_spill]] %s10461_s0  ;;  %s10526_s29 = sld [smem:[#allocation22_spill]]  ;;  %v8099_v60 = vsub.s32 1, %v216_v57  ;;  %v8104_v63 = vsub.s32 0, %v216_v57 }
   0x5   :  { %10516 = sst [smem:[#allocation24_spill]] %s10462_s5  ;;  %s10527_s30 = sld [smem:[#allocation23_spill]] }
   0x6   :  { %10517 = sst [smem:[#allocation25_spill]] %s10463_s2  ;;  %s10525_s2 = sld [smem:[#allocation21_spill]]  ;;  %10528 = vst [vmem:[#allocation2_spill] sm:$0xff] %v8099_v60  ;;  %10530 = vst [vmem:[#allocation3_spill] sm:$0xff] %v8104_v63 }
   0x7   :  { %10518 = sst [smem:[#allocation26_spill]] %s10464_s6  ;;  %s10529_s26 = sld [smem:[#allocation24_spill]] }
   0x8   :  { %10519 = sst [smem:[#allocation27_spill]] %s10465_s8  ;;  %s10532_s5 = sld [smem:[#allocation26_spill]] }
   0x9   :  { %10520 = sst [smem:[#allocation28_spill]] %s10466_s10  ;;  %v6891_v0 = vld [vmem:[%s10524_s9 + $0x4] ss:$8 sps:$4 sm:$0xff]   ;;  %v6893_v3 = vld [vmem:[%s10524_s9] ss:$8 sps:$4 sm:$0xff]   ;;  %s10531_s10 = sld [smem:[#allocation25_spill]] }
   0xa   :  { %10521 = sst [smem:[#allocation29_spill]] %s10467_s3  ;;  %486 = vmatprep.subr.bf16.mxu0 %v6891_v0  ;;  %v6894_v4 = vld [vmem:[%s10524_s9 + $0x14] ss:$8 sps:$4 sm:$0xff]   ;;  %v6896_v5 = vld [vmem:[%s10524_s9 + $0x10] ss:$8 sps:$4 sm:$0xff]   ;;  %v6915_v21 = vld [vmem:[%s10526_s29] sm:$0xff]  }
   0xb   :  { %10522 = sst [smem:[#allocation30_spill]] %s10482_s22  ;;  %487 = vmatpush1.bf16.msra.mxu0 %v6893_v3  ;;  %v6897_v6 = vld [vmem:[%s10524_s9 + $0x24] ss:$8 sps:$4 sm:$0xff]   ;;  %v6899_v8 = vld [vmem:[%s10524_s9 + $0x20] ss:$8 sps:$4 sm:$0xff]   ;;  %6519 = vmatprep.subr.bf16.mxu1 %v6915_v21  ;;  %v6917_v29 = vld [vmem:[%s10526_s29 + $0x10] sm:$0xff]  }
   0xc   :  { %10523 = sst [smem:[#allocation31_spill]] %s10483_s25  ;;  %488 = vmatprep.subr.bf16.mxu0 %v6894_v4  ;;  %v118_v7 = vld [vmem:[%s10525_s2] sm:$0xff]  ;;  %v119_v9 = vld [vmem:[%s10525_s2 + $0x8] sm:$0xff]  ;;  %v6900_v10 = vld [vmem:[%s10524_s9 + $0x34] ss:$8 sps:$4 sm:$0xff]   ;;  %6520 = vmatpush3.bf16.msra.mxu1 %v6915_v21  ;;  %s10538_s6 = sld [smem:[#allocation27_spill]] }
   0xd   :  { %236 = vperm.xlu1 %6873, %v118_v7   ;;  %v6902_v11 = vld [vmem:[%s10524_s9 + $0x30] ss:$8 sps:$4 sm:$0xff]   ;;  %v6903_v12 = vld [vmem:[%s10524_s9 + $0x44] ss:$8 sps:$4 sm:$0xff]   ;;  %v6905_v16 = vld [vmem:[%s10524_s9 + $0x40] ss:$8 sps:$4 sm:$0xff]  }
   0xe   :  { %v121_v13 = vld [vmem:[%s10525_s2 + $0x18] sm:$0xff]  ;;  %v120_v14 = vld [vmem:[%s10525_s2 + $0x10] sm:$0xff]  ;;  %v6909_v19 = vld [vmem:[%s10524_s9 + $0x64] ss:$8 sps:$4 sm:$0xff]   ;;  %s10539_s3 = sld [smem:[#allocation28_spill]]  ;;  %s10540_s7 = sld [smem:[#allocation29_spill]] }
   0xf   :  { %489 = vmatpush1.bf16.msra.mxu0 %v6896_v5  ;;  %244 = vperm.xlu0 %6875, %v120_v14   ;;  %v7971_v15 = vld [vmem:[%s10525_s2 + $0x30] sm:$0xff]  ;;  %v122_v22 = vld [vmem:[%s10525_s2 + $0x20] sm:$0xff]  ;;  %v6916_v25 = vld [vmem:[%s10526_s29 + $0x8] sm:$0xff]  }
  0x10   :  { %490 = vmatprep.subr.bf16.mxu0 %v6897_v6  ;;  %v6906_v17 = vld [vmem:[%s10524_s9 + $0x54] ss:$8 sps:$4 sm:$0xff]   ;;  %v6908_v18 = vld [vmem:[%s10524_s9 + $0x50] ss:$8 sps:$4 sm:$0xff]   ;;  %v6911_v23 = vld [vmem:[%s10524_s9 + $0x60] ss:$8 sps:$4 sm:$0xff]   ;;  %6521 = vmatprep.subr.bf16.mxu1 %v6916_v25 }
  0x11   :  { %240 = vperm.xlu1 %6873, %v119_v9   ;;  %v7989_v20 = vld [vmem:[%s10525_s2 + $0x50] sm:$0xff]  ;;  %v358_v27 = vld [vmem:[%s10527_s30] sm:$0xff]  ;;  %v359_v28 = vld [vmem:[%s10527_s30 + $0x8] sm:$0xff]  ;;  %6522 = vmatpush3.bf16.msra.mxu1 %v6916_v25 }
  0x12   :  { %v6912_v24 = vld [vmem:[%s10524_s9 + $0x74] ss:$8 sps:$4 sm:$0xff]   ;;  %v6914_v26 = vld [vmem:[%s10524_s9 + $0x70] ss:$8 sps:$4 sm:$0xff]   ;;  %6523 = vmatprep.subr.bf16.mxu1 %v6917_v29  ;;  %v123_v30 = vld [vmem:[%s10525_s2 + $0x28] sm:$0xff]  ;;  %v366_v31 = vpack.c.bf16 %v359_v28, %v358_v27 }
  0x13   :  { %491 = vmatpush1.bf16.msra.mxu0 %v6899_v8  ;;  %260 = vperm.xlu0 %6875, %v7971_v15   ;;  %v360_v32 = vld [vmem:[%s10527_s30 + $0x10] sm:$0xff]  ;;  %v361_v33 = vld [vmem:[%s10527_s30 + $0x18] sm:$0xff]  ;;  %v6919_v36 = vld [vmem:[%s10526_s29 + $0x20] sm:$0xff]  }
  0x14   :  { %492 = vmatprep.subr.bf16.mxu0 %v6900_v10  ;;  %v125_v34 = vld [vmem:[%s10525_s2 + $0x38] sm:$0xff]  ;;  %v367_v37 = vpack.c.bf16 %v361_v33, %v360_v32  ;;  %v6920_v38 = vld [vmem:[%s10526_s29 + $0x28] sm:$0xff]   ;;  %v362_v39 = vld [vmem:[%s10527_s30 + $0x20] sm:$0xff] }
  0x15   :  { %6874 = vset.pattern.permute.xlu1 %v10492_v2  ;;  %6524 = vmatpush3.bf16.msra.mxu1 %v6917_v29  ;;  %v6918_v35 = vld [vmem:[%s10526_s29 + $0x18] sm:$0xff]   ;;  %v363_v40 = vld [vmem:[%s10527_s30 + $0x28] sm:$0xff]  ;;  %v126_v41 = vld [vmem:[%s10525_s2 + $0x40] sm:$0xff] }
  0x16   :  { %152 = vperm.xlu1 %6874, %v121_v13   ;;  %6525 = vmatprep.subr.bf16.mxu1 %v6918_v35  ;;  %v127_v42 = vld [vmem:[%s10525_s2 + $0x48] sm:$0xff]  ;;  %v368_v43 = vpack.c.bf16 %v363_v40, %v362_v39  ;;  %v6921_v44 = vld [vmem:[%s10526_s29 + $0x30] sm:$0xff]   ;;  %v6922_v45 = vld [vmem:[%s10526_s29 + $0x38] sm:$0xff]  }
  0x17   :  { %493 = vmatpush1.bf16.msra.mxu0 %v6902_v11  ;;  %276 = vperm.xlu0 %6875, %v7989_v20   ;;  %v364_v46 = vld [vmem:[%s10527_s30 + $0x30] sm:$0xff]  ;;  %v365_v47 = vld [vmem:[%s10527_s30 + $0x38] sm:$0xff]  ;;  %v131_v48 = vld [vmem:[%s10525_s2 + $0x68] sm:$0xff] }
  0x18   :  { %494 = vmatprep.subr.bf16.mxu0 %v6903_v12  ;;  %v369_v49 = vpack.c.bf16 %v365_v47, %v364_v46  ;;  %v132_v50 = vld [vmem:[%s10525_s2 + $0x70] sm:$0xff]  ;;  %v129_v51 = vld [vmem:[%s10525_s2 + $0x58] sm:$0xff]  ;;  %v130_v52 = vld [vmem:[%s10525_s2 + $0x60] sm:$0xff] }
  0x19   :  { %6526 = vmatpush3.bf16.msra.mxu1 %v6918_v35  ;;  %v133_v53 = vld [vmem:[%s10525_s2 + $0x78] sm:$0xff]  ;;  %v134_v62 = vld [vmem:[%s10529_s26] sm:$0x3] }
  0x1a   :  { %6876 = vset.pattern.permute.xlu1 %v7793_v1  ;;  %6527 = vmatprep.subr.bf16.mxu1 %v6919_v36  ;;  %v8107_v3 = vrot.slane %v134_v62, %v8099_v60  ;;  %v8112_v4 = vrot.slane %v134_v62, %v8104_v63  ;;  %v6923_v5 = vld [vmem:[%s10531_s10] sm:$0xff]  }
  0x1b   :  { %495 = vmatpush1.bf16.msra.mxu0 %v6905_v16  ;;  %248 = vperm.xlu1 %6876, %v121_v13   ;;  %v8125_v13 = vld [vmem:[%s10532_s5] ss:$0 sm:$0xff] }
  0x1c   :  { %496 = vmatprep.subr.bf16.mxu0 %v6906_v17  ;;  %6884 = vset.pattern.permute.xlu0 %v10492_v2 }
  0x1d   :  { %137 = vperm.xlu0 %6884, %v118_v7   ;;  %6528 = vmatpush3.bf16.msra.mxu1 %v6919_v36 }
  0x1e   :  { %6529 = vmatprep.subr.bf16.mxu1 %v6920_v38 }
  0x1f   :  { %497 = vmatpush1.bf16.msra.mxu0 %v6908_v18  ;;  %6877 = vset.pattern.permute.xlu1 %v10492_v2 }
  0x20   :  { %498 = vmatprep.subr.bf16.mxu0 %v6909_v19  ;;  %157 = vperm.xlu1 %6877, %v122_v22  }
  0x21   :  { %142 = vperm.xlu0 %6884, %v119_v9   ;;  %6530 = vmatpush3.bf16.msra.mxu1 %v6920_v38 }
  0x22   :  { %6531 = vmatprep.subr.bf16.mxu1 %v6921_v44 }
  0x23   :  { %499 = vmatpush1.bf16.msra.mxu0 %v6911_v23 }
  0x24   :  { %500 = vmatprep.subr.bf16.mxu0 %v6912_v24  ;;  %6878 = vset.pattern.permute.xlu1 %v7793_v1 }
  0x25   :  { %252 = vperm.xlu1 %6878, %v122_v22   ;;  %147 = vperm.xlu0 %6884, %v120_v14  }
  0x26   :  { %6532 = vmatpush3.bf16.msra.mxu1 %v6921_v44 }
  0x27   :  { %501 = vmatpush1.bf16.msra.mxu0 %v6914_v26  ;;  %6533 = vmatprep.subr.bf16.mxu1 %v6922_v45 }
  0x29   :  { %256 = vperm.xlu1 %6878, %v123_v30   ;;  %162 = vperm.xlu0 %6884, %v123_v30  }
  0x2a   :  { %519 = vmatmul.mubr.bf16.vlgmr.msra.gmra.mrb[0].mxu0 %v366_v31  ;;  %6534 = vmatpush3.bf16.msra.mxu1 %v6922_v45 }
  0x2b   :  { %528 = vmatprep.mubr.bf16.mxu0 %v10492_v2 }
  0x2d   :  { %6879 = vset.pattern.permute.xlu1 %v10492_v2  ;;  %167 = vperm.xlu0 %6884, %v7971_v15  }
  0x2e   :  { %172 = vperm.xlu1 %6879, %v125_v34  }
  0x31   :  { %182 = vperm.xlu0 %6884, %v127_v42  }
  0x32   :  { %529 = vmatmul.mubr.bf16.gmra.mrb[4].mxu0 %v367_v37  ;;  %6880 = vset.pattern.permute.xlu1 %v7793_v1 }
  0x33   :  { %538 = vmatprep.mubr.bf16.mxu0 %v10492_v2  ;;  %264 = vperm.xlu1 %6880, %v125_v34  }
  0x35   :  { %187 = vperm.xlu0 %6884, %v7989_v20  }
  0x37   :  { %6881 = vset.pattern.permute.xlu1 %v10492_v2 }
  0x38   :  { %177 = vperm.xlu1 %6881, %v126_v41  }
  0x39   :  { %202 = vperm.xlu0 %6884, %v131_v48  }
  0x3a   :  { %539 = vmatmul.mubr.bf16.gmra.mrb[8].mxu0 %v368_v43 }
  0x3b   :  { %548 = vmatprep.mubr.bf16.mxu0 %v10492_v2 }
  0x3c   :  { %6882 = vset.pattern.permute.xlu1 %v7793_v1 }
  0x3d   :  { %268 = vperm.xlu1 %6882, %v126_v41   ;;  %207 = vperm.xlu0 %6884, %v132_v50  }
  0x41   :  { %272 = vperm.xlu1 %6882, %v127_v42   ;;  %6889 = vset.pattern.permute.xlu0 %v7793_v1 }
  0x42   :  { %549 = vmatmul.mubr.bf16.gmra.mrb[12].mxu0 %v369_v49  ;;  %292 = vperm.xlu0 %6889, %v132_v50  }
  0x43   :  { %6559 = vmatprep.mubr.msk.bf16.mxu0 %vm771_vm0, %v6923_v5 }
  0x45   :  { %6883 = vset.pattern.permute.xlu1 %v10492_v2 }
  0x46   :  { %192 = vperm.xlu1 %6883, %v129_v51  }
  0x4a   :  { %6885 = vset.pattern.permute.xlu1 %v7793_v1 }
  0x4b   :  { %280 = vperm.xlu1 %6885, %v129_v51  }
  0x4f   :  { %6886 = vset.pattern.permute.xlu1 %v10492_v2 }
  0x50   :  { %197 = vperm.xlu1 %6886, %v130_v52  }
  0x54   :  { %6887 = vset.pattern.permute.xlu1 %v7793_v1 }
  0x55   :  { %284 = vperm.xlu1 %6887, %v130_v52  }
  0x59   :  { %288 = vperm.xlu1 %6887, %v131_v48  }
  0x5d   :  { %6888 = vset.pattern.permute.xlu1 %v10492_v2 }
  0x5e   :  { %212 = vperm.xlu1 %6888, %v133_v53  }
  0x62   :  { %6890 = vset.pattern.permute.xlu1 %v7793_v1 }
  0x63   :  { %296 = vperm.xlu1 %6890, %v133_v53  }
  0x8c   :  { %v237_v54 = vpop.permute.xlu1 %236 }
  0x8d   :  { %v303_v6 = vmul.f32 %v8107_v3, %v237_v54 }
  0x8e   :  { %v245_v58 = vpop.permute.xlu0 %244 }
  0x8f   :  { %v305_v20 = vmul.f32 %v8107_v3, %v245_v58 }
  0x90   :  { %v241_v56 = vpop.permute.xlu1 %240 }
  0x91   :  { %v304_v10 = vmul.f32 %v8107_v3, %v241_v56 }
  0x92   :  { %v261_v61 = vpop.permute.xlu0 %260 }
  0x93   :  { %v309_v40 = vmul.f32 %v8107_v3, %v261_v61 }
  0x95   :  { %v153_v59 = vpop.permute.xlu1 %152 }
  0x96   :  { %v8109_v1 = vpop.permute.xlu0 %276  ;;  %v222_v12 = vmul.f32 %v8112_v4, %v153_v59 }
  0x9a   :  { %v249_v0 = vpop.permute.xlu1 %248 }
  0x9b   :  { %v306_v14 = vmul.f32 %v8107_v3, %v249_v0 }
  0x9c   :  { %v138_v8 = vpop.permute.xlu0 %137 }
  0x9d   :  { %v219_v9 = vmul.f32 %v8112_v4, %v138_v8  ;;  %v322_v21 = vadd.f32 %v306_v14, %v222_v12 }
  0x9f   :  { %v158_v7 = vpop.permute.xlu1 %157  ;;  %v319_v11 = vadd.f32 %v303_v6, %v219_v9  ;;  %v8142_v29 = vadd.f32 %v8125_v13, %v322_v21 }
  0xa0   :  { %v143_v16 = vpop.permute.xlu0 %142  ;;  %v223_v22 = vmul.f32 %v8112_v4, %v158_v7  ;;  %v313_v7 = vmul.f32 %v8107_v3, %v8109_v1 }
  0xa1   :  { %v220_v17 = vmul.f32 %v8112_v4, %v143_v16  ;;  %v8130_v19 = vadd.f32 %v8125_v13, %v319_v11 }
  0xa3   :  { %v320_v18 = vadd.f32 %v304_v10, %v220_v17 }
  0xa4   :  { %v253_v15 = vpop.permute.xlu1 %252  ;;  %v148_v25 = vpop.permute.xlu0 %147 }
  0xa5   :  { %v307_v23 = vmul.f32 %v8107_v3, %v253_v15  ;;  %v8136_v26 = vadd.f32 %v8125_v13, %v320_v18  ;;  %v221_v27 = vmul.f32 %v8112_v4, %v148_v25 }
  0xa7   :  { %v370_v28 = vpack.c.bf16 %v8136_v26, %v8130_v19  ;;  %v323_v30 = vadd.f32 %v307_v23, %v223_v22  ;;  %v321_v32 = vadd.f32 %v305_v20, %v221_v27 }
  0xa8   :  { %v257_v24 = vpop.permute.xlu1 %256  ;;  %v163_v34 = vpop.permute.xlu0 %162 }
  0xa9   :  { %v308_v31 = vmul.f32 %v8107_v3, %v257_v24  ;;  %6535 = vmatprep.mubr.bf16.mxu1 %v370_v28  ;;  %v8146_v35 = vadd.f32 %v8125_v13, %v321_v32  ;;  %v224_v36 = vmul.f32 %v8112_v4, %v163_v34  ;;  %v8150_v37 = vadd.f32 %v8125_v13, %v323_v30 }
  0xab   :  { %v371_v38 = vpack.c.bf16 %v8142_v29, %v8146_v35  ;;  %v324_v39 = vadd.f32 %v308_v31, %v224_v36 }
  0xac   :  { %v168_v44 = vpop.permute.xlu0 %167 }
  0xad   :  { %v173_v33 = vpop.permute.xlu1 %172  ;;  %6536 = vmatmul.mubr.bf16.vlgmr.msra.gmra.mrb[0].mxu1 %v371_v38  ;;  %v8157_v43 = vadd.f32 %v8125_v13, %v324_v39  ;;  %v225_v46 = vmul.f32 %v8112_v4, %v168_v44 }
  0xae   :  { %v226_v41 = vmul.f32 %v8112_v4, %v173_v33 }
  0xaf   :  { %v372_v47 = vpack.c.bf16 %v8157_v43, %v8150_v37  ;;  %v325_v49 = vadd.f32 %v309_v40, %v225_v46 }
  0xb0   :  { %v183_v56 = vpop.permute.xlu0 %182 }
  0xb1   :  { %6539 = vmatprep.mubr.bf16.mxu1 %v372_v47  ;;  %v8167_v52 = vadd.f32 %v8125_v13, %v325_v49  ;;  %v228_v59 = vmul.f32 %v8112_v4, %v183_v56 }
  0xb2   :  { %v265_v42 = vpop.permute.xlu1 %264 }
  0xb3   :  { %v310_v45 = vmul.f32 %v8107_v3, %v265_v42 }
  0xb4   :  { %v188_v0 = vpop.permute.xlu0 %187 }
  0xb5   :  { %v326_v48 = vadd.f32 %v310_v45, %v226_v41  ;;  %v229_v10 = vmul.f32 %v8112_v4, %v188_v0 }
  0xb7   :  { %v8164_v50 = vadd.f32 %v8125_v13, %v326_v48  ;;  %v178_v51 = vpop.permute.xlu1 %177  ;;  %v329_v14 = vadd.f32 %v313_v7, %v229_v10 }
  0xb8   :  { %v227_v54 = vmul.f32 %v8112_v4, %v178_v51  ;;  %v203_v1 = vpop.permute.xlu0 %202 }
  0xb9   :  { %v373_v53 = vpack.c.bf16 %v8164_v50, %v8167_v52  ;;  %v8189_v18 = vadd.f32 %v8125_v13, %v329_v14  ;;  %v232_v30 = vmul.f32 %v8112_v4, %v203_v1 }
  0xbb   :  { %6540 = vmatmul.mubr.bf16.gmra.mrb[4].mxu1 %v373_v53 }
  0xbc   :  { %v269_v55 = vpop.permute.xlu1 %268  ;;  %v208_v25 = vpop.permute.xlu0 %207 }
  0xbd   :  { %v311_v57 = vmul.f32 %v8107_v3, %v269_v55  ;;  %v233_v39 = vmul.f32 %v8112_v4, %v208_v25 }
  0xbf   :  { %v327_v58 = vadd.f32 %v311_v57, %v227_v54 }
  0xc0   :  { %v273_v61 = vpop.permute.xlu1 %272 }
  0xc1   :  { %v312_v62 = vmul.f32 %v8107_v3, %v273_v61  ;;  %v8176_v5 = vadd.f32 %v8125_v13, %v327_v58  ;;  %v293_v33 = vpop.permute.xlu0 %292 }
  0xc2   :  { %v317_v41 = vmul.f32 %v8107_v3, %v293_v33 }
  0xc3   :  { %v328_v6 = vadd.f32 %v312_v62, %v228_v59 }
  0xc4   :  { %v333_v45 = vadd.f32 %v317_v41, %v233_v39 }
  0xc5   :  { %v193_v8 = vpop.permute.xlu1 %192  ;;  %v8181_v9 = vadd.f32 %v8125_v13, %v328_v6 }
  0xc6   :  { %v230_v12 = vmul.f32 %v8112_v4, %v193_v8  ;;  %v8213_v48 = vadd.f32 %v8125_v13, %v333_v45  ;;  %v6925_v45 = vld [vmem:[%s10531_s10 + $0x10] sm:$0xff]  }
  0xc7   :  { %v374_v11 = vpack.c.bf16 %v8181_v9, %v8176_v5 }
  0xc8   :  { %10536 = vst [vmem:[#allocation7_spill] sm:$0xff] %v8213_v48 }
  0xc9   :  { %6543 = vmatprep.mubr.bf16.mxu1 %v374_v11 }
  0xca   :  { %v281_v15 = vpop.permute.xlu1 %280 }
  0xcb   :  { %v314_v16 = vmul.f32 %v8107_v3, %v281_v15 }
  0xcd   :  { %v330_v17 = vadd.f32 %v314_v16, %v230_v12 }
  0xcf   :  { %v8192_v20 = vadd.f32 %v8125_v13, %v330_v17  ;;  %v198_v21 = vpop.permute.xlu1 %197 }
  0xd0   :  { %v231_v23 = vmul.f32 %v8112_v4, %v198_v21 }
  0xd1   :  { %10533 = vst [vmem:[#allocation4_spill] sm:$0xff] %v8192_v20  ;;  %v375_v22 = vpack.c.bf16 %v8192_v20, %v8189_v18 }
  0xd3   :  { %6544 = vmatmul.mubr.bf16.gmra.mrb[8].mxu1 %v375_v22 }
  0xd4   :  { %v285_v24 = vpop.permute.xlu1 %284 }
  0xd5   :  { %v315_v27 = vmul.f32 %v8107_v3, %v285_v24 }
  0xd7   :  { %v331_v28 = vadd.f32 %v315_v27, %v231_v23 }
  0xd8   :  { %v289_v31 = vpop.permute.xlu1 %288 }
  0xd9   :  { %v316_v32 = vmul.f32 %v8107_v3, %v289_v31  ;;  %v8201_v34 = vadd.f32 %v8125_v13, %v331_v28 }
  0xdb   :  { %10534 = vst [vmem:[#allocation5_spill] sm:$0xff] %v8201_v34  ;;  %v332_v36 = vadd.f32 %v316_v32, %v232_v30 }
  0xdd   :  { %v8204_v38 = vadd.f32 %v8125_v13, %v332_v36  ;;  %v213_v40 = vpop.permute.xlu1 %212 }
  0xde   :  { %v234_v44 = vmul.f32 %v8112_v4, %v213_v40  ;;  %v394_v4 = vld [vmem:[%s10538_s6] sm:$0x3] }
  0xdf   :  { %10535 = vst [vmem:[#allocation6_spill] sm:$0xff] %v8204_v38  ;;  %v376_v42 = vpack.c.bf16 %v8204_v38, %v8201_v34  ;;  %v399_v54 = vrot.slane %v394_v4, %v8104_v63  ;;  %v403_v55 = vrot.slane %v394_v4, %v8099_v60  ;;  %v6930_v4 = vld [vmem:[%s10531_s10 + $0x38] sm:$0xff]  }
  0xe1   :  { %6547 = vmatprep.mubr.bf16.mxu1 %v376_v42 }
  0xe2   :  { %v297_v46 = vpop.permute.xlu1 %296 }
  0xe3   :  { %v318_v47 = vmul.f32 %v8107_v3, %v297_v46  ;;  %v6926_v46 = vld [vmem:[%s10531_s10 + $0x18] sm:$0xff]  }
  0xe5   :  { %v334_v49 = vadd.f32 %v318_v47, %v234_v44  ;;  %v6924_v44 = vld [vmem:[%s10531_s10 + $0x8] sm:$0xff]   ;;  %v6927_v47 = vld [vmem:[%s10531_s10 + $0x20] sm:$0xff]  }
  0xe7   :  { %v8216_v51 = vadd.f32 %v8125_v13, %v334_v49  ;;  %v6928_v49 = vld [vmem:[%s10531_s10 + $0x28] sm:$0xff]  }
  0xe9   :  { %10537 = vst [vmem:[#allocation8_spill] sm:$0xff] %v8216_v51  ;;  %v377_v53 = vpack.c.bf16 %v8216_v51, %v8213_v48 }
  0xeb   :  { %6548 = vmatmul.mubr.bf16.gmra.mrb[12].mxu1 %v377_v53  ;;  %v6929_v53 = vld [vmem:[%s10531_s10 + $0x30] sm:$0xff]  }
  0xec   :  { %1077 = vmatprep.mubr.bf16.mxu1 %v10492_v2 }
  0xfd   :  { %v520_v3 = vpop.f32.mrb[0].mxu0 }
  0xfe   :  { %v8226_v56 = vadd.f32 %v520_v3, %v399_v54  ;;  %v522_v57 = vpop.f32.mrb[1].mxu0 }
  0xff   :  { %v524_v13 = vpop.f32.mrb[2].mxu0  ;;  %v523_v61 = vadd.f32 %v522_v57, %v403_v55 }
 0x100   :  { %v8228_v58 = vadd.f32 %v524_v13, %v399_v54  ;;  %v526_v59 = vpop.f32.mrb[3].mxu0 }
 0x101   :  { %v527_v62 = vadd.f32 %v526_v59, %v403_v55 }
 0x103   :  { %v727_v0 = vpack.c.bf16 %v527_v62, %v523_v61 }
 0x105   :  { %v530_v6 = vpop.f32.mrb[4].mxu0  ;;  %6551 = vmatprep.subr.bf16.mxu0 %v727_v0 }
 0x106   :  { %v8230_v7 = vadd.f32 %v530_v6, %v399_v54  ;;  %v532_v8 = vpop.f32.mrb[5].mxu0  ;;  %6552 = vmatpush3.bf16.msra.mxu0 %v727_v0 }
 0x107   :  { %v534_v10 = vpop.f32.mrb[6].mxu0  ;;  %v533_v14 = vadd.f32 %v532_v8, %v403_v55 }
 0x108   :  { %v8232_v11 = vadd.f32 %v534_v10, %v399_v54  ;;  %v536_v12 = vpop.f32.mrb[7].mxu0 }
 0x109   :  { %v537_v15 = vadd.f32 %v536_v12, %v403_v55 }
 0x10b   :  { %v728_v16 = vpack.c.bf16 %v537_v15, %v533_v14 }
 0x10d   :  { %v540_v17 = vpop.f32.mrb[8].mxu0  ;;  %6553 = vmatprep.subr.bf16.mxu0 %v728_v16 }
 0x10e   :  { %v8234_v1 = vadd.f32 %v540_v17, %v399_v54  ;;  %v542_v21 = vpop.f32.mrb[9].mxu0  ;;  %6554 = vmatpush3.bf16.msra.mxu0 %v728_v16 }
 0x10f   :  { %v544_v22 = vpop.f32.mrb[10].mxu0  ;;  %v543_v25 = vadd.f32 %v542_v21, %v403_v55 }
 0x110   :  { %v8236_v23 = vadd.f32 %v544_v22, %v399_v54  ;;  %v546_v24 = vpop.f32.mrb[11].mxu0 }
 0x111   :  { %v547_v27 = vadd.f32 %v546_v24, %v403_v55 }
 0x113   :  { %v729_v28 = vpack.c.bf16 %v547_v27, %v543_v25 }
 0x115   :  { %v550_v30 = vpop.f32.mrb[12].mxu0  ;;  %6555 = vmatprep.subr.bf16.mxu0 %v729_v28 }
 0x116   :  { %v8238_v31 = vadd.f32 %v550_v30, %v399_v54  ;;  %v552_v32 = vpop.f32.mrb[13].mxu0  ;;  %6556 = vmatpush3.bf16.msra.mxu0 %v729_v28 }
 0x117   :  { %v554_v33 = vpop.f32.mrb[14].mxu0  ;;  %v553_v40 = vadd.f32 %v552_v32, %v403_v55 }
 0x118   :  { %v8240_v36 = vadd.f32 %v554_v33, %v399_v54  ;;  %v556_v39 = vpop.f32.mrb[15].mxu0  ;;  %v5855_v54 = vld [vmem:[%s10539_s3] ss:$0 sm:$0xff] }
 0x119   :  { %v557_v41 = vadd.f32 %v556_v39, %v403_v55 }
 0x11b   :  { %v730_v42 = vpack.c.bf16 %v557_v41, %v553_v40 }
 0x11d   :  { %6557 = vmatprep.subr.bf16.mxu0 %v730_v42 }
 0x11e   :  { %6558 = vmatpush3.bf16.msra.mxu0 %v730_v42 }
 0x121   :  { %6560 = vmatmul.mubr.msk.bf16.vlgmr.msra.gmra.mrb[16].mxu0 %vm771_vm0, %v6924_v44 }
 0x122   :  { %6563 = vmatprep.mubr.msk.bf16.mxu0 %vm771_vm0, %v6925_v45 }
 0x129   :  { %6564 = vmatmul.mubr.msk.bf16.gmra.mrb[20].mxu0 %vm771_vm0, %v6926_v46 }
 0x12a   :  { %6567 = vmatprep.mubr.msk.bf16.mxu0 %vm771_vm0, %v6927_v47 }
 0x131   :  { %6568 = vmatmul.mubr.msk.bf16.gmra.mrb[24].mxu0 %vm771_vm0, %v6928_v49 }
 0x132   :  { %6571 = vmatprep.mubr.msk.bf16.mxu0 %vm771_vm0, %v6929_v53 }
 0x139   :  { %6572 = vmatmul.mubr.msk.bf16.gmra.mrb[28].mxu0 %vm771_vm0, %v6930_v4 }
 0x180   :  { %v6537_v3 = vpop.f32.mrb[0].mxu1 }
 0x181   :  { %v8273_v55 = vadd.f32 %v6537_v3, %v5855_v54  ;;  %v664_v57 = vpop.f32.mrb[1].mxu1 }
 0x182   :  { %v8275_v13 = vadd.f32 %v5855_v54, %v664_v57  ;;  %v6538_v59 = vpop.f32.mrb[2].mxu1 }
 0x183   :  { %v8277_v61 = vadd.f32 %v6538_v59, %v5855_v54  ;;  %v667_v62 = vpop.f32.mrb[3].mxu1 }
 0x184   :  { %v5880_v0 = vmul.f32 -1.442695, %v8275_v13  ;;  %v8280_v6 = vadd.f32 %v5855_v54, %v667_v62 }
 0x186   :  { %7175 = vpow2.f32 %v5880_v0  ;;  %v5881_v8 = vmul.f32 -1.442695, %v8280_v6 }
 0x188   :  { %7177 = vpow2.f32 %v5881_v8  ;;  %v5882_v8 = vmul.f32 -1.442695, %v8273_v55 }
 0x18e   :  { %v6541_v10 = vpop.f32.mrb[4].mxu1 }
 0x18f   :  { %v8283_v12 = vadd.f32 %v6541_v10, %v5855_v54  ;;  %v680_v14 = vpop.f32.mrb[5].mxu1  ;;  %v5883_v10 = vmul.f32 -1.442695, %v8277_v61 }
 0x190   :  { %v8285_v15 = vadd.f32 %v5855_v54, %v680_v14  ;;  %v6542_v16 = vpop.f32.mrb[6].mxu1  ;;  %v7176_v24 = vpop.eup %7175 }
 0x191   :  { %v8287_v17 = vadd.f32 %v6542_v16, %v5855_v54  ;;  %v683_v21 = vpop.f32.mrb[7].mxu1  ;;  %v941_v25 = vadd.f32 1.0, %v7176_v24  ;;  %v5886_v14 = vmul.f32 -1.442695, %v8283_v12 }
 0x192   :  { %v8289_v22 = vadd.f32 %v5855_v54, %v683_v21  ;;  %v7178_v27 = vpop.eup %7177  ;;  %v5884_v16 = vmul.f32 -1.442695, %v8285_v15 }
 0x193   :  { %7179 = vrcp.f32 %v941_v25  ;;  %v942_v28 = vadd.f32 1.0, %v7178_v27  ;;  %v5887_v24 = vmul.f32 -1.442695, %v8287_v17 }
 0x194   :  { %v5885_v21 = vmul.f32 -1.442695, %v8289_v22 }
 0x195   :  { %7181 = vrcp.f32 %v942_v28 }
 0x196   :  { %7183 = vpow2.f32 %v5882_v8 }
 0x197   :  { %7185 = vpow2.f32 %v5883_v10 }
 0x198   :  { %7187 = vpow2.f32 %v5886_v14 }
 0x199   :  { %7189 = vpow2.f32 %v5884_v16 }
 0x19a   :  { %7191 = vpow2.f32 %v5885_v21 }
 0x19b   :  { %7193 = vpow2.f32 %v5887_v24 }
 0x19d   :  { %v8291_v30 = vpop.eup %7179 }
 0x19f   :  { %v8293_v32 = vpop.eup %7181 }
 0x1a0   :  { %v1006_v33 = vpack.c.bf16 %v8293_v32, %v8291_v30  ;;  %v7184_v25 = vpop.eup %7183 }
 0x1a1   :  { %v7186_v28 = vpop.eup %7185 }
 0x1a2   :  { %1045 = vmatprep.subr.bf16.mxu1 %v1006_v33 }
 0x1a6   :  { %v6545_v39 = vpop.f32.mrb[8].mxu1 }
 0x1a7   :  { %v8297_v40 = vadd.f32 %v6545_v39, %v5855_v54  ;;  %v696_v41 = vpop.f32.mrb[9].mxu1  ;;  %v7188_v39 = vpop.eup %7187 }
 0x1a8   :  { %v8299_v42 = vadd.f32 %v5855_v54, %v696_v41  ;;  %v6546_v44 = vpop.f32.mrb[10].mxu1 }
 0x1a9   :  { %v8301_v45 = vadd.f32 %v6546_v44, %v5855_v54  ;;  %v699_v46 = vpop.f32.mrb[11].mxu1  ;;  %v5890_v41 = vmul.f32 -1.442695, %v8297_v40  ;;  %v7190_v44 = vpop.eup %7189 }
 0x1aa   :  { %v8303_v47 = vadd.f32 %v5855_v54, %v699_v46  ;;  %v5888_v27 = vmul.f32 -1.442695, %v8299_v42 }
 0x1ab   :  { %v5891_v46 = vmul.f32 -1.442695, %v8301_v45 }
 0x1ac   :  { %v5889_v33 = vmul.f32 -1.442695, %v8303_v47 }
 0x1be   :  { %v6549_v49 = vpop.f32.mrb[12].mxu1 }
 0x1bf   :  { %v8305_v53 = vadd.f32 %v6549_v49, %v5855_v54  ;;  %v712_v4 = vpop.f32.mrb[13].mxu1  ;;  %v7192_v49 = vpop.eup %7191 }
 0x1c0   :  { %v8307_v3 = vadd.f32 %v5855_v54, %v712_v4  ;;  %v6550_v57 = vpop.f32.mrb[14].mxu1  ;;  %v944_v4 = vadd.f32 1.0, %v7186_v28  ;;  %v946_v8 = vadd.f32 1.0, %v7192_v49  ;;  %v7194_v14 = vpop.eup %7193 }
 0x1c1   :  { %v8309_v59 = vadd.f32 %v6550_v57, %v5855_v54  ;;  %v715_v62 = vpop.f32.mrb[15].mxu1  ;;  %v947_v57 = vadd.f32 1.0, %v7188_v39  ;;  %v5894_v21 = vmul.f32 -1.442695, %v8305_v53 }
 0x1c2   :  { %v8311_v0 = vadd.f32 %v5855_v54, %v715_v62  ;;  %v943_v54 = vadd.f32 1.0, %v7184_v25  ;;  %v945_v62 = vadd.f32 1.0, %v7190_v44  ;;  %v5892_v10 = vmul.f32 -1.442695, %v8307_v3 }
 0x1c3   :  { %v5895_v24 = vmul.f32 -1.442695, %v8309_v59  ;;  %v948_v25 = vadd.f32 1.0, %v7194_v14 }
 0x1c4   :  { %7195 = vrcp.f32 %v943_v54  ;;  %v5893_v16 = vmul.f32 -1.442695, %v8311_v0 }
 0x1c5   :  { %7197 = vpow2.f32 %v5888_v27 }
 0x1c6   :  { %7199 = vpow2.f32 %v5889_v33 }
 0x1c7   :  { %7201 = vpow2.f32 %v5890_v41 }
 0x1c8   :  { %7203 = vpow2.f32 %v5891_v46 }
 0x1c9   :  { %7205 = vrcp.f32 %v944_v4 }
 0x1ca   :  { %7207 = vrcp.f32 %v947_v57 }
 0x1cb   :  { %7209 = vrcp.f32 %v945_v62 }
 0x1cc   :  { %7211 = vrcp.f32 %v946_v8 }
 0x1cd   :  { %7213 = vpow2.f32 %v5892_v10 }
 0x1ce   :  { %v7196_v54 = vpop.eup %7195  ;;  %7215 = vpow2.f32 %v5893_v16 }
 0x1cf   :  { %v7198_v27 = vpop.eup %7197  ;;  %7217 = vpow2.f32 %v5894_v21 }
 0x1d0   :  { %v7200_v28 = vpop.eup %7199  ;;  %7219 = vpow2.f32 %v5895_v24  ;;  %v949_v44 = vadd.f32 1.0, %v7198_v27 }
 0x1d1   :  { %v7202_v33 = vpop.eup %7201  ;;  %7221 = vrcp.f32 %v948_v25  ;;  %v950_v4 = vadd.f32 1.0, %v7200_v28 }
 0x1d2   :  { %v7204_v41 = vpop.eup %7203  ;;  %v951_v8 = vadd.f32 1.0, %v7202_v33  ;;  %7223 = vrcp.f32 %v949_v44 }
 0x1d3   :  { %v7206_v49 = vpop.eup %7205  ;;  %v952_v16 = vadd.f32 1.0, %v7204_v41  ;;  %7225 = vrcp.f32 %v950_v4 }
 0x1d4   :  { %v7208_v62 = vpop.eup %7207  ;;  %7227 = vrcp.f32 %v951_v8  ;;  %v1008_v28 = vpack.c.bf16 %v7206_v49, %v7196_v54 }
 0x1d5   :  { %v7210_v51 = vpop.eup %7209  ;;  %7229 = vrcp.f32 %v952_v16 }
 0x1d6   :  { %v7212_v48 = vpop.eup %7211 }
 0x1d7   :  { %v7214_v38 = vpop.eup %7213  ;;  %v1010_v4 = vpack.c.bf16 %v7212_v48, %v7210_v51 }
 0x1d8   :  { %v7216_v34 = vpop.eup %7215 }
 0x1d9   :  { %v7218_v20 = vpop.eup %7217 }
 0x1f4   :  { %v6561_v39 = vpop.f32.mrb[16].mxu0 }
 0x1f5   :  { %v830_v46 = vpop.f32.mrb[17].mxu0  ;;  %v991_v2 = vmul.f32 %v7196_v54, %v6561_v39  ;;  %v7220_v39 = vpop.eup %7219 }
 0x1f6   :  { %v6562_v57 = vpop.f32.mrb[18].mxu0  ;;  %v989_v21 = vmul.f32 %v8291_v30, %v830_v46  ;;  %v7222_v30 = vpop.eup %7221  ;;  %v954_v46 = vadd.f32 1.0, %v7216_v34 }
 0x1f7   :  { %v992_v14 = vmul.f32 %v7206_v49, %v6562_v57  ;;  %v833_v10 = vpop.f32.mrb[19].mxu0  ;;  %v953_v57 = vadd.f32 1.0, %v7214_v38  ;;  %v7224_v38 = vpop.eup %7223  ;;  %v1012_v16 = vpack.c.bf16 %v7222_v30, %v7208_v62 }
 0x1f8   :  { %v990_v24 = vmul.f32 %v8293_v32, %v833_v10  ;;  %v955_v10 = vadd.f32 1.0, %v7218_v20 }
 0x1f9   :  { %v1007_v25 = vpack.c.bf16 %v992_v14, %v991_v2  ;;  %7231 = vrcp.f32 %v953_v57 }
 0x1fa   :  { %v1005_v27 = vpack.c.bf16 %v990_v24, %v989_v21  ;;  %v956_v21 = vadd.f32 1.0, %v7220_v39  ;;  %7233 = vrcp.f32 %v954_v46 }
 0x1fb   :  { %7235 = vrcp.f32 %v955_v10 }
 0x1fc   :  { %v6565_v33 = vpop.f32.mrb[20].mxu0  ;;  %1046 = vmatpush1.bf16.msra.mxu1 %v1005_v27  ;;  %v7226_v27 = vpop.eup %7225  ;;  %7237 = vrcp.f32 %v956_v21 }
 0x1fd   :  { %v846_v41 = vpop.f32.mrb[21].mxu0  ;;  %1047 = vmatprep.subr.bf16.mxu1 %v1008_v28  ;;  %v995_v44 = vmul.f32 %v7208_v62, %v6565_v33  ;;  %v7228_v20 = vpop.eup %7227  ;;  %v1014_v57 = vpack.c.bf16 %v7226_v27, %v7224_v38 }
 0x1fe   :  { %v6566_v32 = vpop.f32.mrb[22].mxu0  ;;  %v993_v24 = vmul.f32 %v7210_v51, %v846_v41  ;;  %v7230_v33 = vpop.eup %7229 }
 0x1ff   :  { %v996_v2 = vmul.f32 %v7222_v30, %v6566_v32  ;;  %v849_v14 = vpop.f32.mrb[23].mxu0  ;;  %v1016_v30 = vpack.c.bf16 %v7230_v33, %v7228_v20 }
 0x200   :  { %v994_v8 = vmul.f32 %v7212_v48, %v849_v14  ;;  %1048 = vmatpush1.bf16.msra.mxu1 %v1007_v25 }
 0x201   :  { %v1011_v54 = vpack.c.bf16 %v996_v2, %v995_v44  ;;  %1049 = vmatprep.subr.bf16.mxu1 %v1010_v4 }
 0x202   :  { %v1009_v49 = vpack.c.bf16 %v994_v8, %v993_v24 }
 0x203   :  { %v7232_v62 = vpop.eup %7231 }
 0x204   :  { %v6569_v34 = vpop.f32.mrb[24].mxu0  ;;  %1050 = vmatpush1.bf16.msra.mxu1 %v1009_v49  ;;  %v7234_v44 = vpop.eup %7233 }
 0x205   :  { %v862_v28 = vpop.f32.mrb[25].mxu0  ;;  %1051 = vmatprep.subr.bf16.mxu1 %v1012_v16  ;;  %v999_v51 = vmul.f32 %v7228_v20, %v6569_v34  ;;  %v7236_v14 = vpop.eup %7235  ;;  %v1018_v34 = vpack.c.bf16 %v7234_v44, %v7232_v62  ;;  %v6931_v20 = vld [vmem:[%s10540_s7] sm:$0xff]  }
 0x206   :  { %v6570_v39 = vpop.f32.mrb[26].mxu0  ;;  %v997_v41 = vmul.f32 %v7224_v38, %v862_v28  ;;  %v7238_v21 = vpop.eup %7237 }
 0x207   :  { %v1000_v48 = vmul.f32 %v7230_v33, %v6570_v39  ;;  %v865_v25 = vpop.f32.mrb[27].mxu0  ;;  %v1020_v39 = vpack.c.bf16 %v7238_v21, %v7236_v14  ;;  %v10541_v33 = vmov 0  }
 0x208   :  { %v998_v32 = vmul.f32 %v7226_v27, %v865_v25  ;;  %1052 = vmatpush1.bf16.msra.mxu1 %v1011_v54  ;;  %v6934_v25 = vld [vmem:[%s10540_s7 + $0x18] sm:$0xff]  }
 0x209   :  { %v1015_v46 = vpack.c.bf16 %v1000_v48, %v999_v51  ;;  %1053 = vmatprep.subr.bf16.mxu1 %v1014_v57  ;;  %v6932_v51 = vld [vmem:[%s10540_s7 + $0x8] sm:$0xff]   ;;  %v6933_v48 = vld [vmem:[%s10540_s7 + $0x10] sm:$0xff]   ;;  %v6935_v57 = vld [vmem:[%s10468_s4] sm:$0xff]  }
 0x20a   :  { %v1013_v10 = vpack.c.bf16 %v998_v32, %v997_v41  ;;  %6583 = vmatprep.mubr.msk.bf16.mxu0 %vm771_vm0, %v6935_v57 }
 0x20c   :  { %v6573_v2 = vpop.f32.mrb[28].mxu0  ;;  %1054 = vmatpush1.bf16.msra.mxu1 %v1013_v10 }
 0x20d   :  { %v878_v4 = vpop.f32.mrb[29].mxu0  ;;  %1055 = vmatprep.subr.bf16.mxu1 %v1016_v30  ;;  %v1003_v8 = vmul.f32 %v7236_v14, %v6573_v2 }
 0x20e   :  { %v6574_v24 = vpop.f32.mrb[30].mxu0  ;;  %v1001_v38 = vmul.f32 %v7232_v62, %v878_v4 }
 0x20f   :  { %v1004_v49 = vmul.f32 %v7238_v21, %v6574_v24  ;;  %v881_v16 = vpop.f32.mrb[31].mxu0 }
 0x210   :  { %v1002_v27 = vmul.f32 %v7234_v44, %v881_v16  ;;  %1056 = vmatpush1.bf16.msra.mxu1 %v1015_v46  ;;  %v6967_v16 = vld [vmem:[%s10469_s11] ss:$8 sps:$4 sm:$0xff]  }
 0x211   :  { %v1019_v54 = vpack.c.bf16 %v1004_v49, %v1003_v8  ;;  %1057 = vmatprep.subr.bf16.mxu1 %v1018_v34 }
 0x212   :  { %v1017_v28 = vpack.c.bf16 %v1002_v27, %v1001_v38  ;;  %v6969_v27 = vld [vmem:[%s10469_s11 + $0x4] ss:$8 sps:$4 sm:$0xff]  }
 0x214   :  { %1058 = vmatpush1.bf16.msra.mxu1 %v1017_v28 }
 0x215   :  { %1059 = vmatprep.subr.bf16.mxu1 %v1020_v39 }
 0x218   :  { %1060 = vmatpush1.bf16.msra.mxu1 %v1019_v54 }
 0x219   :  { %1551 = vmatprep.subr.bf16.mxu1 %v6969_v27 }
 0x21b   :  { %1078 = vmatmul.mubr.bf16.vlgmr.msra.gmra.mrb[16].mxu1 %v6931_v20  ;;  %v6972_v20 = vld [vmem:[%s10469_s11 + $0x14] ss:$8 sps:$4 sm:$0xff]  }
 0x21c   :  { %1087 = vmatprep.mubr.bf16.mxu1 %v10541_v33  ;;  %1552 = vmatpush1.bf16.msra.mxu1 %v6967_v16 }
 0x21d   :  { %1553 = vmatprep.subr.bf16.mxu1 %v6972_v20 }
 0x223   :  { %1088 = vmatmul.mubr.bf16.gmra.mrb[20].mxu1 %v6932_v51 }
 0x224   :  { %1097 = vmatprep.mubr.bf16.mxu1 %v10541_v33 }
 0x22b   :  { %1098 = vmatmul.mubr.bf16.gmra.mrb[24].mxu1 %v6933_v48 }
 0x22c   :  { %1107 = vmatprep.mubr.bf16.mxu1 %v10541_v33 }
 0x233   :  { %1108 = vmatmul.mubr.bf16.gmra.mrb[28].mxu1 %v6934_v25 }
 0x2ee   :  { %v1079_v41 = vpop.f32.mrb[16].mxu1 }
 0x2ef   :  { %v1081_v32 = vpop.f32.mrb[17].mxu1 }
 0x2f0   :  { %v1118_v46 = vadd.f32 1e-06, %v1081_v32  ;;  %v1083_v10 = vpop.f32.mrb[18].mxu1 }
 0x2f1   :  { %v1085_v62 = vpop.f32.mrb[19].mxu1 }
 0x2f2   :  { %7239 = vrcp.f32 %v1118_v46  ;;  %v1119_v30 = vadd.f32 1e-06, %v1085_v62 }
 0x2f4   :  { %7241 = vrcp.f32 %v1119_v30  ;;  %v6973_v30 = vld [vmem:[%s10469_s11 + $0x20] ss:$8 sps:$4 sm:$0xff]  }
 0x2f6   :  { %v1089_v44 = vpop.f32.mrb[20].mxu1 }
 0x2f7   :  { %v1091_v2 = vpop.f32.mrb[21].mxu1 }
 0x2f8   :  { %v1120_v14 = vadd.f32 1e-06, %v1091_v2  ;;  %v1093_v4 = vpop.f32.mrb[22].mxu1 }
 0x2f9   :  { %v1095_v21 = vpop.f32.mrb[23].mxu1 }
 0x2fa   :  { %7243 = vrcp.f32 %v1120_v14  ;;  %v1121_v24 = vadd.f32 1e-06, %v1095_v21  ;;  %v6978_v21 = vld [vmem:[%s10469_s11 + $0x34] ss:$8 sps:$4 sm:$0xff]  }
 0x2fc   :  { %v7240_v8 = vpop.eup %7239  ;;  %7245 = vrcp.f32 %v1121_v24 }
 0x2fd   :  { %v1134_v49 = vmul.f32 %v7240_v8, %v1079_v41  ;;  %v6970_v41 = vld [vmem:[%s10469_s11 + $0x10] ss:$8 sps:$4 sm:$0xff]  }
 0x2fe   :  { %v7242_v34 = vpop.eup %7241  ;;  %v1099_v38 = vpop.f32.mrb[24].mxu1  ;;  %1554 = vmatpush1.bf16.msra.mxu1 %v6970_v41  ;;  %v6979_v41 = vld [vmem:[%s10469_s11 + $0x40] ss:$8 sps:$4 sm:$0xff]  }
 0x2ff   :  { %v1101_v54 = vpop.f32.mrb[25].mxu1  ;;  %v1135_v28 = vmul.f32 %v7242_v34, %v1083_v10  ;;  %v8355_v39 = vadd.f32 %v1134_v49, %v8226_v56  ;;  %v6975_v56 = vld [vmem:[%s10469_s11 + $0x24] ss:$8 sps:$4 sm:$0xff]  }
 0x300   :  { %v1122_v51 = vadd.f32 1e-06, %v1101_v54  ;;  %v1103_v48 = vpop.f32.mrb[26].mxu1  ;;  %1555 = vmatprep.subr.bf16.mxu1 %v6975_v56  ;;  %v6984_v56 = vld [vmem:[%s10469_s11 + $0x54] ss:$8 sps:$4 sm:$0xff]  }
 0x301   :  { %v1105_v25 = vpop.f32.mrb[27].mxu1  ;;  %v8361_v57 = vadd.f32 %v1135_v28, %v8228_v58  ;;  %v6976_v28 = vld [vmem:[%s10469_s11 + $0x30] ss:$8 sps:$4 sm:$0xff]  }
 0x302   :  { %7247 = vrcp.f32 %v1122_v51  ;;  %v1123_v32 = vadd.f32 1e-06, %v1105_v25  ;;  %1556 = vmatpush1.bf16.msra.mxu1 %v6973_v30 }
 0x303   :  { %v1150_v46 = vpack.c.bf16 %v8361_v57, %v8355_v39  ;;  %v1842_v10 = vadd.f32 %v8361_v57, %v8355_v39  ;;  %1557 = vmatprep.subr.bf16.mxu1 %v6978_v21 }
 0x304   :  { %v7244_v58 = vpop.eup %7243  ;;  %7249 = vrcp.f32 %v1123_v32 }
 0x305   :  { %6575 = vmatprep.subr.bf16.mxu0 %v1150_v46  ;;  %v1136_v62 = vmul.f32 %v7244_v58, %v1089_v44  ;;  %v6987_v58 = vld [vmem:[%s10469_s11 + $0x64] ss:$8 sps:$4 sm:$0xff]  }
 0x306   :  { %v7246_v2 = vpop.eup %7245  ;;  %v1109_v14 = vpop.f32.mrb[28].mxu1  ;;  %6576 = vmatpush3.bf16.msra.mxu0 %v1150_v46  ;;  %1558 = vmatpush1.bf16.msra.mxu1 %v6976_v28  ;;  %v6993_v28 = vld [vmem:[%s10469_s11 + $0x84] ss:$8 sps:$4 sm:$0xff]  }
 0x307   :  { %v1111_v24 = vpop.f32.mrb[29].mxu1  ;;  %v1137_v8 = vmul.f32 %v7246_v2, %v1093_v4  ;;  %v8380_v49 = vadd.f32 %v1136_v62, %v8230_v7  ;;  %v6981_v7 = vld [vmem:[%s10469_s11 + $0x44] ss:$8 sps:$4 sm:$0xff]   ;;  %v6985_v2 = vld [vmem:[%s10469_s11 + $0x60] ss:$8 sps:$4 sm:$0xff]  }
 0x308   :  { %v1124_v16 = vadd.f32 1e-06, %v1111_v24  ;;  %v1113_v44 = vpop.f32.mrb[30].mxu1  ;;  %1559 = vmatprep.subr.bf16.mxu1 %v6981_v7  ;;  %v6990_v24 = vld [vmem:[%s10469_s11 + $0x74] ss:$8 sps:$4 sm:$0xff]  }
 0x309   :  { %v1115_v34 = vpop.f32.mrb[31].mxu1  ;;  %v8383_v27 = vadd.f32 %v1137_v8, %v8232_v11  ;;  %v1843_v54 = vadd.f32 %v1842_v10, %v8380_v49  ;;  %v6943_v7 = vld [vmem:[%s10524_s9 + $0x84] ss:$8 sps:$4 sm:$0xff]  }
 0x30a   :  { %7251 = vrcp.f32 %v1124_v16  ;;  %v1125_v20 = vadd.f32 1e-06, %v1115_v34  ;;  %1560 = vmatpush1.bf16.msra.mxu1 %v6979_v41  ;;  %v6946_v41 = vld [vmem:[%s10524_s9 + $0x94] ss:$8 sps:$4 sm:$0xff]  }
 0x30b   :  { %v1151_v4 = vpack.c.bf16 %v8383_v27, %v8380_v49  ;;  %v1844_v11 = vadd.f32 %v1843_v54, %v8383_v27  ;;  %1561 = vmatprep.subr.bf16.mxu1 %v6984_v56  ;;  %v6988_v54 = vld [vmem:[%s10469_s11 + $0x70] ss:$8 sps:$4 sm:$0xff]  }
 0x30c   :  { %v7248_v51 = vpop.eup %7247  ;;  %7253 = vrcp.f32 %v1125_v20 }
 0x30d   :  { %6577 = vmatprep.subr.bf16.mxu0 %v1151_v4  ;;  %v1138_v25 = vmul.f32 %v7248_v51, %v1099_v38  ;;  %v6982_v38 = vld [vmem:[%s10469_s11 + $0x50] ss:$8 sps:$4 sm:$0xff]   ;;  %v6941_v51 = vld [vmem:[%s10524_s9 + $0x80] ss:$8 sps:$4 sm:$0xff]  }
 0x30e   :  { %v7250_v32 = vpop.eup %7249  ;;  %6578 = vmatpush3.bf16.msra.mxu0 %v1151_v4  ;;  %1562 = vmatpush1.bf16.msra.mxu1 %v6982_v38  ;;  %v6936_v4 = vld [vmem:[%s10468_s4 + $0x8] sm:$0xff]   ;;  %v6944_v38 = vld [vmem:[%s10524_s9 + $0x90] ss:$8 sps:$4 sm:$0xff]  }
 0x30f   :  { %v1139_v46 = vmul.f32 %v7250_v32, %v1103_v48  ;;  %v8402_v10 = vadd.f32 %v1138_v25, %v8234_v1  ;;  %1563 = vmatprep.subr.bf16.mxu1 %v6987_v58  ;;  %v6996_v32 = vld [vmem:[%s10469_s11 + $0x94] ss:$8 sps:$4 sm:$0xff]   ;;  %v6999_v58 = vld [vmem:[%s10469_s11 + $0xa4] ss:$8 sps:$4 sm:$0xff]  }
 0x311   :  { %v8411_v62 = vadd.f32 %v1139_v46, %v8236_v23  ;;  %v1845_v30 = vadd.f32 %v1844_v11, %v8402_v10  ;;  %v6991_v11 = vld [vmem:[%s10469_s11 + $0x80] ss:$8 sps:$4 sm:$0xff]   ;;  %v6994_v46 = vld [vmem:[%s10469_s11 + $0x90] ss:$8 sps:$4 sm:$0xff]  }
 0x312   :  { %1564 = vmatpush1.bf16.msra.mxu1 %v6985_v2  ;;  %v6938_v2 = vld [vmem:[%s10468_s4 + $0x18] sm:$0xff]  }
 0x313   :  { %v1152_v48 = vpack.c.bf16 %v8411_v62, %v8402_v10  ;;  %v1846_v1 = vadd.f32 %v1845_v30, %v8411_v62  ;;  %1565 = vmatprep.subr.bf16.mxu1 %v6990_v24  ;;  %v6939_v24 = vld [vmem:[%s10468_s4 + $0x20] sm:$0xff]  }
 0x314   :  { %v7252_v21 = vpop.eup %7251 }
 0x315   :  { %6579 = vmatprep.subr.bf16.mxu0 %v1152_v48  ;;  %v1140_v23 = vmul.f32 %v7252_v21, %v1109_v14  ;;  %v6997_v21 = vld [vmem:[%s10469_s11 + $0xa0] ss:$8 sps:$4 sm:$0xff]  }
 0x316   :  { %v7254_v8 = vpop.eup %7253  ;;  %6580 = vmatpush3.bf16.msra.mxu0 %v1152_v48  ;;  %1566 = vmatpush1.bf16.msra.mxu1 %v6988_v54  ;;  %v6949_v48 = vld [vmem:[%s10524_s9 + $0xa4] ss:$8 sps:$4 sm:$0xff]   ;;  %v6954_v54 = vld [vmem:[%s10524_s9 + $0xb4] ss:$8 sps:$4 sm:$0xff]  }
 0x317   :  { %v1141_v16 = vmul.f32 %v7254_v8, %v1113_v44  ;;  %v8424_v34 = vadd.f32 %v1140_v23, %v8238_v31  ;;  %1567 = vmatprep.subr.bf16.mxu1 %v6993_v28  ;;  %v6947_v23 = vld [vmem:[%s10524_s9 + $0xa0] ss:$8 sps:$4 sm:$0xff]   ;;  %v7002_v28 = vld [vmem:[%s10469_s11 + $0xb4] ss:$8 sps:$4 sm:$0xff]  }
 0x319   :  { %v1149_v20 = vadd.f32 %v1141_v16, %v8240_v36  ;;  %v1847_v14 = vadd.f32 %v1846_v1, %v8424_v34  ;;  %v6937_v36 = vld [vmem:[%s10468_s4 + $0x10] sm:$0xff]  }
 0x31a   :  { %1568 = vmatpush1.bf16.msra.mxu1 %v6991_v11 }
 0x31b   :  { %v1153_v31 = vpack.c.bf16 %v1149_v20, %v8424_v34  ;;  %v1848_v44 = vadd.f32 %v1847_v14, %v1149_v20  ;;  %1569 = vmatprep.subr.bf16.mxu1 %v6996_v32 }
 0x31d   :  { %6581 = vmatprep.subr.bf16.mxu0 %v1153_v31  ;;  %v1849_v25 = vrot.slane %v1848_v44, 4 }
 0x31e   :  { %6582 = vmatpush3.bf16.msra.mxu0 %v1153_v31  ;;  %1570 = vmatpush1.bf16.msra.mxu1 %v6994_v46  ;;  %v6952_v31 = vld [vmem:[%s10524_s9 + $0xb0] ss:$8 sps:$4 sm:$0xff]  }
 0x31f   :  { %v1850_v56 = vadd.f32 %v1849_v25, %v1848_v44  ;;  %2252 = vmatprep.subr.bf16.mxu0 %v6943_v7  ;;  %1571 = vmatprep.subr.bf16.mxu1 %v6999_v58  ;;  %v7000_v7 = vld [vmem:[%s10469_s11 + $0xb0] ss:$8 sps:$4 sm:$0xff]   ;;  %v7005_v25 = vld [vmem:[%s10469_s11 + $0xc4] ss:$8 sps:$4 sm:$0xff]   ;;  %v7008_v58 = vld [vmem:[%s10469_s11 + $0xd4] ss:$8 sps:$4 sm:$0xff]  }
 0x321   :  { %v1851_v30 = vrot.slane %v1850_v56, 2  ;;  %6584 = vmatmul.mubr.msk.bf16.vlgmr.msra.gmra.mrb[32].mxu0 %vm771_vm0, %v6936_v4 }
 0x322   :  { %6587 = vmatprep.mubr.msk.bf16.mxu0 %vm771_vm0, %v6937_v36  ;;  %2253 = vmatpush1.bf16.msra.mxu0 %v6941_v51  ;;  %v6957_v51 = vld [vmem:[%s10524_s9 + $0xc4] ss:$8 sps:$4 sm:$0xff]  }
 0x323   :  { %v1852_v1 = vadd.f32 %v1851_v30, %v1850_v56  ;;  %2254 = vmatprep.subr.bf16.mxu0 %v6946_v41  ;;  %1572 = vmatpush1.bf16.msra.mxu1 %v6997_v21 }
 0x324   :  { %1573 = vmatprep.subr.bf16.mxu1 %v7002_v28  ;;  %v6961_v28 = vld [vmem:[%s10524_s9 + $0xe0] ss:$8 sps:$4 sm:$0xff]  }
 0x325   :  { %v1853_v8 = vrot.slane %v1852_v1, 1 }
 0x326   :  { %2255 = vmatpush1.bf16.msra.mxu0 %v6944_v38  ;;  %v6960_v38 = vld [vmem:[%s10524_s9 + $0xd4] ss:$8 sps:$4 sm:$0xff]  }
 0x327   :  { %v1854_v16 = vadd.f32 %v1853_v8, %v1852_v1  ;;  %2256 = vmatprep.subr.bf16.mxu0 %v6949_v48  ;;  %1574 = vmatpush1.bf16.msra.mxu1 %v7000_v7  ;;  %v7006_v1 = vld [vmem:[%s10469_s11 + $0xd0] ss:$8 sps:$4 sm:$0xff]  }
 0x328   :  { %1575 = vmatprep.subr.bf16.mxu1 %v7005_v25 }
 0x329   :  { %v1856_v14 = vmul.f32 0.015625, %v1854_v16  ;;  %6588 = vmatmul.mubr.msk.bf16.gmra.mrb[36].mxu0 %vm771_vm0, %v6938_v2  ;;  %v6958_v2 = vld [vmem:[%s10524_s9 + $0xd0] ss:$8 sps:$4 sm:$0xff]  }
 0x32a   :  { %6591 = vmatprep.mubr.msk.bf16.mxu0 %vm771_vm0, %v6939_v24  ;;  %2257 = vmatpush1.bf16.msra.mxu0 %v6947_v23  ;;  %v6963_v23 = vld [vmem:[%s10524_s9 + $0xe4] ss:$8 sps:$4 sm:$0xff]  }
 0x32b   :  { %v8497_v44 = vsub.f32 %v8355_v39, %v1856_v14  ;;  %v8500_v4 = vsub.f32 %v8361_v57, %v1856_v14  ;;  %v8503_v11 = vsub.f32 %v8380_v49, %v1856_v14  ;;  %v8506_v36 = vsub.f32 %v8383_v27, %v1856_v14  ;;  %2258 = vmatprep.subr.bf16.mxu0 %v6954_v54  ;;  %v6951_v54 = vld [vmem:[%s10468_s4 + $0x38] sm:$0xff]  }
 0x32c   :  { %v8515_v39 = vsub.f32 %v8402_v10, %v1856_v14  ;;  %v8518_v57 = vsub.f32 %v8411_v62, %v1856_v14  ;;  %v8521_v49 = vsub.f32 %v8424_v34, %v1856_v14  ;;  %v8523_v27 = vsub.f32 %v1149_v20, %v1856_v14  ;;  %v6940_v10 = vld [vmem:[%s10468_s4 + $0x28] sm:$0xff]   ;;  %v6950_v34 = vld [vmem:[%s10468_s4 + $0x30] sm:$0xff]  }
 0x32d   :  { %v1865_v41 = vmul.f32 %v8497_v44, %v8497_v44  ;;  %v1866_v32 = vmul.f32 %v8500_v4, %v8500_v4  ;;  %v7003_v62 = vld [vmem:[%s10469_s11 + $0xc0] ss:$8 sps:$4 sm:$0xff]   ;;  %v1867_v56 = vmul.f32 %v8503_v11, %v8503_v11  ;;  %v1868_v30 = vmul.f32 %v8506_v36, %v8506_v36 }
 0x32e   :  { %2259 = vmatpush1.bf16.msra.mxu0 %v6952_v31  ;;  %v6955_v20 = vld [vmem:[%s10524_s9 + $0xc0] ss:$8 sps:$4 sm:$0xff]   ;;  %1576 = vmatpush1.bf16.msra.mxu1 %v7003_v62  ;;  %v1869_v21 = vmul.f32 %v8515_v39, %v8515_v39  ;;  %v1870_v8 = vmul.f32 %v8518_v57, %v8518_v57  ;;  %v1871_v14 = vmul.f32 %v8521_v49, %v8521_v49  ;;  %v6966_v31 = vld [vmem:[%s10524_s9 + $0xf4] ss:$8 sps:$4 sm:$0xff]  }
 0x32f   :  { %v1873_v46 = vadd.f32 %v1866_v32, %v1865_v41  ;;  %2260 = vmatprep.subr.bf16.mxu0 %v6957_v51  ;;  %1577 = vmatprep.subr.bf16.mxu1 %v7008_v58  ;;  %v1872_v51 = vmul.f32 %v8523_v27, %v8523_v27  ;;  %v6964_v41 = vld [vmem:[%s10524_s9 + $0xf0] ss:$8 sps:$4 sm:$0xff]  }
 0x331   :  { %v1874_v48 = vadd.f32 %v1873_v46, %v1867_v56  ;;  %6592 = vmatmul.mubr.msk.bf16.gmra.mrb[40].mxu0 %vm771_vm0, %v6940_v10 }
 0x332   :  { %6595 = vmatprep.mubr.msk.bf16.mxu0 %vm771_vm0, %v6950_v34  ;;  %2261 = vmatpush1.bf16.msra.mxu0 %v6955_v20 }
 0x333   :  { %v1875_v24 = vadd.f32 %v1874_v48, %v1868_v30  ;;  %2262 = vmatprep.subr.bf16.mxu0 %v6960_v38  ;;  %1578 = vmatpush1.bf16.msra.mxu1 %v7006_v1  ;;  %v5964_v48 = vld [vmem:[%s10470_s13] ss:$0 sm:$0xff] }
 0x335   :  { %v1876_v16 = vadd.f32 %v1875_v24, %v1869_v21 }
 0x336   :  { %2263 = vmatpush1.bf16.msra.mxu0 %v6958_v2 }
 0x337   :  { %v1877_v7 = vadd.f32 %v1876_v16, %v1870_v8  ;;  %2264 = vmatprep.subr.bf16.mxu0 %v6963_v23  ;;  %v5965_v23 = vld [vmem:[%s10471_s14] ss:$0 sm:$0xff] }
 0x339   :  { %v1878_v25 = vadd.f32 %v1877_v7, %v1871_v14  ;;  %6596 = vmatmul.mubr.msk.bf16.gmra.mrb[44].mxu0 %vm771_vm0, %v6951_v54 }
 0x33a   :  { %2265 = vmatpush1.bf16.msra.mxu0 %v6961_v28  ;;  %2284 = vmatprep.mubr.bf16.mxu0 %v10541_v33 }
 0x33b   :  { %v1879_v32 = vadd.f32 %v1878_v25, %v1872_v51  ;;  %2266 = vmatprep.subr.bf16.mxu0 %v6966_v31 }
 0x33d   :  { %v1880_v10 = vrot.slane %v1879_v32, 4 }
 0x33e   :  { %2267 = vmatpush1.bf16.msra.mxu0 %v6964_v41 }
 0x33f   :  { %v1881_v62 = vadd.f32 %v1880_v10, %v1879_v32 }
 0x341   :  { %v1882_v34 = vrot.slane %v1881_v62, 2 }
 0x343   :  { %v1883_v20 = vadd.f32 %v1882_v34, %v1881_v62 }
 0x345   :  { %v1884_v56 = vrot.slane %v1883_v20, 1 }
 0x347   :  { %v1885_v46 = vadd.f32 %v1884_v56, %v1883_v20  ;;  %v7715_v56 = vld [vmem:[%s10527_s30 + $0x10] sm:$0xff] }
 0x349   :  { %v1886_v38 = vmul.f32 0.015625, %v1885_v46 }
 0x34b   :  { %v1887_v58 = vadd.f32 1e-05, %v1886_v38  ;;  %v7716_v38 = vld [vmem:[%s10527_s30 + $0x18] sm:$0xff] }
 0x34d   :  { %7255 = vrsqrt.f32 %v1887_v58 }
 0x357   :  { %v7256_v30 = vpop.eup %7255 }
 0x358   :  { %v1889_v1 = vmul.f32 %v7256_v30, %v8497_v44  ;;  %v1890_v2 = vmul.f32 %v7256_v30, %v8500_v4  ;;  %v1891_v21 = vmul.f32 %v7256_v30, %v8503_v11  ;;  %v1892_v24 = vmul.f32 %v7256_v30, %v8506_v36 }
 0x359   :  { %v1893_v8 = vmul.f32 %v7256_v30, %v8515_v39  ;;  %v1894_v16 = vmul.f32 %v7256_v30, %v8518_v57  ;;  %v1895_v54 = vmul.f32 %v7256_v30, %v8521_v49  ;;  %v1896_v28 = vmul.f32 %v7256_v30, %v8523_v27  ;;  %v7713_v39 = vld [vmem:[%s10527_s30] sm:$0xff]  ;;  %v7714_v57 = vld [vmem:[%s10527_s30 + $0x8] sm:$0xff] }
 0x35a   :  { %v1903_v14 = vmul.f32 %v5964_v48, %v1889_v1  ;;  %v1904_v44 = vmul.f32 %v5964_v48, %v1890_v2  ;;  %v1905_v7 = vmul.f32 %v5964_v48, %v1891_v21  ;;  %v1906_v4 = vmul.f32 %v5964_v48, %v1892_v24 }
 0x35b   :  { %v1907_v27 = vmul.f32 %v5964_v48, %v1893_v8  ;;  %v1908_v20 = vmul.f32 %v5964_v48, %v1894_v16  ;;  %v1909_v2 = vmul.f32 %v5964_v48, %v1895_v54  ;;  %v1910_v16 = vmul.f32 %v5964_v48, %v1896_v28 }
 0x35c   :  { %v1917_v31 = vadd.f32 %v5965_v23, %v1903_v14  ;;  %v1918_v11 = vadd.f32 %v5965_v23, %v1904_v44  ;;  %v1919_v25 = vadd.f32 %v5965_v23, %v1905_v7  ;;  %v1920_v41 = vadd.f32 %v5965_v23, %v1906_v4  ;;  %v7717_v14 = vld [vmem:[%s10527_s30 + $0x20] sm:$0xff]  ;;  %v7718_v7 = vld [vmem:[%s10527_s30 + $0x28] sm:$0xff] }
 0x35d   :  { %v1921_v30 = vadd.f32 %v5965_v23, %v1907_v27  ;;  %v1922_v1 = vadd.f32 %v5965_v23, %v1908_v20  ;;  %v1923_v4 = vadd.f32 %v5965_v23, %v1909_v2  ;;  %v7012_v27 = vld [vmem:[%s10469_s11 + $0xf0] ss:$8 sps:$4 sm:$0xff]  }
 0x35e   :  { %v1925_v51 = vmax.f32 %v1917_v31, 0.0  ;;  %v1926_v36 = vmax.f32 %v1918_v11, 0.0  ;;  %v1927_v62 = vmax.f32 %v1919_v25, 0.0  ;;  %v1928_v34 = vmax.f32 %v1920_v41, 0.0  ;;  %v7720_v41 = vld [vmem:[%s10527_s30 + $0x38] sm:$0xff]  ;;  %v7017_v20 = vld [vmem:[%s10526_s29 + $0x50] sm:$0xff]  }
 0x35f   :  { %v1929_v24 = vmax.f32 %v1921_v30, 0.0  ;;  %v1930_v8 = vmax.f32 %v1922_v1, 0.0  ;;  %v1924_v31 = vadd.f32 %v5965_v23, %v1910_v16  ;;  %v1931_v28 = vmax.f32 %v1923_v4, 0.0  ;;  %v7719_v23 = vld [vmem:[%s10527_s30 + $0x30] sm:$0xff]  ;;  %v7020_v30 = vld [vmem:[%s10526_s29 + $0x68] sm:$0xff]   ;;  %v7022_v2 = vld [vmem:[%s10526_s29 + $0x78] sm:$0xff]  }
 0x360   :  { %v8601_v32 = vadd.f32 %v7713_v39, %v1925_v51  ;;  %v8606_v49 = vadd.f32 %v7714_v57, %v1926_v36  ;;  %v8614_v46 = vadd.f32 %v7715_v56, %v1927_v62  ;;  %v8619_v58 = vadd.f32 %v7716_v38, %v1928_v34  ;;  %v7011_v51 = vld [vmem:[%s10469_s11 + $0xe4] ss:$8 sps:$4 sm:$0xff]   ;;  %v7009_v36 = vld [vmem:[%s10469_s11 + $0xe0] ss:$8 sps:$4 sm:$0xff]   ;;  %v7014_v57 = vld [vmem:[%s10469_s11 + $0xf4] ss:$8 sps:$4 sm:$0xff]  }
 0x361   :  { %v8627_v44 = vadd.f32 %v7717_v14, %v1929_v24  ;;  %v8632_v54 = vadd.f32 %v7718_v7, %v1930_v8  ;;  %v1932_v11 = vmax.f32 %v1924_v31, 0.0  ;;  %v8646_v25 = vadd.f32 %v7719_v23, %v1931_v28  ;;  %1579 = vmatprep.subr.bf16.mxu1 %v7011_v51  ;;  %v7015_v62 = vld [vmem:[%s10526_s29 + $0x40] sm:$0xff]   ;;  %v7016_v34 = vld [vmem:[%s10526_s29 + $0x48] sm:$0xff]   ;;  %v7018_v56 = vld [vmem:[%s10526_s29 + $0x58] sm:$0xff]   ;;  %s10571_s30 = sld [smem:[#allocation30_spill]] }
 0x362   :  { %10542 = vst [vmem:[#allocation9_spill] sm:$0xff] %v8601_v32  ;;  %10543 = vst [vmem:[#allocation10_spill] sm:$0xff] %v8606_v49  ;;  %v2130_v10 = vpack.c.bf16 %v8606_v49, %v8601_v32  ;;  %v2131_v21 = vpack.c.bf16 %v8619_v58, %v8614_v46  ;;  %1580 = vmatpush1.bf16.msra.mxu1 %v7009_v36  ;;  %6599 = vmatprep.subr.bf16.mxu0 %v7015_v62  ;;  %v7019_v38 = vld [vmem:[%s10526_s29 + $0x60] sm:$0xff]   ;;  %v7021_v1 = vld [vmem:[%s10526_s29 + $0x70] sm:$0xff]  }
 0x363   :  { %10544 = vst [vmem:[#allocation11_spill] sm:$0xff] %v8614_v46  ;;  %10545 = vst [vmem:[#allocation12_spill] sm:$0xff] %v8619_v58  ;;  %v2132_v48 = vpack.c.bf16 %v8632_v54, %v8627_v44  ;;  %v8651_v39 = vadd.f32 %v7720_v41, %v1932_v11  ;;  %1581 = vmatprep.subr.bf16.mxu1 %v7014_v57  ;;  %v1331_v11 = vpack.c.bf16 %v8280_v6, %v8275_v13 }
 0x364   :  { %2285 = vmatmul.mubr.bf16.vlgmr.msra.gmra.mrb[48].mxu0 %v2130_v10  ;;  %10546 = vst [vmem:[#allocation13_spill] sm:$0xff] %v8627_v44  ;;  %10547 = vst [vmem:[#allocation14_spill] sm:$0xff] %v8632_v54 }
 0x365   :  { %2294 = vmatprep.mubr.bf16.mxu0 %v10541_v33  ;;  %10548 = vst [vmem:[#allocation15_spill] sm:$0xff] %v8646_v25  ;;  %10549 = vst [vmem:[#allocation16_spill] sm:$0xff] %v8651_v39  ;;  %v2133_v10 = vpack.c.bf16 %v8651_v39, %v8646_v25  ;;  %6600 = vmatpush3.bf16.msra.mxu0 %v7015_v62 }
 0x366   :  { %1582 = vmatpush1.bf16.msra.mxu1 %v7012_v27  ;;  %6601 = vmatprep.subr.bf16.mxu0 %v7016_v34 }
 0x369   :  { %6602 = vmatpush3.bf16.msra.mxu0 %v7016_v34 }
 0x36a   :  { %6603 = vmatprep.subr.bf16.mxu0 %v7017_v20 }
 0x36c   :  { %2295 = vmatmul.mubr.bf16.gmra.mrb[52].mxu0 %v2131_v21 }
 0x36d   :  { %2304 = vmatprep.mubr.bf16.mxu0 %v10541_v33  ;;  %6604 = vmatpush3.bf16.msra.mxu0 %v7017_v20 }
 0x36e   :  { %6605 = vmatprep.subr.bf16.mxu0 %v7018_v56 }
 0x371   :  { %6606 = vmatpush3.bf16.msra.mxu0 %v7018_v56  ;;  %v1333_v56 = vpack.c.bf16 %v8277_v61, %v8273_v55 }
 0x372   :  { %6607 = vmatprep.subr.bf16.mxu0 %v7019_v38 }
 0x374   :  { %2305 = vmatmul.mubr.bf16.gmra.mrb[56].mxu0 %v2132_v48 }
 0x375   :  { %2314 = vmatprep.mubr.bf16.mxu0 %v10541_v33  ;;  %6608 = vmatpush3.bf16.msra.mxu0 %v7019_v38 }
 0x376   :  { %6609 = vmatprep.subr.bf16.mxu0 %v7020_v30 }
 0x379   :  { %6610 = vmatpush3.bf16.msra.mxu0 %v7020_v30 }
 0x37a   :  { %6611 = vmatprep.subr.bf16.mxu0 %v7021_v1 }
 0x37c   :  { %2315 = vmatmul.mubr.bf16.gmra.mrb[60].mxu0 %v2133_v10 }
 0x37d   :  { %6612 = vmatpush3.bf16.msra.mxu0 %v7021_v1 }
 0x37e   :  { %6613 = vmatprep.subr.bf16.mxu0 %v7022_v2 }
 0x381   :  { %6614 = vmatpush3.bf16.msra.mxu0 %v7022_v2 }
 0x3f4   :  { %v6585_v21 = vpop.f32.mrb[32].mxu0 }
 0x3f5   :  { %v1252_v24 = vpop.f32.mrb[33].mxu0  ;;  %v1317_v16 = vand.u32 2147483647, %v6585_v21 }
 0x3f6   :  { %v6586_v8 = vpop.f32.mrb[34].mxu0  ;;  %v1315_v4 = vand.u32 2147483647, %v1252_v24 }
 0x3f7   :  { %v1318_v14 = vand.u32 2147483647, %v6586_v8  ;;  %v1255_v7 = vpop.f32.mrb[35].mxu0 }
 0x3f8   :  { %v1316_v31 = vand.u32 2147483647, %v1255_v7 }
 0x3f9   :  { %v1334_v48 = vpack.c.bf16 %v1318_v14, %v1317_v16 }
 0x3fa   :  { %v1332_v28 = vpack.c.bf16 %v1316_v31, %v1315_v4  ;;  %v1335_v4 = vpack.c.bf16 %v8289_v22, %v8285_v15 }
 0x3fc   :  { %1583 = vmatprep.mubr.bf16.mxu1 %v1332_v28  ;;  %v6589_v51 = vpop.f32.mrb[36].mxu0 }
 0x3fd   :  { %1584 = vmatmul.mubr.bf16.vlgmr.msra.gmra.mrb[32].mxu1 %v1331_v11  ;;  %v1321_v36 = vand.u32 2147483647, %v6589_v51  ;;  %v1268_v23 = vpop.f32.mrb[37].mxu0 }
 0x3fe   :  { %1593 = vmatprep.mubr.bf16.mxu1 %v1334_v48  ;;  %v1319_v41 = vand.u32 2147483647, %v1268_v23  ;;  %v6590_v57 = vpop.f32.mrb[38].mxu0 }
 0x3ff   :  { %v1322_v27 = vand.u32 2147483647, %v6590_v57  ;;  %v1271_v10 = vpop.f32.mrb[39].mxu0 }
 0x400   :  { %v1320_v62 = vand.u32 2147483647, %v1271_v10  ;;  %v1337_v10 = vpack.c.bf16 %v8287_v17, %v8283_v12 }
 0x401   :  { %v1338_v34 = vpack.c.bf16 %v1322_v27, %v1321_v36 }
 0x402   :  { %v1336_v20 = vpack.c.bf16 %v1320_v62, %v1319_v41  ;;  %v1339_v62 = vpack.c.bf16 %v8303_v47, %v8299_v42 }
 0x404   :  { %v6593_v38 = vpop.f32.mrb[40].mxu0 }
 0x405   :  { %1594 = vmatmul.mubr.bf16.gmra.mrb[36].mxu1 %v1333_v56  ;;  %v1325_v30 = vand.u32 2147483647, %v6593_v38  ;;  %v1284_v1 = vpop.f32.mrb[41].mxu0  ;;  %v5984_v56 = vld [vmem:[%s10538_s6 + $0x2] sm:$0x3]  ;;  %v1345_v38 = vpack.c.bf16 %v8309_v59, %v8305_v53 }
 0x406   :  { %1603 = vmatprep.mubr.bf16.mxu1 %v1336_v20  ;;  %v1323_v2 = vand.u32 2147483647, %v1284_v1  ;;  %v6594_v21 = vpop.f32.mrb[42].mxu0  ;;  %v1343_v20 = vpack.c.bf16 %v8311_v0, %v8307_v3 }
 0x407   :  { %v1326_v24 = vand.u32 2147483647, %v6594_v21  ;;  %v1287_v8 = vpop.f32.mrb[43].mxu0 }
 0x408   :  { %v1324_v16 = vand.u32 2147483647, %v1287_v8 }
 0x409   :  { %v1342_v14 = vpack.c.bf16 %v1326_v24, %v1325_v30  ;;  %v2165_v30 = vrot.slane %v5984_v56, %v8104_v63 }
 0x40a   :  { %v1340_v7 = vpack.c.bf16 %v1324_v16, %v1323_v2  ;;  %v2169_v2 = vrot.slane %v5984_v56, %v8099_v60 }
 0x40c   :  { %v6597_v31 = vpop.f32.mrb[44].mxu0 }
 0x40d   :  { %1604 = vmatmul.mubr.bf16.gmra.mrb[40].mxu1 %v1335_v4  ;;  %v1329_v48 = vand.u32 2147483647, %v6597_v31  ;;  %v1300_v28 = vpop.f32.mrb[45].mxu0 }
 0x40e   :  { %1613 = vmatprep.mubr.bf16.mxu1 %v1338_v34  ;;  %v1327_v11 = vand.u32 2147483647, %v1300_v28  ;;  %v6598_v51 = vpop.f32.mrb[46].mxu0  ;;  %v1341_v34 = vpack.c.bf16 %v8301_v45, %v8297_v40 }
 0x40f   :  { %v1330_v36 = vand.u32 2147483647, %v6598_v51  ;;  %v1303_v23 = vpop.f32.mrb[47].mxu0 }
 0x410   :  { %v1328_v41 = vand.u32 2147483647, %v1303_v23 }
 0x411   :  { %v1346_v57 = vpack.c.bf16 %v1330_v36, %v1329_v48 }
 0x412   :  { %v1344_v27 = vpack.c.bf16 %v1328_v41, %v1327_v11 }
 0x415   :  { %1614 = vmatmul.mubr.bf16.gmra.mrb[44].mxu1 %v1337_v10 }
 0x416   :  { %1623 = vmatprep.mubr.bf16.mxu1 %v1340_v7 }
 0x41d   :  { %1624 = vmatmul.mubr.bf16.gmra.mrb[48].mxu1 %v1339_v62 }
 0x41e   :  { %1633 = vmatprep.mubr.bf16.mxu1 %v1342_v14 }
 0x425   :  { %1634 = vmatmul.mubr.bf16.gmra.mrb[52].mxu1 %v1341_v34 }
 0x426   :  { %1643 = vmatprep.mubr.bf16.mxu1 %v1344_v27 }
 0x42d   :  { %1644 = vmatmul.mubr.bf16.gmra.mrb[56].mxu1 %v1343_v20 }
 0x42e   :  { %1653 = vmatprep.mubr.bf16.mxu1 %v1346_v57 }
 0x435   :  { %1654 = vmatmul.mubr.bf16.gmra.mrb[60].mxu1 %v1345_v38 }
 0x436   :  { %2756 = vmatprep.mubr.bf16.mxu1 %v10541_v33 }
 0x437   :  { %v2286_v1 = vpop.f32.mrb[48].mxu0 }
 0x438   :  { %v8707_v21 = vadd.f32 %v2286_v1, %v2165_v30  ;;  %v2288_v24 = vpop.f32.mrb[49].mxu0 }
 0x439   :  { %v2290_v8 = vpop.f32.mrb[50].mxu0  ;;  %v2289_v7 = vadd.f32 %v2288_v24, %v2169_v2 }
 0x43a   :  { %v8709_v16 = vadd.f32 %v2290_v8, %v2165_v30  ;;  %v2292_v14 = vpop.f32.mrb[51].mxu0 }
 0x43b   :  { %v2293_v4 = vadd.f32 %v2292_v14, %v2169_v2 }
 0x43d   :  { %v8711_v31 = vpack.c.bf16 %v2293_v4, %v2289_v7 }
 0x43f   :  { %v2296_v48 = vpop.f32.mrb[52].mxu0  ;;  %6631 = vmatprep.subr.bf16.mxu0 %v8711_v31 }
 0x440   :  { %v8714_v28 = vadd.f32 %v2296_v48, %v2165_v30  ;;  %v2298_v11 = vpop.f32.mrb[53].mxu0 }
 0x441   :  { %v2299_v51 = vadd.f32 %v2298_v11, %v2169_v2  ;;  %v2300_v36 = vpop.f32.mrb[54].mxu0 }
 0x442   :  { %v8716_v23 = vadd.f32 %v2300_v36, %v2165_v30  ;;  %v2302_v41 = vpop.f32.mrb[55].mxu0 }
 0x443   :  { %v2303_v57 = vadd.f32 %v2302_v41, %v2169_v2 }
 0x445   :  { %v8718_v27 = vpack.c.bf16 %v2303_v57, %v2299_v51 }
 0x447   :  { %v2306_v10 = vpop.f32.mrb[56].mxu0 }
 0x448   :  { %v8720_v62 = vadd.f32 %v2306_v10, %v2165_v30  ;;  %v2308_v34 = vpop.f32.mrb[57].mxu0  ;;  %v1379_v10 = vld [vmem:[%s10472_s12] sm:$0x3] }
 0x449   :  { %v2309_v20 = vadd.f32 %v2308_v34, %v2169_v2  ;;  %v2310_v56 = vpop.f32.mrb[58].mxu0  ;;  %v8736_v34 = vrot.slane %v1379_v10, %v8104_v63  ;;  %v8742_v63 = vrot.slane %v1379_v10, %v8099_v60 }
 0x44a   :  { %v8722_v38 = vadd.f32 %v2310_v56, %v2165_v30  ;;  %v2312_v1 = vpop.f32.mrb[59].mxu0 }
 0x44b   :  { %v2313_v24 = vadd.f32 %v2312_v1, %v2169_v2 }
 0x44c   :  { %10550 = vst [vmem:[#allocation17_spill] sm:$0xff] %v8722_v38 }
 0x44d   :  { %v8724_v8 = vpack.c.bf16 %v2313_v24, %v2309_v20 }
 0x44f   :  { %v2316_v14 = vpop.f32.mrb[60].mxu0 }
 0x450   :  { %v8726_v7 = vadd.f32 %v2316_v14, %v2165_v30  ;;  %v2318_v4 = vpop.f32.mrb[61].mxu0 }
 0x451   :  { %v2319_v48 = vadd.f32 %v2318_v4, %v2169_v2  ;;  %v2320_v11 = vpop.f32.mrb[62].mxu0 }
 0x452   :  { %10551 = vst [vmem:[#allocation18_spill] sm:$0xff] %v8726_v7  ;;  %v8728_v51 = vadd.f32 %v2320_v11, %v2165_v30  ;;  %v2322_v36 = vpop.f32.mrb[63].mxu0 }
 0x453   :  { %v2323_v41 = vadd.f32 %v2322_v36, %v2169_v2 }
 0x454   :  { %10552 = vst [vmem:[#allocation19_spill] sm:$0xff] %v8728_v51 }
 0x455   :  { %v8730_v57 = vpack.c.bf16 %v2323_v41, %v2319_v48 }
 0x4d0   :  { %v1585_v20 = vpop.f32.mrb[32].mxu1 }
 0x4d1   :  { %v1586_v56 = vadd.f32 %v1585_v20, %v8736_v34  ;;  %v1587_v1 = vpop.f32.mrb[33].mxu1 }
 0x4d2   :  { %v1589_v24 = vpop.f32.mrb[34].mxu1 }
 0x4d3   :  { %v5948_v14 = vmul.f32 -1.442695, %v1586_v56  ;;  %v1590_v30 = vadd.f32 %v1589_v24, %v8736_v34  ;;  %v1591_v4 = vpop.f32.mrb[35].mxu1  ;;  %v1588_v24 = vadd.f32 %v1587_v1, %v8742_v63 }
 0x4d4   :  { %v1592_v10 = vadd.f32 %v1591_v4, %v8742_v63 }
 0x4d5   :  { %7257 = vpow2.f32 %v5948_v14  ;;  %v5949_v2 = vmul.f32 -1.442695, %v1590_v30 }
 0x4d7   :  { %7259 = vpow2.f32 %v5949_v2 }
 0x4d8   :  { %v1595_v48 = vpop.f32.mrb[36].mxu1 }
 0x4d9   :  { %v1596_v11 = vadd.f32 %v1595_v48, %v8736_v34  ;;  %v1597_v36 = vpop.f32.mrb[37].mxu1 }
 0x4da   :  { %v1599_v41 = vpop.f32.mrb[38].mxu1 }
 0x4db   :  { %v5950_v39 = vmul.f32 -1.442695, %v1596_v11  ;;  %v1600_v20 = vadd.f32 %v1599_v41, %v8736_v34  ;;  %v1601_v25 = vpop.f32.mrb[39].mxu1 }
 0x4dd   :  { %7261 = vpow2.f32 %v5950_v39  ;;  %v5951_v56 = vmul.f32 -1.442695, %v1600_v20 }
 0x4df   :  { %v7258_v54 = vpop.eup %7257  ;;  %7263 = vpow2.f32 %v5951_v56  ;;  %v1598_v56 = vadd.f32 %v1597_v36, %v8742_v63 }
 0x4e0   :  { %v1712_v14 = vadd.f32 1.0, %v7258_v54  ;;  %v1605_v30 = vpop.f32.mrb[40].mxu1 }
 0x4e1   :  { %v7260_v2 = vpop.eup %7259  ;;  %v1606_v48 = vadd.f32 %v1605_v30, %v8736_v34  ;;  %v1607_v44 = vpop.f32.mrb[41].mxu1 }
 0x4e2   :  { %7265 = vrcp.f32 %v1712_v14  ;;  %v1713_v58 = vadd.f32 1.0, %v7260_v2  ;;  %v1609_v11 = vpop.f32.mrb[42].mxu1  ;;  %v1608_v36 = vadd.f32 %v1607_v44, %v8742_v63 }
 0x4e3   :  { %7267 = vtanh.f32 %v1588_v24  ;;  %v5952_v41 = vmul.f32 -1.442695, %v1606_v48  ;;  %v1610_v39 = vadd.f32 %v1609_v11, %v8736_v34  ;;  %v1611_v20 = vpop.f32.mrb[43].mxu1  ;;  %v1602_v48 = vadd.f32 %v1601_v25, %v8742_v63 }
 0x4e4   :  { %7269 = vrcp.f32 %v1713_v58 }
 0x4e5   :  { %7271 = vpow2.f32 %v5952_v41  ;;  %v5953_v1 = vmul.f32 -1.442695, %v1610_v39 }
 0x4e6   :  { %7273 = vtanh.f32 %v1592_v10 }
 0x4e7   :  { %v7262_v54 = vpop.eup %7261  ;;  %7275 = vpow2.f32 %v5953_v1 }
 0x4e8   :  { %v1714_v30 = vadd.f32 1.0, %v7262_v54  ;;  %v1615_v60 = vpop.f32.mrb[44].mxu1 }
 0x4e9   :  { %v7264_v14 = vpop.eup %7263  ;;  %v1616_v2 = vadd.f32 %v1615_v60, %v8736_v34  ;;  %v1617_v4 = vpop.f32.mrb[45].mxu1 }
 0x4ea   :  { %7277 = vrcp.f32 %v1714_v30  ;;  %v1715_v24 = vadd.f32 1.0, %v7264_v14  ;;  %v1619_v11 = vpop.f32.mrb[46].mxu1 }
 0x4eb   :  { %7279 = vtanh.f32 %v1598_v56  ;;  %v5954_v58 = vmul.f32 -1.442695, %v1616_v2  ;;  %v1620_v41 = vadd.f32 %v1619_v11, %v8736_v34  ;;  %v1621_v10 = vpop.f32.mrb[47].mxu1 }
 0x4ec   :  { %v7266_v39 = vpop.eup %7265  ;;  %7281 = vrcp.f32 %v1715_v24 }
 0x4ed   :  { %v7268_v1 = vpop.eup %7267  ;;  %v1792_v54 = vsub.f32 1.0, %v7266_v39  ;;  %7283 = vpow2.f32 %v5954_v58  ;;  %v5955_v46 = vmul.f32 -1.442695, %v1620_v41  ;;  %v1776_v14 = vmul.f32 %v7266_v39, %v8275_v13 }
 0x4ee   :  { %v7270_v60 = vpop.eup %7269  ;;  %7285 = vtanh.f32 %v1602_v48  ;;  %v1612_v13 = vadd.f32 %v1611_v20, %v8742_v63 }
 0x4ef   :  { %v7272_v30 = vpop.eup %7271  ;;  %v1808_v25 = vmul.f32 %v7268_v1, %v1792_v54  ;;  %v1793_v49 = vsub.f32 1.0, %v7270_v60  ;;  %7287 = vpow2.f32 %v5955_v46  ;;  %v1777_v44 = vmul.f32 %v7270_v60, %v8280_v6 }
 0x4f0   :  { %v7274_v56 = vpop.eup %7273  ;;  %v1716_v2 = vadd.f32 1.0, %v7272_v30  ;;  %7289 = vtanh.f32 %v1608_v36  ;;  %v1625_v11 = vpop.f32.mrb[48].mxu1  ;;  %v1618_v46 = vadd.f32 %v1617_v4, %v8742_v63 }
 0x4f1   :  { %v7276_v32 = vpop.eup %7275  ;;  %v8755_v24 = vadd.f32 %v1808_v25, %v1776_v14  ;;  %v1809_v51 = vmul.f32 %v7274_v56, %v1793_v49  ;;  %v1626_v58 = vadd.f32 %v1625_v11, %v8736_v34  ;;  %v1627_v41 = vpop.f32.mrb[49].mxu1 }
 0x4f2   :  { %7291 = vrcp.f32 %v1716_v2  ;;  %v1717_v48 = vadd.f32 1.0, %v7276_v32  ;;  %v1629_v39 = vpop.f32.mrb[50].mxu1 }
 0x4f3   :  { %v8760_v1 = vadd.f32 %v1809_v51, %v1777_v44  ;;  %v5956_v36 = vmul.f32 -1.442695, %v1626_v58  ;;  %v1630_v54 = vadd.f32 %v1629_v39, %v8736_v34  ;;  %v1631_v30 = vpop.f32.mrb[51].mxu1 }
 0x4f4   :  { %v7278_v14 = vpop.eup %7277  ;;  %7293 = vrcp.f32 %v1717_v48 }
 0x4f5   :  { %v7280_v6 = vpop.eup %7279  ;;  %v1943_v49 = vadd.f32 %v8760_v1, %v8755_v24  ;;  %v1794_v60 = vsub.f32 1.0, %v7278_v14  ;;  %7295 = vpow2.f32 %v5956_v36  ;;  %v5957_v20 = vmul.f32 -1.442695, %v1630_v54 }
 0x4f6   :  { %v7282_v32 = vpop.eup %7281  ;;  %7297 = vtanh.f32 %v1612_v13  ;;  %v1778_v51 = vmul.f32 %v7278_v14, %v8273_v55  ;;  %v1622_v55 = vadd.f32 %v1621_v10, %v8742_v63 }
 0x4f7   :  { %v7284_v25 = vpop.eup %7283  ;;  %v1810_v56 = vmul.f32 %v7280_v6, %v1794_v60  ;;  %v1795_v4 = vsub.f32 1.0, %v7282_v32  ;;  %7299 = vtanh.f32 %v1618_v46  ;;  %v1779_v39 = vmul.f32 %v7282_v32, %v8277_v61 }
 0x4f8   :  { %v7286_v2 = vpop.eup %7285  ;;  %v1718_v11 = vadd.f32 1.0, %v7284_v25  ;;  %7301 = vpow2.f32 %v5957_v20  ;;  %v1635_v44 = vpop.f32.mrb[52].mxu1 }
 0x4f9   :  { %v7288_v58 = vpop.eup %7287  ;;  %v8767_v48 = vadd.f32 %v1810_v56, %v1778_v51  ;;  %v1811_v7 = vmul.f32 %v7286_v2, %v1795_v4  ;;  %v1636_v36 = vadd.f32 %v1635_v44, %v8736_v34  ;;  %v1637_v13 = vpop.f32.mrb[53].mxu1 }
 0x4fa   :  { %v7290_v54 = vpop.eup %7289  ;;  %7303 = vrcp.f32 %v1718_v11  ;;  %v1719_v38 = vadd.f32 1.0, %v7288_v58  ;;  %v1639_v14 = vpop.f32.mrb[54].mxu1  ;;  %v1628_v58 = vadd.f32 %v1627_v41, %v8742_v63 }
 0x4fb   :  { %v1944_v46 = vadd.f32 %v1943_v49, %v8767_v48  ;;  %v8773_v6 = vadd.f32 %v1811_v7, %v1779_v39  ;;  %v5958_v60 = vmul.f32 -1.442695, %v1636_v36  ;;  %v1640_v20 = vadd.f32 %v1639_v14, %v8736_v34  ;;  %v1641_v25 = vpop.f32.mrb[55].mxu1 }
 0x4fc   :  { %v7292_v51 = vpop.eup %7291  ;;  %7305 = vrcp.f32 %v1719_v38 }
 0x4fd   :  { %v1945_v61 = vadd.f32 %v1944_v46, %v8773_v6  ;;  %v1796_v32 = vsub.f32 1.0, %v7292_v51  ;;  %7307 = vpow2.f32 %v5958_v60  ;;  %v5959_v4 = vmul.f32 -1.442695, %v1640_v20 }
 0x4fe   :  { %v7294_v56 = vpop.eup %7293  ;;  %7309 = vtanh.f32 %v1622_v55  ;;  %v1780_v10 = vmul.f32 %v7292_v51, %v8285_v15  ;;  %v1632_v15 = vadd.f32 %v1631_v30, %v8742_v63 }
 0x4ff   :  { %v7296_v2 = vpop.eup %7295  ;;  %v1812_v11 = vmul.f32 %v7290_v54, %v1796_v32  ;;  %v1797_v49 = vsub.f32 1.0, %v7294_v56  ;;  %7311 = vpow2.f32 %v5959_v4  ;;  %v1781_v14 = vmul.f32 %v7294_v56, %v8289_v22 }
 0x500   :  { %v7298_v7 = vpop.eup %7297  ;;  %v1720_v44 = vadd.f32 1.0, %v7296_v2  ;;  %v1645_v39 = vpop.f32.mrb[56].mxu1 }
 0x501   :  { %v7300_v36 = vpop.eup %7299  ;;  %v8779_v38 = vadd.f32 %v1812_v11, %v1780_v10  ;;  %v1813_v46 = vmul.f32 %v7298_v7, %v1797_v49  ;;  %v1646_v55 = vadd.f32 %v1645_v39, %v8736_v34  ;;  %v1647_v60 = vpop.f32.mrb[57].mxu1 }
 0x502   :  { %v7302_v20 = vpop.eup %7301  ;;  %7313 = vrcp.f32 %v1720_v44  ;;  %v1649_v54 = vpop.f32.mrb[58].mxu1 }
 0x503   :  { %v1946_v51 = vadd.f32 %v1945_v61, %v8779_v38  ;;  %v8785_v32 = vadd.f32 %v1813_v46, %v1781_v14  ;;  %v1721_v41 = vadd.f32 1.0, %v7302_v20  ;;  %v5960_v4 = vmul.f32 -1.442695, %v1646_v55  ;;  %v1651_v2 = vpop.f32.mrb[59].mxu1 }
 0x504   :  { %v7304_v10 = vpop.eup %7303  ;;  %7315 = vtanh.f32 %v1628_v58  ;;  %v1650_v22 = vadd.f32 %v1649_v54, %v8736_v34  ;;  %v1638_v55 = vadd.f32 %v1637_v13, %v8742_v63 }
 0x505   :  { %v1947_v56 = vadd.f32 %v1946_v51, %v8785_v32  ;;  %v1798_v11 = vsub.f32 1.0, %v7304_v10  ;;  %7317 = vrcp.f32 %v1721_v41  ;;  %v1782_v44 = vmul.f32 %v7304_v10, %v8283_v12 }
 0x506   :  { %v7306_v49 = vpop.eup %7305  ;;  %7319 = vpow2.f32 %v5960_v4  ;;  %v5961_v7 = vmul.f32 -1.442695, %v1650_v22  ;;  %v1642_v12 = vadd.f32 %v1641_v25, %v8742_v63 }
 0x507   :  { %v7308_v30 = vpop.eup %7307  ;;  %v1814_v61 = vmul.f32 %v7300_v36, %v1798_v11  ;;  %v1799_v39 = vsub.f32 1.0, %v7306_v49  ;;  %7321 = vtanh.f32 %v1632_v15  ;;  %v1783_v54 = vmul.f32 %v7306_v49, %v8287_v17 }
 0x508   :  { %v7310_v14 = vpop.eup %7309  ;;  %v1722_v46 = vadd.f32 1.0, %v7308_v30  ;;  %7323 = vpow2.f32 %v5961_v7  ;;  %v1655_v58 = vpop.f32.mrb[60].mxu1 }
 0x509   :  { %v8791_v20 = vadd.f32 %v1814_v61, %v1782_v44  ;;  %v1815_v51 = vmul.f32 %v7310_v14, %v1799_v39  ;;  %v1656_v41 = vadd.f32 %v1655_v58, %v8736_v34  ;;  %v1657_v4 = vpop.f32.mrb[61].mxu1  ;;  %v7312_v22 = vpop.eup %7311 }
 0x50a   :  { %7325 = vrcp.f32 %v1722_v46  ;;  %v1659_v36 = vpop.f32.mrb[62].mxu1  ;;  %v1723_v13 = vadd.f32 1.0, %v7312_v22 }
 0x50b   :  { %v1948_v15 = vadd.f32 %v1947_v56, %v8791_v20  ;;  %v8797_v10 = vadd.f32 %v1815_v51, %v1783_v54  ;;  %v5962_v11 = vmul.f32 -1.442695, %v1656_v41  ;;  %v1661_v7 = vpop.f32.mrb[63].mxu1  ;;  %7327 = vtanh.f32 %v1638_v55 }
 0x50c   :  { %v7314_v30 = vpop.eup %7313  ;;  %v1660_v17 = vadd.f32 %v1659_v36, %v8736_v34  ;;  %7329 = vrcp.f32 %v1723_v13  ;;  %v1648_v54 = vadd.f32 %v1647_v60, %v8742_v63 }
 0x50d   :  { %v1949_v49 = vadd.f32 %v1948_v15, %v8797_v10  ;;  %v1800_v44 = vsub.f32 1.0, %v7314_v30  ;;  %7331 = vpow2.f32 %v5962_v11  ;;  %v1784_v14 = vmul.f32 %v7314_v30, %v8299_v42 }
 0x50e   :  { %v7316_v61 = vpop.eup %7315  ;;  %v5963_v39 = vmul.f32 -1.442695, %v1660_v17  ;;  %7333 = vtanh.f32 %v1642_v12  ;;  %v1652_v42 = vadd.f32 %v1651_v2, %v8742_v63 }
 0x50f   :  { %v7318_v25 = vpop.eup %7317  ;;  %v1816_v56 = vmul.f32 %v7316_v61, %v1800_v44 }
 0x510   :  { %v7320_v46 = vpop.eup %7319  ;;  %v1801_v58 = vsub.f32 1.0, %v7318_v25  ;;  %7335 = vpow2.f32 %v5963_v39  ;;  %v1785_v22 = vmul.f32 %v7318_v25, %v8303_v47  ;;  %v1658_v25 = vadd.f32 %v1657_v4, %v8742_v63 }
 0x511   :  { %v7322_v55 = vpop.eup %7321  ;;  %v8803_v51 = vadd.f32 %v1816_v56, %v1784_v14  ;;  %v1724_v34 = vadd.f32 1.0, %v7320_v46 }
 0x512   :  { %v7324_v41 = vpop.eup %7323  ;;  %v1817_v36 = vmul.f32 %v7322_v55, %v1801_v58 }
 0x513   :  { %v1950_v15 = vadd.f32 %v1949_v49, %v8803_v51  ;;  %7337 = vrcp.f32 %v1724_v34  ;;  %v1725_v13 = vadd.f32 1.0, %v7324_v41  ;;  %v1662_v41 = vadd.f32 %v1661_v7, %v8742_v63 }
 0x514   :  { %v7326_v12 = vpop.eup %7325  ;;  %v8808_v11 = vadd.f32 %v1817_v36, %v1785_v22  ;;  %7339 = vtanh.f32 %v1648_v54 }
 0x515   :  { %v1802_v60 = vsub.f32 1.0, %v7326_v12  ;;  %7341 = vrcp.f32 %v1725_v13  ;;  %v7328_v30 = vpop.eup %7327  ;;  %v1786_v61 = vmul.f32 %v7326_v12, %v8297_v40 }
 0x516   :  { %v1951_v17 = vadd.f32 %v1950_v15, %v8808_v11  ;;  %v7330_v44 = vpop.eup %7329  ;;  %7343 = vtanh.f32 %v1652_v42 }
 0x517   :  { %v1818_v47 = vmul.f32 %v7328_v30, %v1802_v60  ;;  %v7332_v39 = vpop.eup %7331  ;;  %v1803_v49 = vsub.f32 1.0, %v7330_v44  ;;  %v1787_v58 = vmul.f32 %v7330_v44, %v8301_v45 }
 0x518   :  { %v7334_v14 = vpop.eup %7333  ;;  %v1726_v56 = vadd.f32 1.0, %v7332_v39 }
 0x519   :  { %v1834_v2 = vadd.f32 %v1818_v47, %v1786_v61  ;;  %v1819_v54 = vmul.f32 %v7334_v14, %v1803_v49 }
 0x51a   :  { %v7336_v46 = vpop.eup %7335  ;;  %7345 = vrcp.f32 %v1726_v56 }
 0x51b   :  { %v1952_v55 = vadd.f32 %v1951_v17, %v1834_v2  ;;  %v1727_v34 = vadd.f32 1.0, %v7336_v46  ;;  %v1835_v22 = vadd.f32 %v1819_v54, %v1787_v58  ;;  %7347 = vtanh.f32 %v1658_v25 }
 0x51d   :  { %v7338_v40 = vpop.eup %7337  ;;  %7349 = vrcp.f32 %v1727_v34  ;;  %v1953_v15 = vadd.f32 %v1952_v55, %v1835_v22 }
 0x51e   :  { %v7340_v36 = vpop.eup %7339  ;;  %v1804_v13 = vsub.f32 1.0, %v7338_v40  ;;  %7351 = vtanh.f32 %v1662_v41  ;;  %v1788_v42 = vmul.f32 %v7338_v40, %v8307_v3 }
 0x51f   :  { %v7342_v4 = vpop.eup %7341 }
 0x520   :  { %v1820_v12 = vmul.f32 %v7340_v36, %v1804_v13  ;;  %v1805_v60 = vsub.f32 1.0, %v7342_v4  ;;  %v7344_v45 = vpop.eup %7343  ;;  %v1789_v17 = vmul.f32 %v7342_v4, %v8311_v0 }
 0x522   :  { %v1836_v30 = vadd.f32 %v1820_v12, %v1788_v42  ;;  %v1821_v44 = vmul.f32 %v7344_v45, %v1805_v60 }
 0x524   :  { %v1954_v61 = vadd.f32 %v1953_v15, %v1836_v30  ;;  %v1837_v63 = vadd.f32 %v1821_v44, %v1789_v17  ;;  %v7346_v7 = vpop.eup %7345 }
 0x525   :  { %v7348_v47 = vpop.eup %7347  ;;  %v1806_v49 = vsub.f32 1.0, %v7346_v7  ;;  %v1790_v14 = vmul.f32 %v7346_v7, %v8305_v53 }
 0x526   :  { %v1955_v39 = vadd.f32 %v1954_v61, %v1837_v63 }
 0x527   :  { %v7350_v25 = vpop.eup %7349  ;;  %v1822_v56 = vmul.f32 %v7348_v47, %v1806_v49 }
 0x528   :  { %v1807_v46 = vsub.f32 1.0, %v7350_v25  ;;  %v7352_v58 = vpop.eup %7351  ;;  %v1791_v54 = vmul.f32 %v7350_v25, %v8309_v59 }
 0x529   :  { %v1838_v3 = vadd.f32 %v1822_v56, %v1790_v14 }
 0x52a   :  { %v1823_v55 = vmul.f32 %v7352_v58, %v1807_v46 }
 0x52b   :  { %v1956_v34 = vadd.f32 %v1955_v39, %v1838_v3 }
 0x52c   :  { %v1839_v41 = vadd.f32 %v1823_v55, %v1791_v54 }
 0x52e   :  { %v1957_v0 = vadd.f32 %v1956_v34, %v1839_v41 }
 0x530   :  { %v1958_v40 = vrot.slane %v1957_v0, 4 }
 0x532   :  { %v1959_v36 = vadd.f32 %v1958_v40, %v1957_v0 }
 0x534   :  { %v1960_v15 = vrot.slane %v1959_v36, 2 }
 0x536   :  { %v1961_v13 = vadd.f32 %v1960_v15, %v1959_v36 }
 0x538   :  { %v1962_v4 = vrot.slane %v1961_v13, 1 }
 0x53a   :  { %v1963_v42 = vadd.f32 %v1962_v4, %v1961_v13 }
 0x53c   :  { %v1965_v12 = vmul.f32 0.0078125, %v1963_v42 }
 0x53e   :  { %v8819_v60 = vsub.f32 %v1839_v41, %v1965_v12  ;;  %v1966_v53 = vsub.f32 %v8755_v24, %v1965_v12  ;;  %v1967_v45 = vsub.f32 %v8760_v1, %v1965_v12  ;;  %v1968_v17 = vsub.f32 %v8767_v48, %v1965_v12 }
 0x53f   :  { %v1969_v59 = vsub.f32 %v8773_v6, %v1965_v12  ;;  %v1970_v44 = vsub.f32 %v8779_v38, %v1965_v12  ;;  %v1971_v61 = vsub.f32 %v8785_v32, %v1965_v12  ;;  %v1972_v7 = vsub.f32 %v8791_v20, %v1965_v12 }
 0x540   :  { %v1973_v47 = vsub.f32 %v8797_v10, %v1965_v12  ;;  %v8830_v39 = vsub.f32 %v8803_v51, %v1965_v12  ;;  %v8833_v49 = vsub.f32 %v8808_v11, %v1965_v12  ;;  %v8835_v24 = vsub.f32 %v1834_v2, %v1965_v12 }
 0x541   :  { %v8837_v1 = vsub.f32 %v1835_v22, %v1965_v12  ;;  %v8839_v48 = vsub.f32 %v1836_v30, %v1965_v12  ;;  %v8841_v6 = vsub.f32 %v1837_v63, %v1965_v12  ;;  %v8843_v38 = vsub.f32 %v1838_v3, %v1965_v12 }
 0x542   :  { %v1982_v32 = vmul.f32 %v1966_v53, %v1966_v53  ;;  %v1983_v20 = vmul.f32 %v1967_v45, %v1967_v45  ;;  %v1984_v25 = vmul.f32 %v1968_v17, %v1968_v17  ;;  %v1985_v14 = vmul.f32 %v1969_v59, %v1969_v59 }
 0x543   :  { %v1986_v56 = vmul.f32 %v1970_v44, %v1970_v44  ;;  %v1987_v11 = vmul.f32 %v1971_v61, %v1971_v61  ;;  %v1988_v2 = vmul.f32 %v1972_v7, %v1972_v7  ;;  %v1989_v22 = vmul.f32 %v1973_v47, %v1973_v47 }
 0x544   :  { %v1998_v10 = vadd.f32 %v1983_v20, %v1982_v32  ;;  %v1990_v30 = vmul.f32 %v8830_v39, %v8830_v39  ;;  %v1991_v3 = vmul.f32 %v8833_v49, %v8833_v49  ;;  %v1992_v41 = vmul.f32 %v8835_v24, %v8835_v24 }
 0x545   :  { %v1993_v40 = vmul.f32 %v8837_v1, %v8837_v1  ;;  %v1994_v15 = vmul.f32 %v8839_v48, %v8839_v48  ;;  %v1995_v4 = vmul.f32 %v8841_v6, %v8841_v6  ;;  %v1996_v12 = vmul.f32 %v8843_v38, %v8843_v38 }
 0x546   :  { %v1999_v51 = vadd.f32 %v1998_v10, %v1984_v25  ;;  %v1997_v20 = vmul.f32 %v8819_v60, %v8819_v60 }
 0x548   :  { %v2000_v46 = vadd.f32 %v1999_v51, %v1985_v14 }
 0x54a   :  { %v2001_v58 = vadd.f32 %v2000_v46, %v1986_v56 }
 0x54c   :  { %v2002_v54 = vadd.f32 %v2001_v58, %v1987_v11 }
 0x54e   :  { %v2003_v55 = vadd.f32 %v2002_v54, %v1988_v2 }
 0x550   :  { %v2004_v63 = vadd.f32 %v2003_v55, %v1989_v22  ;;  %v8866_v55 = vld [vmem:[%s10473_s15] ss:$0 sm:$0xff] }
 0x552   :  { %v2005_v34 = vadd.f32 %v2004_v63, %v1990_v30 }
 0x554   :  { %v2006_v0 = vadd.f32 %v2005_v34, %v1991_v3 }
 0x556   :  { %v2007_v36 = vadd.f32 %v2006_v0, %v1992_v41  ;;  %v8875_v41 = vld [vmem:[%s10474_s16] ss:$0 sm:$0xff] }
 0x558   :  { %v2008_v13 = vadd.f32 %v2007_v36, %v1993_v40 }
 0x55a   :  { %v2009_v42 = vadd.f32 %v2008_v13, %v1994_v15 }
 0x55c   :  { %v2010_v32 = vadd.f32 %v2009_v42, %v1995_v4 }
 0x55e   :  { %v2011_v25 = vadd.f32 %v2010_v32, %v1996_v12 }
 0x560   :  { %v2012_v10 = vadd.f32 %v2011_v25, %v1997_v20 }
 0x562   :  { %v2013_v14 = vrot.slane %v2012_v10, 4 }
 0x564   :  { %v2014_v51 = vadd.f32 %v2013_v14, %v2012_v10 }
 0x566   :  { %v2015_v56 = vrot.slane %v2014_v51, 2 }
 0x568   :  { %v2016_v46 = vadd.f32 %v2015_v56, %v2014_v51 }
 0x56a   :  { %v2017_v11 = vrot.slane %v2016_v46, 1 }
 0x56c   :  { %v2018_v58 = vadd.f32 %v2017_v11, %v2016_v46 }
 0x56e   :  { %v2019_v2 = vmul.f32 0.0078125, %v2018_v58 }
 0x570   :  { %v2020_v54 = vadd.f32 1e-05, %v2019_v2 }
 0x572   :  { %7353 = vrsqrt.f32 %v2020_v54 }
 0x57c   :  { %v8861_v22 = vpop.eup %7353 }
 0x57d   :  { %v2022_v30 = vmul.f32 %v8861_v22, %v1966_v53  ;;  %v2023_v63 = vmul.f32 %v8861_v22, %v1967_v45  ;;  %v2024_v3 = vmul.f32 %v8861_v22, %v1968_v17  ;;  %v2025_v34 = vmul.f32 %v8861_v22, %v1969_v59 }
 0x57e   :  { %v2026_v0 = vmul.f32 %v8861_v22, %v1970_v44  ;;  %v2027_v40 = vmul.f32 %v8861_v22, %v1971_v61  ;;  %v2028_v36 = vmul.f32 %v8861_v22, %v1972_v7  ;;  %v2029_v15 = vmul.f32 %v8861_v22, %v1973_v47 }
 0x57f   :  { %v2044_v53 = vmul.f32 %v8866_v55, %v2022_v30  ;;  %v2045_v45 = vmul.f32 %v8866_v55, %v2023_v63  ;;  %v2046_v17 = vmul.f32 %v8866_v55, %v2024_v3  ;;  %v2047_v59 = vmul.f32 %v8866_v55, %v2025_v34 }
 0x580   :  { %v2048_v13 = vmul.f32 %v8866_v55, %v2026_v0  ;;  %v2049_v4 = vmul.f32 %v8866_v55, %v2027_v40  ;;  %v2050_v44 = vmul.f32 %v8866_v55, %v2028_v36  ;;  %v2051_v61 = vmul.f32 %v8866_v55, %v2029_v15 }
 0x581   :  { %v2066_v7 = vadd.f32 %v8875_v41, %v2044_v53  ;;  %v2067_v47 = vadd.f32 %v8875_v41, %v2045_v45  ;;  %v2068_v42 = vadd.f32 %v8875_v41, %v2046_v17  ;;  %v2069_v12 = vadd.f32 %v8875_v41, %v2047_v59 }
 0x582   :  { %v2070_v32 = vadd.f32 %v8875_v41, %v2048_v13  ;;  %v2071_v20 = vadd.f32 %v8875_v41, %v2049_v4  ;;  %v2072_v25 = vadd.f32 %v8875_v41, %v2050_v44  ;;  %v2073_v10 = vadd.f32 %v8875_v41, %v2051_v61 }
 0x583   :  { %v2082_v14 = vmax.f32 %v2066_v7, 0.0  ;;  %v2083_v51 = vmax.f32 %v2067_v47, 0.0  ;;  %v2084_v56 = vmax.f32 %v2068_v42, 0.0  ;;  %v2085_v46 = vmax.f32 %v2069_v12, 0.0 }
 0x584   :  { %v2086_v11 = vmax.f32 %v2070_v32, 0.0  ;;  %v2087_v58 = vmax.f32 %v2071_v20, 0.0  ;;  %v2088_v2 = vmax.f32 %v2072_v25, 0.0  ;;  %v2089_v54 = vmax.f32 %v2073_v10, 0.0 }
 0x585   :  { %v2098_v30 = vadd.f32 %v2082_v14, %v8130_v19  ;;  %v2099_v63 = vadd.f32 %v2083_v51, %v8136_v26  ;;  %v2100_v3 = vadd.f32 %v2084_v56, %v8146_v35  ;;  %v2101_v34 = vadd.f32 %v2085_v46, %v8142_v29 }
 0x586   :  { %v2102_v0 = vadd.f32 %v2086_v11, %v8150_v37  ;;  %v2103_v40 = vadd.f32 %v2087_v58, %v8157_v43  ;;  %v2104_v36 = vadd.f32 %v2088_v2, %v8167_v52  ;;  %v2105_v15 = vadd.f32 %v2089_v54, %v8164_v50  ;;  %v10556_v2 = vld [vmem:[#allocation7_spill] sm:$0xff] }
 0x587   :  { %2114 = vst [vmem:[%s10475_s23] sm:$0xff] %v2098_v30  ;;  %2115 = vst [vmem:[%s10475_s23 + $0x8] sm:$0xff] %v2099_v63  ;;  %v2134_v19 = vpack.c.bf16 %v2099_v63, %v2098_v30  ;;  %v2135_v26 = vpack.c.bf16 %v2101_v34, %v2100_v3  ;;  %v2030_v29 = vmul.f32 %v8861_v22, %v8830_v39  ;;  %v10557_v30 = vld [vmem:[#allocation8_spill] sm:$0xff] }
 0x588   :  { %2116 = vst [vmem:[%s10475_s23 + $0x10] sm:$0xff] %v2100_v3  ;;  %2117 = vst [vmem:[%s10475_s23 + $0x18] sm:$0xff] %v2101_v34  ;;  %v2031_v35 = vmul.f32 %v8861_v22, %v8833_v49  ;;  %v2136_v37 = vpack.c.bf16 %v2103_v40, %v2102_v0  ;;  %v2137_v43 = vpack.c.bf16 %v2105_v15, %v2104_v36 }
 0x589   :  { %2118 = vst [vmem:[%s10475_s23 + $0x20] sm:$0xff] %v2102_v0  ;;  %2119 = vst [vmem:[%s10475_s23 + $0x28] sm:$0xff] %v2103_v40  ;;  %v2032_v50 = vmul.f32 %v8861_v22, %v8835_v24  ;;  %v2033_v52 = vmul.f32 %v8861_v22, %v8837_v1  ;;  %6615 = vmatprep.mubr.bf16.mxu0 %v2134_v19  ;;  %v2052_v39 = vmul.f32 %v8866_v55, %v2030_v29  ;;  %v7721_v0 = vld [vmem:[%s10531_s10] sm:$0xff]   ;;  %v7722_v40 = vld [vmem:[%s10531_s10 + $0x8] sm:$0xff]  }
 0x58a   :  { %2120 = vst [vmem:[%s10475_s23 + $0x30] sm:$0xff] %v2104_v36  ;;  %2121 = vst [vmem:[%s10475_s23 + $0x38] sm:$0xff] %v2105_v15  ;;  %v2053_v49 = vmul.f32 %v8866_v55, %v2031_v35  ;;  %v2034_v53 = vmul.f32 %v8861_v22, %v8839_v48  ;;  %v2035_v45 = vmul.f32 %v8861_v22, %v8841_v6  ;;  %6616 = vmatmul.mubr.bf16.vlgmr.msra.gmra.mrb[64].mxu0 %v2135_v26  ;;  %v7724_v36 = vld [vmem:[%s10531_s10 + $0x18] sm:$0xff]   ;;  %v7725_v15 = vld [vmem:[%s10531_s10 + $0x20] sm:$0xff]  }
 0x58b   :  { %v2054_v17 = vmul.f32 %v8866_v55, %v2032_v50  ;;  %v2055_v59 = vmul.f32 %v8866_v55, %v2033_v52  ;;  %v2036_v24 = vmul.f32 %v8861_v22, %v8843_v38  ;;  %v2037_v1 = vmul.f32 %v8861_v22, %v8819_v60  ;;  %6632 = vmatpush3.bf16.msra.mxu0 %v8711_v31  ;;  %v7726_v19 = vld [vmem:[%s10531_s10 + $0x28] sm:$0xff]   ;;  %v7727_v26 = vld [vmem:[%s10531_s10 + $0x30] sm:$0xff]   ;;  %v7728_v29 = vld [vmem:[%s10531_s10 + $0x38] sm:$0xff]  }
 0x58c   :  { %6619 = vmatprep.mubr.bf16.mxu0 %v2136_v37  ;;  %v2074_v13 = vadd.f32 %v8875_v41, %v2052_v39  ;;  %v2075_v48 = vadd.f32 %v8875_v41, %v2053_v49  ;;  %v2056_v6 = vmul.f32 %v8866_v55, %v2034_v53  ;;  %6633 = vmatprep.subr.bf16.mxu0 %v8718_v27  ;;  %v7729_v35 = vld [vmem:[%s10468_s4] sm:$0xff]  }
 0x58d   :  { %v2076_v4 = vadd.f32 %v8875_v41, %v2054_v17  ;;  %v2077_v44 = vadd.f32 %v8875_v41, %v2055_v59  ;;  %v2057_v38 = vmul.f32 %v8866_v55, %v2035_v45  ;;  %v2058_v61 = vmul.f32 %v8866_v55, %v2036_v24  ;;  %v9039_v37 = vld [vmem:[%s10539_s3 + $0x1] ss:$0 sm:$0xff] }
 0x58e   :  { %v2090_v60 = vmax.f32 %v2074_v13, 0.0  ;;  %v2091_v22 = vmax.f32 %v2075_v48, 0.0  ;;  %v2078_v31 = vadd.f32 %v8875_v41, %v2056_v6  ;;  %v2059_v7 = vmul.f32 %v8866_v55, %v2037_v1  ;;  %v10553_v55 = vld [vmem:[#allocation4_spill] sm:$0xff] }
 0x58f   :  { %v2092_v47 = vmax.f32 %v2076_v4, 0.0  ;;  %v2093_v42 = vmax.f32 %v2077_v44, 0.0  ;;  %v2079_v12 = vadd.f32 %v8875_v41, %v2057_v38  ;;  %v2080_v32 = vadd.f32 %v8875_v41, %v2058_v61  ;;  %6634 = vmatpush3.bf16.msra.mxu0 %v8718_v27 }
 0x590   :  { %v2106_v20 = vadd.f32 %v2090_v60, %v8176_v5  ;;  %v2107_v25 = vadd.f32 %v2091_v22, %v8181_v9  ;;  %v2094_v10 = vmax.f32 %v2078_v31, 0.0  ;;  %v2081_v14 = vadd.f32 %v8875_v41, %v2059_v7  ;;  %6635 = vmatprep.subr.bf16.mxu0 %v8724_v8  ;;  %v10554_v9 = vld [vmem:[#allocation5_spill] sm:$0xff] }
 0x591   :  { %v2108_v51 = vadd.f32 %v2092_v47, %v8189_v18  ;;  %v2109_v56 = vadd.f32 %v2093_v42, %v10553_v55  ;;  %v2095_v46 = vmax.f32 %v2079_v12, 0.0  ;;  %v2096_v11 = vmax.f32 %v2080_v32, 0.0  ;;  %v10555_v18 = vld [vmem:[#allocation6_spill] sm:$0xff] }
 0x592   :  { %2122 = vst [vmem:[%s10475_s23 + $0x40] sm:$0xff] %v2106_v20  ;;  %2123 = vst [vmem:[%s10475_s23 + $0x48] sm:$0xff] %v2107_v25  ;;  %v2138_v5 = vpack.c.bf16 %v2107_v25, %v2106_v20  ;;  %v2110_v27 = vadd.f32 %v2094_v10, %v10554_v9  ;;  %v2097_v41 = vmax.f32 %v2081_v14, 0.0  ;;  %6620 = vmatmul.mubr.bf16.gmra.mrb[68].mxu0 %v2137_v43 }
 0x593   :  { %2124 = vst [vmem:[%s10475_s23 + $0x50] sm:$0xff] %v2108_v51  ;;  %2125 = vst [vmem:[%s10475_s23 + $0x58] sm:$0xff] %v2109_v56  ;;  %v2111_v58 = vadd.f32 %v2095_v46, %v10555_v18  ;;  %v2112_v54 = vadd.f32 %v2096_v11, %v10556_v2  ;;  %6636 = vmatpush3.bf16.msra.mxu0 %v8724_v8  ;;  %v2139_v8 = vpack.c.bf16 %v2109_v56, %v2108_v51 }
 0x594   :  { %6623 = vmatprep.mubr.bf16.mxu0 %v2138_v5  ;;  %2126 = vst [vmem:[%s10475_s23 + $0x60] sm:$0xff] %v2110_v27  ;;  %v2113_v63 = vadd.f32 %v2097_v41, %v10557_v30  ;;  %6637 = vmatprep.subr.bf16.mxu0 %v8730_v57 }
 0x595   :  { %2127 = vst [vmem:[%s10475_s23 + $0x68] sm:$0xff] %v2111_v58  ;;  %2128 = vst [vmem:[%s10475_s23 + $0x70] sm:$0xff] %v2112_v54  ;;  %v2140_v3 = vpack.c.bf16 %v2111_v58, %v2110_v27 }
 0x596   :  { %2129 = vst [vmem:[%s10475_s23 + $0x78] sm:$0xff] %v2113_v63  ;;  %v2141_v34 = vpack.c.bf16 %v2113_v63, %v2112_v54 }
 0x597   :  { %6638 = vmatpush3.bf16.msra.mxu0 %v8730_v57  ;;  %v7723_v57 = vld [vmem:[%s10531_s10 + $0x10] sm:$0xff]  }
 0x59a   :  { %6624 = vmatmul.mubr.bf16.gmra.mrb[72].mxu0 %v2139_v8 }
 0x59b   :  { %6627 = vmatprep.mubr.bf16.mxu0 %v2140_v3 }
 0x5a2   :  { %6628 = vmatmul.mubr.bf16.gmra.mrb[76].mxu0 %v2141_v34 }
 0x5a3   :  { %6639 = vmatprep.mubr.msk.bf16.mxu0 %vm771_vm0, %v7721_v0 }
 0x5aa   :  { %6640 = vmatmul.mubr.msk.bf16.vlgmr.msra.gmra.mrb[80].mxu0 %vm771_vm0, %v7722_v40 }
 0x5ab   :  { %6643 = vmatprep.mubr.msk.bf16.mxu0 %vm771_vm0, %v7723_v57 }
 0x5b2   :  { %6644 = vmatmul.mubr.msk.bf16.gmra.mrb[84].mxu0 %vm771_vm0, %v7724_v36 }
 0x5b3   :  { %6647 = vmatprep.mubr.msk.bf16.mxu0 %vm771_vm0, %v7725_v15 }
 0x5ba   :  { %6648 = vmatmul.mubr.msk.bf16.gmra.mrb[88].mxu0 %vm771_vm0, %v7726_v19 }
 0x5bb   :  { %6651 = vmatprep.mubr.msk.bf16.mxu0 %vm771_vm0, %v7727_v26 }
 0x5c2   :  { %6652 = vmatmul.mubr.msk.bf16.gmra.mrb[92].mxu0 %vm771_vm0, %v7728_v29 }
 0x5c3   :  { %6663 = vmatprep.mubr.msk.bf16.mxu0 %vm771_vm0, %v7729_v35 }
 0x65d   :  { %v6617_v43 = vpop.f32.mrb[64].mxu0 }
 0x65e   :  { %v9042_v50 = vadd.f32 %v6617_v43, %v9039_v37  ;;  %v2432_v52 = vpop.f32.mrb[65].mxu0 }
 0x65f   :  { %v9045_v39 = vadd.f32 %v9039_v37, %v2432_v52  ;;  %v6618_v49 = vpop.f32.mrb[66].mxu0 }
 0x660   :  { %v6037_v53 = vmul.f32 -1.442695, %v9042_v50  ;;  %v9049_v45 = vadd.f32 %v6618_v49, %v9039_v37  ;;  %v2435_v17 = vpop.f32.mrb[67].mxu0 }
 0x661   :  { %v6035_v59 = vmul.f32 -1.442695, %v9045_v39  ;;  %v9053_v24 = vadd.f32 %v9039_v37, %v2435_v17 }
 0x662   :  { %7355 = vpow2.f32 %v6037_v53  ;;  %v6038_v1 = vmul.f32 -1.442695, %v9049_v45 }
 0x663   :  { %7357 = vpow2.f32 %v6035_v59  ;;  %v6036_v13 = vmul.f32 -1.442695, %v9053_v24 }
 0x664   :  { %7359 = vpow2.f32 %v6038_v1 }
 0x665   :  { %7361 = vpow2.f32 %v6036_v13  ;;  %v6621_v48 = vpop.f32.mrb[68].mxu0 }
 0x666   :  { %v9058_v6 = vadd.f32 %v6621_v48, %v9039_v37  ;;  %v2448_v4 = vpop.f32.mrb[69].mxu0 }
 0x667   :  { %v9061_v44 = vadd.f32 %v9039_v37, %v2448_v4  ;;  %v6622_v38 = vpop.f32.mrb[70].mxu0 }
 0x668   :  { %v6041_v61 = vmul.f32 -1.442695, %v9058_v6  ;;  %v9065_v60 = vadd.f32 %v6622_v38, %v9039_v37  ;;  %v2451_v22 = vpop.f32.mrb[71].mxu0 }
 0x669   :  { %v6039_v31 = vmul.f32 -1.442695, %v9061_v44  ;;  %v9069_v7 = vadd.f32 %v9039_v37, %v2451_v22 }
 0x66a   :  { %7363 = vpow2.f32 %v6041_v61  ;;  %v6042_v47 = vmul.f32 -1.442695, %v9065_v60 }
 0x66b   :  { %7365 = vpow2.f32 %v6039_v31  ;;  %v6040_v42 = vmul.f32 -1.442695, %v9069_v7 }
 0x66c   :  { %v7356_v12 = vpop.eup %7355  ;;  %7367 = vpow2.f32 %v6042_v47 }
 0x66d   :  { %v7358_v32 = vpop.eup %7357  ;;  %v2646_v20 = vadd.f32 1.0, %v7356_v12  ;;  %7369 = vpow2.f32 %v6040_v42  ;;  %v6625_v25 = vpop.f32.mrb[72].mxu0 }
 0x66e   :  { %v7360_v10 = vpop.eup %7359  ;;  %v2644_v14 = vadd.f32 1.0, %v7358_v32  ;;  %v9074_v51 = vadd.f32 %v6625_v25, %v9039_v37  ;;  %v2464_v55 = vpop.f32.mrb[73].mxu0 }
 0x66f   :  { %v7362_v56 = vpop.eup %7361  ;;  %7371 = vrcp.f32 %v2646_v20  ;;  %v2647_v46 = vadd.f32 1.0, %v7360_v10  ;;  %v9077_v11 = vadd.f32 %v9039_v37, %v2464_v55  ;;  %v6626_v5 = vpop.f32.mrb[74].mxu0 }
 0x670   :  { %7373 = vrcp.f32 %v2644_v14  ;;  %v2645_v9 = vadd.f32 1.0, %v7362_v56  ;;  %v6045_v27 = vmul.f32 -1.442695, %v9074_v51  ;;  %v9081_v41 = vadd.f32 %v6626_v5, %v9039_v37  ;;  %v2467_v18 = vpop.f32.mrb[75].mxu0 }
 0x671   :  { %7375 = vrcp.f32 %v2647_v46  ;;  %v6043_v58 = vmul.f32 -1.442695, %v9077_v11  ;;  %v9085_v2 = vadd.f32 %v9039_v37, %v2467_v18 }
 0x672   :  { %7377 = vrcp.f32 %v2645_v9  ;;  %v6046_v54 = vmul.f32 -1.442695, %v9081_v41 }
 0x673   :  { %7379 = vpow2.f32 %v6045_v27  ;;  %v6044_v30 = vmul.f32 -1.442695, %v9085_v2 }
 0x674   :  { %v7364_v63 = vpop.eup %7363  ;;  %7381 = vpow2.f32 %v6043_v58 }
 0x675   :  { %v7366_v8 = vpop.eup %7365  ;;  %v2650_v3 = vadd.f32 1.0, %v7364_v63  ;;  %7383 = vpow2.f32 %v6046_v54  ;;  %v6629_v34 = vpop.f32.mrb[76].mxu0 }
 0x676   :  { %v7368_v0 = vpop.eup %7367  ;;  %v2648_v40 = vadd.f32 1.0, %v7366_v8  ;;  %7385 = vpow2.f32 %v6044_v30  ;;  %v9090_v57 = vadd.f32 %v6629_v34, %v9039_v37  ;;  %v2480_v36 = vpop.f32.mrb[77].mxu0 }
 0x677   :  { %v7370_v15 = vpop.eup %7369  ;;  %7387 = vrcp.f32 %v2650_v3  ;;  %v2651_v19 = vadd.f32 1.0, %v7368_v0  ;;  %v9093_v26 = vadd.f32 %v9039_v37, %v2480_v36  ;;  %v6630_v29 = vpop.f32.mrb[78].mxu0 }
 0x678   :  { %7389 = vrcp.f32 %v2648_v40  ;;  %v2649_v35 = vadd.f32 1.0, %v7370_v15  ;;  %v6049_v43 = vmul.f32 -1.442695, %v9090_v57  ;;  %v9097_v52 = vadd.f32 %v6630_v29, %v9039_v37  ;;  %v2483_v49 = vpop.f32.mrb[79].mxu0 }
 0x679   :  { %v7372_v53 = vpop.eup %7371  ;;  %7391 = vrcp.f32 %v2651_v19  ;;  %v6047_v17 = vmul.f32 -1.442695, %v9093_v26  ;;  %v9101_v59 = vadd.f32 %v9039_v37, %v2483_v49 }
 0x67a   :  { %v7374_v1 = vpop.eup %7373  ;;  %7393 = vrcp.f32 %v2649_v35  ;;  %v6050_v13 = vmul.f32 -1.442695, %v9097_v52 }
 0x67b   :  { %v7376_v48 = vpop.eup %7375  ;;  %7395 = vpow2.f32 %v6049_v43  ;;  %v6048_v4 = vmul.f32 -1.442695, %v9101_v59 }
 0x67c   :  { %v7378_v38 = vpop.eup %7377  ;;  %7397 = vpow2.f32 %v6047_v17  ;;  %v2711_v8 = vpack.c.bf16 %v7376_v48, %v7372_v53 }
 0x67d   :  { %v7380_v61 = vpop.eup %7379  ;;  %7399 = vpow2.f32 %v6050_v13  ;;  %v6641_v22 = vpop.f32.mrb[80].mxu0  ;;  %v2709_v31 = vpack.c.bf16 %v7378_v38, %v7374_v1 }
 0x67e   :  { %v7382_v47 = vpop.eup %7381  ;;  %v2654_v42 = vadd.f32 1.0, %v7380_v61  ;;  %7401 = vpow2.f32 %v6048_v4  ;;  %v2533_v12 = vpop.f32.mrb[81].mxu0  ;;  %v2694_v10 = vmul.f32 %v7372_v53, %v6641_v22 }
 0x67f   :  { %v7384_v37 = vpop.eup %7383  ;;  %v6642_v32 = vpop.f32.mrb[82].mxu0  ;;  %2724 = vmatprep.subr.bf16.mxu1 %v2709_v31  ;;  %v2652_v25 = vadd.f32 1.0, %v7382_v47  ;;  %v2692_v9 = vmul.f32 %v7374_v1, %v2533_v12 }
 0x680   :  { %v7386_v20 = vpop.eup %7385  ;;  %v2695_v14 = vmul.f32 %v7376_v48, %v6642_v32  ;;  %v2536_v55 = vpop.f32.mrb[83].mxu0  ;;  %v2655_v46 = vadd.f32 1.0, %v7384_v37  ;;  %7403 = vrcp.f32 %v2654_v42 }
 0x681   :  { %v7388_v56 = vpop.eup %7387  ;;  %v2653_v5 = vadd.f32 1.0, %v7386_v20  ;;  %v2693_v27 = vmul.f32 %v7378_v38, %v2536_v55 }
 0x682   :  { %v7390_v18 = vpop.eup %7389  ;;  %v2710_v58 = vpack.c.bf16 %v2695_v14, %v2694_v10 }
 0x683   :  { %v7392_v54 = vpop.eup %7391  ;;  %7405 = vrcp.f32 %v2653_v5  ;;  %v2708_v30 = vpack.c.bf16 %v2693_v27, %v2692_v9 }
 0x684   :  { %v7394_v63 = vpop.eup %7393  ;;  %7407 = vrcp.f32 %v2652_v25  ;;  %v2715_v31 = vpack.c.bf16 %v7392_v54, %v7388_v56 }
 0x685   :  { %v7396_v3 = vpop.eup %7395  ;;  %7409 = vrcp.f32 %v2655_v46  ;;  %v6645_v34 = vpop.f32.mrb[84].mxu0  ;;  %2725 = vmatpush1.bf16.msra.mxu1 %v2708_v30  ;;  %v2713_v1 = vpack.c.bf16 %v7394_v63, %v7390_v18 }
 0x686   :  { %v7398_v0 = vpop.eup %7397  ;;  %v2658_v40 = vadd.f32 1.0, %v7396_v3  ;;  %v2549_v36 = vpop.f32.mrb[85].mxu0  ;;  %2726 = vmatprep.subr.bf16.mxu1 %v2711_v8  ;;  %v2698_v43 = vmul.f32 %v7388_v56, %v6645_v34 }
 0x687   :  { %v7400_v15 = vpop.eup %7399  ;;  %v6646_v19 = vpop.f32.mrb[86].mxu0  ;;  %v2656_v35 = vadd.f32 1.0, %v7398_v0  ;;  %v2696_v38 = vmul.f32 %v7390_v18, %v2549_v36 }
 0x688   :  { %v7402_v29 = vpop.eup %7401  ;;  %v2699_v49 = vmul.f32 %v7392_v54, %v6646_v19  ;;  %v2552_v17 = vpop.f32.mrb[87].mxu0  ;;  %v2659_v13 = vadd.f32 1.0, %v7400_v15  ;;  %7411 = vrcp.f32 %v2658_v40 }
 0x689   :  { %v2657_v4 = vadd.f32 1.0, %v7402_v29  ;;  %v2697_v53 = vmul.f32 %v7394_v63, %v2552_v17  ;;  %2727 = vmatpush1.bf16.msra.mxu1 %v2710_v58  ;;  %v7731_v17 = vld [vmem:[%s10540_s7 + $0x8] sm:$0xff]  }
 0x68a   :  { %v2714_v48 = vpack.c.bf16 %v2699_v49, %v2698_v43  ;;  %2728 = vmatprep.subr.bf16.mxu1 %v2713_v1  ;;  %v7404_v22 = vpop.eup %7403  ;;  %v7730_v49 = vld [vmem:[%s10540_s7] sm:$0xff]   ;;  %v7732_v1 = vld [vmem:[%s10540_s7 + $0x10] sm:$0xff]  }
 0x68b   :  { %7413 = vrcp.f32 %v2657_v4  ;;  %v2712_v61 = vpack.c.bf16 %v2697_v53, %v2696_v38 }
 0x68c   :  { %7415 = vrcp.f32 %v2656_v35 }
 0x68d   :  { %v7406_v47 = vpop.eup %7405  ;;  %7417 = vrcp.f32 %v2659_v13  ;;  %v6649_v42 = vpop.f32.mrb[88].mxu0  ;;  %2729 = vmatpush1.bf16.msra.mxu1 %v2712_v61  ;;  %v7733_v13 = vld [vmem:[%s10540_s7 + $0x18] sm:$0xff]  }
 0x68e   :  { %v7408_v12 = vpop.eup %7407  ;;  %v2565_v37 = vpop.f32.mrb[89].mxu0  ;;  %2730 = vmatprep.subr.bf16.mxu1 %v2715_v31  ;;  %v2702_v25 = vmul.f32 %v7404_v22, %v6649_v42 }
 0x68f   :  { %v7410_v32 = vpop.eup %7409  ;;  %v6650_v20 = vpop.f32.mrb[90].mxu0  ;;  %v2717_v55 = vpack.c.bf16 %v7406_v47, %v7408_v12  ;;  %v2700_v46 = vmul.f32 %v7408_v12, %v2565_v37 }
 0x690   :  { %v2703_v10 = vmul.f32 %v7410_v32, %v6650_v20  ;;  %v2568_v14 = vpop.f32.mrb[91].mxu0  ;;  %v2719_v18 = vpack.c.bf16 %v7410_v32, %v7404_v22 }
 0x691   :  { %v2701_v5 = vmul.f32 %v7406_v47, %v2568_v14  ;;  %2731 = vmatpush1.bf16.msra.mxu1 %v2714_v48 }
 0x692   :  { %v2718_v9 = vpack.c.bf16 %v2703_v10, %v2702_v25  ;;  %2732 = vmatprep.subr.bf16.mxu1 %v2717_v55  ;;  %v7412_v56 = vpop.eup %7411  ;;  %v7047_v25 = vld [vmem:[%s10469_s11 + $0x100] ss:$8 sps:$4 sm:$0xff]   ;;  %v7049_v10 = vld [vmem:[%s10469_s11 + $0x104] ss:$8 sps:$4 sm:$0xff]   ;;  %v7052_v55 = vld [vmem:[%s10469_s11 + $0x114] ss:$8 sps:$4 sm:$0xff]  }
 0x693   :  { %v2716_v27 = vpack.c.bf16 %v2701_v5, %v2700_v46 }
 0x695   :  { %v7414_v58 = vpop.eup %7413  ;;  %v6653_v54 = vpop.f32.mrb[92].mxu0  ;;  %2733 = vmatpush1.bf16.msra.mxu1 %v2716_v27 }
 0x696   :  { %v7416_v30 = vpop.eup %7415  ;;  %v2581_v63 = vpop.f32.mrb[93].mxu0  ;;  %2734 = vmatprep.subr.bf16.mxu1 %v2719_v18  ;;  %v2706_v34 = vmul.f32 %v7412_v56, %v6653_v54  ;;  %v7050_v18 = vld [vmem:[%s10469_s11 + $0x110] ss:$8 sps:$4 sm:$0xff]  }
 0x697   :  { %v7418_v8 = vpop.eup %7417  ;;  %v6654_v3 = vpop.f32.mrb[94].mxu0  ;;  %v2721_v36 = vpack.c.bf16 %v7414_v58, %v7416_v30  ;;  %v2704_v15 = vmul.f32 %v7416_v30, %v2581_v63  ;;  %v7055_v30 = vld [vmem:[%s10469_s11 + $0x124] ss:$8 sps:$4 sm:$0xff]  }
 0x698   :  { %v2707_v0 = vmul.f32 %v7418_v8, %v6654_v3  ;;  %v2584_v40 = vpop.f32.mrb[95].mxu0  ;;  %v2723_v43 = vpack.c.bf16 %v7418_v8, %v7412_v56 }
 0x699   :  { %v2705_v19 = vmul.f32 %v7414_v58, %v2584_v40  ;;  %2735 = vmatpush1.bf16.msra.mxu1 %v2718_v9 }
 0x69a   :  { %v2722_v29 = vpack.c.bf16 %v2707_v0, %v2706_v34  ;;  %2736 = vmatprep.subr.bf16.mxu1 %v2721_v36  ;;  %v7053_v0 = vld [vmem:[%s10469_s11 + $0x120] ss:$8 sps:$4 sm:$0xff]  }
 0x69b   :  { %v2720_v35 = vpack.c.bf16 %v2705_v19, %v2704_v15 }
 0x69d   :  { %2737 = vmatpush1.bf16.msra.mxu1 %v2720_v35 }
 0x69e   :  { %2738 = vmatprep.subr.bf16.mxu1 %v2723_v43 }
 0x6a1   :  { %2739 = vmatpush1.bf16.msra.mxu1 %v2722_v29 }
 0x6a2   :  { %3168 = vmatprep.subr.bf16.mxu1 %v7049_v10 }
 0x6a4   :  { %2757 = vmatmul.mubr.bf16.vlgmr.msra.gmra.mrb[64].mxu1 %v7730_v49  ;;  %v7056_v49 = vld [vmem:[%s10469_s11 + $0x130] ss:$8 sps:$4 sm:$0xff]  }
 0x6a5   :  { %2766 = vmatprep.mubr.bf16.mxu1 %v10541_v33  ;;  %3169 = vmatpush1.bf16.msra.mxu1 %v7047_v25  ;;  %v10558_v25 = vld [vmem:[#allocation17_spill] sm:$0xff] }
 0x6a6   :  { %3170 = vmatprep.subr.bf16.mxu1 %v7052_v55 }
 0x6a9   :  { %3171 = vmatpush1.bf16.msra.mxu1 %v7050_v18 }
 0x6aa   :  { %3172 = vmatprep.subr.bf16.mxu1 %v7055_v30 }
 0x6ac   :  { %2767 = vmatmul.mubr.bf16.gmra.mrb[68].mxu1 %v7731_v17 }
 0x6ad   :  { %2776 = vmatprep.mubr.bf16.mxu1 %v10541_v33  ;;  %3173 = vmatpush1.bf16.msra.mxu1 %v7053_v0 }
 0x6b4   :  { %2777 = vmatmul.mubr.bf16.gmra.mrb[72].mxu1 %v7732_v1 }
 0x6b5   :  { %2786 = vmatprep.mubr.bf16.mxu1 %v10541_v33 }
 0x6bc   :  { %2787 = vmatmul.mubr.bf16.gmra.mrb[76].mxu1 %v7733_v13  ;;  %v7061_v13 = vld [vmem:[%s10469_s11 + $0x144] ss:$8 sps:$4 sm:$0xff]  }
 0x777   :  { %v2758_v4 = vpop.f32.mrb[64].mxu1 }
 0x778   :  { %v2760_v38 = vpop.f32.mrb[65].mxu1 }
 0x779   :  { %v2797_v53 = vadd.f32 1e-06, %v2760_v38  ;;  %v2762_v48 = vpop.f32.mrb[66].mxu1 }
 0x77a   :  { %v2764_v61 = vpop.f32.mrb[67].mxu1 }
 0x77b   :  { %7419 = vrcp.f32 %v2797_v53  ;;  %v2798_v22 = vadd.f32 1e-06, %v2764_v61 }
 0x77d   :  { %7421 = vrcp.f32 %v2798_v22  ;;  %v7059_v22 = vld [vmem:[%s10469_s11 + $0x140] ss:$8 sps:$4 sm:$0xff]  }
 0x77f   :  { %v2768_v31 = vpop.f32.mrb[68].mxu1 }
 0x780   :  { %v2770_v47 = vpop.f32.mrb[69].mxu1 }
 0x781   :  { %v2799_v42 = vadd.f32 1e-06, %v2770_v47  ;;  %v2772_v12 = vpop.f32.mrb[70].mxu1 }
 0x782   :  { %v2774_v37 = vpop.f32.mrb[71].mxu1 }
 0x783   :  { %7423 = vrcp.f32 %v2799_v42  ;;  %v2800_v32 = vadd.f32 1e-06, %v2774_v37 }
 0x785   :  { %v7420_v20 = vpop.eup %7419  ;;  %7425 = vrcp.f32 %v2800_v32  ;;  %v7062_v32 = vld [vmem:[%s10469_s11 + $0x150] ss:$8 sps:$4 sm:$0xff]  }
 0x786   :  { %v2813_v14 = vmul.f32 %v7420_v20, %v2758_v4  ;;  %v7067_v20 = vld [vmem:[%s10469_s11 + $0x164] ss:$8 sps:$4 sm:$0xff]  }
 0x787   :  { %v7422_v46 = vpop.eup %7421  ;;  %v2778_v5 = vpop.f32.mrb[72].mxu1 }
 0x788   :  { %v2780_v9 = vpop.f32.mrb[73].mxu1  ;;  %v2814_v27 = vmul.f32 %v7422_v46, %v2762_v48  ;;  %v9130_v56 = vadd.f32 %v2813_v14, %v8707_v21  ;;  %v7065_v46 = vld [vmem:[%s10469_s11 + $0x160] ss:$8 sps:$4 sm:$0xff]  }
 0x789   :  { %v2801_v58 = vadd.f32 1e-06, %v2780_v9  ;;  %v2782_v54 = vpop.f32.mrb[74].mxu1  ;;  %v7070_v9 = vld [vmem:[%s10469_s11 + $0x174] ss:$8 sps:$4 sm:$0xff]  }
 0x78a   :  { %v2784_v63 = vpop.f32.mrb[75].mxu1  ;;  %v9139_v8 = vadd.f32 %v2814_v27, %v8709_v16  ;;  %v7058_v16 = vld [vmem:[%s10469_s11 + $0x134] ss:$8 sps:$4 sm:$0xff]  }
 0x78b   :  { %7427 = vrcp.f32 %v2801_v58  ;;  %v2802_v3 = vadd.f32 1e-06, %v2784_v63  ;;  %3174 = vmatprep.subr.bf16.mxu1 %v7058_v16  ;;  %v7068_v63 = vld [vmem:[%s10469_s11 + $0x170] ss:$8 sps:$4 sm:$0xff]  }
 0x78c   :  { %v2829_v21 = vpack.c.bf16 %v9139_v8, %v9130_v56  ;;  %v3461_v34 = vadd.f32 %v9139_v8, %v9130_v56  ;;  %3175 = vmatpush1.bf16.msra.mxu1 %v7056_v49 }
 0x78d   :  { %v7424_v40 = vpop.eup %7423  ;;  %7429 = vrcp.f32 %v2802_v3  ;;  %3176 = vmatprep.subr.bf16.mxu1 %v7061_v13  ;;  %v7073_v3 = vld [vmem:[%s10469_s11 + $0x184] ss:$8 sps:$4 sm:$0xff]  }
 0x78e   :  { %6655 = vmatprep.subr.bf16.mxu0 %v2829_v21  ;;  %v2815_v36 = vmul.f32 %v7424_v40, %v2768_v31  ;;  %v7079_v13 = vld [vmem:[%s10469_s11 + $0x1a4] ss:$8 sps:$4 sm:$0xff]  }
 0x78f   :  { %v7426_v15 = vpop.eup %7425  ;;  %v2788_v19 = vpop.f32.mrb[76].mxu1  ;;  %6656 = vmatpush3.bf16.msra.mxu0 %v2829_v21  ;;  %v10560_v21 = vld [vmem:[#allocation19_spill] sm:$0xff] }
 0x790   :  { %v2790_v29 = vpop.f32.mrb[77].mxu1  ;;  %v2816_v35 = vmul.f32 %v7426_v15, %v2772_v12  ;;  %v9152_v43 = vadd.f32 %v2815_v36, %v8714_v28  ;;  %3177 = vmatpush1.bf16.msra.mxu1 %v7059_v22  ;;  %v7025_v36 = vld [vmem:[%s10524_s9 + $0x104] ss:$8 sps:$4 sm:$0xff]   ;;  %v7071_v15 = vld [vmem:[%s10469_s11 + $0x180] ss:$8 sps:$4 sm:$0xff]  }
 0x791   :  { %v2803_v17 = vadd.f32 1e-06, %v2790_v29  ;;  %v2792_v1 = vpop.f32.mrb[78].mxu1  ;;  %v7031_v22 = vld [vmem:[%s10524_s9 + $0x124] ss:$8 sps:$4 sm:$0xff]  }
 0x792   :  { %v2794_v4 = vpop.f32.mrb[79].mxu1  ;;  %v9161_v38 = vadd.f32 %v2816_v35, %v8716_v23  ;;  %v3462_v53 = vadd.f32 %v3461_v34, %v9152_v43  ;;  %v7064_v23 = vld [vmem:[%s10469_s11 + $0x154] ss:$8 sps:$4 sm:$0xff]   ;;  %v7023_v35 = vld [vmem:[%s10524_s9 + $0x100] ss:$8 sps:$4 sm:$0xff]  }
 0x793   :  { %7431 = vrcp.f32 %v2803_v17  ;;  %v2804_v28 = vadd.f32 1e-06, %v2794_v4  ;;  %3178 = vmatprep.subr.bf16.mxu1 %v7064_v23  ;;  %v7028_v17 = vld [vmem:[%s10524_s9 + $0x114] ss:$8 sps:$4 sm:$0xff]  }
 0x794   :  { %v2830_v48 = vpack.c.bf16 %v9161_v38, %v9152_v43  ;;  %v3463_v61 = vadd.f32 %v3462_v53, %v9161_v38  ;;  %3179 = vmatpush1.bf16.msra.mxu1 %v7062_v32  ;;  %v7734_v53 = vld [vmem:[%s10468_s4 + $0x8] sm:$0xff]   ;;  %v7082_v23 = vld [vmem:[%s10469_s11 + $0x1b4] ss:$8 sps:$4 sm:$0xff]  }
 0x795   :  { %v7428_v31 = vpop.eup %7427  ;;  %7433 = vrcp.f32 %v2804_v28  ;;  %3180 = vmatprep.subr.bf16.mxu1 %v7067_v20  ;;  %v7735_v28 = vld [vmem:[%s10468_s4 + $0x10] sm:$0xff]  }
 0x796   :  { %6657 = vmatprep.subr.bf16.mxu0 %v2830_v48  ;;  %v2817_v47 = vmul.f32 %v7428_v31, %v2778_v5  ;;  %v7077_v31 = vld [vmem:[%s10469_s11 + $0x1a0] ss:$8 sps:$4 sm:$0xff]   ;;  %v7034_v32 = vld [vmem:[%s10524_s9 + $0x134] ss:$8 sps:$4 sm:$0xff]   ;;  %v7080_v20 = vld [vmem:[%s10469_s11 + $0x1b0] ss:$8 sps:$4 sm:$0xff]  }
 0x797   :  { %v7430_v42 = vpop.eup %7429  ;;  %6658 = vmatpush3.bf16.msra.mxu0 %v2830_v48  ;;  %v7026_v48 = vld [vmem:[%s10524_s9 + $0x110] ss:$8 sps:$4 sm:$0xff]  }
 0x798   :  { %v2818_v12 = vmul.f32 %v7430_v42, %v2782_v54  ;;  %v9174_v37 = vadd.f32 %v2817_v47, %v8720_v62  ;;  %v10559_v54 = vld [vmem:[#allocation18_spill] sm:$0xff]  ;;  %3181 = vmatpush1.bf16.msra.mxu1 %v7065_v46  ;;  %v7032_v46 = vld [vmem:[%s10524_s9 + $0x130] ss:$8 sps:$4 sm:$0xff]  }
 0x799   :  { %3182 = vmatprep.subr.bf16.mxu1 %v7070_v9  ;;  %v7029_v42 = vld [vmem:[%s10524_s9 + $0x120] ss:$8 sps:$4 sm:$0xff]  }
 0x79a   :  { %v9183_v10 = vadd.f32 %v2818_v12, %v10558_v25  ;;  %v3464_v14 = vadd.f32 %v3463_v61, %v9174_v37 }
 0x79c   :  { %v2831_v55 = vpack.c.bf16 %v9183_v10, %v9174_v37  ;;  %v3465_v62 = vadd.f32 %v3464_v14, %v9183_v10  ;;  %3183 = vmatpush1.bf16.msra.mxu1 %v7068_v63  ;;  %v7736_v14 = vld [vmem:[%s10468_s4 + $0x18] sm:$0xff]  }
 0x79d   :  { %v7432_v5 = vpop.eup %7431  ;;  %3184 = vmatprep.subr.bf16.mxu1 %v7073_v3 }
 0x79e   :  { %6659 = vmatprep.subr.bf16.mxu0 %v2831_v55  ;;  %v2819_v27 = vmul.f32 %v7432_v5, %v2788_v19  ;;  %v7076_v19 = vld [vmem:[%s10469_s11 + $0x194] ss:$8 sps:$4 sm:$0xff]  }
 0x79f   :  { %v7434_v18 = vpop.eup %7433  ;;  %6660 = vmatpush3.bf16.msra.mxu0 %v2831_v55  ;;  %v7085_v55 = vld [vmem:[%s10469_s11 + $0x1c4] ss:$8 sps:$4 sm:$0xff]  }
 0x7a0   :  { %v2820_v58 = vmul.f32 %v7434_v18, %v2792_v1  ;;  %v9196_v30 = vadd.f32 %v2819_v27, %v10559_v54  ;;  %3185 = vmatpush1.bf16.msra.mxu1 %v7071_v15  ;;  %v7074_v1 = vld [vmem:[%s10469_s11 + $0x190] ss:$8 sps:$4 sm:$0xff]  }
 0x7a1   :  { %3186 = vmatprep.subr.bf16.mxu1 %v7076_v19  ;;  %v7739_v15 = vld [vmem:[%s10468_s4 + $0x30] sm:$0xff]  }
 0x7a2   :  { %v2828_v34 = vadd.f32 %v2820_v58, %v10560_v21  ;;  %v3466_v0 = vadd.f32 %v3465_v62, %v9196_v30  ;;  %v7737_v62 = vld [vmem:[%s10468_s4 + $0x20] sm:$0xff]   ;;  %v7038_v19 = vld [vmem:[%s10524_s9 + $0x150] ss:$8 sps:$4 sm:$0xff]  }
 0x7a3   :  { %v7037_v58 = vld [vmem:[%s10524_s9 + $0x144] ss:$8 sps:$4 sm:$0xff]  }
 0x7a4   :  { %v2832_v40 = vpack.c.bf16 %v2828_v34, %v9196_v30  ;;  %v3467_v16 = vadd.f32 %v3466_v0, %v2828_v34  ;;  %3187 = vmatpush1.bf16.msra.mxu1 %v7074_v1  ;;  %v7086_v0 = vld [vmem:[%s10469_s11 + $0x1d0] ss:$8 sps:$4 sm:$0xff]  }
 0x7a5   :  { %3188 = vmatprep.subr.bf16.mxu1 %v7079_v13  ;;  %v7041_v13 = vld [vmem:[%s10524_s9 + $0x160] ss:$8 sps:$4 sm:$0xff]  }
 0x7a6   :  { %6661 = vmatprep.subr.bf16.mxu0 %v2832_v40  ;;  %v3468_v29 = vrot.slane %v3467_v16, 4 }
 0x7a7   :  { %6662 = vmatpush3.bf16.msra.mxu0 %v2832_v40 }
 0x7a8   :  { %v3469_v49 = vadd.f32 %v3468_v29, %v3467_v16  ;;  %3871 = vmatprep.subr.bf16.mxu0 %v7025_v36  ;;  %3189 = vmatpush1.bf16.msra.mxu1 %v7077_v31  ;;  %v7738_v36 = vld [vmem:[%s10468_s4 + $0x28] sm:$0xff]   ;;  %v7044_v31 = vld [vmem:[%s10524_s9 + $0x170] ss:$8 sps:$4 sm:$0xff]  }
 0x7a9   :  { %3190 = vmatprep.subr.bf16.mxu1 %v7082_v23 }
 0x7aa   :  { %v3470_v4 = vrot.slane %v3469_v49, 2  ;;  %6664 = vmatmul.mubr.msk.bf16.vlgmr.msra.gmra.mrb[96].mxu0 %vm771_vm0, %v7734_v53 }
 0x7ab   :  { %6667 = vmatprep.mubr.msk.bf16.mxu0 %vm771_vm0, %v7735_v28  ;;  %3872 = vmatpush1.bf16.msra.mxu0 %v7023_v35  ;;  %v7046_v28 = vld [vmem:[%s10524_s9 + $0x174] ss:$8 sps:$4 sm:$0xff]  }
 0x7ac   :  { %v3471_v61 = vadd.f32 %v3470_v4, %v3469_v49  ;;  %3873 = vmatprep.subr.bf16.mxu0 %v7028_v17  ;;  %3191 = vmatpush1.bf16.msra.mxu1 %v7080_v20  ;;  %v7043_v49 = vld [vmem:[%s10524_s9 + $0x164] ss:$8 sps:$4 sm:$0xff]  }
 0x7ad   :  { %3192 = vmatprep.subr.bf16.mxu1 %v7085_v55 }
 0x7ae   :  { %v3472_v47 = vrot.slane %v3471_v61, 1 }
 0x7af   :  { %3874 = vmatpush1.bf16.msra.mxu0 %v7026_v48 }
 0x7b0   :  { %v3473_v12 = vadd.f32 %v3472_v47, %v3471_v61  ;;  %3875 = vmatprep.subr.bf16.mxu0 %v7031_v22  ;;  %v7740_v22 = vld [vmem:[%s10468_s4 + $0x38] sm:$0xff]  }
 0x7b2   :  { %v3474_v25 = vmul.f32 0.015625, %v3473_v12  ;;  %6668 = vmatmul.mubr.msk.bf16.gmra.mrb[100].mxu0 %vm771_vm0, %v7736_v14 }
 0x7b3   :  { %6671 = vmatprep.mubr.msk.bf16.mxu0 %vm771_vm0, %v7737_v62  ;;  %3876 = vmatpush1.bf16.msra.mxu0 %v7029_v42 }
 0x7b4   :  { %v9272_v5 = vsub.f32 %v9130_v56, %v3474_v25  ;;  %v9275_v9 = vsub.f32 %v9139_v8, %v3474_v25  ;;  %v9278_v27 = vsub.f32 %v9152_v43, %v3474_v25  ;;  %v9281_v18 = vsub.f32 %v9161_v38, %v3474_v25  ;;  %3877 = vmatprep.subr.bf16.mxu0 %v7034_v32  ;;  %v7083_v43 = vld [vmem:[%s10469_s11 + $0x1c0] ss:$8 sps:$4 sm:$0xff]  }
 0x7b5   :  { %v9287_v54 = vsub.f32 %v9174_v37, %v3474_v25  ;;  %v9290_v56 = vsub.f32 %v9183_v10, %v3474_v25  ;;  %v9293_v8 = vsub.f32 %v9196_v30, %v3474_v25  ;;  %v9295_v63 = vsub.f32 %v2828_v34, %v3474_v25  ;;  %v7088_v10 = vld [vmem:[%s10469_s11 + $0x1d4] ss:$8 sps:$4 sm:$0xff]   ;;  %v7035_v30 = vld [vmem:[%s10524_s9 + $0x140] ss:$8 sps:$4 sm:$0xff]   ;;  %3193 = vmatpush1.bf16.msra.mxu1 %v7083_v43 }
 0x7b6   :  { %v3483_v38 = vmul.f32 %v9272_v5, %v9272_v5  ;;  %v3484_v37 = vmul.f32 %v9275_v9, %v9275_v9  ;;  %v3485_v3 = vmul.f32 %v9278_v27, %v9278_v27  ;;  %v7040_v34 = vld [vmem:[%s10524_s9 + $0x154] ss:$8 sps:$4 sm:$0xff]   ;;  %v3486_v40 = vmul.f32 %v9281_v18, %v9281_v18  ;;  %3194 = vmatprep.subr.bf16.mxu1 %v7088_v10  ;;  %v6143_v10 = vld [vmem:[%s10471_s14 + $0x1] ss:$0 sm:$0xff] }
 0x7b7   :  { %3878 = vmatpush1.bf16.msra.mxu0 %v7032_v46  ;;  %v3487_v29 = vmul.f32 %v9287_v54, %v9287_v54  ;;  %v3488_v17 = vmul.f32 %v9290_v56, %v9290_v56  ;;  %v3489_v4 = vmul.f32 %v9293_v8, %v9293_v8  ;;  %v3490_v48 = vmul.f32 %v9295_v63, %v9295_v63  ;;  %v6142_v46 = vld [vmem:[%s10470_s13 + $0x1] ss:$0 sm:$0xff] }
 0x7b8   :  { %v3491_v21 = vadd.f32 %v3484_v37, %v3483_v38  ;;  %3879 = vmatprep.subr.bf16.mxu0 %v7037_v58 }
 0x7b9   :  { %3195 = vmatpush1.bf16.msra.mxu1 %v7086_v0 }
 0x7ba   :  { %v3492_v16 = vadd.f32 %v3491_v21, %v3485_v3  ;;  %6672 = vmatmul.mubr.msk.bf16.gmra.mrb[104].mxu0 %vm771_vm0, %v7738_v36 }
 0x7bb   :  { %6675 = vmatprep.mubr.msk.bf16.mxu0 %vm771_vm0, %v7739_v15  ;;  %3880 = vmatpush1.bf16.msra.mxu0 %v7035_v30 }
 0x7bc   :  { %v3493_v35 = vadd.f32 %v3492_v16, %v3486_v40  ;;  %3881 = vmatprep.subr.bf16.mxu0 %v7040_v34 }
 0x7be   :  { %v3494_v1 = vadd.f32 %v3493_v35, %v3487_v29 }
 0x7bf   :  { %3882 = vmatpush1.bf16.msra.mxu0 %v7038_v19 }
 0x7c0   :  { %v3495_v53 = vadd.f32 %v3494_v1, %v3488_v17  ;;  %3883 = vmatprep.subr.bf16.mxu0 %v7043_v49 }
 0x7c2   :  { %v3496_v61 = vadd.f32 %v3495_v53, %v3489_v4  ;;  %6676 = vmatmul.mubr.msk.bf16.gmra.mrb[108].mxu0 %vm771_vm0, %v7740_v22 }
 0x7c3   :  { %3884 = vmatpush1.bf16.msra.mxu0 %v7041_v13  ;;  %3903 = vmatprep.mubr.bf16.mxu0 %v10541_v33 }
 0x7c4   :  { %v3497_v23 = vadd.f32 %v3496_v61, %v3490_v48  ;;  %3885 = vmatprep.subr.bf16.mxu0 %v7046_v28  ;;  %v10561_v61 = vld [vmem:[#allocation9_spill] sm:$0xff] }
 0x7c6   :  { %v3498_v47 = vrot.slane %v3497_v23, 4 }
 0x7c7   :  { %3886 = vmatpush1.bf16.msra.mxu0 %v7044_v31  ;;  %v10562_v31 = vld [vmem:[#allocation10_spill] sm:$0xff] }
 0x7c8   :  { %v3499_v42 = vadd.f32 %v3498_v47, %v3497_v23  ;;  %v10563_v47 = vld [vmem:[#allocation11_spill] sm:$0xff] }
 0x7ca   :  { %v3500_v12 = vrot.slane %v3499_v42, 2 }
 0x7cc   :  { %v3501_v32 = vadd.f32 %v3500_v12, %v3499_v42  ;;  %v10564_v12 = vld [vmem:[#allocation12_spill] sm:$0xff] }
 0x7ce   :  { %v3502_v20 = vrot.slane %v3501_v32, 1 }
 0x7d0   :  { %v3503_v25 = vadd.f32 %v3502_v20, %v3501_v32  ;;  %v10565_v20 = vld [vmem:[#allocation13_spill] sm:$0xff] }
 0x7d2   :  { %v3504_v14 = vmul.f32 0.015625, %v3503_v25 }
 0x7d4   :  { %v3505_v55 = vadd.f32 1e-05, %v3504_v14  ;;  %v10566_v14 = vld [vmem:[#allocation14_spill] sm:$0xff] }
 0x7d6   :  { %7435 = vrsqrt.f32 %v3505_v55 }
 0x7e0   :  { %v7436_v62 = vpop.eup %7435 }
 0x7e1   :  { %v3507_v58 = vmul.f32 %v7436_v62, %v9272_v5  ;;  %v3508_v43 = vmul.f32 %v7436_v62, %v9275_v9  ;;  %v3509_v38 = vmul.f32 %v7436_v62, %v9278_v27  ;;  %v3510_v37 = vmul.f32 %v7436_v62, %v9281_v18 }
 0x7e2   :  { %v3511_v30 = vmul.f32 %v7436_v62, %v9287_v54  ;;  %v3512_v3 = vmul.f32 %v7436_v62, %v9290_v56  ;;  %v3513_v21 = vmul.f32 %v7436_v62, %v9293_v8  ;;  %v3514_v34 = vmul.f32 %v7436_v62, %v9295_v63  ;;  %v10567_v62 = vld [vmem:[#allocation15_spill] sm:$0xff] }
 0x7e3   :  { %v3521_v0 = vmul.f32 %v6142_v46, %v3507_v58  ;;  %v3522_v5 = vmul.f32 %v6142_v46, %v3508_v43  ;;  %v3523_v40 = vmul.f32 %v6142_v46, %v3509_v38  ;;  %v3524_v9 = vmul.f32 %v6142_v46, %v3510_v37  ;;  %v10568_v58 = vld [vmem:[#allocation16_spill] sm:$0xff] }
 0x7e4   :  { %v3525_v16 = vmul.f32 %v6142_v46, %v3511_v30  ;;  %v3526_v27 = vmul.f32 %v6142_v46, %v3512_v3  ;;  %v3527_v36 = vmul.f32 %v6142_v46, %v3513_v21  ;;  %v3528_v18 = vmul.f32 %v6142_v46, %v3514_v34  ;;  %v7089_v3 = vld [vmem:[%s10469_s11 + $0x1e0] ss:$8 sps:$4 sm:$0xff]   ;;  %v7091_v21 = vld [vmem:[%s10469_s11 + $0x1e4] ss:$8 sps:$4 sm:$0xff]   ;;  %v7092_v34 = vld [vmem:[%s10469_s11 + $0x1f0] ss:$8 sps:$4 sm:$0xff]  }
 0x7e5   :  { %v3535_v15 = vadd.f32 %v6143_v10, %v3521_v0  ;;  %v3536_v19 = vadd.f32 %v6143_v10, %v3522_v5  ;;  %v3537_v29 = vadd.f32 %v6143_v10, %v3523_v40  ;;  %v3538_v35 = vadd.f32 %v6143_v10, %v3524_v9  ;;  %3196 = vmatprep.subr.bf16.mxu1 %v7091_v21  ;;  %v7094_v0 = vld [vmem:[%s10469_s11 + $0x1f4] ss:$8 sps:$4 sm:$0xff]   ;;  %v7095_v5 = vld [vmem:[%s10526_s29 + $0x80] sm:$0xff]   ;;  %v7096_v40 = vld [vmem:[%s10526_s29 + $0x88] sm:$0xff]  }
 0x7e6   :  { %v3539_v49 = vadd.f32 %v6143_v10, %v3525_v16  ;;  %v3540_v54 = vadd.f32 %v6143_v10, %v3526_v27  ;;  %v3541_v17 = vadd.f32 %v6143_v10, %v3527_v36  ;;  %v3542_v56 = vadd.f32 %v6143_v10, %v3528_v18  ;;  %3197 = vmatpush1.bf16.msra.mxu1 %v7089_v3  ;;  %v7097_v9 = vld [vmem:[%s10526_s29 + $0x90] sm:$0xff]   ;;  %v7098_v16 = vld [vmem:[%s10526_s29 + $0x98] sm:$0xff]   ;;  %v7099_v27 = vld [vmem:[%s10526_s29 + $0xa0] sm:$0xff]  }
 0x7e7   :  { %v3543_v1 = vmax.f32 %v3535_v15, 0.0  ;;  %v3544_v8 = vmax.f32 %v3536_v19, 0.0  ;;  %v3545_v13 = vmax.f32 %v3537_v29, 0.0  ;;  %v3546_v63 = vmax.f32 %v3538_v35, 0.0  ;;  %3198 = vmatprep.subr.bf16.mxu1 %v7094_v0  ;;  %6679 = vmatprep.subr.bf16.mxu0 %v7095_v5  ;;  %v7100_v36 = vld [vmem:[%s10526_s29 + $0xa8] sm:$0xff]   ;;  %v7101_v18 = vld [vmem:[%s10526_s29 + $0xb0] sm:$0xff]  }
 0x7e8   :  { %v3547_v4 = vmax.f32 %v3539_v49, 0.0  ;;  %v3548_v53 = vmax.f32 %v3540_v54, 0.0  ;;  %v3549_v28 = vmax.f32 %v3541_v17, 0.0  ;;  %v3550_v48 = vmax.f32 %v3542_v56, 0.0  ;;  %v7102_v15 = vld [vmem:[%s10526_s29 + $0xb8] sm:$0xff]  }
 0x7e9   :  { %v3551_v22 = vadd.f32 %v3543_v1, %v10561_v61  ;;  %v3552_v23 = vadd.f32 %v3544_v8, %v10562_v31  ;;  %v3553_v42 = vadd.f32 %v3545_v13, %v10563_v47  ;;  %v3554_v32 = vadd.f32 %v3546_v63, %v10564_v12 }
 0x7ea   :  { %v3555_v25 = vadd.f32 %v3547_v4, %v10565_v20  ;;  %v3556_v55 = vadd.f32 %v3548_v53, %v10566_v14  ;;  %v3557_v46 = vadd.f32 %v3549_v28, %v10567_v62  ;;  %v3558_v43 = vadd.f32 %v3550_v48, %v10568_v58  ;;  %3199 = vmatpush1.bf16.msra.mxu1 %v7092_v34 }
 0x7eb   :  { %v3749_v38 = vpack.c.bf16 %v3552_v23, %v3551_v22  ;;  %v3750_v37 = vpack.c.bf16 %v3554_v32, %v3553_v42  ;;  %v2946_v63 = vpack.c.bf16 %v9053_v24, %v9045_v39  ;;  %v2948_v12 = vpack.c.bf16 %v9049_v45, %v9042_v50 }
 0x7ec   :  { %v3751_v10 = vpack.c.bf16 %v3556_v55, %v3555_v25  ;;  %v3752_v30 = vpack.c.bf16 %v3558_v43, %v3557_v46 }
 0x7ed   :  { %3904 = vmatmul.mubr.bf16.vlgmr.msra.gmra.mrb[112].mxu0 %v3749_v38 }
 0x7ee   :  { %3913 = vmatprep.mubr.bf16.mxu0 %v10541_v33  ;;  %6680 = vmatpush3.bf16.msra.mxu0 %v7095_v5 }
 0x7ef   :  { %6681 = vmatprep.subr.bf16.mxu0 %v7096_v40 }
 0x7f2   :  { %6682 = vmatpush3.bf16.msra.mxu0 %v7096_v40 }
 0x7f3   :  { %6683 = vmatprep.subr.bf16.mxu0 %v7097_v9 }
 0x7f5   :  { %3914 = vmatmul.mubr.bf16.gmra.mrb[116].mxu0 %v3750_v37  ;;  %v2950_v37 = vpack.c.bf16 %v9069_v7, %v9061_v44 }
 0x7f6   :  { %3923 = vmatprep.mubr.bf16.mxu0 %v10541_v33  ;;  %6684 = vmatpush3.bf16.msra.mxu0 %v7097_v9 }
 0x7f7   :  { %6685 = vmatprep.subr.bf16.mxu0 %v7098_v16 }
 0x7fa   :  { %6686 = vmatpush3.bf16.msra.mxu0 %v7098_v16 }
 0x7fb   :  { %6687 = vmatprep.subr.bf16.mxu0 %v7099_v27 }
 0x7fd   :  { %3924 = vmatmul.mubr.bf16.gmra.mrb[120].mxu0 %v3751_v10 }
 0x7fe   :  { %3933 = vmatprep.mubr.bf16.mxu0 %v10541_v33  ;;  %6688 = vmatpush3.bf16.msra.mxu0 %v7099_v27  ;;  %v2952_v27 = vpack.c.bf16 %v9065_v60, %v9058_v6 }
 0x7ff   :  { %6689 = vmatprep.subr.bf16.mxu0 %v7100_v36 }
 0x802   :  { %6690 = vmatpush3.bf16.msra.mxu0 %v7100_v36  ;;  %v2954_v36 = vpack.c.bf16 %v9085_v2, %v9077_v11 }
 0x803   :  { %6691 = vmatprep.subr.bf16.mxu0 %v7101_v18 }
 0x805   :  { %3934 = vmatmul.mubr.bf16.gmra.mrb[124].mxu0 %v3752_v30 }
 0x806   :  { %6692 = vmatpush3.bf16.msra.mxu0 %v7101_v18  ;;  %v2956_v18 = vpack.c.bf16 %v9081_v41, %v9074_v51 }
 0x807   :  { %6693 = vmatprep.subr.bf16.mxu0 %v7102_v15 }
 0x80a   :  { %6694 = vmatpush3.bf16.msra.mxu0 %v7102_v15  ;;  %v2958_v15 = vpack.c.bf16 %v9101_v59, %v9093_v26 }
 0x87d   :  { %v6665_v19 = vpop.f32.mrb[96].mxu0 }
 0x87e   :  { %v2867_v29 = vpop.f32.mrb[97].mxu0  ;;  %v2932_v49 = vand.u32 2147483647, %v6665_v19  ;;  %v6164_v19 = vld [vmem:[%s10538_s6 + $0x4] sm:$0x3] }
 0x87f   :  { %v6666_v35 = vpop.f32.mrb[98].mxu0  ;;  %v2930_v56 = vand.u32 2147483647, %v2867_v29  ;;  %v2960_v29 = vpack.c.bf16 %v9097_v52, %v9090_v57 }
 0x880   :  { %v2933_v54 = vand.u32 2147483647, %v6666_v35  ;;  %v2870_v17 = vpop.f32.mrb[99].mxu0  ;;  %v10569_v35 = vld [vmem:[#allocation3_spill] sm:$0xff] }
 0x881   :  { %v2931_v1 = vand.u32 2147483647, %v2870_v17  ;;  %v10570_v17 = vld [vmem:[#allocation2_spill] sm:$0xff] }
 0x882   :  { %v2949_v8 = vpack.c.bf16 %v2933_v54, %v2932_v49  ;;  %v3784_v49 = vrot.slane %v6164_v19, %v10569_v35 }
 0x883   :  { %v2947_v13 = vpack.c.bf16 %v2931_v1, %v2930_v56  ;;  %v3788_v56 = vrot.slane %v6164_v19, %v10570_v17 }
 0x885   :  { %3200 = vmatprep.mubr.bf16.mxu1 %v2947_v13  ;;  %v6669_v4 = vpop.f32.mrb[100].mxu0 }
 0x886   :  { %3201 = vmatmul.mubr.bf16.vlgmr.msra.gmra.mrb[80].mxu1 %v2946_v63  ;;  %v2936_v53 = vand.u32 2147483647, %v6669_v4  ;;  %v2883_v28 = vpop.f32.mrb[101].mxu0 }
 0x887   :  { %3210 = vmatprep.mubr.bf16.mxu1 %v2949_v8  ;;  %v2934_v48 = vand.u32 2147483647, %v2883_v28  ;;  %v6670_v61 = vpop.f32.mrb[102].mxu0 }
 0x888   :  { %v2937_v22 = vand.u32 2147483647, %v6670_v61  ;;  %v2886_v31 = vpop.f32.mrb[103].mxu0 }
 0x889   :  { %v2935_v23 = vand.u32 2147483647, %v2886_v31 }
 0x88a   :  { %v2953_v47 = vpack.c.bf16 %v2937_v22, %v2936_v53 }
 0x88b   :  { %v2951_v42 = vpack.c.bf16 %v2935_v23, %v2934_v48 }
 0x88d   :  { %v6673_v32 = vpop.f32.mrb[104].mxu0 }
 0x88e   :  { %3211 = vmatmul.mubr.bf16.gmra.mrb[84].mxu1 %v2948_v12  ;;  %v2940_v20 = vand.u32 2147483647, %v6673_v32  ;;  %v2899_v25 = vpop.f32.mrb[105].mxu0 }
 0x88f   :  { %3220 = vmatprep.mubr.bf16.mxu1 %v2951_v42  ;;  %v2938_v14 = vand.u32 2147483647, %v2899_v25  ;;  %v6674_v55 = vpop.f32.mrb[106].mxu0 }
 0x890   :  { %v2941_v62 = vand.u32 2147483647, %v6674_v55  ;;  %v2902_v46 = vpop.f32.mrb[107].mxu0 }
 0x891   :  { %v2939_v58 = vand.u32 2147483647, %v2902_v46 }
 0x892   :  { %v2957_v43 = vpack.c.bf16 %v2941_v62, %v2940_v20 }
 0x893   :  { %v2955_v38 = vpack.c.bf16 %v2939_v58, %v2938_v14 }
 0x895   :  { %v6677_v10 = vpop.f32.mrb[108].mxu0 }
 0x896   :  { %3221 = vmatmul.mubr.bf16.gmra.mrb[88].mxu1 %v2950_v37  ;;  %v2944_v30 = vand.u32 2147483647, %v6677_v10  ;;  %v2915_v3 = vpop.f32.mrb[109].mxu0 }
 0x897   :  { %3230 = vmatprep.mubr.bf16.mxu1 %v2953_v47  ;;  %v2942_v21 = vand.u32 2147483647, %v2915_v3  ;;  %v6678_v34 = vpop.f32.mrb[110].mxu0 }
 0x898   :  { %v2945_v0 = vand.u32 2147483647, %v6678_v34  ;;  %v2918_v5 = vpop.f32.mrb[111].mxu0 }
 0x899   :  { %v2943_v40 = vand.u32 2147483647, %v2918_v5 }
 0x89a   :  { %v2961_v9 = vpack.c.bf16 %v2945_v0, %v2944_v30 }
 0x89b   :  { %v2959_v16 = vpack.c.bf16 %v2943_v40, %v2942_v21 }
 0x89e   :  { %3231 = vmatmul.mubr.bf16.gmra.mrb[92].mxu1 %v2952_v27 }
 0x89f   :  { %3240 = vmatprep.mubr.bf16.mxu1 %v2955_v38 }
 0x8a6   :  { %3241 = vmatmul.mubr.bf16.gmra.mrb[96].mxu1 %v2954_v36 }
 0x8a7   :  { %3250 = vmatprep.mubr.bf16.mxu1 %v2957_v43 }
 0x8ae   :  { %3251 = vmatmul.mubr.bf16.gmra.mrb[100].mxu1 %v2956_v18 }
 0x8af   :  { %3260 = vmatprep.mubr.bf16.mxu1 %v2959_v16  ;;  %v6091_v16 = vld [vmem:[%s10472_s12 + $0x2] sm:$0x3] }
 0x8b0   :  { %v9468_v27 = vrot.slane %v6091_v16, %v10569_v35 }
 0x8b6   :  { %3261 = vmatmul.mubr.bf16.gmra.mrb[104].mxu1 %v2958_v15 }
 0x8b7   :  { %3270 = vmatprep.mubr.bf16.mxu1 %v2961_v9 }
 0x8be   :  { %3271 = vmatmul.mubr.bf16.gmra.mrb[108].mxu1 %v2960_v29 }
 0x8bf   :  { %4375 = vmatprep.mubr.bf16.mxu1 %v10541_v33 }
 0x8c0   :  { %v3905_v54 = vpop.f32.mrb[112].mxu0 }
 0x8c1   :  { %v9439_v1 = vadd.f32 %v3905_v54, %v3784_v49  ;;  %v3907_v8 = vpop.f32.mrb[113].mxu0 }
 0x8c2   :  { %v3909_v13 = vpop.f32.mrb[114].mxu0  ;;  %v3908_v53 = vadd.f32 %v3907_v8, %v3788_v56 }
 0x8c3   :  { %v9441_v63 = vadd.f32 %v3909_v13, %v3784_v49  ;;  %v3911_v4 = vpop.f32.mrb[115].mxu0 }
 0x8c4   :  { %v3912_v28 = vadd.f32 %v3911_v4, %v3788_v56 }
 0x8c6   :  { %v9443_v48 = vpack.c.bf16 %v3912_v28, %v3908_v53  ;;  %v9474_v28 = vrot.slane %v6091_v16, %v10570_v17 }
 0x8c8   :  { %v3915_v61 = vpop.f32.mrb[116].mxu0  ;;  %6711 = vmatprep.subr.bf16.mxu0 %v9443_v48 }
 0x8c9   :  { %v9446_v22 = vadd.f32 %v3915_v61, %v3784_v49  ;;  %v3917_v31 = vpop.f32.mrb[117].mxu0 }
 0x8ca   :  { %v3918_v23 = vadd.f32 %v3917_v31, %v3788_v56  ;;  %v3919_v47 = vpop.f32.mrb[118].mxu0 }
 0x8cb   :  { %v9448_v42 = vadd.f32 %v3919_v47, %v3784_v49  ;;  %v3921_v12 = vpop.f32.mrb[119].mxu0 }
 0x8cc   :  { %v3922_v32 = vadd.f32 %v3921_v12, %v3788_v56 }
 0x8ce   :  { %v9450_v20 = vpack.c.bf16 %v3922_v32, %v3918_v23 }
 0x8d0   :  { %v3925_v25 = vpop.f32.mrb[120].mxu0 }
 0x8d1   :  { %v9452_v14 = vadd.f32 %v3925_v25, %v3784_v49  ;;  %v3927_v55 = vpop.f32.mrb[121].mxu0 }
 0x8d2   :  { %v3928_v62 = vadd.f32 %v3927_v55, %v3788_v56  ;;  %v3929_v46 = vpop.f32.mrb[122].mxu0 }
 0x8d3   :  { %v9454_v58 = vadd.f32 %v3929_v46, %v3784_v49  ;;  %v3931_v43 = vpop.f32.mrb[123].mxu0 }
 0x8d4   :  { %v3932_v38 = vadd.f32 %v3931_v43, %v3788_v56 }
 0x8d6   :  { %v9456_v37 = vpack.c.bf16 %v3932_v38, %v3928_v62 }
 0x8d8   :  { %v3935_v10 = vpop.f32.mrb[124].mxu0 }
 0x8d9   :  { %v9458_v30 = vadd.f32 %v3935_v10, %v3784_v49  ;;  %v3937_v3 = vpop.f32.mrb[125].mxu0 }
 0x8da   :  { %v3938_v21 = vadd.f32 %v3937_v3, %v3788_v56  ;;  %v3939_v34 = vpop.f32.mrb[126].mxu0 }
 0x8db   :  { %v9460_v0 = vadd.f32 %v3939_v34, %v3784_v49  ;;  %v3941_v5 = vpop.f32.mrb[127].mxu0 }
 0x8dc   :  { %v3942_v40 = vadd.f32 %v3941_v5, %v3788_v56 }
 0x8de   :  { %v9462_v9 = vpack.c.bf16 %v3942_v40, %v3938_v21 }
 0x959   :  { %v3202_v36 = vpop.f32.mrb[80].mxu1 }
 0x95a   :  { %v3203_v18 = vadd.f32 %v3202_v36, %v9468_v27  ;;  %v3204_v15 = vpop.f32.mrb[81].mxu1 }
 0x95b   :  { %v3206_v19 = vpop.f32.mrb[82].mxu1  ;;  %v3205_v32 = vadd.f32 %v3204_v15, %v9474_v28 }
 0x95c   :  { %v6124_v29 = vmul.f32 -1.442695, %v3203_v18  ;;  %v3207_v49 = vadd.f32 %v3206_v19, %v9468_v27  ;;  %v3208_v54 = vpop.f32.mrb[83].mxu1 }
 0x95d   :  { %v3209_v10 = vadd.f32 %v3208_v54, %v9474_v28 }
 0x95e   :  { %7437 = vpow2.f32 %v6124_v29  ;;  %v6125_v56 = vmul.f32 -1.442695, %v3207_v49 }
 0x960   :  { %7439 = vpow2.f32 %v6125_v56 }
 0x961   :  { %v3212_v8 = vpop.f32.mrb[84].mxu1 }
 0x962   :  { %v3213_v13 = vadd.f32 %v3212_v8, %v9468_v27  ;;  %v3214_v4 = vpop.f32.mrb[85].mxu1 }
 0x963   :  { %v3216_v53 = vpop.f32.mrb[86].mxu1  ;;  %v3215_v36 = vadd.f32 %v3214_v4, %v9474_v28 }
 0x964   :  { %v6126_v61 = vmul.f32 -1.442695, %v3213_v13  ;;  %v3217_v31 = vadd.f32 %v3216_v53, %v9468_v27  ;;  %v3218_v23 = vpop.f32.mrb[87].mxu1 }
 0x965   :  { %v3219_v56 = vadd.f32 %v3218_v23, %v9474_v28 }
 0x966   :  { %7441 = vpow2.f32 %v6126_v61  ;;  %v6127_v47 = vmul.f32 -1.442695, %v3217_v31 }
 0x968   :  { %v7438_v12 = vpop.eup %7437  ;;  %7443 = vpow2.f32 %v6127_v47 }
 0x969   :  { %v3329_v25 = vadd.f32 1.0, %v7438_v12  ;;  %v3222_v55 = vpop.f32.mrb[88].mxu1 }
 0x96a   :  { %v7440_v62 = vpop.eup %7439  ;;  %v3223_v46 = vadd.f32 %v3222_v55, %v9468_v27  ;;  %v3224_v43 = vpop.f32.mrb[89].mxu1 }
 0x96b   :  { %7445 = vrcp.f32 %v3329_v25  ;;  %v3330_v38 = vadd.f32 1.0, %v7440_v62  ;;  %v3226_v3 = vpop.f32.mrb[90].mxu1  ;;  %v3225_v4 = vadd.f32 %v3224_v43, %v9474_v28 }
 0x96c   :  { %7447 = vtanh.f32 %v3205_v32  ;;  %v6128_v21 = vmul.f32 -1.442695, %v3223_v46  ;;  %v3227_v34 = vadd.f32 %v3226_v3, %v9468_v27  ;;  %v3228_v5 = vpop.f32.mrb[91].mxu1 }
 0x96d   :  { %7449 = vrcp.f32 %v3330_v38 }
 0x96e   :  { %7451 = vpow2.f32 %v6128_v21  ;;  %v6129_v40 = vmul.f32 -1.442695, %v3227_v34 }
 0x96f   :  { %7453 = vtanh.f32 %v3209_v10 }
 0x970   :  { %v7442_v16 = vpop.eup %7441  ;;  %7455 = vpow2.f32 %v6129_v40 }
 0x971   :  { %v3331_v18 = vadd.f32 1.0, %v7442_v16  ;;  %v3232_v15 = vpop.f32.mrb[92].mxu1 }
 0x972   :  { %v7444_v19 = vpop.eup %7443  ;;  %v3233_v29 = vadd.f32 %v3232_v15, %v9468_v27  ;;  %v3234_v49 = vpop.f32.mrb[93].mxu1 }
 0x973   :  { %7457 = vrcp.f32 %v3331_v18  ;;  %v3332_v54 = vadd.f32 1.0, %v7444_v19  ;;  %v3236_v8 = vpop.f32.mrb[94].mxu1 }
 0x974   :  { %7459 = vtanh.f32 %v3215_v36  ;;  %v6130_v13 = vmul.f32 -1.442695, %v3233_v29  ;;  %v3237_v53 = vadd.f32 %v3236_v8, %v9468_v27  ;;  %v3238_v61 = vpop.f32.mrb[95].mxu1  ;;  %v3235_v29 = vadd.f32 %v3234_v49, %v9474_v28 }
 0x975   :  { %v7446_v31 = vpop.eup %7445  ;;  %7461 = vrcp.f32 %v3332_v54 }
 0x976   :  { %v7448_v47 = vpop.eup %7447  ;;  %v3409_v12 = vsub.f32 1.0, %v7446_v31  ;;  %7463 = vpow2.f32 %v6130_v13  ;;  %v6131_v32 = vmul.f32 -1.442695, %v3237_v53  ;;  %v3393_v62 = vmul.f32 %v7446_v31, %v9045_v39 }
 0x977   :  { %v7450_v25 = vpop.eup %7449  ;;  %7465 = vtanh.f32 %v3219_v56  ;;  %v3229_v39 = vadd.f32 %v3228_v5, %v9474_v28 }
 0x978   :  { %v7452_v55 = vpop.eup %7451  ;;  %v3425_v23 = vmul.f32 %v7448_v47, %v3409_v12  ;;  %v3410_v46 = vsub.f32 1.0, %v7450_v25  ;;  %7467 = vpow2.f32 %v6131_v32  ;;  %v3394_v43 = vmul.f32 %v7450_v25, %v9053_v24 }
 0x979   :  { %v7454_v38 = vpop.eup %7453  ;;  %v3333_v10 = vadd.f32 1.0, %v7452_v55  ;;  %7469 = vtanh.f32 %v3225_v4  ;;  %v3242_v3 = vpop.f32.mrb[96].mxu1 }
 0x97a   :  { %v7456_v21 = vpop.eup %7455  ;;  %v9487_v34 = vadd.f32 %v3425_v23, %v3393_v62  ;;  %v3426_v40 = vmul.f32 %v7454_v38, %v3410_v46  ;;  %v3243_v16 = vadd.f32 %v3242_v3, %v9468_v27  ;;  %v3244_v36 = vpop.f32.mrb[97].mxu1 }
 0x97b   :  { %7471 = vrcp.f32 %v3333_v10  ;;  %v3334_v18 = vadd.f32 1.0, %v7456_v21  ;;  %v3246_v15 = vpop.f32.mrb[98].mxu1 }
 0x97c   :  { %v9492_v19 = vadd.f32 %v3426_v40, %v3394_v43  ;;  %v6132_v54 = vmul.f32 -1.442695, %v3243_v16  ;;  %v3247_v56 = vadd.f32 %v3246_v15, %v9468_v27  ;;  %v3248_v8 = vpop.f32.mrb[99].mxu1 }
 0x97d   :  { %v7458_v13 = vpop.eup %7457  ;;  %7473 = vrcp.f32 %v3334_v18 }
 0x97e   :  { %v7460_v24 = vpop.eup %7459  ;;  %v3563_v53 = vadd.f32 %v9492_v19, %v9487_v34  ;;  %v3411_v31 = vsub.f32 1.0, %v7458_v13  ;;  %7475 = vpow2.f32 %v6132_v54  ;;  %v6133_v5 = vmul.f32 -1.442695, %v3247_v56 }
 0x97f   :  { %v7462_v4 = vpop.eup %7461  ;;  %7477 = vtanh.f32 %v3229_v39  ;;  %v3395_v12 = vmul.f32 %v7458_v13, %v9042_v50  ;;  %v3239_v50 = vadd.f32 %v3238_v61, %v9474_v28 }
 0x980   :  { %v7464_v47 = vpop.eup %7463  ;;  %v3427_v32 = vmul.f32 %v7460_v24, %v3411_v31  ;;  %v3412_v49 = vsub.f32 1.0, %v7462_v4  ;;  %7479 = vtanh.f32 %v3235_v29  ;;  %v3396_v38 = vmul.f32 %v7462_v4, %v9049_v45 }
 0x981   :  { %v7466_v25 = vpop.eup %7465  ;;  %v3335_v55 = vadd.f32 1.0, %v7464_v47  ;;  %7481 = vpow2.f32 %v6133_v5  ;;  %v3252_v62 = vpop.f32.mrb[100].mxu1 }
 0x982   :  { %v7468_v23 = vpop.eup %7467  ;;  %v9499_v46 = vadd.f32 %v3427_v32, %v3395_v12  ;;  %v3428_v10 = vmul.f32 %v7466_v25, %v3412_v49  ;;  %v3253_v3 = vadd.f32 %v3252_v62, %v9468_v27  ;;  %v3254_v21 = vpop.f32.mrb[101].mxu1  ;;  %v3245_v32 = vadd.f32 %v3244_v36, %v9474_v28 }
 0x983   :  { %v7470_v43 = vpop.eup %7469  ;;  %7483 = vrcp.f32 %v3335_v55  ;;  %v3336_v40 = vadd.f32 1.0, %v7468_v23  ;;  %v3256_v16 = vpop.f32.mrb[102].mxu1 }
 0x984   :  { %v3564_v18 = vadd.f32 %v3563_v53, %v9499_v46  ;;  %v9505_v39 = vadd.f32 %v3428_v10, %v3396_v38  ;;  %v6134_v15 = vmul.f32 -1.442695, %v3253_v3  ;;  %v3257_v29 = vadd.f32 %v3256_v16, %v9468_v27  ;;  %v3258_v54 = vpop.f32.mrb[103].mxu1 }
 0x985   :  { %v7472_v56 = vpop.eup %7471  ;;  %7485 = vrcp.f32 %v3336_v40 }
 0x986   :  { %v3565_v45 = vadd.f32 %v3564_v18, %v9505_v39  ;;  %v3413_v13 = vsub.f32 1.0, %v7472_v56  ;;  %7487 = vpow2.f32 %v6134_v15  ;;  %v6135_v31 = vmul.f32 -1.442695, %v3257_v29 }
 0x987   :  { %v7474_v24 = vpop.eup %7473  ;;  %7489 = vtanh.f32 %v3239_v50  ;;  %v3397_v61 = vmul.f32 %v7472_v56, %v9061_v44  ;;  %v3249_v44 = vadd.f32 %v3248_v8, %v9474_v28 }
 0x988   :  { %v7476_v4 = vpop.eup %7475  ;;  %v3429_v5 = vmul.f32 %v7470_v43, %v3413_v13  ;;  %v3414_v53 = vsub.f32 1.0, %v7474_v24  ;;  %7491 = vpow2.f32 %v6135_v31  ;;  %v3398_v62 = vmul.f32 %v7474_v24, %v9069_v7 }
 0x989   :  { %v7478_v47 = vpop.eup %7477  ;;  %v3337_v12 = vadd.f32 1.0, %v7476_v4  ;;  %v3262_v49 = vpop.f32.mrb[104].mxu1 }
 0x98a   :  { %v7480_v25 = vpop.eup %7479  ;;  %v9511_v55 = vadd.f32 %v3429_v5, %v3397_v61  ;;  %v3430_v23 = vmul.f32 %v7478_v47, %v3414_v53  ;;  %v3263_v38 = vadd.f32 %v3262_v49, %v9468_v27  ;;  %v3264_v10 = vpop.f32.mrb[105].mxu1  ;;  %v3255_v53 = vadd.f32 %v3254_v21, %v9474_v28 }
 0x98b   :  { %v7482_v3 = vpop.eup %7481  ;;  %7493 = vrcp.f32 %v3337_v12  ;;  %v3266_v43 = vpop.f32.mrb[106].mxu1 }
 0x98c   :  { %v3566_v40 = vadd.f32 %v3565_v45, %v9511_v55  ;;  %v9517_v50 = vadd.f32 %v3430_v23, %v3398_v62  ;;  %v3338_v36 = vadd.f32 1.0, %v7482_v3  ;;  %v6136_v16 = vmul.f32 -1.442695, %v3263_v38  ;;  %v3268_v18 = vpop.f32.mrb[107].mxu1 }
 0x98d   :  { %v7484_v15 = vpop.eup %7483  ;;  %7495 = vtanh.f32 %v3245_v32  ;;  %v3267_v7 = vadd.f32 %v3266_v43, %v9468_v27 }
 0x98e   :  { %v3567_v29 = vadd.f32 %v3566_v40, %v9517_v50  ;;  %v3415_v56 = vsub.f32 1.0, %v7484_v15  ;;  %7497 = vrcp.f32 %v3338_v36  ;;  %v3399_v31 = vmul.f32 %v7484_v15, %v9058_v6 }
 0x98f   :  { %v7486_v13 = vpop.eup %7485  ;;  %7499 = vpow2.f32 %v6136_v16  ;;  %v6137_v24 = vmul.f32 -1.442695, %v3267_v7  ;;  %v3259_v6 = vadd.f32 %v3258_v54, %v9474_v28 }
 0x990   :  { %v7488_v8 = vpop.eup %7487  ;;  %v3431_v45 = vmul.f32 %v7480_v25, %v3415_v56  ;;  %v3416_v4 = vsub.f32 1.0, %v7486_v13  ;;  %7501 = vtanh.f32 %v3249_v44  ;;  %v3400_v32 = vmul.f32 %v7486_v13, %v9065_v60 }
 0x991   :  { %v7490_v61 = vpop.eup %7489  ;;  %v3339_v5 = vadd.f32 1.0, %v7488_v8  ;;  %7503 = vpow2.f32 %v6137_v24  ;;  %v3272_v47 = vpop.f32.mrb[108].mxu1 }
 0x992   :  { %v9523_v12 = vadd.f32 %v3431_v45, %v3399_v31  ;;  %v3432_v49 = vmul.f32 %v7490_v61, %v3416_v4  ;;  %v3273_v62 = vadd.f32 %v3272_v47, %v9468_v27  ;;  %v3274_v23 = vpop.f32.mrb[109].mxu1  ;;  %v7492_v38 = vpop.eup %7491  ;;  %v3265_v31 = vadd.f32 %v3264_v10, %v9474_v28 }
 0x993   :  { %7505 = vrcp.f32 %v3339_v5  ;;  %v3276_v25 = vpop.f32.mrb[110].mxu1  ;;  %v3340_v21 = vadd.f32 1.0, %v7492_v38 }
 0x994   :  { %v3568_v3 = vadd.f32 %v3567_v29, %v9523_v12  ;;  %v9529_v44 = vadd.f32 %v3432_v49, %v3400_v32  ;;  %v6138_v43 = vmul.f32 -1.442695, %v3273_v62  ;;  %v3278_v40 = vpop.f32.mrb[111].mxu1  ;;  %7507 = vtanh.f32 %v3255_v53 }
 0x995   :  { %v7494_v36 = vpop.eup %7493  ;;  %v3277_v60 = vadd.f32 %v3276_v25, %v9468_v27  ;;  %7509 = vrcp.f32 %v3340_v21 }
 0x996   :  { %v3569_v16 = vadd.f32 %v3568_v3, %v9529_v44  ;;  %v3417_v15 = vsub.f32 1.0, %v7494_v36  ;;  %7511 = vpow2.f32 %v6138_v43  ;;  %v3401_v13 = vmul.f32 %v7494_v36, %v9077_v11 }
 0x997   :  { %v7496_v7 = vpop.eup %7495  ;;  %v6139_v56 = vmul.f32 -1.442695, %v3277_v60  ;;  %7513 = vtanh.f32 %v3259_v6  ;;  %v3269_v11 = vadd.f32 %v3268_v18, %v9474_v28  ;;  %v3275_v36 = vadd.f32 %v3274_v23, %v9474_v28 }
 0x998   :  { %v7498_v54 = vpop.eup %7497  ;;  %v3433_v29 = vmul.f32 %v7496_v7, %v3417_v15 }
 0x999   :  { %v7500_v24 = vpop.eup %7499  ;;  %v3418_v8 = vsub.f32 1.0, %v7498_v54  ;;  %7515 = vpow2.f32 %v6139_v56  ;;  %v3402_v5 = vmul.f32 %v7498_v54, %v9085_v2 }
 0x99a   :  { %v7502_v45 = vpop.eup %7501  ;;  %v9535_v4 = vadd.f32 %v3433_v29, %v3401_v13  ;;  %v3341_v27 = vadd.f32 1.0, %v7500_v24  ;;  %v3279_v29 = vadd.f32 %v3278_v40, %v9474_v28 }
 0x99b   :  { %v7504_v61 = vpop.eup %7503  ;;  %v3434_v53 = vmul.f32 %v7502_v45, %v3418_v8 }
 0x99c   :  { %v3570_v47 = vadd.f32 %v3569_v16, %v9535_v4  ;;  %7517 = vrcp.f32 %v3341_v27  ;;  %v3342_v32 = vadd.f32 1.0, %v7504_v61 }
 0x99d   :  { %v7506_v49 = vpop.eup %7505  ;;  %v9540_v62 = vadd.f32 %v3434_v53, %v3402_v5  ;;  %7519 = vtanh.f32 %v3265_v31 }
 0x99e   :  { %v3419_v10 = vsub.f32 1.0, %v7506_v49  ;;  %7521 = vrcp.f32 %v3342_v32  ;;  %v7508_v38 = vpop.eup %7507  ;;  %v3403_v3 = vmul.f32 %v7506_v49, %v9074_v51 }
 0x99f   :  { %v3571_v6 = vadd.f32 %v3570_v47, %v9540_v62  ;;  %v7510_v25 = vpop.eup %7509  ;;  %7523 = vtanh.f32 %v3269_v11 }
 0x9a0   :  { %v3435_v2 = vmul.f32 %v7508_v38, %v3419_v10  ;;  %v7512_v21 = vpop.eup %7511  ;;  %v3420_v43 = vsub.f32 1.0, %v7510_v25  ;;  %v3404_v7 = vmul.f32 %v7510_v25, %v9081_v41 }
 0x9a1   :  { %v7514_v60 = vpop.eup %7513  ;;  %v3343_v16 = vadd.f32 1.0, %v7512_v21 }
 0x9a2   :  { %v3451_v18 = vadd.f32 %v3435_v2, %v3403_v3  ;;  %v3436_v56 = vmul.f32 %v7514_v60, %v3420_v43 }
 0x9a3   :  { %v7516_v15 = vpop.eup %7515  ;;  %7525 = vrcp.f32 %v3343_v16 }
 0x9a4   :  { %v3572_v54 = vadd.f32 %v3571_v6, %v3451_v18  ;;  %v3344_v13 = vadd.f32 1.0, %v7516_v15  ;;  %v3452_v24 = vadd.f32 %v3436_v56, %v3404_v7  ;;  %7527 = vtanh.f32 %v3275_v36 }
 0x9a6   :  { %v7518_v51 = vpop.eup %7517  ;;  %7529 = vrcp.f32 %v3344_v13  ;;  %v3573_v31 = vadd.f32 %v3572_v54, %v3452_v24 }
 0x9a7   :  { %v7520_v8 = vpop.eup %7519  ;;  %v3421_v45 = vsub.f32 1.0, %v7518_v51  ;;  %7531 = vtanh.f32 %v3279_v29  ;;  %v3405_v27 = vmul.f32 %v7518_v51, %v9093_v26 }
 0x9a8   :  { %v7522_v23 = vpop.eup %7521 }
 0x9a9   :  { %v3437_v61 = vmul.f32 %v7520_v8, %v3421_v45  ;;  %v3422_v5 = vsub.f32 1.0, %v7522_v23  ;;  %v7524_v41 = vpop.eup %7523  ;;  %v3406_v47 = vmul.f32 %v7522_v23, %v9101_v59 }
 0x9ab   :  { %v3453_v53 = vadd.f32 %v3437_v61, %v3405_v27  ;;  %v3438_v32 = vmul.f32 %v7524_v41, %v3422_v5 }
 0x9ad   :  { %v3574_v11 = vadd.f32 %v3573_v31, %v3453_v53  ;;  %v3454_v28 = vadd.f32 %v3438_v32, %v3406_v47  ;;  %v7526_v40 = vpop.eup %7525 }
 0x9ae   :  { %v7528_v49 = vpop.eup %7527  ;;  %v3423_v38 = vsub.f32 1.0, %v7526_v40  ;;  %v3407_v25 = vmul.f32 %v7526_v40, %v9090_v57 }
 0x9af   :  { %v3575_v10 = vadd.f32 %v3574_v11, %v3454_v28 }
 0x9b0   :  { %v7530_v6 = vpop.eup %7529  ;;  %v3439_v3 = vmul.f32 %v7528_v49, %v3423_v38 }
 0x9b1   :  { %v3424_v2 = vsub.f32 1.0, %v7530_v6  ;;  %v7532_v21 = vpop.eup %7531  ;;  %v3408_v43 = vmul.f32 %v7530_v6, %v9097_v52 }
 0x9b2   :  { %v3455_v26 = vadd.f32 %v3439_v3, %v3407_v25 }
 0x9b3   :  { %v3440_v36 = vmul.f32 %v7532_v21, %v3424_v2 }
 0x9b4   :  { %v3576_v60 = vadd.f32 %v3575_v10, %v3455_v26 }
 0x9b5   :  { %v3456_v16 = vadd.f32 %v3440_v36, %v3408_v43 }
 0x9b7   :  { %v3577_v59 = vadd.f32 %v3576_v60, %v3456_v16 }
 0x9b9   :  { %v3578_v15 = vrot.slane %v3577_v59, 4 }
 0x9bb   :  { %v3579_v7 = vadd.f32 %v3578_v15, %v3577_v59 }
 0x9bd   :  { %v3580_v56 = vrot.slane %v3579_v7, 2 }
 0x9bf   :  { %v3581_v54 = vadd.f32 %v3580_v56, %v3579_v7 }
 0x9c1   :  { %v3582_v13 = vrot.slane %v3581_v54, 1 }
 0x9c3   :  { %v3583_v29 = vadd.f32 %v3582_v13, %v3581_v54 }
 0x9c5   :  { %v3584_v51 = vmul.f32 0.0078125, %v3583_v29 }
 0x9c7   :  { %v9551_v8 = vsub.f32 %v3456_v16, %v3584_v51  ;;  %v3585_v57 = vsub.f32 %v9487_v34, %v3584_v51  ;;  %v3586_v31 = vsub.f32 %v9492_v19, %v3584_v51  ;;  %v3587_v45 = vsub.f32 %v9499_v46, %v3584_v51 }
 0x9c8   :  { %v3588_v52 = vsub.f32 %v9505_v39, %v3584_v51  ;;  %v3589_v23 = vsub.f32 %v9511_v55, %v3584_v51  ;;  %v3590_v27 = vsub.f32 %v9517_v50, %v3584_v51  ;;  %v3591_v61 = vsub.f32 %v9523_v12, %v3584_v51 }
 0x9c9   :  { %v3592_v5 = vsub.f32 %v9529_v44, %v3584_v51  ;;  %v9562_v41 = vsub.f32 %v9535_v4, %v3584_v51  ;;  %v9565_v47 = vsub.f32 %v9540_v62, %v3584_v51  ;;  %v9567_v34 = vsub.f32 %v3451_v18, %v3584_v51 }
 0x9ca   :  { %v9569_v19 = vsub.f32 %v3452_v24, %v3584_v51  ;;  %v9571_v46 = vsub.f32 %v3453_v53, %v3584_v51  ;;  %v9573_v39 = vsub.f32 %v3454_v28, %v3584_v51  ;;  %v9575_v55 = vsub.f32 %v3455_v26, %v3584_v51 }
 0x9cb   :  { %v3601_v50 = vmul.f32 %v3585_v57, %v3585_v57  ;;  %v3602_v12 = vmul.f32 %v3586_v31, %v3586_v31  ;;  %v3603_v32 = vmul.f32 %v3587_v45, %v3587_v45  ;;  %v3604_v11 = vmul.f32 %v3588_v52, %v3588_v52 }
 0x9cc   :  { %v3605_v40 = vmul.f32 %v3589_v23, %v3589_v23  ;;  %v3606_v62 = vmul.f32 %v3590_v27, %v3590_v27  ;;  %v3607_v18 = vmul.f32 %v3591_v61, %v3591_v61  ;;  %v3608_v24 = vmul.f32 %v3592_v5, %v3592_v5 }
 0x9cd   :  { %v3617_v44 = vadd.f32 %v3602_v12, %v3601_v50  ;;  %v3609_v53 = vmul.f32 %v9562_v41, %v9562_v41  ;;  %v3610_v25 = vmul.f32 %v9565_v47, %v9565_v47  ;;  %v3611_v2 = vmul.f32 %v9567_v34, %v9567_v34 }
 0x9ce   :  { %v3612_v26 = vmul.f32 %v9569_v19, %v9569_v19  ;;  %v3613_v36 = vmul.f32 %v9571_v46, %v9571_v46  ;;  %v3614_v16 = vmul.f32 %v9573_v39, %v9573_v39  ;;  %v3615_v15 = vmul.f32 %v9575_v55, %v9575_v55 }
 0x9cf   :  { %v3618_v4 = vadd.f32 %v3617_v44, %v3603_v32  ;;  %v3616_v56 = vmul.f32 %v9551_v8, %v9551_v8 }
 0x9d1   :  { %v3619_v49 = vadd.f32 %v3618_v4, %v3604_v11 }
 0x9d3   :  { %v3620_v10 = vadd.f32 %v3619_v49, %v3605_v40  ;;  %v9598_v49 = vld [vmem:[%s10473_s15 + $0x1] ss:$0 sm:$0xff] }
 0x9d5   :  { %v3621_v38 = vadd.f32 %v3620_v10, %v3606_v62 }
 0x9d7   :  { %v3622_v6 = vadd.f32 %v3621_v38, %v3607_v18 }
 0x9d9   :  { %v3623_v28 = vadd.f32 %v3622_v6, %v3608_v24  ;;  %v9607_v24 = vld [vmem:[%s10474_s16 + $0x1] ss:$0 sm:$0xff] }
 0x9db   :  { %v3624_v3 = vadd.f32 %v3623_v28, %v3609_v53 }
 0x9dd   :  { %v3625_v21 = vadd.f32 %v3624_v3, %v3610_v25 }
 0x9df   :  { %v3626_v43 = vadd.f32 %v3625_v21, %v3611_v2 }
 0x9e1   :  { %v3627_v60 = vadd.f32 %v3626_v43, %v3612_v26 }
 0x9e3   :  { %v3628_v59 = vadd.f32 %v3627_v60, %v3613_v36 }
 0x9e5   :  { %v3629_v7 = vadd.f32 %v3628_v59, %v3614_v16 }
 0x9e7   :  { %v3630_v54 = vadd.f32 %v3629_v7, %v3615_v15 }
 0x9e9   :  { %v3631_v13 = vadd.f32 %v3630_v54, %v3616_v56 }
 0x9eb   :  { %v3632_v29 = vrot.slane %v3631_v13, 4 }
 0x9ed   :  { %v3633_v51 = vadd.f32 %v3632_v29, %v3631_v13 }
 0x9ef   :  { %v3634_v50 = vrot.slane %v3633_v51, 2 }
 0x9f1   :  { %v3635_v12 = vadd.f32 %v3634_v50, %v3633_v51  ;;  %v7741_v50 = vld [vmem:[%s10475_s23] sm:$0xff] }
 0x9f3   :  { %v3636_v32 = vrot.slane %v3635_v12, 1 }
 0x9f5   :  { %v3637_v44 = vadd.f32 %v3636_v32, %v3635_v12  ;;  %v7742_v32 = vld [vmem:[%s10475_s23 + $0x8] sm:$0xff] }
 0x9f7   :  { %v3638_v11 = vmul.f32 0.0078125, %v3637_v44 }
 0x9f9   :  { %v3639_v4 = vadd.f32 1e-05, %v3638_v11  ;;  %v7743_v11 = vld [vmem:[%s10475_s23 + $0x10] sm:$0xff] }
 0x9fb   :  { %7533 = vrsqrt.f32 %v3639_v4 }
 0xa05   :  { %v9593_v40 = vpop.eup %7533 }
 0xa06   :  { %v3641_v62 = vmul.f32 %v9593_v40, %v3585_v57  ;;  %v3642_v10 = vmul.f32 %v9593_v40, %v3586_v31  ;;  %v3643_v18 = vmul.f32 %v9593_v40, %v3587_v45  ;;  %v3644_v38 = vmul.f32 %v9593_v40, %v3588_v52 }
 0xa07   :  { %v3645_v6 = vmul.f32 %v9593_v40, %v3589_v23  ;;  %v3646_v53 = vmul.f32 %v9593_v40, %v3590_v27  ;;  %v3647_v28 = vmul.f32 %v9593_v40, %v3591_v61  ;;  %v3648_v25 = vmul.f32 %v9593_v40, %v3592_v5 }
 0xa08   :  { %v3663_v57 = vmul.f32 %v9598_v49, %v3641_v62  ;;  %v3664_v31 = vmul.f32 %v9598_v49, %v3642_v10  ;;  %v3665_v45 = vmul.f32 %v9598_v49, %v3643_v18  ;;  %v3666_v52 = vmul.f32 %v9598_v49, %v3644_v38  ;;  %v7744_v62 = vld [vmem:[%s10475_s23 + $0x18] sm:$0xff]  ;;  %v7745_v18 = vld [vmem:[%s10475_s23 + $0x20] sm:$0xff] }
 0xa09   :  { %v3667_v3 = vmul.f32 %v9598_v49, %v3645_v6  ;;  %v3668_v2 = vmul.f32 %v9598_v49, %v3646_v53  ;;  %v3669_v23 = vmul.f32 %v9598_v49, %v3647_v28  ;;  %v3670_v27 = vmul.f32 %v9598_v49, %v3648_v25  ;;  %v7746_v6 = vld [vmem:[%s10475_s23 + $0x28] sm:$0xff]  ;;  %v7747_v28 = vld [vmem:[%s10475_s23 + $0x30] sm:$0xff] }
 0xa0a   :  { %v3685_v61 = vadd.f32 %v9607_v24, %v3663_v57  ;;  %v3686_v5 = vadd.f32 %v9607_v24, %v3664_v31  ;;  %v3687_v21 = vadd.f32 %v9607_v24, %v3665_v45  ;;  %v3688_v26 = vadd.f32 %v9607_v24, %v3666_v52  ;;  %v7748_v57 = vld [vmem:[%s10475_s23 + $0x38] sm:$0xff] }
 0xa0b   :  { %v3689_v43 = vadd.f32 %v9607_v24, %v3667_v3  ;;  %v3690_v36 = vadd.f32 %v9607_v24, %v3668_v2  ;;  %v3691_v60 = vadd.f32 %v9607_v24, %v3669_v23  ;;  %v3692_v16 = vadd.f32 %v9607_v24, %v3670_v27 }
 0xa0c   :  { %v3701_v59 = vmax.f32 %v3685_v61, 0.0  ;;  %v3702_v15 = vmax.f32 %v3686_v5, 0.0  ;;  %v3703_v7 = vmax.f32 %v3687_v21, 0.0  ;;  %v3704_v56 = vmax.f32 %v3688_v26, 0.0 }
 0xa0d   :  { %v3705_v54 = vmax.f32 %v3689_v43, 0.0  ;;  %v3706_v13 = vmax.f32 %v3690_v36, 0.0  ;;  %v3707_v29 = vmax.f32 %v3691_v60, 0.0  ;;  %v3708_v51 = vmax.f32 %v3692_v16, 0.0 }
 0xa0e   :  { %v3717_v12 = vadd.f32 %v7741_v50, %v3701_v59  ;;  %v3718_v44 = vadd.f32 %v7742_v32, %v3702_v15  ;;  %v3719_v4 = vadd.f32 %v7743_v11, %v3703_v7  ;;  %v3720_v10 = vadd.f32 %v7744_v62, %v3704_v56  ;;  %v7751_v11 = vld [vmem:[%s10475_s23 + $0x50] sm:$0xff] }
 0xa0f   :  { %v3721_v38 = vadd.f32 %v7745_v18, %v3705_v54  ;;  %v3722_v53 = vadd.f32 %v7746_v6, %v3706_v13  ;;  %v9650_v25 = vadd.f32 %v7747_v28, %v3707_v29  ;;  %v9655_v31 = vadd.f32 %v7748_v57, %v3708_v51  ;;  %v7749_v51 = vld [vmem:[%s10475_s23 + $0x40] sm:$0xff]  ;;  %v7754_v28 = vld [vmem:[%s10475_s23 + $0x68] sm:$0xff]  ;;  %v7755_v57 = vld [vmem:[%s10475_s23 + $0x70] sm:$0xff] }
 0xa10   :  { %3733 = vst [vmem:[%s10476_s24] sm:$0xff] %v3717_v12  ;;  %3734 = vst [vmem:[%s10476_s24 + $0x8] sm:$0xff] %v3718_v44  ;;  %v3753_v45 = vpack.c.bf16 %v3718_v44, %v3717_v12  ;;  %v3754_v52 = vpack.c.bf16 %v3720_v10, %v3719_v4  ;;  %v3649_v3 = vmul.f32 %v9593_v40, %v9562_v41  ;;  %v7750_v12 = vld [vmem:[%s10475_s23 + $0x48] sm:$0xff] }
 0xa11   :  { %3735 = vst [vmem:[%s10476_s24 + $0x10] sm:$0xff] %v3719_v4  ;;  %3736 = vst [vmem:[%s10476_s24 + $0x18] sm:$0xff] %v3720_v10  ;;  %v3650_v2 = vmul.f32 %v9593_v40, %v9565_v47  ;;  %v3755_v23 = vpack.c.bf16 %v3722_v53, %v3721_v38  ;;  %v3756_v41 = vpack.c.bf16 %v9655_v31, %v9650_v25  ;;  %v7752_v4 = vld [vmem:[%s10475_s23 + $0x58] sm:$0xff] }
 0xa12   :  { %3737 = vst [vmem:[%s10476_s24 + $0x20] sm:$0xff] %v3721_v38  ;;  %3738 = vst [vmem:[%s10476_s24 + $0x28] sm:$0xff] %v3722_v53  ;;  %v3651_v47 = vmul.f32 %v9593_v40, %v9567_v34  ;;  %v3652_v27 = vmul.f32 %v9593_v40, %v9569_v19  ;;  %6695 = vmatprep.mubr.bf16.mxu0 %v3753_v45  ;;  %v3671_v61 = vmul.f32 %v9598_v49, %v3649_v3  ;;  %v7753_v38 = vld [vmem:[%s10475_s23 + $0x60] sm:$0xff]  ;;  %v7756_v45 = vld [vmem:[%s10475_s23 + $0x78] sm:$0xff] }
 0xa13   :  { %3739 = vst [vmem:[%s10476_s24 + $0x30] sm:$0xff] %v9650_v25  ;;  %3740 = vst [vmem:[%s10476_s24 + $0x38] sm:$0xff] %v9655_v31  ;;  %v3672_v5 = vmul.f32 %v9598_v49, %v3650_v2  ;;  %v3653_v21 = vmul.f32 %v9593_v40, %v9571_v46  ;;  %v3654_v26 = vmul.f32 %v9593_v40, %v9573_v39  ;;  %6696 = vmatmul.mubr.bf16.vlgmr.msra.gmra.mrb[128].mxu0 %v3754_v52 }
 0xa14   :  { %v3673_v43 = vmul.f32 %v9598_v49, %v3651_v47  ;;  %v3674_v36 = vmul.f32 %v9598_v49, %v3652_v27  ;;  %v3655_v34 = vmul.f32 %v9593_v40, %v9575_v55  ;;  %v3656_v19 = vmul.f32 %v9593_v40, %v9551_v8  ;;  %6712 = vmatpush3.bf16.msra.mxu0 %v9443_v48  ;;  %v7760_v47 = vld [vmem:[%s10531_s10 + $0x18] sm:$0xff]   ;;  %v7761_v27 = vld [vmem:[%s10531_s10 + $0x20] sm:$0xff]  }
 0xa15   :  { %6699 = vmatprep.mubr.bf16.mxu0 %v3755_v23  ;;  %v3693_v60 = vadd.f32 %v9607_v24, %v3671_v61  ;;  %v3694_v46 = vadd.f32 %v9607_v24, %v3672_v5  ;;  %v3675_v39 = vmul.f32 %v9598_v49, %v3653_v21  ;;  %6713 = vmatprep.subr.bf16.mxu0 %v9450_v20  ;;  %v7757_v23 = vld [vmem:[%s10531_s10] sm:$0xff]   ;;  %v7762_v61 = vld [vmem:[%s10531_s10 + $0x28] sm:$0xff]   ;;  %v7763_v5 = vld [vmem:[%s10531_s10 + $0x30] sm:$0xff]  }
 0xa16   :  { %v3695_v16 = vadd.f32 %v9607_v24, %v3673_v43  ;;  %v3696_v59 = vadd.f32 %v9607_v24, %v3674_v36  ;;  %v3676_v55 = vmul.f32 %v9598_v49, %v3654_v26  ;;  %v3677_v15 = vmul.f32 %v9598_v49, %v3655_v34  ;;  %v7764_v21 = vld [vmem:[%s10531_s10 + $0x38] sm:$0xff]   ;;  %v7765_v26 = vld [vmem:[%s10468_s4] sm:$0xff]  }
 0xa17   :  { %v3709_v8 = vmax.f32 %v3693_v60, 0.0  ;;  %v3710_v40 = vmax.f32 %v3694_v46, 0.0  ;;  %v3697_v48 = vadd.f32 %v9607_v24, %v3675_v39  ;;  %v3678_v7 = vmul.f32 %v9598_v49, %v3656_v19  ;;  %v9811_v43 = vld [vmem:[%s10539_s3 + $0x2] ss:$0 sm:$0xff] }
 0xa18   :  { %v3711_v56 = vmax.f32 %v3695_v16, 0.0  ;;  %v3712_v54 = vmax.f32 %v3696_v59, 0.0  ;;  %v3698_v13 = vadd.f32 %v9607_v24, %v3676_v55  ;;  %v3699_v29 = vadd.f32 %v9607_v24, %v3677_v15  ;;  %6714 = vmatpush3.bf16.msra.mxu0 %v9450_v20 }
 0xa19   :  { %v3725_v50 = vadd.f32 %v7749_v51, %v3709_v8  ;;  %v3726_v32 = vadd.f32 %v7750_v12, %v3710_v40  ;;  %v3713_v44 = vmax.f32 %v3697_v48, 0.0  ;;  %v3700_v49 = vadd.f32 %v9607_v24, %v3678_v7  ;;  %6715 = vmatprep.subr.bf16.mxu0 %v9456_v37 }
 0xa1a   :  { %v3727_v20 = vadd.f32 %v7751_v11, %v3711_v56  ;;  %v3728_v62 = vadd.f32 %v7752_v4, %v3712_v54  ;;  %v3714_v10 = vmax.f32 %v3698_v13, 0.0  ;;  %v3715_v18 = vmax.f32 %v3699_v29, 0.0 }
 0xa1b   :  { %3741 = vst [vmem:[%s10476_s24 + $0x40] sm:$0xff] %v3725_v50  ;;  %3742 = vst [vmem:[%s10476_s24 + $0x48] sm:$0xff] %v3726_v32  ;;  %v3757_v24 = vpack.c.bf16 %v3726_v32, %v3725_v50  ;;  %v3729_v6 = vadd.f32 %v7753_v38, %v3713_v44  ;;  %v3716_v53 = vmax.f32 %v3700_v49, 0.0  ;;  %6700 = vmatmul.mubr.bf16.gmra.mrb[132].mxu0 %v3756_v41  ;;  %v7758_v41 = vld [vmem:[%s10531_s10 + $0x8] sm:$0xff]  }
 0xa1c   :  { %3743 = vst [vmem:[%s10476_s24 + $0x50] sm:$0xff] %v3727_v20  ;;  %3744 = vst [vmem:[%s10476_s24 + $0x58] sm:$0xff] %v3728_v62  ;;  %v3730_v25 = vadd.f32 %v7754_v28, %v3714_v10  ;;  %v3731_v31 = vadd.f32 %v7755_v57, %v3715_v18  ;;  %6716 = vmatpush3.bf16.msra.mxu0 %v9456_v37  ;;  %v3758_v37 = vpack.c.bf16 %v3728_v62, %v3727_v20 }
 0xa1d   :  { %6703 = vmatprep.mubr.bf16.mxu0 %v3757_v24  ;;  %3745 = vst [vmem:[%s10476_s24 + $0x60] sm:$0xff] %v3729_v6  ;;  %v3732_v52 = vadd.f32 %v7756_v45, %v3716_v53  ;;  %6717 = vmatprep.subr.bf16.mxu0 %v9462_v9 }
 0xa1e   :  { %3746 = vst [vmem:[%s10476_s24 + $0x68] sm:$0xff] %v3730_v25  ;;  %3747 = vst [vmem:[%s10476_s24 + $0x70] sm:$0xff] %v3731_v31  ;;  %v3759_v3 = vpack.c.bf16 %v3730_v25, %v3729_v6 }
 0xa1f   :  { %3748 = vst [vmem:[%s10476_s24 + $0x78] sm:$0xff] %v3732_v52  ;;  %v3760_v2 = vpack.c.bf16 %v3732_v52, %v3731_v31 }
 0xa20   :  { %6718 = vmatpush3.bf16.msra.mxu0 %v9462_v9  ;;  %v7759_v9 = vld [vmem:[%s10531_s10 + $0x10] sm:$0xff]  }
 0xa23   :  { %6704 = vmatmul.mubr.bf16.gmra.mrb[136].mxu0 %v3758_v37 }
 0xa24   :  { %6707 = vmatprep.mubr.bf16.mxu0 %v3759_v3 }
 0xa2b   :  { %6708 = vmatmul.mubr.bf16.gmra.mrb[140].mxu0 %v3760_v2 }
 0xa2c   :  { %6719 = vmatprep.mubr.msk.bf16.mxu0 %vm771_vm0, %v7757_v23 }
 0xa33   :  { %6720 = vmatmul.mubr.msk.bf16.vlgmr.msra.gmra.mrb[144].mxu0 %vm771_vm0, %v7758_v41 }
 0xa34   :  { %6723 = vmatprep.mubr.msk.bf16.mxu0 %vm771_vm0, %v7759_v9 }
 0xa3b   :  { %6724 = vmatmul.mubr.msk.bf16.gmra.mrb[148].mxu0 %vm771_vm0, %v7760_v47 }
 0xa3c   :  { %6727 = vmatprep.mubr.msk.bf16.mxu0 %vm771_vm0, %v7761_v27 }
 0xa43   :  { %6728 = vmatmul.mubr.msk.bf16.gmra.mrb[152].mxu0 %vm771_vm0, %v7762_v61 }
 0xa44   :  { %6731 = vmatprep.mubr.msk.bf16.mxu0 %vm771_vm0, %v7763_v5 }
 0xa4b   :  { %6732 = vmatmul.mubr.msk.bf16.gmra.mrb[156].mxu0 %vm771_vm0, %v7764_v21 }
 0xa4c   :  { %6743 = vmatprep.mubr.msk.bf16.mxu0 %vm771_vm0, %v7765_v26 }
 0xae6   :  { %v6697_v36 = vpop.f32.mrb[128].mxu0 }
 0xae7   :  { %v9814_v34 = vadd.f32 %v6697_v36, %v9811_v43  ;;  %v4051_v19 = vpop.f32.mrb[129].mxu0 }
 0xae8   :  { %v9817_v60 = vadd.f32 %v9811_v43, %v4051_v19  ;;  %v6698_v46 = vpop.f32.mrb[130].mxu0 }
 0xae9   :  { %v6217_v39 = vmul.f32 -1.442695, %v9814_v34  ;;  %v9821_v16 = vadd.f32 %v6698_v46, %v9811_v43  ;;  %v4054_v59 = vpop.f32.mrb[131].mxu0 }
 0xaea   :  { %v6215_v55 = vmul.f32 -1.442695, %v9817_v60  ;;  %v9825_v15 = vadd.f32 %v9811_v43, %v4054_v59 }
 0xaeb   :  { %7535 = vpow2.f32 %v6217_v39  ;;  %v6218_v8 = vmul.f32 -1.442695, %v9821_v16 }
 0xaec   :  { %7537 = vpow2.f32 %v6215_v55  ;;  %v6216_v40 = vmul.f32 -1.442695, %v9825_v15 }
 0xaed   :  { %7539 = vpow2.f32 %v6218_v8 }
 0xaee   :  { %7541 = vpow2.f32 %v6216_v40  ;;  %v6701_v48 = vpop.f32.mrb[132].mxu0 }
 0xaef   :  { %v9830_v7 = vadd.f32 %v6701_v48, %v9811_v43  ;;  %v4067_v56 = vpop.f32.mrb[133].mxu0 }
 0xaf0   :  { %v9833_v54 = vadd.f32 %v9811_v43, %v4067_v56  ;;  %v6702_v13 = vpop.f32.mrb[134].mxu0 }
 0xaf1   :  { %v6221_v29 = vmul.f32 -1.442695, %v9830_v7  ;;  %v9837_v51 = vadd.f32 %v6702_v13, %v9811_v43  ;;  %v4070_v50 = vpop.f32.mrb[135].mxu0 }
 0xaf2   :  { %v6219_v12 = vmul.f32 -1.442695, %v9833_v54  ;;  %v9841_v32 = vadd.f32 %v9811_v43, %v4070_v50 }
 0xaf3   :  { %7543 = vpow2.f32 %v6221_v29  ;;  %v6222_v44 = vmul.f32 -1.442695, %v9837_v51 }
 0xaf4   :  { %7545 = vpow2.f32 %v6219_v12  ;;  %v6220_v49 = vmul.f32 -1.442695, %v9841_v32 }
 0xaf5   :  { %v7536_v11 = vpop.eup %7535  ;;  %7547 = vpow2.f32 %v6222_v44 }
 0xaf6   :  { %v7538_v20 = vpop.eup %7537  ;;  %v4265_v4 = vadd.f32 1.0, %v7536_v11  ;;  %7549 = vpow2.f32 %v6220_v49  ;;  %v6705_v62 = vpop.f32.mrb[136].mxu0 }
 0xaf7   :  { %v7540_v10 = vpop.eup %7539  ;;  %v4263_v18 = vadd.f32 1.0, %v7538_v20  ;;  %v9846_v24 = vadd.f32 %v6705_v62, %v9811_v43  ;;  %v4083_v38 = vpop.f32.mrb[137].mxu0 }
 0xaf8   :  { %v7542_v6 = vpop.eup %7541  ;;  %7551 = vrcp.f32 %v4265_v4  ;;  %v4266_v53 = vadd.f32 1.0, %v7540_v10  ;;  %v9849_v28 = vadd.f32 %v9811_v43, %v4083_v38  ;;  %v6706_v25 = vpop.f32.mrb[138].mxu0 }
 0xaf9   :  { %7553 = vrcp.f32 %v4263_v18  ;;  %v4264_v57 = vadd.f32 1.0, %v7542_v6  ;;  %v6225_v31 = vmul.f32 -1.442695, %v9846_v24  ;;  %v9853_v45 = vadd.f32 %v6706_v25, %v9811_v43  ;;  %v4086_v52 = vpop.f32.mrb[139].mxu0 }
 0xafa   :  { %7555 = vrcp.f32 %v4266_v53  ;;  %v6223_v37 = vmul.f32 -1.442695, %v9849_v28  ;;  %v9857_v3 = vadd.f32 %v9811_v43, %v4086_v52 }
 0xafb   :  { %7557 = vrcp.f32 %v4264_v57  ;;  %v6226_v2 = vmul.f32 -1.442695, %v9853_v45 }
 0xafc   :  { %7559 = vpow2.f32 %v6225_v31  ;;  %v6224_v23 = vmul.f32 -1.442695, %v9857_v3 }
 0xafd   :  { %v7544_v41 = vpop.eup %7543  ;;  %7561 = vpow2.f32 %v6223_v37 }
 0xafe   :  { %v7546_v9 = vpop.eup %7545  ;;  %v4269_v47 = vadd.f32 1.0, %v7544_v41  ;;  %7563 = vpow2.f32 %v6226_v2  ;;  %v6709_v27 = vpop.f32.mrb[140].mxu0 }
 0xaff   :  { %v7548_v61 = vpop.eup %7547  ;;  %v4267_v5 = vadd.f32 1.0, %v7546_v9  ;;  %7565 = vpow2.f32 %v6224_v23  ;;  %v9862_v21 = vadd.f32 %v6709_v27, %v9811_v43  ;;  %v4099_v26 = vpop.f32.mrb[141].mxu0 }
 0xb00   :  { %v7550_v36 = vpop.eup %7549  ;;  %7567 = vrcp.f32 %v4269_v47  ;;  %v4270_v19 = vadd.f32 1.0, %v7548_v61  ;;  %v9865_v46 = vadd.f32 %v9811_v43, %v4099_v26  ;;  %v6710_v39 = vpop.f32.mrb[142].mxu0 }
 0xb01   :  { %7569 = vrcp.f32 %v4267_v5  ;;  %v4268_v59 = vadd.f32 1.0, %v7550_v36  ;;  %v6229_v55 = vmul.f32 -1.442695, %v9862_v21  ;;  %v9869_v8 = vadd.f32 %v6710_v39, %v9811_v43  ;;  %v4102_v40 = vpop.f32.mrb[143].mxu0 }
 0xb02   :  { %v7552_v48 = vpop.eup %7551  ;;  %7571 = vrcp.f32 %v4270_v19  ;;  %v6227_v56 = vmul.f32 -1.442695, %v9865_v46  ;;  %v9873_v13 = vadd.f32 %v9811_v43, %v4102_v40 }
 0xb03   :  { %v7554_v29 = vpop.eup %7553  ;;  %7573 = vrcp.f32 %v4268_v59  ;;  %v6230_v50 = vmul.f32 -1.442695, %v9869_v8 }
 0xb04   :  { %v7556_v12 = vpop.eup %7555  ;;  %7575 = vpow2.f32 %v6229_v55  ;;  %v6228_v44 = vmul.f32 -1.442695, %v9873_v13 }
 0xb05   :  { %v7558_v49 = vpop.eup %7557  ;;  %7577 = vpow2.f32 %v6227_v56  ;;  %v4330_v26 = vpack.c.bf16 %v7556_v12, %v7552_v48 }
 0xb06   :  { %v7560_v11 = vpop.eup %7559  ;;  %7579 = vpow2.f32 %v6230_v50  ;;  %v6721_v20 = vpop.f32.mrb[144].mxu0  ;;  %v4328_v4 = vpack.c.bf16 %v7558_v49, %v7554_v29 }
 0xb07   :  { %v7562_v62 = vpop.eup %7561  ;;  %v4273_v10 = vadd.f32 1.0, %v7560_v11  ;;  %7581 = vpow2.f32 %v6228_v44  ;;  %v4152_v18 = vpop.f32.mrb[145].mxu0  ;;  %v4313_v25 = vmul.f32 %v7552_v48, %v6721_v20 }
 0xb08   :  { %v7564_v43 = vpop.eup %7563  ;;  %v6722_v38 = vpop.f32.mrb[146].mxu0  ;;  %4343 = vmatprep.subr.bf16.mxu1 %v4328_v4  ;;  %v4271_v53 = vadd.f32 1.0, %v7562_v62  ;;  %v4311_v23 = vmul.f32 %v7554_v29, %v4152_v18 }
 0xb09   :  { %v7566_v6 = vpop.eup %7565  ;;  %v4314_v57 = vmul.f32 %v7556_v12, %v6722_v38  ;;  %v4155_v31 = vpop.f32.mrb[147].mxu0  ;;  %v4274_v37 = vadd.f32 1.0, %v7564_v43  ;;  %7583 = vrcp.f32 %v4273_v10 }
 0xb0a   :  { %v7568_v52 = vpop.eup %7567  ;;  %v4272_v2 = vadd.f32 1.0, %v7566_v6  ;;  %v4312_v41 = vmul.f32 %v7558_v49, %v4155_v31 }
 0xb0b   :  { %v7570_v9 = vpop.eup %7569  ;;  %v4329_v47 = vpack.c.bf16 %v4314_v57, %v4313_v25 }
 0xb0c   :  { %v7572_v27 = vpop.eup %7571  ;;  %7585 = vrcp.f32 %v4272_v2  ;;  %v4327_v61 = vpack.c.bf16 %v4312_v41, %v4311_v23 }
 0xb0d   :  { %v7574_v5 = vpop.eup %7573  ;;  %7587 = vrcp.f32 %v4271_v53  ;;  %v4334_v38 = vpack.c.bf16 %v7572_v27, %v7568_v52 }
 0xb0e   :  { %v7576_v36 = vpop.eup %7575  ;;  %7589 = vrcp.f32 %v4274_v37  ;;  %v6725_v19 = vpop.f32.mrb[148].mxu0  ;;  %4344 = vmatpush1.bf16.msra.mxu1 %v4327_v61  ;;  %v4332_v20 = vpack.c.bf16 %v7574_v5, %v7570_v9 }
 0xb0f   :  { %v7578_v39 = vpop.eup %7577  ;;  %v4277_v59 = vadd.f32 1.0, %v7576_v36  ;;  %v4168_v55 = vpop.f32.mrb[149].mxu0  ;;  %4345 = vmatprep.subr.bf16.mxu1 %v4330_v26  ;;  %v4317_v44 = vmul.f32 %v7568_v52, %v6725_v19 }
 0xb10   :  { %v7580_v40 = vpop.eup %7579  ;;  %v6726_v56 = vpop.f32.mrb[150].mxu0  ;;  %v4275_v50 = vadd.f32 1.0, %v7578_v39  ;;  %v4315_v10 = vmul.f32 %v7570_v9, %v4168_v55 }
 0xb11   :  { %v7582_v29 = vpop.eup %7581  ;;  %v4318_v49 = vmul.f32 %v7572_v27, %v6726_v56  ;;  %v4171_v11 = vpop.f32.mrb[151].mxu0  ;;  %v4278_v4 = vadd.f32 1.0, %v7580_v40  ;;  %7591 = vrcp.f32 %v4277_v59 }
 0xb12   :  { %v4276_v62 = vadd.f32 1.0, %v7582_v29  ;;  %v4316_v48 = vmul.f32 %v7574_v5, %v4171_v11  ;;  %4346 = vmatpush1.bf16.msra.mxu1 %v4329_v47 }
 0xb13   :  { %v4333_v12 = vpack.c.bf16 %v4318_v49, %v4317_v44  ;;  %4347 = vmatprep.subr.bf16.mxu1 %v4332_v20  ;;  %v7584_v43 = vpop.eup %7583 }
 0xb14   :  { %7593 = vrcp.f32 %v4276_v62  ;;  %v4331_v18 = vpack.c.bf16 %v4316_v48, %v4315_v10  ;;  %v7766_v10 = vld [vmem:[%s10540_s7] sm:$0xff]   ;;  %v7767_v48 = vld [vmem:[%s10540_s7 + $0x8] sm:$0xff]  }
 0xb15   :  { %7595 = vrcp.f32 %v4275_v50 }
 0xb16   :  { %v7586_v6 = vpop.eup %7585  ;;  %7597 = vrcp.f32 %v4278_v4  ;;  %v6729_v53 = vpop.f32.mrb[152].mxu0  ;;  %4348 = vmatpush1.bf16.msra.mxu1 %v4331_v18  ;;  %v7769_v18 = vld [vmem:[%s10540_s7 + $0x18] sm:$0xff]  }
 0xb17   :  { %v7588_v25 = vpop.eup %7587  ;;  %v4184_v57 = vpop.f32.mrb[153].mxu0  ;;  %4349 = vmatprep.subr.bf16.mxu1 %v4334_v38  ;;  %v4321_v2 = vmul.f32 %v7584_v43, %v6729_v53  ;;  %v7105_v38 = vld [vmem:[%s10469_s11 + $0x204] ss:$8 sps:$4 sm:$0xff]  }
 0xb18   :  { %v7590_v31 = vpop.eup %7589  ;;  %v6730_v37 = vpop.f32.mrb[154].mxu0  ;;  %v4336_v9 = vpack.c.bf16 %v7586_v6, %v7588_v25  ;;  %v4319_v47 = vmul.f32 %v7588_v25, %v4184_v57  ;;  %v7111_v53 = vld [vmem:[%s10469_s11 + $0x224] ss:$8 sps:$4 sm:$0xff]   ;;  %v7109_v25 = vld [vmem:[%s10469_s11 + $0x220] ss:$8 sps:$4 sm:$0xff]  }
 0xb19   :  { %v4322_v23 = vmul.f32 %v7590_v31, %v6730_v37  ;;  %v4187_v41 = vpop.f32.mrb[155].mxu0  ;;  %v4338_v27 = vpack.c.bf16 %v7590_v31, %v7584_v43  ;;  %v7103_v43 = vld [vmem:[%s10469_s11 + $0x200] ss:$8 sps:$4 sm:$0xff]   ;;  %v7114_v57 = vld [vmem:[%s10469_s11 + $0x234] ss:$8 sps:$4 sm:$0xff]  }
 0xb1a   :  { %v4320_v61 = vmul.f32 %v7586_v6, %v4187_v41  ;;  %4350 = vmatpush1.bf16.msra.mxu1 %v4333_v12  ;;  %v7768_v12 = vld [vmem:[%s10540_s7 + $0x10] sm:$0xff]   ;;  %v7117_v37 = vld [vmem:[%s10469_s11 + $0x244] ss:$8 sps:$4 sm:$0xff]   ;;  %s10572_s7 = sld [smem:[#allocation31_spill]] }
 0xb1b   :  { %v4337_v5 = vpack.c.bf16 %v4322_v23, %v4321_v2  ;;  %4351 = vmatprep.subr.bf16.mxu1 %v4336_v9  ;;  %v7592_v52 = vpop.eup %7591  ;;  %v7108_v6 = vld [vmem:[%s10469_s11 + $0x214] ss:$8 sps:$4 sm:$0xff]   ;;  %v7112_v31 = vld [vmem:[%s10469_s11 + $0x230] ss:$8 sps:$4 sm:$0xff]   ;;  %v7115_v2 = vld [vmem:[%s10469_s11 + $0x240] ss:$8 sps:$4 sm:$0xff]  }
 0xb1c   :  { %v4335_v26 = vpack.c.bf16 %v4320_v61, %v4319_v47  ;;  %v7120_v23 = vld [vmem:[%s10469_s11 + $0x254] ss:$8 sps:$4 sm:$0xff]   ;;  %v7118_v41 = vld [vmem:[%s10469_s11 + $0x250] ss:$8 sps:$4 sm:$0xff]   ;;  %v7123_v9 = vld [vmem:[%s10469_s11 + $0x264] ss:$8 sps:$4 sm:$0xff]  }
 0xb1d   :  { %v7121_v47 = vld [vmem:[%s10469_s11 + $0x260] ss:$8 sps:$4 sm:$0xff]   ;;  %v7126_v61 = vld [vmem:[%s10469_s11 + $0x274] ss:$8 sps:$4 sm:$0xff]  }
 0xb1e   :  { %v7594_v36 = vpop.eup %7593  ;;  %v6733_v19 = vpop.f32.mrb[156].mxu0  ;;  %4352 = vmatpush1.bf16.msra.mxu1 %v4335_v26  ;;  %v7129_v26 = vld [vmem:[%s10469_s11 + $0x284] ss:$8 sps:$4 sm:$0xff]  }
 0xb1f   :  { %v7596_v39 = vpop.eup %7595  ;;  %v4200_v59 = vpop.f32.mrb[157].mxu0  ;;  %4353 = vmatprep.subr.bf16.mxu1 %v4338_v27  ;;  %v4325_v56 = vmul.f32 %v7592_v52, %v6733_v19  ;;  %v7132_v27 = vld [vmem:[%s10469_s11 + $0x294] ss:$8 sps:$4 sm:$0xff]   ;;  %v7135_v19 = vld [vmem:[%s10469_s11 + $0x2a4] ss:$8 sps:$4 sm:$0xff]  }
 0xb20   :  { %v7598_v55 = vpop.eup %7597  ;;  %v6734_v40 = vpop.f32.mrb[158].mxu0  ;;  %v4340_v44 = vpack.c.bf16 %v7594_v36, %v7596_v39  ;;  %v4323_v49 = vmul.f32 %v7596_v39, %v4200_v59  ;;  %v7133_v39 = vld [vmem:[%s10469_s11 + $0x2a0] ss:$8 sps:$4 sm:$0xff]   ;;  %v7138_v59 = vld [vmem:[%s10469_s11 + $0x2b4] ss:$8 sps:$4 sm:$0xff]  }
 0xb21   :  { %v4326_v29 = vmul.f32 %v7598_v55, %v6734_v40  ;;  %v4203_v50 = vpop.f32.mrb[159].mxu0  ;;  %v4342_v62 = vpack.c.bf16 %v7598_v55, %v7592_v52  ;;  %v7127_v52 = vld [vmem:[%s10469_s11 + $0x280] ss:$8 sps:$4 sm:$0xff]   ;;  %v7136_v55 = vld [vmem:[%s10469_s11 + $0x2b0] ss:$8 sps:$4 sm:$0xff]  }
 0xb22   :  { %v4324_v11 = vmul.f32 %v7594_v36, %v4203_v50  ;;  %4354 = vmatpush1.bf16.msra.mxu1 %v4337_v5  ;;  %v7124_v5 = vld [vmem:[%s10469_s11 + $0x270] ss:$8 sps:$4 sm:$0xff]   ;;  %v7141_v40 = vld [vmem:[%s10469_s11 + $0x2c4] ss:$8 sps:$4 sm:$0xff]  }
 0xb23   :  { %v4341_v20 = vpack.c.bf16 %v4326_v29, %v4325_v56  ;;  %4355 = vmatprep.subr.bf16.mxu1 %v4340_v44  ;;  %v7130_v36 = vld [vmem:[%s10469_s11 + $0x290] ss:$8 sps:$4 sm:$0xff]   ;;  %v7139_v56 = vld [vmem:[%s10469_s11 + $0x2c0] ss:$8 sps:$4 sm:$0xff]   ;;  %v7144_v29 = vld [vmem:[%s10469_s11 + $0x2d4] ss:$8 sps:$4 sm:$0xff]  }
 0xb24   :  { %v4339_v4 = vpack.c.bf16 %v4324_v11, %v4323_v49  ;;  %v7142_v50 = vld [vmem:[%s10469_s11 + $0x2d0] ss:$8 sps:$4 sm:$0xff]  }
 0xb26   :  { %4356 = vmatpush1.bf16.msra.mxu1 %v4339_v4 }
 0xb27   :  { %4357 = vmatprep.subr.bf16.mxu1 %v4342_v62 }
 0xb2a   :  { %4358 = vmatpush1.bf16.msra.mxu1 %v4341_v20 }
 0xb2b   :  { %4787 = vmatprep.subr.bf16.mxu1 %v7105_v38 }
 0xb2d   :  { %4376 = vmatmul.mubr.bf16.vlgmr.msra.gmra.mrb[112].mxu1 %v7766_v10 }
 0xb2e   :  { %4385 = vmatprep.mubr.bf16.mxu1 %v10541_v33  ;;  %4788 = vmatpush1.bf16.msra.mxu1 %v7103_v43 }
 0xb2f   :  { %4789 = vmatprep.subr.bf16.mxu1 %v7108_v6 }
 0xb35   :  { %4386 = vmatmul.mubr.bf16.gmra.mrb[116].mxu1 %v7767_v48 }
 0xb36   :  { %4395 = vmatprep.mubr.bf16.mxu1 %v10541_v33 }
 0xb3d   :  { %4396 = vmatmul.mubr.bf16.gmra.mrb[120].mxu1 %v7768_v12 }
 0xb3e   :  { %4405 = vmatprep.mubr.bf16.mxu1 %v10541_v33  ;;  %v7106_v33 = vld [vmem:[%s10469_s11 + $0x210] ss:$8 sps:$4 sm:$0xff]  }
 0xb3f   :  { %4790 = vmatpush1.bf16.msra.mxu1 %v7106_v33 }
 0xb40   :  { %4791 = vmatprep.subr.bf16.mxu1 %v7111_v53 }
 0xb43   :  { %4792 = vmatpush1.bf16.msra.mxu1 %v7109_v25 }
 0xb44   :  { %4793 = vmatprep.subr.bf16.mxu1 %v7114_v57 }
 0xb45   :  { %4406 = vmatmul.mubr.bf16.gmra.mrb[124].mxu1 %v7769_v18 }
 0xb47   :  { %4794 = vmatpush1.bf16.msra.mxu1 %v7112_v31 }
 0xb48   :  { %4795 = vmatprep.subr.bf16.mxu1 %v7117_v37 }
 0xb4b   :  { %4796 = vmatpush1.bf16.msra.mxu1 %v7115_v2 }
 0xb4c   :  { %4797 = vmatprep.subr.bf16.mxu1 %v7120_v23 }
 0xb4f   :  { %4798 = vmatpush1.bf16.msra.mxu1 %v7118_v41 }
 0xb50   :  { %4799 = vmatprep.subr.bf16.mxu1 %v7123_v9 }
 0xb53   :  { %4800 = vmatpush1.bf16.msra.mxu1 %v7121_v47 }
 0xb54   :  { %4801 = vmatprep.subr.bf16.mxu1 %v7126_v61 }
 0xb57   :  { %4802 = vmatpush1.bf16.msra.mxu1 %v7124_v5 }
 0xb58   :  { %4803 = vmatprep.subr.bf16.mxu1 %v7129_v26 }
 0xb5b   :  { %4804 = vmatpush1.bf16.msra.mxu1 %v7127_v52 }
 0xb5c   :  { %4805 = vmatprep.subr.bf16.mxu1 %v7132_v27 }
 0xb5f   :  { %4806 = vmatpush1.bf16.msra.mxu1 %v7130_v36 }
 0xb60   :  { %4807 = vmatprep.subr.bf16.mxu1 %v7135_v19 }
 0xb63   :  { %4808 = vmatpush1.bf16.msra.mxu1 %v7133_v39 }
 0xb64   :  { %4809 = vmatprep.subr.bf16.mxu1 %v7138_v59 }
 0xb67   :  { %4810 = vmatpush1.bf16.msra.mxu1 %v7136_v55 }
 0xb68   :  { %4811 = vmatprep.subr.bf16.mxu1 %v7141_v40 }
 0xb6b   :  { %4812 = vmatpush1.bf16.msra.mxu1 %v7139_v56 }
 0xb6c   :  { %4813 = vmatprep.subr.bf16.mxu1 %v7144_v29 }
 0xb6f   :  { %4814 = vmatpush1.bf16.msra.mxu1 %v7142_v50 }
 0xc00   :  { %v4377_v44 = vpop.f32.mrb[112].mxu1 }
 0xc01   :  { %v4379_v49 = vpop.f32.mrb[113].mxu1 }
 0xc02   :  { %v4416_v11 = vadd.f32 1e-06, %v4379_v49  ;;  %v4381_v20 = vpop.f32.mrb[114].mxu1 }
 0xc03   :  { %v4383_v4 = vpop.f32.mrb[115].mxu1 }
 0xc04   :  { %7599 = vrcp.f32 %v4416_v11  ;;  %v4417_v62 = vadd.f32 1e-06, %v4383_v4 }
 0xc06   :  { %7601 = vrcp.f32 %v4417_v62 }
 0xc08   :  { %v4387_v10 = vpop.f32.mrb[116].mxu1 }
 0xc09   :  { %v4389_v48 = vpop.f32.mrb[117].mxu1 }
 0xc0a   :  { %v4418_v12 = vadd.f32 1e-06, %v4389_v48  ;;  %v4391_v18 = vpop.f32.mrb[118].mxu1 }
 0xc0b   :  { %v4393_v43 = vpop.f32.mrb[119].mxu1 }
 0xc0c   :  { %7603 = vrcp.f32 %v4418_v12  ;;  %v4419_v38 = vadd.f32 1e-06, %v4393_v43  ;;  %v7774_v43 = vld [vmem:[%s10468_s4 + $0x28] sm:$0xff]  }
 0xc0e   :  { %v7600_v6 = vpop.eup %7599  ;;  %7605 = vrcp.f32 %v4419_v38  ;;  %v7775_v38 = vld [vmem:[%s10468_s4 + $0x30] sm:$0xff]  }
 0xc0f   :  { %v4432_v33 = vmul.f32 %v7600_v6, %v4377_v44  ;;  %v7776_v6 = vld [vmem:[%s10468_s4 + $0x38] sm:$0xff]  }
 0xc10   :  { %v7602_v53 = vpop.eup %7601  ;;  %v4397_v25 = vpop.f32.mrb[120].mxu1 }
 0xc11   :  { %v4399_v57 = vpop.f32.mrb[121].mxu1  ;;  %v4433_v31 = vmul.f32 %v7602_v53, %v4381_v20  ;;  %v4440_v37 = vadd.f32 %v4432_v33, %v9439_v1  ;;  %v7145_v33 = vld [vmem:[%s10469_s11 + $0x2e0] ss:$8 sps:$4 sm:$0xff]   ;;  %v7147_v53 = vld [vmem:[%s10469_s11 + $0x2e4] ss:$8 sps:$4 sm:$0xff]  }
 0xc12   :  { %v4420_v2 = vadd.f32 1e-06, %v4399_v57  ;;  %v4401_v23 = vpop.f32.mrb[122].mxu1  ;;  %4815 = vmatprep.subr.bf16.mxu1 %v7147_v53  ;;  %v7150_v57 = vld [vmem:[%s10469_s11 + $0x2f4] ss:$8 sps:$4 sm:$0xff]   ;;  %v4571_v53 = vpack.c.bf16 %v9837_v51, %v9830_v7 }
 0xc13   :  { %v4403_v41 = vpop.f32.mrb[123].mxu1  ;;  %v4441_v9 = vadd.f32 %v4433_v31, %v9441_v63  ;;  %4816 = vmatpush1.bf16.msra.mxu1 %v7145_v33 }
 0xc14   :  { %7607 = vrcp.f32 %v4420_v2  ;;  %v4421_v47 = vadd.f32 1e-06, %v4403_v41  ;;  %4817 = vmatprep.subr.bf16.mxu1 %v7150_v57  ;;  %v4575_v57 = vpack.c.bf16 %v9853_v45, %v9846_v24 }
 0xc15   :  { %v4448_v61 = vpack.c.bf16 %v4441_v9, %v4440_v37 }
 0xc16   :  { %v7604_v5 = vpop.eup %7603  ;;  %7609 = vrcp.f32 %v4421_v47 }
 0xc17   :  { %6735 = vmatprep.subr.bf16.mxu0 %v4448_v61  ;;  %v4434_v26 = vmul.f32 %v7604_v5, %v4387_v10 }
 0xc18   :  { %v7606_v52 = vpop.eup %7605  ;;  %v4407_v27 = vpop.f32.mrb[124].mxu1  ;;  %6736 = vmatpush3.bf16.msra.mxu0 %v4448_v61 }
 0xc19   :  { %v4409_v36 = vpop.f32.mrb[125].mxu1  ;;  %v4435_v19 = vmul.f32 %v7606_v52, %v4391_v18  ;;  %v4442_v39 = vadd.f32 %v4434_v26, %v9446_v22  ;;  %v4565_v52 = vpack.c.bf16 %v9825_v15, %v9817_v60 }
 0xc1a   :  { %v4422_v1 = vadd.f32 1e-06, %v4409_v36  ;;  %v4411_v59 = vpop.f32.mrb[126].mxu1 }
 0xc1b   :  { %v4413_v55 = vpop.f32.mrb[127].mxu1  ;;  %v4443_v40 = vadd.f32 %v4435_v19, %v9448_v42 }
 0xc1c   :  { %7611 = vrcp.f32 %v4422_v1  ;;  %v4423_v63 = vadd.f32 1e-06, %v4413_v55 }
 0xc1d   :  { %v4449_v56 = vpack.c.bf16 %v4443_v40, %v4442_v39 }
 0xc1e   :  { %v7608_v29 = vpop.eup %7607  ;;  %7613 = vrcp.f32 %v4423_v63 }
 0xc1f   :  { %6737 = vmatprep.subr.bf16.mxu0 %v4449_v56  ;;  %v4436_v50 = vmul.f32 %v7608_v29, %v4397_v25  ;;  %v7148_v25 = vld [vmem:[%s10469_s11 + $0x2f0] ss:$8 sps:$4 sm:$0xff]   ;;  %v4567_v29 = vpack.c.bf16 %v9821_v16, %v9814_v34 }
 0xc20   :  { %v7610_v44 = vpop.eup %7609  ;;  %6738 = vmatpush3.bf16.msra.mxu0 %v4449_v56  ;;  %4818 = vmatpush1.bf16.msra.mxu1 %v7148_v25  ;;  %v4573_v25 = vpack.c.bf16 %v9857_v3, %v9849_v28 }
 0xc21   :  { %v4437_v49 = vmul.f32 %v7610_v44, %v4401_v23  ;;  %v4444_v11 = vadd.f32 %v4436_v50, %v9452_v14  ;;  %v7770_v14 = vld [vmem:[%s10468_s4 + $0x8] sm:$0xff]  }
 0xc23   :  { %v4445_v20 = vadd.f32 %v4437_v49, %v9454_v58  ;;  %v7771_v58 = vld [vmem:[%s10468_s4 + $0x10] sm:$0xff]  }
 0xc25   :  { %v4450_v22 = vpack.c.bf16 %v4445_v20, %v4444_v11 }
 0xc26   :  { %v7612_v4 = vpop.eup %7611 }
 0xc27   :  { %6739 = vmatprep.subr.bf16.mxu0 %v4450_v22  ;;  %v4438_v62 = vmul.f32 %v7612_v4, %v4407_v27 }
 0xc28   :  { %v7614_v10 = vpop.eup %7613  ;;  %6740 = vmatpush3.bf16.msra.mxu0 %v4450_v22 }
 0xc29   :  { %v4439_v42 = vmul.f32 %v7614_v10, %v4411_v59  ;;  %v4446_v48 = vadd.f32 %v4438_v62, %v9458_v30  ;;  %v7772_v30 = vld [vmem:[%s10468_s4 + $0x18] sm:$0xff]  }
 0xc2b   :  { %v4447_v12 = vadd.f32 %v4439_v42, %v9460_v0  ;;  %v7773_v0 = vld [vmem:[%s10468_s4 + $0x20] sm:$0xff]  }
 0xc2d   :  { %v4451_v18 = vpack.c.bf16 %v4447_v12, %v4446_v48  ;;  %v4569_v48 = vpack.c.bf16 %v9841_v32, %v9833_v54 }
 0xc2f   :  { %6741 = vmatprep.subr.bf16.mxu0 %v4451_v18 }
 0xc30   :  { %6742 = vmatpush3.bf16.msra.mxu0 %v4451_v18 }
 0xc33   :  { %6744 = vmatmul.mubr.msk.bf16.vlgmr.msra.gmra.mrb[160].mxu0 %vm771_vm0, %v7770_v14 }
 0xc34   :  { %6747 = vmatprep.mubr.msk.bf16.mxu0 %vm771_vm0, %v7771_v58 }
 0xc3b   :  { %6748 = vmatmul.mubr.msk.bf16.gmra.mrb[164].mxu0 %vm771_vm0, %v7772_v30 }
 0xc3c   :  { %6751 = vmatprep.mubr.msk.bf16.mxu0 %vm771_vm0, %v7773_v0 }
 0xc43   :  { %6752 = vmatmul.mubr.msk.bf16.gmra.mrb[168].mxu0 %vm771_vm0, %v7774_v43 }
 0xc44   :  { %6755 = vmatprep.mubr.msk.bf16.mxu0 %vm771_vm0, %v7775_v38 }
 0xc4b   :  { %6756 = vmatmul.mubr.msk.bf16.gmra.mrb[172].mxu0 %vm771_vm0, %v7776_v6 }
 0xd06   :  { %v6745_v31 = vpop.f32.mrb[160].mxu0 }
 0xd07   :  { %v4486_v37 = vpop.f32.mrb[161].mxu0  ;;  %v4551_v23 = vand.u32 2147483647, %v6745_v31  ;;  %v4577_v31 = vpack.c.bf16 %v9873_v13, %v9865_v46 }
 0xd08   :  { %v6746_v2 = vpop.f32.mrb[162].mxu0  ;;  %v4549_v47 = vand.u32 2147483647, %v4486_v37  ;;  %v4579_v37 = vpack.c.bf16 %v9869_v8, %v9862_v21 }
 0xd09   :  { %v4552_v41 = vand.u32 2147483647, %v6746_v2  ;;  %v4489_v9 = vpop.f32.mrb[163].mxu0  ;;  %v7151_v2 = vld [vmem:[%s10477_s17] sm:$0xff]  }
 0xd0a   :  { %v4550_v61 = vand.u32 2147483647, %v4489_v9  ;;  %6759 = vmatprep.subr.bf16.mxu0 %v7151_v2  ;;  %v7154_v9 = vld [vmem:[%s10477_s17 + $0x18] sm:$0xff]  }
 0xd0b   :  { %v4568_v5 = vpack.c.bf16 %v4552_v41, %v4551_v23  ;;  %v7152_v23 = vld [vmem:[%s10477_s17 + $0x8] sm:$0xff]   ;;  %6760 = vmatpush3.bf16.msra.mxu0 %v7151_v2  ;;  %v7153_v41 = vld [vmem:[%s10477_s17 + $0x10] sm:$0xff]  }
 0xd0c   :  { %v4566_v26 = vpack.c.bf16 %v4550_v61, %v4549_v47  ;;  %6761 = vmatprep.subr.bf16.mxu0 %v7152_v23  ;;  %v6271_v47 = vld [vmem:[%s10472_s12 + $0x4] sm:$0x3] }
 0xd0d   :  { %v10056_v61 = vrot.slane %v6271_v47, %v10569_v35 }
 0xd0e   :  { %4819 = vmatprep.mubr.bf16.mxu1 %v4566_v26  ;;  %v6749_v27 = vpop.f32.mrb[164].mxu0 }
 0xd0f   :  { %4820 = vmatmul.mubr.bf16.vlgmr.msra.gmra.mrb[128].mxu1 %v4565_v52  ;;  %v4555_v36 = vand.u32 2147483647, %v6749_v27  ;;  %v4502_v19 = vpop.f32.mrb[165].mxu0  ;;  %6762 = vmatpush3.bf16.msra.mxu0 %v7152_v23 }
 0xd10   :  { %4829 = vmatprep.mubr.bf16.mxu1 %v4568_v5  ;;  %v4553_v39 = vand.u32 2147483647, %v4502_v19  ;;  %v6750_v1 = vpop.f32.mrb[166].mxu0  ;;  %6763 = vmatprep.subr.bf16.mxu0 %v7153_v41  ;;  %v7155_v5 = vld [vmem:[%s10477_s17 + $0x20] sm:$0xff]  }
 0xd11   :  { %v4556_v59 = vand.u32 2147483647, %v6750_v1  ;;  %v4505_v55 = vpop.f32.mrb[167].mxu0 }
 0xd12   :  { %v4554_v40 = vand.u32 2147483647, %v4505_v55  ;;  %v7157_v55 = vld [vmem:[%s10477_s17 + $0x30] sm:$0xff]  }
 0xd13   :  { %v4572_v63 = vpack.c.bf16 %v4556_v59, %v4555_v36  ;;  %6764 = vmatpush3.bf16.msra.mxu0 %v7153_v41  ;;  %v7156_v36 = vld [vmem:[%s10477_s17 + $0x28] sm:$0xff]  }
 0xd14   :  { %v4570_v56 = vpack.c.bf16 %v4554_v40, %v4553_v39  ;;  %6765 = vmatprep.subr.bf16.mxu0 %v7154_v9 }
 0xd16   :  { %v6753_v50 = vpop.f32.mrb[168].mxu0 }
 0xd17   :  { %4830 = vmatmul.mubr.bf16.gmra.mrb[132].mxu1 %v4567_v29  ;;  %v4559_v44 = vand.u32 2147483647, %v6753_v50  ;;  %v4518_v49 = vpop.f32.mrb[169].mxu0  ;;  %6766 = vmatpush3.bf16.msra.mxu0 %v7154_v9  ;;  %v7158_v29 = vld [vmem:[%s10477_s17 + $0x38] sm:$0xff]  }
 0xd18   :  { %4839 = vmatprep.mubr.bf16.mxu1 %v4570_v56  ;;  %v4557_v11 = vand.u32 2147483647, %v4518_v49  ;;  %v6754_v20 = vpop.f32.mrb[170].mxu0  ;;  %6767 = vmatprep.subr.bf16.mxu0 %v7155_v5 }
 0xd19   :  { %v4560_v22 = vand.u32 2147483647, %v6754_v20  ;;  %v4521_v4 = vpop.f32.mrb[171].mxu0 }
 0xd1a   :  { %v4558_v62 = vand.u32 2147483647, %v4521_v4 }
 0xd1b   :  { %v4576_v10 = vpack.c.bf16 %v4560_v22, %v4559_v44  ;;  %6768 = vmatpush3.bf16.msra.mxu0 %v7155_v5  ;;  %v10074_v44 = vrot.slane %v6271_v47, %v10570_v17 }
 0xd1c   :  { %v4574_v42 = vpack.c.bf16 %v4558_v62, %v4557_v11  ;;  %6769 = vmatprep.subr.bf16.mxu0 %v7156_v36 }
 0xd1e   :  { %v6757_v12 = vpop.f32.mrb[172].mxu0 }
 0xd1f   :  { %4840 = vmatmul.mubr.bf16.gmra.mrb[136].mxu1 %v4569_v48  ;;  %v4563_v18 = vand.u32 2147483647, %v6757_v12  ;;  %v4534_v14 = vpop.f32.mrb[173].mxu0  ;;  %6770 = vmatpush3.bf16.msra.mxu0 %v7156_v36 }
 0xd20   :  { %4849 = vmatprep.mubr.bf16.mxu1 %v4572_v63  ;;  %v4561_v58 = vand.u32 2147483647, %v4534_v14  ;;  %v6758_v30 = vpop.f32.mrb[174].mxu0  ;;  %6771 = vmatprep.subr.bf16.mxu0 %v7157_v55 }
 0xd21   :  { %v4564_v0 = vand.u32 2147483647, %v6758_v30  ;;  %v4537_v43 = vpop.f32.mrb[175].mxu0 }
 0xd22   :  { %v4562_v38 = vand.u32 2147483647, %v4537_v43 }
 0xd23   :  { %v4580_v6 = vpack.c.bf16 %v4564_v0, %v4563_v18  ;;  %6772 = vmatpush3.bf16.msra.mxu0 %v7157_v55 }
 0xd24   :  { %v4578_v33 = vpack.c.bf16 %v4562_v38, %v4561_v58  ;;  %6773 = vmatprep.subr.bf16.mxu0 %v7158_v29 }
 0xd27   :  { %4850 = vmatmul.mubr.bf16.gmra.mrb[140].mxu1 %v4571_v53  ;;  %6774 = vmatpush3.bf16.msra.mxu0 %v7158_v29 }
 0xd28   :  { %4859 = vmatprep.mubr.bf16.mxu1 %v4574_v42 }
 0xd2f   :  { %4860 = vmatmul.mubr.bf16.gmra.mrb[144].mxu1 %v4573_v25 }
 0xd30   :  { %4869 = vmatprep.mubr.bf16.mxu1 %v4576_v10 }
 0xd37   :  { %4870 = vmatmul.mubr.bf16.gmra.mrb[148].mxu1 %v4575_v57 }
 0xd38   :  { %4879 = vmatprep.mubr.bf16.mxu1 %v4578_v33 }
 0xd3f   :  { %4880 = vmatmul.mubr.bf16.gmra.mrb[152].mxu1 %v4577_v31 }
 0xd40   :  { %4889 = vmatprep.mubr.bf16.mxu1 %v4580_v6 }
 0xd47   :  { %4890 = vmatmul.mubr.bf16.gmra.mrb[156].mxu1 %v4579_v37 }
 0xde2   :  { %v4821_v26 = vpop.f32.mrb[128].mxu1 }
 0xde3   :  { %v4822_v52 = vadd.f32 %v4821_v26, %v10056_v61  ;;  %v4823_v27 = vpop.f32.mrb[129].mxu1 }
 0xde4   :  { %v4825_v19 = vpop.f32.mrb[130].mxu1  ;;  %v4824_v62 = vadd.f32 %v4823_v27, %v10074_v44 }
 0xde5   :  { %v6304_v39 = vmul.f32 -1.442695, %v4822_v52  ;;  %v4826_v35 = vadd.f32 %v4825_v19, %v10056_v61  ;;  %v4827_v1 = vpop.f32.mrb[131].mxu1 }
 0xde6   :  { %v4828_v14 = vadd.f32 %v4827_v1, %v10074_v44 }
 0xde7   :  { %7615 = vpow2.f32 %v6304_v39  ;;  %v6305_v59 = vmul.f32 -1.442695, %v4826_v35 }
 0xde9   :  { %7617 = vpow2.f32 %v6305_v59 }
 0xdea   :  { %v4831_v40 = vpop.f32.mrb[132].mxu1 }
 0xdeb   :  { %v4832_v63 = vadd.f32 %v4831_v40, %v10056_v61  ;;  %v4833_v56 = vpop.f32.mrb[133].mxu1 }
 0xdec   :  { %v4835_v50 = vpop.f32.mrb[134].mxu1  ;;  %v4834_v33 = vadd.f32 %v4833_v56, %v10074_v44 }
 0xded   :  { %v6306_v49 = vmul.f32 -1.442695, %v4832_v63  ;;  %v4836_v11 = vadd.f32 %v4835_v50, %v10056_v61  ;;  %v4837_v20 = vpop.f32.mrb[135].mxu1 }
 0xdee   :  { %v4838_v23 = vadd.f32 %v4837_v20, %v10074_v44 }
 0xdef   :  { %7619 = vpow2.f32 %v6306_v49  ;;  %v6307_v22 = vmul.f32 -1.442695, %v4836_v11 }
 0xdf1   :  { %v7616_v4 = vpop.eup %7615  ;;  %7621 = vpow2.f32 %v6307_v22 }
 0xdf2   :  { %v4948_v10 = vadd.f32 1.0, %v7616_v4  ;;  %v4841_v42 = vpop.f32.mrb[136].mxu1 }
 0xdf3   :  { %v7618_v48 = vpop.eup %7617  ;;  %v4842_v12 = vadd.f32 %v4841_v42, %v10056_v61  ;;  %v4843_v17 = vpop.f32.mrb[137].mxu1 }
 0xdf4   :  { %7623 = vrcp.f32 %v4948_v10  ;;  %v4949_v18 = vadd.f32 1.0, %v7618_v48  ;;  %v4845_v58 = vpop.f32.mrb[138].mxu1  ;;  %v4844_v52 = vadd.f32 %v4843_v17, %v10074_v44 }
 0xdf5   :  { %7625 = vtanh.f32 %v4824_v62  ;;  %v6308_v30 = vmul.f32 -1.442695, %v4842_v12  ;;  %v4846_v0 = vadd.f32 %v4845_v58, %v10056_v61  ;;  %v4847_v43 = vpop.f32.mrb[139].mxu1 }
 0xdf6   :  { %7627 = vrcp.f32 %v4949_v18 }
 0xdf7   :  { %7629 = vpow2.f32 %v6308_v30  ;;  %v6309_v38 = vmul.f32 -1.442695, %v4846_v0 }
 0xdf8   :  { %7631 = vtanh.f32 %v4828_v14 }
 0xdf9   :  { %v7620_v6 = vpop.eup %7619  ;;  %7633 = vpow2.f32 %v6309_v38 }
 0xdfa   :  { %v4950_v53 = vadd.f32 1.0, %v7620_v6  ;;  %v4851_v25 = vpop.f32.mrb[140].mxu1 }
 0xdfb   :  { %v7622_v57 = vpop.eup %7621  ;;  %v4852_v31 = vadd.f32 %v4851_v25, %v10056_v61  ;;  %v4853_v37 = vpop.f32.mrb[141].mxu1 }
 0xdfc   :  { %7635 = vrcp.f32 %v4950_v53  ;;  %v4951_v2 = vadd.f32 1.0, %v7622_v57  ;;  %v4855_v41 = vpop.f32.mrb[142].mxu1  ;;  %v4854_v42 = vadd.f32 %v4853_v37, %v10074_v44 }
 0xdfd   :  { %7637 = vtanh.f32 %v4834_v33  ;;  %v6310_v9 = vmul.f32 -1.442695, %v4852_v31  ;;  %v4856_v47 = vadd.f32 %v4855_v41, %v10056_v61  ;;  %v4857_v5 = vpop.f32.mrb[143].mxu1 }
 0xdfe   :  { %v7624_v26 = vpop.eup %7623  ;;  %7639 = vrcp.f32 %v4951_v2 }
 0xdff   :  { %v7626_v27 = vpop.eup %7625  ;;  %v5028_v36 = vsub.f32 1.0, %v7624_v26  ;;  %7641 = vpow2.f32 %v6310_v9  ;;  %v6311_v19 = vmul.f32 -1.442695, %v4856_v47  ;;  %v5012_v1 = vmul.f32 %v7624_v26, %v9817_v60 }
 0xe00   :  { %v7628_v39 = vpop.eup %7627  ;;  %7643 = vtanh.f32 %v4838_v23  ;;  %v4848_v60 = vadd.f32 %v4847_v43, %v10074_v44 }
 0xe01   :  { %v7630_v35 = vpop.eup %7629  ;;  %v5044_v59 = vmul.f32 %v7626_v27, %v5028_v36  ;;  %v5029_v55 = vsub.f32 1.0, %v7628_v39  ;;  %7645 = vpow2.f32 %v6311_v19  ;;  %v5013_v49 = vmul.f32 %v7628_v39, %v9825_v15 }
 0xe02   :  { %v7632_v40 = vpop.eup %7631  ;;  %v4952_v63 = vadd.f32 1.0, %v7630_v35  ;;  %7647 = vtanh.f32 %v4844_v52  ;;  %v4861_v56 = vpop.f32.mrb[144].mxu1 }
 0xe03   :  { %v7634_v29 = vpop.eup %7633  ;;  %v10087_v50 = vadd.f32 %v5044_v59, %v5012_v1  ;;  %v5045_v11 = vmul.f32 %v7632_v40, %v5029_v55  ;;  %v4862_v20 = vadd.f32 %v4861_v56, %v10056_v61  ;;  %v4863_v22 = vpop.f32.mrb[145].mxu1 }
 0xe04   :  { %7649 = vrcp.f32 %v4952_v63  ;;  %v4953_v4 = vadd.f32 1.0, %v7634_v29  ;;  %v4865_v62 = vpop.f32.mrb[146].mxu1 }
 0xe05   :  { %v10092_v10 = vadd.f32 %v5045_v11, %v5013_v49  ;;  %v6312_v48 = vmul.f32 -1.442695, %v4862_v20  ;;  %v4866_v12 = vadd.f32 %v4865_v62, %v10056_v61  ;;  %v4867_v17 = vpop.f32.mrb[147].mxu1  ;;  %v4864_v20 = vadd.f32 %v4863_v22, %v10074_v44 }
 0xe06   :  { %v7636_v18 = vpop.eup %7635  ;;  %7651 = vrcp.f32 %v4953_v4 }
 0xe07   :  { %v7638_v15 = vpop.eup %7637  ;;  %v5080_v14 = vadd.f32 %v10092_v10, %v10087_v50  ;;  %v5030_v58 = vsub.f32 1.0, %v7636_v18  ;;  %7653 = vpow2.f32 %v6312_v48  ;;  %v6313_v0 = vmul.f32 -1.442695, %v4866_v12 }
 0xe08   :  { %v7640_v30 = vpop.eup %7639  ;;  %7655 = vtanh.f32 %v4848_v60  ;;  %v5014_v38 = vmul.f32 %v7636_v18, %v9814_v34  ;;  %v4858_v34 = vadd.f32 %v4857_v5, %v10074_v44 }
 0xe09   :  { %v7642_v43 = vpop.eup %7641  ;;  %v5046_v6 = vmul.f32 %v7638_v15, %v5030_v58  ;;  %v5031_v33 = vsub.f32 1.0, %v7640_v30  ;;  %7657 = vtanh.f32 %v4854_v42  ;;  %v5015_v2 = vmul.f32 %v7640_v30, %v9821_v16 }
 0xe0a   :  { %v7644_v53 = vpop.eup %7643  ;;  %v4954_v25 = vadd.f32 1.0, %v7642_v43  ;;  %7659 = vpow2.f32 %v6313_v0  ;;  %v4871_v57 = vpop.f32.mrb[148].mxu1 }
 0xe0b   :  { %v7646_v31 = vpop.eup %7645  ;;  %v10099_v37 = vadd.f32 %v5046_v6, %v5014_v38  ;;  %v5047_v23 = vmul.f32 %v7644_v53, %v5031_v33  ;;  %v4872_v41 = vadd.f32 %v4871_v57, %v10056_v61  ;;  %v4873_v9 = vpop.f32.mrb[149].mxu1 }
 0xe0c   :  { %v7648_v47 = vpop.eup %7647  ;;  %7661 = vrcp.f32 %v4954_v25  ;;  %v4955_v26 = vadd.f32 1.0, %v7646_v31  ;;  %v4875_v52 = vpop.f32.mrb[150].mxu1 }
 0xe0d   :  { %v5081_v27 = vadd.f32 %v5080_v14, %v10099_v37  ;;  %v10105_v36 = vadd.f32 %v5047_v23, %v5015_v2  ;;  %v6314_v19 = vmul.f32 -1.442695, %v4872_v41  ;;  %v4876_v39 = vadd.f32 %v4875_v52, %v10056_v61  ;;  %v4877_v35 = vpop.f32.mrb[151].mxu1 }
 0xe0e   :  { %v7650_v1 = vpop.eup %7649  ;;  %7663 = vrcp.f32 %v4955_v26 }
 0xe0f   :  { %v5082_v16 = vadd.f32 %v5081_v27, %v10105_v36  ;;  %v5032_v59 = vsub.f32 1.0, %v7650_v1  ;;  %7665 = vpow2.f32 %v6314_v19  ;;  %v6315_v40 = vmul.f32 -1.442695, %v4876_v39 }
 0xe10   :  { %v7652_v55 = vpop.eup %7651  ;;  %7667 = vtanh.f32 %v4858_v34  ;;  %v5016_v5 = vmul.f32 %v7650_v1, %v9833_v54  ;;  %v4868_v54 = vadd.f32 %v4867_v17, %v10074_v44 }
 0xe11   :  { %v7654_v63 = vpop.eup %7653  ;;  %v5048_v56 = vmul.f32 %v7648_v47, %v5032_v59  ;;  %v5033_v29 = vsub.f32 1.0, %v7652_v55  ;;  %7669 = vpow2.f32 %v6315_v40  ;;  %v5017_v42 = vmul.f32 %v7652_v55, %v9841_v32 }
 0xe12   :  { %v7656_v49 = vpop.eup %7655  ;;  %v4956_v11 = vadd.f32 1.0, %v7654_v63  ;;  %v4881_v4 = vpop.f32.mrb[152].mxu1  ;;  %v4874_v47 = vadd.f32 %v4873_v9, %v10074_v44 }
 0xe13   :  { %v7658_v60 = vpop.eup %7657  ;;  %v10111_v62 = vadd.f32 %v5048_v56, %v5016_v5  ;;  %v5049_v48 = vmul.f32 %v7656_v49, %v5033_v29  ;;  %v4882_v12 = vadd.f32 %v4881_v4, %v10056_v61  ;;  %v4883_v18 = vpop.f32.mrb[153].mxu1 }
 0xe14   :  { %v7660_v15 = vpop.eup %7659  ;;  %7671 = vrcp.f32 %v4956_v11  ;;  %v4885_v14 = vpop.f32.mrb[154].mxu1 }
 0xe15   :  { %v5083_v58 = vadd.f32 %v5082_v16, %v10111_v62  ;;  %v10117_v30 = vadd.f32 %v5049_v48, %v5017_v42  ;;  %v4957_v22 = vadd.f32 1.0, %v7660_v15  ;;  %v6316_v0 = vmul.f32 -1.442695, %v4882_v12  ;;  %v4887_v43 = vpop.f32.mrb[155].mxu1 }
 0xe16   :  { %v7662_v38 = vpop.eup %7661  ;;  %7673 = vtanh.f32 %v4864_v20  ;;  %v4886_v32 = vadd.f32 %v4885_v14, %v10056_v61  ;;  %v4884_v48 = vadd.f32 %v4883_v18, %v10074_v44 }
 0xe17   :  { %v5084_v6 = vadd.f32 %v5083_v58, %v10117_v30  ;;  %v5034_v33 = vsub.f32 1.0, %v7662_v38  ;;  %7675 = vrcp.f32 %v4957_v22  ;;  %v5018_v57 = vmul.f32 %v7662_v38, %v9830_v7 }
 0xe18   :  { %v7664_v53 = vpop.eup %7663  ;;  %7677 = vpow2.f32 %v6316_v0  ;;  %v6317_v25 = vmul.f32 -1.442695, %v4886_v32  ;;  %v4878_v7 = vadd.f32 %v4877_v35, %v10074_v44 }
 0xe19   :  { %v7666_v17 = vpop.eup %7665  ;;  %v5050_v31 = vmul.f32 %v7658_v60, %v5034_v33  ;;  %v5035_v2 = vsub.f32 1.0, %v7664_v53  ;;  %7679 = vtanh.f32 %v4868_v54  ;;  %v5019_v52 = vmul.f32 %v7664_v53, %v9837_v51 }
 0xe1a   :  { %v7668_v23 = vpop.eup %7667  ;;  %v4958_v41 = vadd.f32 1.0, %v7666_v17  ;;  %7681 = vpow2.f32 %v6317_v25  ;;  %v4891_v26 = vpop.f32.mrb[156].mxu1 }
 0xe1b   :  { %v10123_v34 = vadd.f32 %v5050_v31, %v5018_v57  ;;  %v5051_v27 = vmul.f32 %v7668_v23, %v5035_v2  ;;  %v4892_v19 = vadd.f32 %v4891_v26, %v10056_v61  ;;  %v4893_v39 = vpop.f32.mrb[157].mxu1  ;;  %v7670_v1 = vpop.eup %7669 }
 0xe1c   :  { %7683 = vrcp.f32 %v4958_v41  ;;  %v4895_v16 = vpop.f32.mrb[158].mxu1  ;;  %v4959_v9 = vadd.f32 1.0, %v7670_v1  ;;  %v4894_v31 = vadd.f32 %v4893_v39, %v10074_v44 }
 0xe1d   :  { %v5085_v59 = vadd.f32 %v5084_v6, %v10123_v34  ;;  %v10129_v55 = vadd.f32 %v5051_v27, %v5019_v52  ;;  %v6318_v40 = vmul.f32 -1.442695, %v4892_v19  ;;  %v4897_v63 = vpop.f32.mrb[159].mxu1  ;;  %7685 = vtanh.f32 %v4874_v47 }
 0xe1e   :  { %v7672_v5 = vpop.eup %7671  ;;  %v4896_v51 = vadd.f32 %v4895_v16, %v10056_v61  ;;  %7687 = vrcp.f32 %v4959_v9 }
 0xe1f   :  { %v5086_v56 = vadd.f32 %v5085_v59, %v10129_v55  ;;  %v5036_v29 = vsub.f32 1.0, %v7672_v5  ;;  %7689 = vpow2.f32 %v6318_v40  ;;  %v5020_v20 = vmul.f32 %v7672_v5, %v9849_v28 }
 0xe20   :  { %v7674_v49 = vpop.eup %7673  ;;  %v6319_v11 = vmul.f32 -1.442695, %v4896_v51  ;;  %7691 = vtanh.f32 %v4878_v7  ;;  %v4888_v28 = vadd.f32 %v4887_v43, %v10074_v44 }
 0xe21   :  { %v7676_v35 = vpop.eup %7675  ;;  %v5052_v4 = vmul.f32 %v7674_v49, %v5036_v29 }
 0xe22   :  { %v7678_v60 = vpop.eup %7677  ;;  %v5037_v42 = vsub.f32 1.0, %v7676_v35  ;;  %7693 = vpow2.f32 %v6319_v11  ;;  %v5021_v14 = vmul.f32 %v7676_v35, %v9857_v3  ;;  %v10155_v11 = vld [vmem:[%s10478_s19] sm:$0xff]  }
 0xe23   :  { %v7680_v12 = vpop.eup %7679  ;;  %v10135_v15 = vadd.f32 %v5052_v4, %v5020_v20  ;;  %v4960_v61 = vadd.f32 1.0, %v7678_v60  ;;  %6791 = vmatprep.subr.bf16.mxu0 %v10155_v11 }
 0xe24   :  { %v7682_v54 = vpop.eup %7681  ;;  %v5053_v58 = vmul.f32 %v7680_v12, %v5037_v42 }
 0xe25   :  { %v5087_v22 = vadd.f32 %v5086_v56, %v10135_v15  ;;  %7695 = vrcp.f32 %v4960_v61  ;;  %v4961_v0 = vadd.f32 1.0, %v7682_v54 }
 0xe26   :  { %v7684_v38 = vpop.eup %7683  ;;  %v10140_v32 = vadd.f32 %v5053_v58, %v5021_v14  ;;  %7697 = vtanh.f32 %v4884_v48 }
 0xe27   :  { %v5038_v18 = vsub.f32 1.0, %v7684_v38  ;;  %7699 = vrcp.f32 %v4961_v0  ;;  %v7686_v6 = vpop.eup %7685  ;;  %v5022_v25 = vmul.f32 %v7684_v38, %v9846_v24  ;;  %v4898_v24 = vadd.f32 %v4897_v63, %v10074_v44 }
 0xe28   :  { %v5088_v33 = vadd.f32 %v5087_v22, %v10140_v32  ;;  %v7688_v53 = vpop.eup %7687  ;;  %7701 = vtanh.f32 %v4888_v28 }
 0xe29   :  { %v5054_v3 = vmul.f32 %v7686_v6, %v5038_v18  ;;  %v7690_v17 = vpop.eup %7689  ;;  %v5039_v57 = vsub.f32 1.0, %v7688_v53  ;;  %v5023_v47 = vmul.f32 %v7688_v53, %v9853_v45 }
 0xe2a   :  { %v7692_v2 = vpop.eup %7691  ;;  %v4962_v23 = vadd.f32 1.0, %v7690_v17 }
 0xe2b   :  { %v10145_v43 = vadd.f32 %v5054_v3, %v5022_v25  ;;  %v5055_v26 = vmul.f32 %v7692_v2, %v5039_v57 }
 0xe2c   :  { %v7694_v41 = vpop.eup %7693  ;;  %7703 = vrcp.f32 %v4962_v23 }
 0xe2d   :  { %v5089_v52 = vadd.f32 %v5088_v33, %v10145_v43  ;;  %v4963_v27 = vadd.f32 1.0, %v7694_v41  ;;  %v5071_v19 = vadd.f32 %v5055_v26, %v5023_v47  ;;  %7705 = vtanh.f32 %v4894_v31 }
 0xe2f   :  { %v7696_v1 = vpop.eup %7695  ;;  %7707 = vrcp.f32 %v4963_v27  ;;  %v5090_v39 = vadd.f32 %v5089_v52, %v5071_v19 }
 0xe30   :  { %v7698_v7 = vpop.eup %7697  ;;  %v5040_v16 = vsub.f32 1.0, %v7696_v1  ;;  %7709 = vtanh.f32 %v4898_v24  ;;  %v5024_v9 = vmul.f32 %v7696_v1, %v9865_v46 }
 0xe31   :  { %v7700_v59 = vpop.eup %7699 }
 0xe32   :  { %v5056_v40 = vmul.f32 %v7698_v7, %v5040_v16  ;;  %v5041_v45 = vsub.f32 1.0, %v7700_v59  ;;  %v7702_v5 = vpop.eup %7701  ;;  %v5025_v56 = vmul.f32 %v7700_v59, %v9873_v13 }
 0xe34   :  { %v5072_v51 = vadd.f32 %v5056_v40, %v5024_v9  ;;  %v5057_v29 = vmul.f32 %v7702_v5, %v5041_v45 }
 0xe36   :  { %v5091_v49 = vadd.f32 %v5090_v39, %v5072_v51  ;;  %v5073_v44 = vadd.f32 %v5057_v29, %v5025_v56  ;;  %v7704_v63 = vpop.eup %7703 }
 0xe37   :  { %v7706_v35 = vpop.eup %7705  ;;  %v5042_v4 = vsub.f32 1.0, %v7704_v63  ;;  %v5026_v46 = vmul.f32 %v7704_v63, %v9862_v21 }
 0xe38   :  { %v5092_v20 = vadd.f32 %v5091_v49, %v5073_v44 }
 0xe39   :  { %v7708_v60 = vpop.eup %7707  ;;  %v5058_v42 = vmul.f32 %v7706_v35, %v5042_v4 }
 0xe3a   :  { %v5043_v48 = vsub.f32 1.0, %v7708_v60  ;;  %v7710_v13 = vpop.eup %7709  ;;  %v5027_v61 = vmul.f32 %v7708_v60, %v9869_v8 }
 0xe3b   :  { %v5074_v12 = vadd.f32 %v5058_v42, %v5026_v46 }
 0xe3c   :  { %v5059_v54 = vmul.f32 %v7710_v13, %v5043_v48 }
 0xe3d   :  { %v5093_v14 = vadd.f32 %v5092_v20, %v5074_v12 }
 0xe3e   :  { %v5075_v58 = vadd.f32 %v5059_v54, %v5027_v61 }
 0xe40   :  { %v5094_v22 = vadd.f32 %v5093_v14, %v5075_v58 }
 0xe42   :  { %v5095_v0 = vrot.slane %v5094_v22, 4 }
 0xe44   :  { %v5096_v28 = vadd.f32 %v5095_v0, %v5094_v22  ;;  %v10208_v0 = vld [vmem:[%s10473_s15 + $0x2] ss:$0 sm:$0xff] }
 0xe46   :  { %v5097_v38 = vrot.slane %v5096_v28, 2 }
 0xe48   :  { %v5098_v18 = vadd.f32 %v5097_v38, %v5096_v28 }
 0xe4a   :  { %v5099_v6 = vrot.slane %v5098_v18, 1 }
 0xe4c   :  { %v5100_v33 = vadd.f32 %v5099_v6, %v5098_v18 }
 0xe4e   :  { %v5101_v53 = vmul.f32 0.0078125, %v5100_v33  ;;  %v10217_v33 = vld [vmem:[%s10474_s16 + $0x2] ss:$0 sm:$0xff] }
 0xe50   :  { %v10160_v25 = vsub.f32 %v5075_v58, %v5101_v53  ;;  %v5102_v21 = vsub.f32 %v10087_v50, %v5101_v53  ;;  %v5103_v3 = vsub.f32 %v10092_v10, %v5101_v53  ;;  %v5104_v17 = vsub.f32 %v10099_v37, %v5101_v53 }
 0xe51   :  { %v5105_v8 = vsub.f32 %v10105_v36, %v5101_v53  ;;  %v5106_v57 = vsub.f32 %v10111_v62, %v5101_v53  ;;  %v5107_v31 = vsub.f32 %v10117_v30, %v5101_v53  ;;  %v5108_v2 = vsub.f32 %v10123_v34, %v5101_v53 }
 0xe52   :  { %v5109_v23 = vsub.f32 %v10129_v55, %v5101_v53  ;;  %v10171_v41 = vsub.f32 %v10135_v15, %v5101_v53  ;;  %v10174_v47 = vsub.f32 %v10140_v32, %v5101_v53  ;;  %v10177_v50 = vsub.f32 %v10145_v43, %v5101_v53 }
 0xe53   :  { %v10179_v10 = vsub.f32 %v5071_v19, %v5101_v53  ;;  %v10181_v37 = vsub.f32 %v5072_v51, %v5101_v53  ;;  %v10183_v36 = vsub.f32 %v5073_v44, %v5101_v53  ;;  %v10185_v62 = vsub.f32 %v5074_v12, %v5101_v53 }
 0xe54   :  { %v5118_v30 = vmul.f32 %v5102_v21, %v5102_v21  ;;  %v5119_v34 = vmul.f32 %v5103_v3, %v5103_v3  ;;  %v5120_v55 = vmul.f32 %v5104_v17, %v5104_v17  ;;  %v5121_v15 = vmul.f32 %v5105_v8, %v5105_v8 }
 0xe55   :  { %v5122_v27 = vmul.f32 %v5106_v57, %v5106_v57  ;;  %v5123_v24 = vmul.f32 %v5107_v31, %v5107_v31  ;;  %v5124_v43 = vmul.f32 %v5108_v2, %v5108_v2  ;;  %v5125_v19 = vmul.f32 %v5109_v23, %v5109_v23 }
 0xe56   :  { %v5134_v26 = vadd.f32 %v5119_v34, %v5118_v30  ;;  %v5126_v16 = vmul.f32 %v10171_v41, %v10171_v41  ;;  %v5127_v9 = vmul.f32 %v10174_v47, %v10174_v47  ;;  %v5128_v45 = vmul.f32 %v10177_v50, %v10177_v50 }
 0xe57   :  { %v5129_v51 = vmul.f32 %v10179_v10, %v10179_v10  ;;  %v5130_v29 = vmul.f32 %v10181_v37, %v10181_v37  ;;  %v5131_v44 = vmul.f32 %v10183_v36, %v10183_v36  ;;  %v5132_v35 = vmul.f32 %v10185_v62, %v10185_v62 }
 0xe58   :  { %v5135_v52 = vadd.f32 %v5134_v26, %v5120_v55  ;;  %v5133_v4 = vmul.f32 %v10160_v25, %v10160_v25 }
 0xe5a   :  { %v5136_v32 = vadd.f32 %v5135_v52, %v5121_v15 }
 0xe5c   :  { %v5137_v1 = vadd.f32 %v5136_v32, %v5122_v27 }
 0xe5e   :  { %v5138_v7 = vadd.f32 %v5137_v1, %v5123_v24 }
 0xe60   :  { %v5139_v39 = vadd.f32 %v5138_v7, %v5124_v43 }
 0xe62   :  { %v5140_v59 = vadd.f32 %v5139_v39, %v5125_v19 }
 0xe64   :  { %v5141_v40 = vadd.f32 %v5140_v59, %v5126_v16 }
 0xe66   :  { %v5142_v5 = vadd.f32 %v5141_v40, %v5127_v9 }
 0xe68   :  { %v5143_v56 = vadd.f32 %v5142_v5, %v5128_v45  ;;  %v7777_v5 = vld [vmem:[%s10476_s24] sm:$0xff] }
 0xe6a   :  { %v5144_v49 = vadd.f32 %v5143_v56, %v5129_v51  ;;  %v7778_v56 = vld [vmem:[%s10476_s24 + $0x8] sm:$0xff] }
 0xe6c   :  { %v5145_v63 = vadd.f32 %v5144_v49, %v5130_v29  ;;  %v7779_v49 = vld [vmem:[%s10476_s24 + $0x10] sm:$0xff] }
 0xe6e   :  { %v5146_v20 = vadd.f32 %v5145_v63, %v5131_v44  ;;  %v7780_v63 = vld [vmem:[%s10476_s24 + $0x18] sm:$0xff] }
 0xe70   :  { %v5147_v60 = vadd.f32 %v5146_v20, %v5132_v35  ;;  %v7781_v20 = vld [vmem:[%s10476_s24 + $0x20] sm:$0xff] }
 0xe72   :  { %v5148_v46 = vadd.f32 %v5147_v60, %v5133_v4  ;;  %v7782_v60 = vld [vmem:[%s10476_s24 + $0x28] sm:$0xff] }
 0xe74   :  { %v5149_v42 = vrot.slane %v5148_v46, 4 }
 0xe76   :  { %v5150_v48 = vadd.f32 %v5149_v42, %v5148_v46  ;;  %v7783_v42 = vld [vmem:[%s10476_s24 + $0x30] sm:$0xff] }
 0xe78   :  { %v5151_v13 = vrot.slane %v5150_v48, 2 }
 0xe7a   :  { %v5152_v12 = vadd.f32 %v5151_v13, %v5150_v48  ;;  %v7784_v13 = vld [vmem:[%s10476_s24 + $0x38] sm:$0xff] }
 0xe7c   :  { %v5153_v61 = vrot.slane %v5152_v12, 1 }
 0xe7e   :  { %v5154_v54 = vadd.f32 %v5153_v61, %v5152_v12 }
 0xe80   :  { %v5155_v14 = vmul.f32 0.0078125, %v5154_v54 }
 0xe82   :  { %v5156_v58 = vadd.f32 1e-05, %v5155_v14 }
 0xe84   :  { %7711 = vrsqrt.f32 %v5156_v58 }
 0xe8e   :  { %v10203_v22 = vpop.eup %7711 }
 0xe8f   :  { %v5158_v28 = vmul.f32 %v10203_v22, %v5102_v21  ;;  %v5159_v38 = vmul.f32 %v10203_v22, %v5103_v3  ;;  %v5160_v18 = vmul.f32 %v10203_v22, %v5104_v17  ;;  %v5161_v6 = vmul.f32 %v10203_v22, %v5105_v8 }
 0xe90   :  { %v5162_v53 = vmul.f32 %v10203_v22, %v5106_v57  ;;  %v5163_v30 = vmul.f32 %v10203_v22, %v5107_v31  ;;  %v5164_v34 = vmul.f32 %v10203_v22, %v5108_v2  ;;  %v5165_v55 = vmul.f32 %v10203_v22, %v5109_v23 }
 0xe91   :  { %v5180_v21 = vmul.f32 %v10208_v0, %v5158_v28  ;;  %v5181_v3 = vmul.f32 %v10208_v0, %v5159_v38  ;;  %v5182_v17 = vmul.f32 %v10208_v0, %v5160_v18  ;;  %v5183_v8 = vmul.f32 %v10208_v0, %v5161_v6 }
 0xe92   :  { %v5184_v26 = vmul.f32 %v10208_v0, %v5162_v53  ;;  %v5185_v15 = vmul.f32 %v10208_v0, %v5163_v30  ;;  %v5186_v57 = vmul.f32 %v10208_v0, %v5164_v34  ;;  %v5187_v31 = vmul.f32 %v10208_v0, %v5165_v55 }
 0xe93   :  { %v5202_v2 = vadd.f32 %v10217_v33, %v5180_v21  ;;  %v5203_v23 = vadd.f32 %v10217_v33, %v5181_v3  ;;  %v5204_v52 = vadd.f32 %v10217_v33, %v5182_v17  ;;  %v5205_v27 = vadd.f32 %v10217_v33, %v5183_v8 }
 0xe94   :  { %v5206_v32 = vadd.f32 %v10217_v33, %v5184_v26  ;;  %v5207_v24 = vadd.f32 %v10217_v33, %v5185_v15  ;;  %v5208_v1 = vadd.f32 %v10217_v33, %v5186_v57  ;;  %v5209_v43 = vadd.f32 %v10217_v33, %v5187_v31 }
 0xe95   :  { %v5218_v7 = vmax.f32 %v5202_v2, 0.0  ;;  %v5219_v19 = vmax.f32 %v5203_v23, 0.0  ;;  %v5220_v39 = vmax.f32 %v5204_v52, 0.0  ;;  %v5221_v16 = vmax.f32 %v5205_v27, 0.0  ;;  %v7161_v2 = vld [vmem:[%s10478_s19 + $0x10] sm:$0xff]  }
 0xe96   :  { %v5222_v59 = vmax.f32 %v5206_v32, 0.0  ;;  %v5223_v9 = vmax.f32 %v5207_v24, 0.0  ;;  %v5224_v40 = vmax.f32 %v5208_v1, 0.0  ;;  %v5225_v45 = vmax.f32 %v5209_v43, 0.0  ;;  %v7786_v24 = vld [vmem:[%s10476_s24 + $0x48] sm:$0xff] }
 0xe97   :  { %v5234_v51 = vadd.f32 %v7777_v5, %v5218_v7  ;;  %v5235_v29 = vadd.f32 %v7778_v56, %v5219_v19  ;;  %v5236_v44 = vadd.f32 %v7779_v49, %v5220_v39  ;;  %v5237_v35 = vadd.f32 %v7780_v63, %v5221_v16  ;;  %v7787_v19 = vld [vmem:[%s10476_s24 + $0x50] sm:$0xff] }
 0xe98   :  { %v5238_v4 = vadd.f32 %v7781_v20, %v5222_v59  ;;  %v5239_v46 = vadd.f32 %v7782_v60, %v5223_v9  ;;  %v5240_v48 = vadd.f32 %v7783_v42, %v5224_v40  ;;  %v5241_v12 = vadd.f32 %v7784_v13, %v5225_v45  ;;  %v7789_v45 = vld [vmem:[%s10476_s24 + $0x60] sm:$0xff]  ;;  %v7164_v42 = vld [vmem:[%s10478_s19 + $0x28] sm:$0xff]   ;;  %v7166_v13 = vld [vmem:[%s10478_s19 + $0x38] sm:$0xff]  }
 0xe99   :  { %v5250_v61 = vpack.c.bf16 %v5235_v29, %v5234_v51  ;;  %v5251_v54 = vpack.c.bf16 %v5237_v35, %v5236_v44  ;;  %v5166_v14 = vmul.f32 %v10203_v22, %v10171_v41  ;;  %v5167_v58 = vmul.f32 %v10203_v22, %v10174_v47  ;;  %v7160_v47 = vld [vmem:[%s10478_s19 + $0x8] sm:$0xff]   ;;  %v7162_v29 = vld [vmem:[%s10478_s19 + $0x18] sm:$0xff]   ;;  %v7791_v44 = vld [vmem:[%s10476_s24 + $0x70] sm:$0xff] }
 0xe9a   :  { %v5252_v28 = vpack.c.bf16 %v5239_v46, %v5238_v4  ;;  %v5253_v38 = vpack.c.bf16 %v5241_v12, %v5240_v48  ;;  %v5168_v18 = vmul.f32 %v10203_v22, %v10177_v50  ;;  %v5169_v6 = vmul.f32 %v10203_v22, %v10179_v10  ;;  %v7790_v51 = vld [vmem:[%s10476_s24 + $0x68] sm:$0xff]  ;;  %v7792_v35 = vld [vmem:[%s10476_s24 + $0x78] sm:$0xff]  ;;  %v7163_v46 = vld [vmem:[%s10478_s19 + $0x20] sm:$0xff]  }
 0xe9b   :  { %6775 = vmatprep.mubr.bf16.mxu0 %v5250_v61  ;;  %v5188_v53 = vmul.f32 %v10208_v0, %v5166_v14  ;;  %v5189_v30 = vmul.f32 %v10208_v0, %v5167_v58  ;;  %v5170_v34 = vmul.f32 %v10203_v22, %v10181_v37  ;;  %v5171_v41 = vmul.f32 %v10203_v22, %v10183_v36  ;;  %v7165_v48 = vld [vmem:[%s10478_s19 + $0x30] sm:$0xff]   ;;  %v7167_v12 = vld [vmem:[%s10479_s21] sm:$0xff]   ;;  %v7168_v61 = vld [vmem:[%s10479_s21 + $0x8] sm:$0xff]  }
 0xe9c   :  { %6776 = vmatmul.mubr.bf16.vlgmr.msra.gmra.mrb[176].mxu0 %v5251_v54  ;;  %v5190_v50 = vmul.f32 %v10208_v0, %v5168_v18  ;;  %v5191_v10 = vmul.f32 %v10208_v0, %v5169_v6  ;;  %v5172_v55 = vmul.f32 %v10203_v22, %v10185_v62  ;;  %v5173_v21 = vmul.f32 %v10203_v22, %v10160_v25  ;;  %v7169_v54 = vld [vmem:[%s10479_s21 + $0x10] sm:$0xff]   ;;  %v10353_v14 = vld [vmem:[%s10479_s21 + $0x18] sm:$0xff]   ;;  %v10359_v58 = vld [vmem:[%s10479_s21 + $0x20] sm:$0xff]  }
 0xe9d   :  { %6779 = vmatprep.mubr.bf16.mxu0 %v5252_v28  ;;  %v5210_v37 = vadd.f32 %v10217_v33, %v5188_v53  ;;  %v5211_v36 = vadd.f32 %v10217_v33, %v5189_v30  ;;  %v5192_v3 = vmul.f32 %v10208_v0, %v5170_v34  ;;  %v5193_v17 = vmul.f32 %v10208_v0, %v5171_v41  ;;  %v10366_v28 = vld [vmem:[%s10479_s21 + $0x28] sm:$0xff]  }
 0xe9e   :  { %v5212_v8 = vadd.f32 %v10217_v33, %v5190_v50  ;;  %v5213_v26 = vadd.f32 %v10217_v33, %v5191_v10  ;;  %v5194_v15 = vmul.f32 %v10208_v0, %v5172_v55  ;;  %v5195_v62 = vmul.f32 %v10208_v0, %v5173_v21  ;;  %6792 = vmatpush3.bf16.msra.mxu0 %v10155_v11  ;;  %v7785_v11 = vld [vmem:[%s10476_s24 + $0x40] sm:$0xff] }
 0xe9f   :  { %v5226_v25 = vmax.f32 %v5210_v37, 0.0  ;;  %v5227_v22 = vmax.f32 %v5211_v36, 0.0  ;;  %v5214_v57 = vadd.f32 %v10217_v33, %v5192_v3  ;;  %v5215_v31 = vadd.f32 %v10217_v33, %v5193_v17  ;;  %6793 = vmatprep.subr.bf16.mxu0 %v7160_v47  ;;  %6855 = vmatprep.subr.bf16.mxu1 %v7167_v12 }
 0xea0   :  { %v5228_v23 = vmax.f32 %v5212_v8, 0.0  ;;  %v5229_v52 = vmax.f32 %v5213_v26, 0.0  ;;  %v5216_v27 = vadd.f32 %v10217_v33, %v5194_v15  ;;  %v5217_v32 = vadd.f32 %v10217_v33, %v5195_v62  ;;  %v7788_v33 = vld [vmem:[%s10476_s24 + $0x58] sm:$0xff]  ;;  %6863 = vmatpush3.bf16.msra.mxu1 %v7167_v12 }
 0xea1   :  { %v5242_v0 = vadd.f32 %v7785_v11, %v5226_v25  ;;  %v5243_v1 = vadd.f32 %v7786_v24, %v5227_v22  ;;  %v5230_v43 = vmax.f32 %v5214_v57, 0.0  ;;  %v5231_v7 = vmax.f32 %v5215_v31, 0.0  ;;  %6856 = vmatprep.subr.bf16.mxu1 %v7168_v61 }
 0xea2   :  { %v5244_v39 = vadd.f32 %v7787_v19, %v5228_v23  ;;  %v5245_v16 = vadd.f32 %v7788_v33, %v5229_v52  ;;  %v5232_v59 = vmax.f32 %v5216_v27, 0.0  ;;  %v5233_v9 = vmax.f32 %v5217_v32, 0.0  ;;  %6794 = vmatpush3.bf16.msra.mxu0 %v7160_v47 }
 0xea3   :  { %v5254_v40 = vpack.c.bf16 %v5243_v1, %v5242_v0  ;;  %v5246_v5 = vadd.f32 %v7789_v45, %v5230_v43  ;;  %v5247_v56 = vadd.f32 %v7790_v51, %v5231_v7  ;;  %6795 = vmatprep.subr.bf16.mxu0 %v7161_v2 }
 0xea4   :  { %6780 = vmatmul.mubr.bf16.gmra.mrb[180].mxu0 %v5253_v38  ;;  %v5255_v49 = vpack.c.bf16 %v5245_v16, %v5244_v39  ;;  %v5248_v63 = vadd.f32 %v7791_v44, %v5232_v59  ;;  %v5249_v20 = vadd.f32 %v7792_v35, %v5233_v9  ;;  %6864 = vmatpush3.bf16.msra.mxu1 %v7168_v61  ;;  %v10374_v38 = vld [vmem:[%s10480_s18] ss:$0 sm:$0xff] }
 0xea5   :  { %6783 = vmatprep.mubr.bf16.mxu0 %v5254_v40  ;;  %v5256_v4 = vpack.c.bf16 %v5247_v56, %v5246_v5  ;;  %6857 = vmatprep.subr.bf16.mxu1 %v7169_v54 }
 0xea6   :  { %v5257_v60 = vpack.c.bf16 %v5249_v20, %v5248_v63  ;;  %6796 = vmatpush3.bf16.msra.mxu0 %v7161_v2 }
 0xea7   :  { %6797 = vmatprep.subr.bf16.mxu0 %v7162_v29 }
 0xea8   :  { %6865 = vmatpush3.bf16.msra.mxu1 %v7169_v54 }
 0xea9   :  { %6858 = vmatprep.subr.bf16.mxu1 %v10353_v14 }
 0xeaa   :  { %6798 = vmatpush3.bf16.msra.mxu0 %v7162_v29 }
 0xeab   :  { %6799 = vmatprep.subr.bf16.mxu0 %v7163_v46 }
 0xeac   :  { %6784 = vmatmul.mubr.bf16.gmra.mrb[184].mxu0 %v5255_v49  ;;  %6866 = vmatpush3.bf16.msra.mxu1 %v10353_v14 }
 0xead   :  { %6787 = vmatprep.mubr.bf16.mxu0 %v5256_v4  ;;  %6859 = vmatprep.subr.bf16.mxu1 %v10359_v58 }
 0xeae   :  { %6800 = vmatpush3.bf16.msra.mxu0 %v7163_v46 }
 0xeaf   :  { %6801 = vmatprep.subr.bf16.mxu0 %v7164_v42 }
 0xeb0   :  { %6867 = vmatpush3.bf16.msra.mxu1 %v10359_v58 }
 0xeb1   :  { %6860 = vmatprep.subr.bf16.mxu1 %v10366_v28 }
 0xeb2   :  { %6802 = vmatpush3.bf16.msra.mxu0 %v7164_v42 }
 0xeb3   :  { %6803 = vmatprep.subr.bf16.mxu0 %v7165_v48 }
 0xeb4   :  { %6788 = vmatmul.mubr.bf16.gmra.mrb[188].mxu0 %v5257_v60  ;;  %6868 = vmatpush3.bf16.msra.mxu1 %v10366_v28 }
 0xeb6   :  { %6804 = vmatpush3.bf16.msra.mxu0 %v7165_v48 }
 0xeb7   :  { %6805 = vmatprep.subr.bf16.mxu0 %v7166_v13 }
 0xeba   :  { %6806 = vmatpush3.bf16.msra.mxu0 %v7166_v13  ;;  %v7173_v13 = vld [vmem:[%s10479_s21 + $0x30] sm:$0xff]  }
 0xebb   :  { %6823 = vmatprep.subr.bf16.mxu0 %v7167_v12  ;;  %6861 = vmatprep.subr.bf16.mxu1 %v7173_v13 }
 0xebc   :  { %6869 = vmatpush3.bf16.msra.mxu1 %v7173_v13 }
 0xf6f   :  { %v6777_v18 = vpop.f32.mrb[176].mxu0 }
 0xf70   :  { %v5372_v6 = vadd.f32 %v6777_v18, %v10374_v38  ;;  %v5363_v53 = vpop.f32.mrb[177].mxu0 }
 0xf71   :  { %v5364_v30 = vadd.f32 %v10374_v38, %v5363_v53  ;;  %v6778_v34 = vpop.f32.mrb[178].mxu0 }
 0xf72   :  { %v5375_v41 = vadd.f32 %v6778_v34, %v10374_v38  ;;  %v5366_v47 = vpop.f32.mrb[179].mxu0  ;;  %v5428_v10 = vmax.f32 %v5372_v6, 0.0 }
 0xf73   :  { %v5367_v50 = vadd.f32 %v10374_v38, %v5366_v47  ;;  %v5426_v21 = vmax.f32 %v5364_v30, 0.0 }
 0xf74   :  { %v5429_v55 = vmax.f32 %v5375_v41, 0.0 }
 0xf75   :  { %v5427_v37 = vmax.f32 %v5367_v50, 0.0 }
 0xf76   :  { %v5443_v36 = vpack.c.bf16 %v5429_v55, %v5428_v10 }
 0xf77   :  { %v5442_v3 = vpack.c.bf16 %v5427_v37, %v5426_v21  ;;  %v6781_v17 = vpop.f32.mrb[180].mxu0 }
 0xf78   :  { %v5388_v8 = vadd.f32 %v6781_v17, %v10374_v38  ;;  %v5379_v26 = vpop.f32.mrb[181].mxu0 }
 0xf79   :  { %v5380_v15 = vadd.f32 %v10374_v38, %v5379_v26  ;;  %v6782_v62 = vpop.f32.mrb[182].mxu0  ;;  %6807 = vmatprep.mubr.bf16.mxu0 %v5442_v3 }
 0xf7a   :  { %v5391_v25 = vadd.f32 %v6782_v62, %v10374_v38  ;;  %v5382_v22 = vpop.f32.mrb[183].mxu0  ;;  %6808 = vmatmul.mubr.bf16.vlgmr.msra.gmra.mrb[192].mxu0 %v5443_v36  ;;  %v5432_v31 = vmax.f32 %v5388_v8, 0.0 }
 0xf7b   :  { %v5383_v57 = vadd.f32 %v10374_v38, %v5382_v22  ;;  %6824 = vmatpush3.bf16.msra.mxu0 %v7167_v12  ;;  %v5430_v23 = vmax.f32 %v5380_v15, 0.0  ;;  %v7174_v12 = vld [vmem:[%s10479_s21 + $0x38] sm:$0xff]  }
 0xf7c   :  { %v5433_v2 = vmax.f32 %v5391_v25, 0.0  ;;  %6825 = vmatprep.subr.bf16.mxu0 %v7168_v61  ;;  %6862 = vmatprep.subr.bf16.mxu1 %v7174_v12 }
 0xf7d   :  { %v5431_v52 = vmax.f32 %v5383_v57, 0.0  ;;  %6870 = vmatpush3.bf16.msra.mxu1 %v7174_v12 }
 0xf7e   :  { %v5445_v27 = vpack.c.bf16 %v5433_v2, %v5432_v31 }
 0xf7f   :  { %v5444_v32 = vpack.c.bf16 %v5431_v52, %v5430_v23  ;;  %v6785_v11 = vpop.f32.mrb[184].mxu0  ;;  %6826 = vmatpush3.bf16.msra.mxu0 %v7168_v61  ;;  %v6333_v61 = vld [vmem:[%s10481_s20] ss:$0 sm:$0xff] }
 0xf80   :  { %v5404_v0 = vadd.f32 %v6785_v11, %v10374_v38  ;;  %v5395_v24 = vpop.f32.mrb[185].mxu0  ;;  %6827 = vmatprep.subr.bf16.mxu0 %v7169_v54 }
 0xf81   :  { %v5396_v1 = vadd.f32 %v10374_v38, %v5395_v24  ;;  %v6786_v43 = vpop.f32.mrb[186].mxu0  ;;  %6811 = vmatprep.mubr.bf16.mxu0 %v5444_v32 }
 0xf82   :  { %v5407_v7 = vadd.f32 %v6786_v43, %v10374_v38  ;;  %v5398_v19 = vpop.f32.mrb[187].mxu0  ;;  %6812 = vmatmul.mubr.bf16.gmra.mrb[196].mxu0 %v5445_v27  ;;  %v5436_v33 = vmax.f32 %v5404_v0, 0.0 }
 0xf83   :  { %v5399_v39 = vadd.f32 %v10374_v38, %v5398_v19  ;;  %6828 = vmatpush3.bf16.msra.mxu0 %v7169_v54  ;;  %v5434_v59 = vmax.f32 %v5396_v1, 0.0 }
 0xf84   :  { %v5437_v16 = vmax.f32 %v5407_v7, 0.0  ;;  %6829 = vmatprep.subr.bf16.mxu0 %v10353_v14 }
 0xf85   :  { %v5435_v9 = vmax.f32 %v5399_v39, 0.0 }
 0xf86   :  { %v5447_v40 = vpack.c.bf16 %v5437_v16, %v5436_v33 }
 0xf87   :  { %v5446_v45 = vpack.c.bf16 %v5435_v9, %v5434_v59  ;;  %v6789_v5 = vpop.f32.mrb[188].mxu0  ;;  %6830 = vmatpush3.bf16.msra.mxu0 %v10353_v14 }
 0xf88   :  { %v5420_v51 = vadd.f32 %v6789_v5, %v10374_v38  ;;  %v5411_v56 = vpop.f32.mrb[189].mxu0  ;;  %6831 = vmatprep.subr.bf16.mxu0 %v10359_v58 }
 0xf89   :  { %v5412_v29 = vadd.f32 %v10374_v38, %v5411_v56  ;;  %v6790_v49 = vpop.f32.mrb[190].mxu0  ;;  %6815 = vmatprep.mubr.bf16.mxu0 %v5446_v45 }
 0xf8a   :  { %v5423_v44 = vadd.f32 %v6790_v49, %v10374_v38  ;;  %v5414_v63 = vpop.f32.mrb[191].mxu0  ;;  %6816 = vmatmul.mubr.bf16.gmra.mrb[200].mxu0 %v5447_v40  ;;  %v5440_v20 = vmax.f32 %v5420_v51, 0.0 }
 0xf8b   :  { %v5415_v35 = vadd.f32 %v10374_v38, %v5414_v63  ;;  %6832 = vmatpush3.bf16.msra.mxu0 %v10359_v58  ;;  %v5438_v60 = vmax.f32 %v5412_v29, 0.0 }
 0xf8c   :  { %v5441_v4 = vmax.f32 %v5423_v44, 0.0  ;;  %6833 = vmatprep.subr.bf16.mxu0 %v10366_v28 }
 0xf8d   :  { %v5439_v46 = vmax.f32 %v5415_v35, 0.0 }
 0xf8e   :  { %v5449_v42 = vpack.c.bf16 %v5441_v4, %v5440_v20  ;;  %v6342_v4 = vld [vmem:[%s10571_s30] ss:$0 sm:$0xff] }
 0xf8f   :  { %v5448_v48 = vpack.c.bf16 %v5439_v46, %v5438_v60  ;;  %6834 = vmatpush3.bf16.msra.mxu0 %v10366_v28 }
 0xf90   :  { %6835 = vmatprep.subr.bf16.mxu0 %v7173_v13 }
 0xf91   :  { %6819 = vmatprep.mubr.bf16.mxu0 %v5448_v48 }
 0xf92   :  { %6820 = vmatmul.mubr.bf16.gmra.mrb[204].mxu0 %v5449_v42 }
 0xf93   :  { %6836 = vmatpush3.bf16.msra.mxu0 %v7173_v13 }
 0xf94   :  { %6837 = vmatprep.subr.bf16.mxu0 %v7174_v12 }
 0xf97   :  { %6838 = vmatpush3.bf16.msra.mxu0 %v7174_v12 }
0x104d   :  { %v6809_v54 = vpop.f32.mrb[192].mxu0 }
0x104e   :  { %v5564_v14 = vadd.f32 %v6809_v54, %v6333_v61  ;;  %v5555_v58 = vpop.f32.mrb[193].mxu0 }
0x104f   :  { %v5556_v28 = vadd.f32 %v6333_v61, %v5555_v58  ;;  %v6810_v38 = vpop.f32.mrb[194].mxu0 }
0x1050   :  { %v5567_v18 = vadd.f32 %v6810_v38, %v6333_v61  ;;  %v5558_v6 = vpop.f32.mrb[195].mxu0  ;;  %v5620_v30 = vmax.f32 %v5564_v14, 0.0 }
0x1051   :  { %v5559_v53 = vadd.f32 %v6333_v61, %v5558_v6  ;;  %v5618_v41 = vmax.f32 %v5556_v28, 0.0 }
0x1052   :  { %v5621_v34 = vmax.f32 %v5567_v18, 0.0 }
0x1053   :  { %v5619_v47 = vmax.f32 %v5559_v53, 0.0 }
0x1054   :  { %v5635_v50 = vpack.c.bf16 %v5621_v34, %v5620_v30 }
0x1055   :  { %v5634_v10 = vpack.c.bf16 %v5619_v47, %v5618_v41  ;;  %v6813_v55 = vpop.f32.mrb[196].mxu0 }
0x1056   :  { %v5580_v21 = vadd.f32 %v6813_v55, %v6333_v61  ;;  %v5571_v37 = vpop.f32.mrb[197].mxu0 }
0x1057   :  { %v5572_v36 = vadd.f32 %v6333_v61, %v5571_v37  ;;  %v6814_v3 = vpop.f32.mrb[198].mxu0  ;;  %6839 = vmatprep.mubr.bf16.mxu0 %v5634_v10 }
0x1058   :  { %v5583_v17 = vadd.f32 %v6814_v3, %v6333_v61  ;;  %v5574_v8 = vpop.f32.mrb[199].mxu0  ;;  %6840 = vmatmul.mubr.bf16.vlgmr.msra.gmra.mrb[208].mxu0 %v5635_v50  ;;  %v5624_v15 = vmax.f32 %v5580_v21, 0.0 }
0x1059   :  { %v5575_v26 = vadd.f32 %v6333_v61, %v5574_v8  ;;  %v5622_v25 = vmax.f32 %v5572_v36, 0.0 }
0x105a   :  { %v5625_v62 = vmax.f32 %v5583_v17, 0.0 }
0x105b   :  { %v5623_v22 = vmax.f32 %v5575_v26, 0.0 }
0x105c   :  { %v5637_v57 = vpack.c.bf16 %v5625_v62, %v5624_v15 }
0x105d   :  { %v5636_v31 = vpack.c.bf16 %v5623_v22, %v5622_v25  ;;  %v6817_v2 = vpop.f32.mrb[200].mxu0 }
0x105e   :  { %v5596_v23 = vadd.f32 %v6817_v2, %v6333_v61  ;;  %v5587_v52 = vpop.f32.mrb[201].mxu0 }
0x105f   :  { %v5588_v27 = vadd.f32 %v6333_v61, %v5587_v52  ;;  %v6818_v32 = vpop.f32.mrb[202].mxu0  ;;  %6843 = vmatprep.mubr.bf16.mxu0 %v5636_v31 }
0x1060   :  { %v5599_v11 = vadd.f32 %v6818_v32, %v6333_v61  ;;  %v5590_v0 = vpop.f32.mrb[203].mxu0  ;;  %6844 = vmatmul.mubr.bf16.gmra.mrb[212].mxu0 %v5637_v57  ;;  %v5628_v1 = vmax.f32 %v5596_v23, 0.0 }
0x1061   :  { %v5591_v24 = vadd.f32 %v6333_v61, %v5590_v0  ;;  %v5626_v7 = vmax.f32 %v5588_v27, 0.0 }
0x1062   :  { %v5629_v43 = vmax.f32 %v5599_v11, 0.0 }
0x1063   :  { %v5627_v19 = vmax.f32 %v5591_v24, 0.0 }
0x1064   :  { %v5639_v39 = vpack.c.bf16 %v5629_v43, %v5628_v1 }
0x1065   :  { %v5638_v33 = vpack.c.bf16 %v5627_v19, %v5626_v7  ;;  %v6821_v16 = vpop.f32.mrb[204].mxu0 }
0x1066   :  { %v5612_v59 = vadd.f32 %v6821_v16, %v6333_v61  ;;  %v5603_v9 = vpop.f32.mrb[205].mxu0 }
0x1067   :  { %v5604_v40 = vadd.f32 %v6333_v61, %v5603_v9  ;;  %v6822_v45 = vpop.f32.mrb[206].mxu0  ;;  %6847 = vmatprep.mubr.bf16.mxu1 %v5638_v33 }
0x1068   :  { %v5615_v5 = vadd.f32 %v6822_v45, %v6333_v61  ;;  %v5606_v51 = vpop.f32.mrb[207].mxu0  ;;  %6848 = vmatmul.mubr.bf16.vlgmr.msra.gmra.mrb[160].mxu1 %v5639_v39  ;;  %v5632_v29 = vmax.f32 %v5612_v59, 0.0 }
0x1069   :  { %v5607_v56 = vadd.f32 %v6333_v61, %v5606_v51  ;;  %v5630_v44 = vmax.f32 %v5604_v40, 0.0 }
0x106a   :  { %v5633_v49 = vmax.f32 %v5615_v5, 0.0 }
0x106b   :  { %v5631_v63 = vmax.f32 %v5607_v56, 0.0 }
0x106c   :  { %v5641_v35 = vpack.c.bf16 %v5633_v49, %v5632_v29 }
0x106d   :  { %v5640_v20 = vpack.c.bf16 %v5631_v63, %v5630_v44 }
0x106f   :  { %6851 = vmatprep.mubr.bf16.mxu1 %v5640_v20 }
0x1070   :  { %6852 = vmatmul.mubr.bf16.gmra.mrb[164].mxu1 %v5641_v35 }
0x112b   :  { %v6841_v60 = vpop.f32.mrb[208].mxu0 }
0x112c   :  { %v5756_v46 = vadd.f32 %v6841_v60, %v6342_v4  ;;  %v5747_v42 = vpop.f32.mrb[209].mxu0 }
0x112d   :  { %v5748_v48 = vadd.f32 %v6342_v4, %v5747_v42  ;;  %v6842_v13 = vpop.f32.mrb[210].mxu0 }
0x112e   :  { %5812 = vst [vmem:[%s10572_s7 + $0x10] sm:$0xff] %v5756_v46  ;;  %v5759_v12 = vadd.f32 %v6842_v13, %v6342_v4  ;;  %v5750_v61 = vpop.f32.mrb[211].mxu0 }
0x112f   :  { %5810 = vst [vmem:[%s10572_s7] sm:$0xff] %v5748_v48  ;;  %v5751_v54 = vadd.f32 %v6342_v4, %v5750_v61 }
0x1130   :  { %5813 = vst [vmem:[%s10572_s7 + $0x18] sm:$0xff] %v5759_v12 }
0x1131   :  { %5811 = vst [vmem:[%s10572_s7 + $0x8] sm:$0xff] %v5751_v54 }
0x1133   :  { %v6845_v14 = vpop.f32.mrb[212].mxu0 }
0x1134   :  { %v5772_v58 = vadd.f32 %v6845_v14, %v6342_v4  ;;  %v5763_v28 = vpop.f32.mrb[213].mxu0 }
0x1135   :  { %v5764_v38 = vadd.f32 %v6342_v4, %v5763_v28  ;;  %v6846_v18 = vpop.f32.mrb[214].mxu0 }
0x1136   :  { %5816 = vst [vmem:[%s10572_s7 + $0x30] sm:$0xff] %v5772_v58  ;;  %v5775_v6 = vadd.f32 %v6846_v18, %v6342_v4  ;;  %v5766_v53 = vpop.f32.mrb[215].mxu0 }
0x1137   :  { %5814 = vst [vmem:[%s10572_s7 + $0x20] sm:$0xff] %v5764_v38  ;;  %v5767_v30 = vadd.f32 %v6342_v4, %v5766_v53 }
0x1138   :  { %5817 = vst [vmem:[%s10572_s7 + $0x38] sm:$0xff] %v5775_v6 }
0x1139   :  { %5815 = vst [vmem:[%s10572_s7 + $0x28] sm:$0xff] %v5767_v30 }
0x113b   :  { %v6849_v34 = vpop.f32.mrb[160].mxu1 }
0x113c   :  { %v5788_v41 = vadd.f32 %v6849_v34, %v6342_v4  ;;  %v5779_v47 = vpop.f32.mrb[161].mxu1 }
0x113d   :  { %v5780_v50 = vadd.f32 %v6342_v4, %v5779_v47  ;;  %v6850_v10 = vpop.f32.mrb[162].mxu1 }
0x113e   :  { %5820 = vst [vmem:[%s10572_s7 + $0x50] sm:$0xff] %v5788_v41  ;;  %v5791_v55 = vadd.f32 %v6850_v10, %v6342_v4  ;;  %v5782_v21 = vpop.f32.mrb[163].mxu1 }
0x113f   :  { %5818 = vst [vmem:[%s10572_s7 + $0x40] sm:$0xff] %v5780_v50  ;;  %v5783_v37 = vadd.f32 %v6342_v4, %v5782_v21 }
0x1140   :  { %5821 = vst [vmem:[%s10572_s7 + $0x58] sm:$0xff] %v5791_v55 }
0x1141   :  { %5819 = vst [vmem:[%s10572_s7 + $0x48] sm:$0xff] %v5783_v37 }
0x1143   :  { %v6853_v36 = vpop.f32.mrb[164].mxu1 }
0x1144   :  { %v5804_v3 = vadd.f32 %v6853_v36, %v6342_v4  ;;  %v5795_v17 = vpop.f32.mrb[165].mxu1 }
0x1145   :  { %v5796_v8 = vadd.f32 %v6342_v4, %v5795_v17  ;;  %v6854_v26 = vpop.f32.mrb[166].mxu1 }
0x1146   :  { %5824 = vst [vmem:[%s10572_s7 + $0x70] sm:$0xff] %v5804_v3  ;;  %v5807_v15 = vadd.f32 %v6854_v26, %v6342_v4  ;;  %v5798_v62 = vpop.f32.mrb[167].mxu1 }
0x1147   :  { %5822 = vst [vmem:[%s10572_s7 + $0x60] sm:$0xff] %v5796_v8  ;;  %v5799_v25 = vadd.f32 %v6342_v4, %v5798_v62 }
0x1148   :  { %5825 = vst [vmem:[%s10572_s7 + $0x78] sm:$0xff] %v5807_v15 }
0x1149   :  { %5823 = vst [vmem:[%s10572_s7 + $0x68] sm:$0xff] %v5799_v25 }

</bundles_post_ra>
